<compile_context>
chip_gen: v7x
topology: tpu7x:2x2x1
jax: 0.10.0
libtpu: 0.0.40
codegen_flags: <defaults>
</compile_context>

<pallas_src>
import math

import jax
import jax.numpy as jnp
from jax import lax
from jax.experimental import pallas as pl
from jax.experimental.pallas import tpu as pltpu


# ----------------------------------------------------------------------------
# Pallas kernel: per edge-tile fused (one-hot gather + 4 matmuls + swish + mul)
# ----------------------------------------------------------------------------
def _init_kernel(ij_ref, rbf_ref,
                 w_rbf01_ref, b_rbf0_ref,
                 p1_ref, p2_ref, w3_ref, b_lin_ref,
                 e1_ref, e2_ref):
    te = ij_ref.shape[0]
    n_nodes, hidden = p1_ref.shape
    cdt = p1_ref.dtype                      # matmul compute dtype (bf16 or f32)

    # ---- in-kernel gather of node contributions: one-hot matmul on the MXU ----
    idx = ij_ref[...]                                           # [TE, 2] int32
    iota = lax.broadcasted_iota(jnp.int32, (te, n_nodes), 1)    # [TE, N]
    oh_i = (iota == idx[:, 0:1]).astype(cdt)                    # [TE, N]
    oh_j = (iota == idx[:, 1:2]).astype(cdt)                    # [TE, N]

    # ---- fused rbf projection: one dot yields rbf0 pre-act and the e2 scale ----
    rbf = rbf_ref[...]                                          # [TE, R] cdt
    both = jnp.dot(rbf, w_rbf01_ref[...],
                   preferred_element_type=jnp.float32)          # [TE, 2H] f32
    rbf0 = both[:, :hidden] + b_rbf0_ref[...]                   # f32
    rbf0 = rbf0 * jax.nn.sigmoid(rbf0)                          # swish (f32)
    scale = both[:, hidden:]                                    # rbf @ W_rbf1

    # ---- lin(cat([x[i], x[j], rbf0])) with node-side blocks folded into P1/P2 ----
    h = (jnp.dot(oh_i, p1_ref[...], preferred_element_type=jnp.float32)
         + jnp.dot(oh_j, p2_ref[...], preferred_element_type=jnp.float32)
         + jnp.dot(rbf0.astype(cdt), w3_ref[...],
                   preferred_element_type=jnp.float32)
         + b_lin_ref[...])
    e1 = h * jax.nn.sigmoid(h)                                  # swish (f32)
    e2 = scale * e1

    e1_ref[...] = e1
    e2_ref[...] = e2


# ----------------------------------------------------------------------------
# Wrapper: node-side precompute (tiny) + pallas_call over edge tiles
# ----------------------------------------------------------------------------
def prepare_init_params(params, x_atom, *, compute_dtype=jnp.bfloat16):
    """Embedding lookup + fold the x[i]/x[j] blocks of `lin` into per-node
    projections (O(N*H*H) wrapper work, N << E)."""
    node_emb = params["emb_w"][x_atom].astype(jnp.float32)      # [N, H]
    p1 = (node_emb @ params["w1"]).astype(compute_dtype)        # [N, H]
    p2 = (node_emb @ params["w2"]).astype(compute_dtype)        # [N, H]
    w_rbf01 = jnp.concatenate([params["w_rbf0"], params["w_rbf1"]],
                              axis=1).astype(compute_dtype)     # [R, 2H]
    return {
        "p1": p1, "p2": p2,
        "w_rbf01": w_rbf01,
        "w3": params["w3"].astype(compute_dtype),
        "b_rbf0": params["b_rbf0"].astype(jnp.float32),
        "b_lin": params["b_lin"].astype(jnp.float32),
    }


def init_forward_pallas(rbf, edge_i, edge_j, prep, *, tile_e=1024):
    """rbf: [E, R] f32; edge_i/edge_j: [E] int; prep: prepare_init_params(...)."""
    E, R = rbf.shape
    N, H = prep["p1"].shape
    cdt = prep["p1"].dtype
    # TODO(synk): for very large node counts (node table not VMEM-resident),
    # fall back to a DMA row-gather (pl.Element index_map) instead of the
    # one-hot matmul gather used here.

    rbf_c = rbf.astype(cdt)                                     # [E, R]
    ij = jnp.stack([edge_i, edge_j], axis=-1).astype(jnp.int32)  # [E, 2]

    # Pad the edge axis up to a whole number of tiles; padded rows are finite
    # garbage (index 0, rbf 0) and are sliced off before returning.
    n_tiles = pl.cdiv(E, tile_e)
    e_pad = n_tiles * tile_e
    if e_pad != E:
        pad = e_pad - E
        rbf_c = jnp.pad(rbf_c, ((0, pad), (0, 0)))
        ij = jnp.pad(ij, ((0, pad), (0, 0)))

    edge_ij_spec = pl.BlockSpec((tile_e, 2), lambda e: (e, 0))
    edge_rbf_spec = pl.BlockSpec((tile_e, R), lambda e: (e, 0))
    edge_out_spec = pl.BlockSpec((tile_e, H), lambda e: (e, 0))
    full = lambda shape: pl.BlockSpec(shape, lambda e: (0, 0))

    out_shape = (jax.ShapeDtypeStruct((e_pad, H), jnp.float32),
                 jax.ShapeDtypeStruct((e_pad, H), jnp.float32))

    e1, e2 = pl.pallas_call(
        _init_kernel,
        out_shape=out_shape,
        grid_spec=pltpu.PrefetchScalarGridSpec(
            num_scalar_prefetch=0,
            grid=(n_tiles,),
            in_specs=[
                edge_ij_spec,            # ij indices        [E, 2] int32
                edge_rbf_spec,           # rbf               [E, R]
                full((R, 2 * H)),        # [W_rbf0 | W_rbf1] [R, 2H]
                full((1, H)),            # b_rbf0
                full((N, H)),            # P1 = emb[x] @ W1
                full((N, H)),            # P2 = emb[x] @ W2
                full((H, H)),            # W3 (lin, rbf0 block)
                full((1, H)),            # b_lin
            ],
            out_specs=[edge_out_spec, edge_out_spec],
        ),
        compiler_params=pltpu.CompilerParams(
            dimension_semantics=("parallel",),
            vmem_limit_bytes=32 * 1024 * 1024),
    )(ij, rbf_c, prep["w_rbf01"], prep["b_rbf0"],
      prep["p1"], prep["p2"], prep["w3"], prep["b_lin"])

    if e_pad != E:
        e1 = e1[:E]
        e2 = e2[:E]
    return e1, e2


# ----------------------------------------------------------------------------
# Parameter construction (deterministic, shapes match the PyTorch module)
# ----------------------------------------------------------------------------
def make_params(key, num_radial, hidden):
    ks = jax.random.split(key, 7)
    s3 = math.sqrt(3.0)
    # Embedding(95, hidden), uniform(-sqrt(3), sqrt(3))
    emb_w = jax.random.uniform(ks[0], (95, hidden), jnp.float32, -s3, s3)
    # lin_rbf_0: Linear(num_radial, hidden)
    bnd0 = 1.0 / math.sqrt(num_radial)
    w_rbf0 = jax.random.uniform(ks[1], (num_radial, hidden), jnp.float32, -bnd0, bnd0)
    b_rbf0 = jax.random.uniform(ks[2], (1, hidden), jnp.float32, -bnd0, bnd0)
    # lin: Linear(3*hidden, hidden) -- stored as three [H, H] blocks
    bnd1 = 1.0 / math.sqrt(3 * hidden)
    w_lin = jax.random.uniform(ks[3], (3 * hidden, hidden), jnp.float32, -bnd1, bnd1)
    b_lin = jax.random.uniform(ks[4], (1, hidden), jnp.float32, -bnd1, bnd1)
    # lin_rbf_1: Linear(num_radial, hidden, bias=False), glorot_orthogonal
    # TODO(synk): exact glorot_orthogonal init replaced with scaled normal (shapes identical)
    w_rbf1 = jax.random.normal(ks[5], (num_radial, hidden), jnp.float32) * math.sqrt(
        2.0 / (num_radial + hidden))
    return {
        "emb_w": emb_w,
        "w_rbf0": w_rbf0, "b_rbf0": b_rbf0,
        "w1": w_lin[:hidden], "w2": w_lin[hidden:2 * hidden], "w3": w_lin[2 * hidden:],
        "b_lin": b_lin,
        "w_rbf1": w_rbf1,
    }


def rbf_emb_features(dist, num_rbf, rbound_upper):
    """Plain-JAX reimplementation of rbf_emb.forward (input construction glue)."""
    start = math.exp(-rbound_upper)
    end = math.exp(0.0)
    means = jnp.linspace(start, end, num_rbf)
    betas = jnp.full((num_rbf,), (2.0 / num_rbf * (end - start)) ** (-2))
    d = dist[:, None]
    rbounds = 0.5 * (jnp.cos(d * math.pi / rbound_upper) + 1.0)
    rbounds = rbounds * (d < rbound_upper).astype(jnp.float32)
    return rbounds * jnp.exp(-betas * jnp.square(jnp.exp(-d) - means))


# ----------------------------------------------------------------------------
# Main
# ----------------------------------------------------------------------------
if __name__ == "__main__":
    num_radial = 8
    hidden = 128          # lane-dense output (last dim == 128)
    n_nodes = 64
    n_edges = 4096        # 4 edge tiles of 1024 -> >=2 parallel steps for v7x
    tile_e = 1024
    cutoff = 5.0

    key = jax.random.PRNGKey(0)
    kp, kx, ki, kj, kd = jax.random.split(key, 5)

    params = make_params(kp, num_radial, hidden)

    # Inputs consistent with init.forward(x, emb, i, j)
    x = jax.random.randint(kx, (n_nodes,), 0, 95, dtype=jnp.int32)   # atomic numbers
    i = jax.random.randint(ki, (n_edges,), 0, n_nodes, dtype=jnp.int32)
    j = jax.random.randint(kj, (n_edges,), 0, n_nodes, dtype=jnp.int32)
    dist = jax.random.uniform(kd, (n_edges,), jnp.float32, 0.1, cutoff + 1.0)
    rbf = rbf_emb_features(dist, num_radial, cutoff)                  # emb[0]

    prep = prepare_init_params(params, x, compute_dtype=jnp.bfloat16)
    e1, e2 = init_forward_pallas(rbf, i, j, prep, tile_e=tile_e)
    jax.block_until_ready((e1, e2))

    swish = lambda t: t * jax.nn.sigmoid(t)
    f32 = lambda a: a.astype(jnp.float32)
    cdt = prep["p1"].dtype

    # --- tight reference: same (bf16-rounded) operands as the kernel, f32 math ---
    rbf_c = f32(rbf.astype(cdt))
    both_r = rbf_c @ f32(prep["w_rbf01"])
    rbf0_r = swish(both_r[:, :hidden] + prep["b_rbf0"])
    scale_r = both_r[:, hidden:]
    h_r = (f32(prep["p1"])[i] + f32(prep["p2"])[j]
           + f32(rbf0_r.astype(cdt)) @ f32(prep["w3"]) + prep["b_lin"])
    e1_r = swish(h_r)
    e2_r = scale_r * e1_r
    assert jnp.allclose(e1, e1_r, atol=1e-2, rtol=1e-2)
    assert jnp.allclose(e2, e2_r, atol=1e-2, rtol=1e-2)

    # --- loose reference: original (unfused, full-f32) module math ---
    node_emb = params["emb_w"][x]
    xi, xj = node_emb[i], node_emb[j]
    rbf0_o = swish(rbf @ params["w_rbf0"] + params["b_rbf0"])
    e1_o = swish(xi @ params["w1"] + xj @ params["w2"]
                 + rbf0_o @ params["w3"] + params["b_lin"])
    e2_o = (rbf @ params["w_rbf1"]) * e1_o
    assert float(jnp.max(jnp.abs(e1 - e1_o))) < 5e-2
    assert float(jnp.max(jnp.abs(e2 - e2_o))) < 5e-2

    print("KERNEL_OK")
</pallas_src>

<mosaic_0001>
module attributes {stable_mosaic.version = 11 : i64} {
  func.func @_init_kernel(%arg0: i32, %arg1: memref<1024x2xi32, #tpu.memory_space<vmem>>, %arg2: memref<1024x8xbf16, #tpu.memory_space<vmem>>, %arg3: memref<8x256xbf16, #tpu.memory_space<vmem>>, %arg4: memref<1x128xf32, #tpu.memory_space<vmem>>, %arg5: memref<64x128xbf16, #tpu.memory_space<vmem>>, %arg6: memref<64x128xbf16, #tpu.memory_space<vmem>>, %arg7: memref<128x128xbf16, #tpu.memory_space<vmem>>, %arg8: memref<1x128xf32, #tpu.memory_space<vmem>>, %arg9: memref<1024x128xf32, #tpu.memory_space<vmem>>, %arg10: memref<1024x128xf32, #tpu.memory_space<vmem>>) attributes {dimension_semantics = [#tpu.dimension_semantics<parallel>], iteration_bounds = array<i64: 4>, scalar_prefetch = 0 : i64, scratch_operands = 0 : i64, tpu.core_type = #tpu.core_type<tc>, window_params = [{transform_indices = @transform_0, window_bounds = array<i64: 1024, 2>}, {transform_indices = @transform_1, window_bounds = array<i64: 1024, 8>}, {pipeline_mode = #tpu.pipeline_mode<synchronous>, transform_indices = @transform_2, window_bounds = array<i64: 8, 256>}, {pipeline_mode = #tpu.pipeline_mode<synchronous>, transform_indices = @transform_3, window_bounds = array<i64: 1, 128>}, {pipeline_mode = #tpu.pipeline_mode<synchronous>, transform_indices = @transform_4, window_bounds = array<i64: 64, 128>}, {pipeline_mode = #tpu.pipeline_mode<synchronous>, transform_indices = @transform_5, window_bounds = array<i64: 64, 128>}, {pipeline_mode = #tpu.pipeline_mode<synchronous>, transform_indices = @transform_6, window_bounds = array<i64: 128, 128>}, {pipeline_mode = #tpu.pipeline_mode<synchronous>, transform_indices = @transform_7, window_bounds = array<i64: 1, 128>}, {transform_indices = @transform_8, window_bounds = array<i64: 1024, 128>}, {transform_indices = @transform_9, window_bounds = array<i64: 1024, 128>}]} {
    %c0 = arith.constant 0 : index
    %c0_0 = arith.constant 0 : index
    %0 = vector.load %arg1[%c0, %c0_0] : memref<1024x2xi32, #tpu.memory_space<vmem>>, vector<1024x2xi32>
    %1 = tpu.iota {dimensions = array<i32: 1>} : vector<1024x64xi32>
    %2 = vector.extract_strided_slice %0 {offsets = [0, 0], sizes = [1024, 1], strides = [1, 1]} : vector<1024x2xi32> to vector<1024x1xi32>
    %3 = vector.broadcast %2 : vector<1024x1xi32> to vector<1024x64xi32>
    %4 = arith.cmpi eq, %1, %3 : vector<1024x64xi32>
    %5 = arith.extui %4 : vector<1024x64xi1> to vector<1024x64xi32>
    %6 = arith.sitofp %5 : vector<1024x64xi32> to vector<1024x64xf32>
    %7 = arith.truncf %6 : vector<1024x64xf32> to vector<1024x64xbf16>
    %8 = vector.extract_strided_slice %0 {offsets = [0, 1], sizes = [1024, 1], strides = [1, 1]} : vector<1024x2xi32> to vector<1024x1xi32>
    %9 = vector.broadcast %8 : vector<1024x1xi32> to vector<1024x64xi32>
    %10 = arith.cmpi eq, %1, %9 : vector<1024x64xi32>
    %11 = arith.extui %10 : vector<1024x64xi1> to vector<1024x64xi32>
    %12 = arith.sitofp %11 : vector<1024x64xi32> to vector<1024x64xf32>
    %13 = arith.truncf %12 : vector<1024x64xf32> to vector<1024x64xbf16>
    %c0_1 = arith.constant 0 : index
    %c0_2 = arith.constant 0 : index
    %14 = vector.load %arg2[%c0_1, %c0_2] : memref<1024x8xbf16, #tpu.memory_space<vmem>>, vector<1024x8xbf16>
    %c0_3 = arith.constant 0 : index
    %c0_4 = arith.constant 0 : index
    %15 = vector.load %arg3[%c0_3, %c0_4] : memref<8x256xbf16, #tpu.memory_space<vmem>>, vector<8x256xbf16>
    %cst = arith.constant dense<0.000000e+00> : vector<1024x256xf32>
    %16 = tpu.matmul %14, %15, %cst {dimension_numbers = #tpu.dot_dimension_numbers<[1], [0], [0], [1], [0, 0, 1, 1], [], []>} : vector<1024x8xbf16>, vector<8x256xbf16>, vector<1024x256xf32> -> vector<1024x256xf32>
    %17 = vector.extract_strided_slice %16 {offsets = [0, 0], sizes = [1024, 128], strides = [1, 1]} : vector<1024x256xf32> to vector<1024x128xf32>
    %c0_5 = arith.constant 0 : index
    %c0_6 = arith.constant 0 : index
    %18 = vector.load %arg4[%c0_5, %c0_6] : memref<1x128xf32, #tpu.memory_space<vmem>>, vector<1x128xf32>
    %19 = vector.broadcast %18 : vector<1x128xf32> to vector<1024x128xf32>
    %20 = arith.addf %17, %19 : vector<1024x128xf32>
    %21 = arith.negf %20 : vector<1024x128xf32>
    %22 = math.exp %21 : vector<1024x128xf32>
    %cst_7 = arith.constant 1.000000e+00 : f32
    %23 = vector.broadcast %cst_7 : f32 to vector<1024x128xf32>
    %24 = arith.addf %23, %22 : vector<1024x128xf32>
    %25 = arith.divf %23, %24 : vector<1024x128xf32>
    %26 = arith.mulf %20, %25 : vector<1024x128xf32>
    %27 = vector.extract_strided_slice %16 {offsets = [0, 128], sizes = [1024, 128], strides = [1, 1]} : vector<1024x256xf32> to vector<1024x128xf32>
    %c0_8 = arith.constant 0 : index
    %c0_9 = arith.constant 0 : index
    %28 = vector.load %arg5[%c0_8, %c0_9] : memref<64x128xbf16, #tpu.memory_space<vmem>>, vector<64x128xbf16>
    %cst_10 = arith.constant dense<0.000000e+00> : vector<1024x128xf32>
    %29 = tpu.matmul %7, %28, %cst_10 {dimension_numbers = #tpu.dot_dimension_numbers<[1], [0], [0], [1], [0, 0, 1, 1], [], []>} : vector<1024x64xbf16>, vector<64x128xbf16>, vector<1024x128xf32> -> vector<1024x128xf32>
    %c0_11 = arith.constant 0 : index
    %c0_12 = arith.constant 0 : index
    %30 = vector.load %arg6[%c0_11, %c0_12] : memref<64x128xbf16, #tpu.memory_space<vmem>>, vector<64x128xbf16>
    %cst_13 = arith.constant dense<0.000000e+00> : vector<1024x128xf32>
    %31 = tpu.matmul %13, %30, %cst_13 {dimension_numbers = #tpu.dot_dimension_numbers<[1], [0], [0], [1], [0, 0, 1, 1], [], []>} : vector<1024x64xbf16>, vector<64x128xbf16>, vector<1024x128xf32> -> vector<1024x128xf32>
    %32 = arith.addf %29, %31 : vector<1024x128xf32>
    %33 = arith.truncf %26 : vector<1024x128xf32> to vector<1024x128xbf16>
    %c0_14 = arith.constant 0 : index
    %c0_15 = arith.constant 0 : index
    %34 = vector.load %arg7[%c0_14, %c0_15] : memref<128x128xbf16, #tpu.memory_space<vmem>>, vector<128x128xbf16>
    %cst_16 = arith.constant dense<0.000000e+00> : vector<1024x128xf32>
    %35 = tpu.matmul %33, %34, %cst_16 {dimension_numbers = #tpu.dot_dimension_numbers<[1], [0], [0], [1], [0, 0, 1, 1], [], []>} : vector<1024x128xbf16>, vector<128x128xbf16>, vector<1024x128xf32> -> vector<1024x128xf32>
    %36 = arith.addf %32, %35 : vector<1024x128xf32>
    %c0_17 = arith.constant 0 : index
    %c0_18 = arith.constant 0 : index
    %37 = vector.load %arg8[%c0_17, %c0_18] : memref<1x128xf32, #tpu.memory_space<vmem>>, vector<1x128xf32>
    %38 = vector.broadcast %37 : vector<1x128xf32> to vector<1024x128xf32>
    %39 = arith.addf %36, %38 : vector<1024x128xf32>
    %40 = arith.negf %39 : vector<1024x128xf32>
    %41 = math.exp %40 : vector<1024x128xf32>
    %cst_19 = arith.constant 1.000000e+00 : f32
    %42 = vector.broadcast %cst_19 : f32 to vector<1024x128xf32>
    %43 = arith.addf %42, %41 : vector<1024x128xf32>
    %44 = arith.divf %42, %43 : vector<1024x128xf32>
    %45 = arith.mulf %39, %44 : vector<1024x128xf32>
    %46 = arith.mulf %27, %45 : vector<1024x128xf32>
    %c0_20 = arith.constant 0 : index
    %c0_21 = arith.constant 0 : index
    %47 = vector.load %arg9[%c0_20, %c0_21] : memref<1024x128xf32, #tpu.memory_space<vmem>>, vector<1024x128xf32>
    tpu.vector_store %arg9[%c0_20, %c0_21], %45 {strides = array<i32>} : memref<1024x128xf32, #tpu.memory_space<vmem>>, vector<1024x128xf32>,
    %c0_22 = arith.constant 0 : index
    %c0_23 = arith.constant 0 : index
    %48 = vector.load %arg10[%c0_22, %c0_23] : memref<1024x128xf32, #tpu.memory_space<vmem>>, vector<1024x128xf32>
    tpu.vector_store %arg10[%c0_22, %c0_23], %46 {strides = array<i32>} : memref<1024x128xf32, #tpu.memory_space<vmem>>, vector<1024x128xf32>,
    return
  }
  func.func @transform_0(%arg0: i32) -> (i32, i32) {
    %c0_i32 = arith.constant 0 : i32
    %c0_i32_0 = arith.constant 0 : i32
    return %arg0, %c0_i32 : i32, i32
  }
  func.func @transform_1(%arg0: i32) -> (i32, i32) {
    %c0_i32 = arith.constant 0 : i32
    %c0_i32_0 = arith.constant 0 : i32
    return %arg0, %c0_i32 : i32, i32
  }
  func.func @transform_2(%arg0: i32) -> (i32, i32) {
    %c0_i32 = arith.constant 0 : i32
    %c0_i32_0 = arith.constant 0 : i32
    %c0_i32_1 = arith.constant 0 : i32
    return %c0_i32, %c0_i32_0 : i32, i32
  }
  func.func @transform_3(%arg0: i32) -> (i32, i32) {
    %c0_i32 = arith.constant 0 : i32
    %c0_i32_0 = arith.constant 0 : i32
    %c0_i32_1 = arith.constant 0 : i32
    return %c0_i32, %c0_i32_0 : i32, i32
  }
  func.func @transform_4(%arg0: i32) -> (i32, i32) {
    %c0_i32 = arith.constant 0 : i32
    %c0_i32_0 = arith.constant 0 : i32
    %c0_i32_1 = arith.constant 0 : i32
    return %c0_i32, %c0_i32_0 : i32, i32
  }
  func.func @transform_5(%arg0: i32) -> (i32, i32) {
    %c0_i32 = arith.constant 0 : i32
    %c0_i32_0 = arith.constant 0 : i32
    %c0_i32_1 = arith.constant 0 : i32
    return %c0_i32, %c0_i32_0 : i32, i32
  }
  func.func @transform_6(%arg0: i32) -> (i32, i32) {
    %c0_i32 = arith.constant 0 : i32
    %c0_i32_0 = arith.constant 0 : i32
    %c0_i32_1 = arith.constant 0 : i32
    return %c0_i32, %c0_i32_0 : i32, i32
  }
  func.func @transform_7(%arg0: i32) -> (i32, i32) {
    %c0_i32 = arith.constant 0 : i32
    %c0_i32_0 = arith.constant 0 : i32
    %c0_i32_1 = arith.constant 0 : i32
    return %c0_i32, %c0_i32_0 : i32, i32
  }
  func.func @transform_8(%arg0: i32) -> (i32, i32) {
    %c0_i32 = arith.constant 0 : i32
    %c0_i32_0 = arith.constant 0 : i32
    return %arg0, %c0_i32 : i32, i32
  }
  func.func @transform_9(%arg0: i32) -> (i32, i32) {
    %c0_i32 = arith.constant 0 : i32
    %c0_i32_0 = arith.constant 0 : i32
    return %arg0, %c0_i32 : i32, i32
  }
}

</mosaic_0001>

<bundles_post_ra>
// kernel: tpu_custom_call.1
= control target key start
LH: loop header
LB: loop body
LE: loop exit
PB: predicated region body
PF: predicated region fallthrough
CT: control target
= control target key end

     0   :  { %s16522_s0 = inlined_call_operand.vmem [shape: s32[4096,2], index: 0, kind: input, shape index: {}]   ;;  %s16523_s1 = inlined_call_operand.vmem [shape: bf16[4096,8], index: 1, kind: input, shape index: {}]   ;;  %s16524_s2 = inlined_call_operand.vmem [shape: bf16[8,256], index: 2, kind: input, shape index: {}]   ;;  %s16525_s3 = inlined_call_operand.vmem [shape: f32[1,128], index: 3, kind: input, shape index: {}]   ;;  %s16526_s4 = inlined_call_operand.vmem [shape: bf16[64,128], index: 4, kind: input, shape index: {}]   ;;  %s16527_s5 = inlined_call_operand.vmem [shape: bf16[64,128], index: 5, kind: input, shape index: {}]   ;;  %s16528_s6 = inlined_call_operand.vmem [shape: bf16[128,128], index: 6, kind: input, shape index: {}]   ;;  %s16529_s7 = inlined_call_operand.vmem [shape: f32[1,128], index: 7, kind: input, shape index: {}]   ;;  %s16530_s8 = inlined_call_operand.hbm [shape: f32[4096,128], index: 8, kind: output, shape index: {0}]   ;;  %s16531_s9 = inlined_call_operand.hbm [shape: f32[4096,128], index: 9, kind: output, shape index: {1}]  }
   0x1   :  { %16586 = sst [smem:[#allocation147_spill]] %s16522_s0 }
   0x2   :  { %16587 = sst [smem:[#allocation148_spill]] %s16523_s1 }
   0x3   :  { %15 = vsyncpa [#allocation3], 0 }
   0x4   :  { %17 = vsyncpa [#allocation3 + $0x1], 0 }
   0x5   :  { %18 = vsyncpa [#allocation5], 0 }
   0x6   :  { %20 = vsyncpa [#allocation5 + $0x1], 0  ;;  %s11565_s30 = smov 0   ;;  %s11567_s10 = smov 0  }
   0x7   :  { %s11569_s11 = smov 0   ;;  %s11571_s12 = smov 0  }
   0x8 LB: > { %s11586_s13 = sadd.s32 4294967295, %s11506_s12   ;;  %s8417_s14 = sadd.s32 4294967294, %s11506_s12   ;;  %s11506_s12 = sphi %s11571_s12, %s16993_s12   ;;  %s11502_s11 = sphi %s11569_s11, %s16992_s11   ;;  %s11498_s10 = sphi %s11567_s10, %s16991_s10   ;;  %s11494_s30 = sphi %s11565_s30, %s16990_s30  }
   0x9   : > { %s11590_s15 = sadd.s32 1, %s11506_s12   ;;  %s211_s16 = sadd.s32 1, %s11502_s11 }
   0xa   : > { %s208_s17 = ssub.s32 %s11506_s12, %s11590_s15  ;;  %p221_p0 = scmp.ne.s32.totalorder %s11502_s11, %s11498_s10 }
   0xb   : > { %p209_p1 = scmp.eq.s32.totalorder %s208_s17, 0  ;;  %p222_p2 = scmp.eq.s32.totalorder %s11586_s13, 3 }
   0xc   : > { %p227_p3 = scmp.ne.s32.totalorder %s11498_s10, %s11494_s30  ;;  %p228_p4 = scmp.eq.s32.totalorder %s8417_s14, 3 }
   0xd   : > { %s11601_s18 = scalar_select %p209_p1, %s11502_s11, %s211_s16  }
   0xe   : > { %p11603_p5 = por %p222_p2, %p221_p0  ;;  %p11607_p6 = por %p228_p4, %p227_p3 }
   0xf   : > { %p8420_p7 = scmp.ge.s32.totalorder %s11506_s12, 1  ;;  %p308_p8 = scmp.lt.s32.totalorder %s11506_s12, 5 }
  0x11   : > { %p309_p9 = pnand %p8420_p7, %p308_p8 }
  0x13   : > { %312 = sbr.rel (%p309_p9) target bundleno = 1138 (0x472), region = 52 }
  0x1a   : > { %s8423_s21 = sshll.u32 %s11586_s13, 7  ;;  %v2291_v0 = vld [vmem:[%s16524_s2] sm:$0xff]  ;;  %vm2810_vm0 = vcmask 1043456   ;;  %v16532_v1 = vmov 1   ;;  %v16536_v2 = vmov 0   ;;  %s16590_s0 = sld [smem:[#allocation147_spill]] }
  0x1b   : > { %10165 = vset.pattern.permute.xlu0 %v16532_v1  ;;  %10163 = vset.pattern.permute.xlu1 %v16536_v2  ;;  %p355_p10 = scmp.lt.s32.totalorder %s8423_s21, 511  ;;  %v8748_v3 = vcombine.high %v2291_v0, %v2291_v0  ;;  %v8747_v4 = vcombine.low %v2291_v0, %v2291_v0  ;;  %s16591_s1 = sld [smem:[#allocation148_spill]]  ;;  %vm2617_vm1 = vcmask 64512   ;;  %v10189_v35 = vld [vmem:[%s16527_s5] sm:$0xff]   ;;  %v10190_v37 = vld [vmem:[%s16527_s5 + $0x8] sm:$0xff]   ;;  %v10192_v40 = vld [vmem:[%s16527_s5 + $0x10] sm:$0xff]  }
  0x1c   : > { %2849 = vmatprep.mubr.bf16.mxu0 %v16536_v2  ;;  %9850 = vmatprep.subr.bf16.mxu1 %v10189_v35  ;;  %v10193_v44 = vld [vmem:[%s16527_s5 + $0x18] sm:$0xff]   ;;  %v11695_v47 = vld [vmem:[%s16526_s4] sm:$0xff]   ;;  %vm4561_vm4 = vcmask 523264   ;;  %s9224_s22 = sshll.u32 %s11586_s13, 14  ;;  %s11511_s29 = smov [#allocation2]  }
  0x1d   : > { %s16995_s21 = smov (!%p355_p10, %s8423_s21), 511  ;;  %8749 = vmatprep.subr.msk.bf16.mxu0 %vm2810_vm0, %v8748_v3  ;;  %v2812_v5 = vsel %vm2810_vm0, %v8747_v4, 0  ;;  %9854 = vmatpush3.bf16.msra.mxu1 %v10189_v35  ;;  %s16434_s14 = scalar_lea.hbm %s16530_s8, %s9224_s22 }
  0x1e   : > { %2818 = vmatpush1.bf16.msra.mxu0 %v2812_v5  ;;  %s8424_s24 = sshll.u32 %s16995_s21, 3  ;;  %s8426_s28 = sshll.u32 %s16995_s21, 2  ;;  %9851 = vmatprep.subr.bf16.mxu1 %v10190_v37 }
  0x1f   : > { %9434 = vmatprep.subr.bf16.mxu0 %v10189_v35 }
  0x20   : > { %s11623_s27 = scalar_lea.vmem %s16590_s0, %s8424_s24  ;;  %s15301_s24 = sand.u32 1, %s11498_s10  }
  0x21   : > { %v434_v6 = vld [vmem:[%s11623_s27 + $0x208] sm:$0xff]  ;;  %v371_v7 = vld [vmem:[%s11623_s27 + $0x10] sm:$0xff]  ;;  %v437_v8 = vld [vmem:[%s11623_s27 + $0x220] sm:$0xff]  ;;  %s11632_s16 = scalar_lea.vmem %s16591_s1, %s8426_s28  ;;  %9855 = vmatpush3.bf16.msra.mxu1 %v10190_v37  ;;  %s8421_s25 = sshll.u32 %s15301_s24, 10 }
  0x22   : > { %1527 = vperm.xlu0 %10165, %v434_v6   ;;  %506 = vperm.xlu1 %10163, %v371_v7   ;;  %v372_v9 = vld [vmem:[%s11623_s27 + $0x18] sm:$0xff]  ;;  %v439_v10 = vld [vmem:[%s11623_s27 + $0x230] sm:$0xff]  ;;  %v374_v11 = vld [vmem:[%s11623_s27 + $0x28] sm:$0xff]  ;;  %s15346_s26 = scalar_lea.vmem [#allocation2], %s8421_s25  ;;  %s15361_s28 = scalar_lea.vmem [#allocation4], %s8421_s25 }
  0x23   : > { %v10172_v12 = vld [vmem:[%s11632_s16] sm:$0xff]   ;;  %v376_v14 = vld [vmem:[%s11623_s27 + $0x38] sm:$0xff]  ;;  %v10173_v15 = vld [vmem:[%s11632_s16 + $0x8] sm:$0xff]   ;;  %9852 = vmatprep.subr.bf16.mxu1 %v10192_v40  ;;  %s8295_s23 = sshll.u32 %s15346_s26, 4  ;;  %s8311_s13 = sshll.u32 %s15361_s28, 4  ;;  %s16437_s23 = int_to_ptr.vmem [resolvable:$true] %s8295_s23  ;;  %s16448_s13 = int_to_ptr.vmem [resolvable:$true] %s8311_s13 }
  0x24   : > { %8750 = vmatmul.mubr.msk.bf16.vlgmr.msra.gmra.mrb[0].mxu0 %vm2617_vm1, %v10172_v12  ;;  %v441_v13 = vld [vmem:[%s11623_s27 + $0x240] sm:$0xff]  ;;  %v443_v16 = vld [vmem:[%s11623_s27 + $0x250] sm:$0xff]  ;;  %v378_v17 = vld [vmem:[%s11623_s27 + $0x48] sm:$0xff]  ;;  %s11412_s25 = scalar_lea.vmem %s16437_s23, 16384  ;;  %s11416_s0 = sshll.u32 %s11511_s29, 4  ;;  %s11417_s0 = int_to_ptr.vmem [resolvable:$false] %s11416_s0 }
  0x25   : > { %2859 = vmatprep.mubr.bf16.mxu0 %v16536_v2  ;;  %v445_v18 = vld [vmem:[%s11623_s27 + $0x260] sm:$0xff]  ;;  %v380_v19 = vld [vmem:[%s11623_s27 + $0x58] sm:$0xff]  ;;  %v10174_v20 = vld [vmem:[%s11632_s16 + $0x10] sm:$0xff]   ;;  %9435 = vmatpush3.bf16.msra.mxu0 %v10189_v35  ;;  %p11413_p11 = scmp.ne.s32.totalorder %s16437_s23, %s11412_s25  ;;  %s11418_s1 = scalar_lea.vmem %s11417_s0, 32768 }
  0x26   : > { %1536 = vperm.xlu0 %10165, %v437_v8   ;;  %509 = vperm.xlu1 %10163, %v372_v9   ;;  %v447_v21 = vld [vmem:[%s11623_s27 + $0x270] sm:$0xff]  ;;  %v382_v22 = vld [vmem:[%s11623_s27 + $0x68] sm:$0xff]  ;;  %v449_v23 = vld [vmem:[%s11623_s27 + $0x280] sm:$0xff]  ;;  %p11419_p0 = scmp.lt.s32.totalorder %s16437_s23, %s11417_s0  ;;  %p11420_p1 = scmp.lt.s32.totalorder %s11418_s1, %s11412_s25 }
  0x27   : > { %v384_v24 = vld [vmem:[%s11623_s27 + $0x78] sm:$0xff]  ;;  %v451_v26 = vld [vmem:[%s11623_s27 + $0x290] sm:$0xff]  ;;  %v386_v27 = vld [vmem:[%s11623_s27 + $0x88] sm:$0xff]  ;;  %9436 = vmatprep.subr.bf16.mxu0 %v10190_v37  ;;  %9856 = vmatpush3.bf16.msra.mxu1 %v10192_v40  ;;  %p11414_p12 = pnand %p11413_p11, %p11603_p5 }
  0x28   : > { %v10175_v25 = vld [vmem:[%s11632_s16 + $0x18] sm:$0xff]   ;;  %v453_v28 = vld [vmem:[%s11623_s27 + $0x2a0] sm:$0xff]  ;;  %v455_v31 = vld [vmem:[%s11623_s27 + $0x2b0] sm:$0xff]  ;;  %9853 = vmatprep.subr.bf16.mxu1 %v10193_v44  ;;  %p11421_p2 = por %p11420_p1, %p11419_p0 }
  0x29   : > { %v433_v29 = vld [vmem:[%s11623_s27 + $0x200] sm:$0xff]  ;;  %v435_v32 = vld [vmem:[%s11623_s27 + $0x210] sm:$0xff]  ;;  %v436_v34 = vld [vmem:[%s11623_s27 + $0x218] sm:$0xff]  ;;  %9437 = vmatpush3.bf16.msra.mxu0 %v10190_v37  ;;  %p11415_p13 = pneg %p11414_p12 }
  0x2a   : > { %1542 = vperm.xlu0 %10165, %v439_v10   ;;  %515 = vperm.xlu1 %10163, %v374_v11   ;;  %v10176_v30 = vld [vmem:[%s11632_s16 + $0x20] sm:$0xff]   ;;  %v10177_v36 = vld [vmem:[%s11632_s16 + $0x28] sm:$0xff]   ;;  %v459_v38 = vld [vmem:[%s11623_s27 + $0x2d0] sm:$0xff] }
  0x2b   : > { %v457_v33 = vld [vmem:[%s11623_s27 + $0x2c0] sm:$0xff]  ;;  %v438_v39 = vld [vmem:[%s11623_s27 + $0x228] sm:$0xff]  ;;  %v440_v42 = vld [vmem:[%s11623_s27 + $0x238] sm:$0xff]  ;;  %9438 = vmatprep.subr.bf16.mxu0 %v10192_v40  ;;  %9857 = vmatpush3.bf16.msra.mxu1 %v10193_v44  ;;  %p11422_p3 = pnand %p11421_p2, %p11415_p13 }
  0x2c   : > { %8751 = vmatmul.mubr.msk.bf16.gmra.mrb[4].mxu0 %vm2617_vm1, %v10173_v15  ;;  %v461_v41 = vld [vmem:[%s11623_s27 + $0x2e0] sm:$0xff]  ;;  %v10178_v43 = vld [vmem:[%s11632_s16 + $0x30] sm:$0xff]   ;;  %v442_v46 = vld [vmem:[%s11623_s27 + $0x248] sm:$0xff]  ;;  %9570 = vmatprep.subr.bf16.mxu1 %v11695_v47 }
  0x2d   : > { %2869 = vmatprep.mubr.bf16.mxu0 %v16536_v2  ;;  %v463_v45 = vld [vmem:[%s11623_s27 + $0x2f0] sm:$0xff]  ;;  %v465_v48 = vld [vmem:[%s11623_s27 + $0x300] sm:$0xff]  ;;  %v444_v49 = vld [vmem:[%s11623_s27 + $0x258] sm:$0xff]  ;;  %9439 = vmatpush3.bf16.msra.mxu0 %v10192_v40 }
  0x2e   : > { %1548 = vperm.xlu0 %10165, %v441_v13   ;;  %521 = vperm.xlu1 %10163, %v376_v14   ;;  %v10179_v50 = vld [vmem:[%s11632_s16 + $0x38] sm:$0xff]   ;;  %v467_v51 = vld [vmem:[%s11623_s27 + $0x310] sm:$0xff]  ;;  %v446_v52 = vld [vmem:[%s11623_s27 + $0x268] sm:$0xff] }
  0x2f   : > { %9440 = vmatprep.subr.bf16.mxu0 %v10193_v44  ;;  %v469_v53 = vld [vmem:[%s11623_s27 + $0x320] sm:$0xff]  ;;  %v448_v54 = vld [vmem:[%s11623_s27 + $0x278] sm:$0xff]  ;;  %v471_v56 = vld [vmem:[%s11623_s27 + $0x330] sm:$0xff] }
  0x30   : > { %v10180_v55 = vld [vmem:[%s11632_s16 + $0x40] sm:$0xff]   ;;  %v450_v57 = vld [vmem:[%s11623_s27 + $0x288] sm:$0xff]  ;;  %v452_v59 = vld [vmem:[%s11623_s27 + $0x298] sm:$0xff] }
  0x31   : > { %9441 = vmatpush3.bf16.msra.mxu0 %v10193_v44  ;;  %v473_v58 = vld [vmem:[%s11623_s27 + $0x340] sm:$0xff]  ;;  %v10181_v60 = vld [vmem:[%s11632_s16 + $0x48] sm:$0xff]   ;;  %v475_v61 = vld [vmem:[%s11623_s27 + $0x350] sm:$0xff] }
  0x32   : > { %1554 = vperm.xlu0 %10165, %v443_v16   ;;  %527 = vperm.xlu1 %10163, %v378_v17   ;;  %v454_v62 = vld [vmem:[%s11623_s27 + $0x2a8] sm:$0xff]  ;;  %v477_v63 = vld [vmem:[%s11623_s27 + $0x360] sm:$0xff]  ;;  %v456_v0 = vld [vmem:[%s11623_s27 + $0x2b8] sm:$0xff] }
  0x33   : > { %v10182_v3 = vld [vmem:[%s11632_s16 + $0x50] sm:$0xff]   ;;  %v458_v5 = vld [vmem:[%s11623_s27 + $0x2c8] sm:$0xff]  ;;  %v481_v6 = vld [vmem:[%s11623_s27 + $0x380] sm:$0xff] }
  0x34   : > { %8752 = vmatmul.mubr.msk.bf16.gmra.mrb[8].mxu0 %vm2617_vm1, %v10174_v20  ;;  %v479_v4 = vld [vmem:[%s11623_s27 + $0x370] sm:$0xff]  ;;  %v460_v7 = vld [vmem:[%s11623_s27 + $0x2d8] sm:$0xff]  ;;  %v462_v10 = vld [vmem:[%s11623_s27 + $0x2e8] sm:$0xff] }
  0x35   : > { %2879 = vmatprep.mubr.bf16.mxu0 %v16536_v2  ;;  %v10183_v8 = vld [vmem:[%s11632_s16 + $0x58] sm:$0xff]   ;;  %v483_v9 = vld [vmem:[%s11623_s27 + $0x390] sm:$0xff]  ;;  %v485_v11 = vld [vmem:[%s11623_s27 + $0x3a0] sm:$0xff] }
  0x36   : > { %1560 = vperm.xlu0 %10165, %v445_v18   ;;  %533 = vperm.xlu1 %10163, %v380_v19   ;;  %v464_v12 = vld [vmem:[%s11623_s27 + $0x2f8] sm:$0xff]  ;;  %v10184_v13 = vld [vmem:[%s11632_s16 + $0x60] sm:$0xff]   ;;  %v487_v14 = vld [vmem:[%s11623_s27 + $0x3b0] sm:$0xff] }
  0x37   : > { %v466_v15 = vld [vmem:[%s11623_s27 + $0x308] sm:$0xff]  ;;  %v489_v16 = vld [vmem:[%s11623_s27 + $0x3c0] sm:$0xff]  ;;  %v468_v17 = vld [vmem:[%s11623_s27 + $0x318] sm:$0xff] }
  0x38   : > { %v10185_v18 = vld [vmem:[%s11632_s16 + $0x68] sm:$0xff]   ;;  %v491_v19 = vld [vmem:[%s11623_s27 + $0x3d0] sm:$0xff]  ;;  %v10188_v37 = vld [vmem:[%s11632_s16 + $0x80] sm:$0xff]  }
  0x39   : > { %v470_v20 = vld [vmem:[%s11623_s27 + $0x328] sm:$0xff] }
  0x3a   : > { %1566 = vperm.xlu0 %10165, %v447_v21   ;;  %539 = vperm.xlu1 %10163, %v382_v22   ;;  %v493_v21 = vld [vmem:[%s11623_s27 + $0x3e0] sm:$0xff]  ;;  %v472_v22 = vld [vmem:[%s11623_s27 + $0x338] sm:$0xff] }
  0x3c   : > { %8753 = vmatmul.mubr.msk.bf16.gmra.mrb[12].mxu0 %vm2617_vm1, %v10175_v25  ;;  %v474_v25 = vld [vmem:[%s11623_s27 + $0x348] sm:$0xff] }
  0x3d   : > { %2889 = vmatprep.mubr.bf16.mxu0 %v16536_v2 }
  0x3e   : > { %1572 = vperm.xlu0 %10165, %v449_v23   ;;  %545 = vperm.xlu1 %10163, %v384_v24   ;;  %v10186_v23 = vld [vmem:[%s11632_s16 + $0x70] sm:$0xff]  }
  0x3f   : > { %v495_v24 = vld [vmem:[%s11623_s27 + $0x3f0] sm:$0xff] }
  0x42   : > { %1578 = vperm.xlu0 %10165, %v451_v26   ;;  %551 = vperm.xlu1 %10163, %v386_v27   ;;  %v476_v26 = vld [vmem:[%s11623_s27 + $0x358] sm:$0xff]  ;;  %v369_v27 = vld [vmem:[%s11623_s27] sm:$0xff] }
  0x44   : > { %8754 = vmatmul.mubr.msk.bf16.gmra.mrb[16].mxu0 %vm2617_vm1, %v10176_v30  ;;  %v370_v30 = vld [vmem:[%s11623_s27 + $0x8] sm:$0xff] }
  0x45   : > { %2899 = vmatprep.mubr.bf16.mxu0 %v16536_v2 }
  0x46   : > { %1584 = vperm.xlu0 %10165, %v453_v28   ;;  %10164 = vset.pattern.permute.xlu1 %v16532_v1  ;;  %v10187_v28 = vld [vmem:[%s11632_s16 + $0x78] sm:$0xff]   ;;  %v11283_v1 = vld [vmem:[%s11623_s27 + $0x228] sm:$0xff] }
  0x47   : > { %1524 = vperm.xlu1 %10164, %v433_v29   ;;  %v478_v29 = vld [vmem:[%s11623_s27 + $0x368] sm:$0xff] }
  0x4a   : > { %1590 = vperm.xlu0 %10165, %v455_v31  }
  0x4b   : > { %1530 = vperm.xlu1 %10164, %v435_v32  }
  0x4c   : > { %8755 = vmatmul.mubr.msk.bf16.gmra.mrb[20].mxu0 %vm2617_vm1, %v10177_v36 }
  0x4d   : > { %2909 = vmatprep.mubr.bf16.mxu0 %v16536_v2 }
  0x4e   : > { %1596 = vperm.xlu0 %10165, %v457_v33   ;;  %v480_v33 = vld [vmem:[%s11623_s27 + $0x378] sm:$0xff] }
  0x4f   : > { %1533 = vperm.xlu1 %10164, %v436_v34   ;;  %v373_v34 = vld [vmem:[%s11623_s27 + $0x20] sm:$0xff] }
  0x52   : > { %1602 = vperm.xlu0 %10165, %v459_v38   ;;  %v482_v38 = vld [vmem:[%s11623_s27 + $0x388] sm:$0xff] }
  0x53   : > { %1539 = vperm.xlu1 %10164, %v438_v39   ;;  %v375_v39 = vld [vmem:[%s11623_s27 + $0x30] sm:$0xff] }
  0x54   : > { %8756 = vmatmul.mubr.msk.bf16.gmra.mrb[24].mxu0 %vm2617_vm1, %v10178_v43  ;;  %v377_v43 = vld [vmem:[%s11623_s27 + $0x40] sm:$0xff] }
  0x55   : > { %2919 = vmatprep.mubr.bf16.mxu0 %v16536_v2 }
  0x56   : > { %1608 = vperm.xlu0 %10165, %v461_v41  }
  0x57   : > { %1545 = vperm.xlu1 %10164, %v440_v42   ;;  %v484_v42 = vld [vmem:[%s11623_s27 + $0x398] sm:$0xff] }
  0x5a   : > { %1614 = vperm.xlu0 %10165, %v463_v45  }
  0x5b   : > { %1551 = vperm.xlu1 %10164, %v442_v46   ;;  %v10191_v46 = vld [vmem:[%s11632_s16 + $0x88] sm:$0xff]  }
  0x5c   : > { %8757 = vmatmul.mubr.msk.bf16.gmra.mrb[28].mxu0 %vm2617_vm1, %v10179_v50 }
  0x5d   : > { %2929 = vmatprep.mubr.bf16.mxu0 %v16536_v2 }
  0x5e   : > { %1620 = vperm.xlu0 %10165, %v465_v48   ;;  %v486_v48 = vld [vmem:[%s11623_s27 + $0x3a8] sm:$0xff] }
  0x5f   : > { %1557 = vperm.xlu1 %10164, %v444_v49   ;;  %v379_v49 = vld [vmem:[%s11623_s27 + $0x50] sm:$0xff] }
  0x62   : > { %1626 = vperm.xlu0 %10165, %v467_v51  }
  0x63   : > { %1563 = vperm.xlu1 %10164, %v446_v52   ;;  %v488_v52 = vld [vmem:[%s11623_s27 + $0x3b8] sm:$0xff] }
  0x64   : > { %8758 = vmatmul.mubr.msk.bf16.gmra.mrb[32].mxu0 %vm2617_vm1, %v10180_v55 }
  0x65   : > { %2939 = vmatprep.mubr.bf16.mxu0 %v16536_v2 }
  0x66   : > { %1632 = vperm.xlu0 %10165, %v469_v53   ;;  %v381_v53 = vld [vmem:[%s11623_s27 + $0x60] sm:$0xff] }
  0x67   : > { %1569 = vperm.xlu1 %10164, %v448_v54  }
  0x6a   : > { %1638 = vperm.xlu0 %10165, %v471_v56   ;;  %v10194_v56 = vld [vmem:[%s11632_s16 + $0x90] sm:$0xff]  }
  0x6b   : > { %1575 = vperm.xlu1 %10164, %v450_v57   ;;  %v490_v57 = vld [vmem:[%s11623_s27 + $0x3c8] sm:$0xff] }
  0x6c   : > { %8759 = vmatmul.mubr.msk.bf16.gmra.mrb[36].mxu0 %vm2617_vm1, %v10181_v60 }
  0x6d   : > { %2949 = vmatprep.mubr.bf16.mxu0 %v16536_v2 }
  0x6e   : > { %1644 = vperm.xlu0 %10165, %v473_v58   ;;  %v383_v58 = vld [vmem:[%s11623_s27 + $0x70] sm:$0xff] }
  0x6f   : > { %1581 = vperm.xlu1 %10164, %v452_v59  }
  0x72   : > { %1650 = vperm.xlu0 %10165, %v475_v61   ;;  %v492_v61 = vld [vmem:[%s11623_s27 + $0x3d8] sm:$0xff] }
  0x73   : > { %1587 = vperm.xlu1 %10164, %v454_v62   ;;  %v385_v62 = vld [vmem:[%s11623_s27 + $0x80] sm:$0xff] }
  0x74   : > { %8760 = vmatmul.mubr.msk.bf16.gmra.mrb[40].mxu0 %vm2617_vm1, %v10182_v3 }
  0x75   : > { %2959 = vmatprep.mubr.bf16.mxu0 %v16536_v2 }
  0x76   : > { %1656 = vperm.xlu0 %10165, %v477_v63   ;;  %v497_v63 = vlaneseq }
  0x77   : > { %1593 = vperm.xlu1 %10164, %v456_v0  }
  0x7a   : > { %1662 = vperm.xlu0 %10165, %v479_v4   ;;  %v10196_v4 = vld [vmem:[%s11632_s16 + $0x98] sm:$0xff]  }
  0x7b   : > { %1599 = vperm.xlu1 %10164, %v458_v5   ;;  %v494_v5 = vld [vmem:[%s11623_s27 + $0x3e8] sm:$0xff] }
  0x7c   : > { %8761 = vmatmul.mubr.msk.bf16.gmra.mrb[44].mxu0 %vm2617_vm1, %v10183_v8 }
  0x7d   : > { %2969 = vmatprep.mubr.bf16.mxu0 %v16536_v2 }
  0x7e   : > { %1668 = vperm.xlu0 %10165, %v481_v6   ;;  %v387_v6 = vld [vmem:[%s11623_s27 + $0x90] sm:$0xff] }
  0x7f   : > { %1605 = vperm.xlu1 %10164, %v460_v7   ;;  %v11822_v7 = vand.u32 127, %v497_v63  ;;  %v396_v63 = vld [vmem:[%s11623_s27 + $0xd8] sm:$0xff] }
  0x82   : > { %1674 = vperm.xlu0 %10165, %v483_v9  }
  0x83   : > { %1611 = vperm.xlu1 %10164, %v462_v10   ;;  %v496_v10 = vld [vmem:[%s11623_s27 + $0x3f8] sm:$0xff] }
  0x84   : > { %8762 = vmatmul.mubr.msk.bf16.gmra.mrb[48].mxu0 %vm2617_vm1, %v10184_v13  ;;  %v10197_v13 = vld [vmem:[%s11632_s16 + $0xa0] sm:$0xff]  }
  0x85   : > { %2979 = vmatprep.mubr.bf16.mxu0 %v16536_v2 }
  0x86   : > { %1680 = vperm.xlu0 %10165, %v485_v11   ;;  %v388_v11 = vld [vmem:[%s11623_s27 + $0x98] sm:$0xff] }
  0x87   : > { %1617 = vperm.xlu1 %10164, %v464_v12  }
  0x8a   : > { %1686 = vperm.xlu0 %10165, %v487_v14  }
  0x8b   : > { %1623 = vperm.xlu1 %10164, %v466_v15   ;;  %v16534_v15 = vmov 0.0  }
  0x8c   : > { %8763 = vmatmul.mubr.msk.bf16.gmra.mrb[52].mxu0 %vm2617_vm1, %v10185_v18 }
  0x8d   : > { %2989 = vmatprep.mubr.bf16.mxu0 %v16536_v2 }
  0x8e   : > { %1692 = vperm.xlu0 %10165, %v489_v16  }
  0x8f   : > { %1629 = vperm.xlu1 %10164, %v468_v17  }
  0x92   : > { %1698 = vperm.xlu0 %10165, %v491_v19  }
  0x93   : > { %1635 = vperm.xlu1 %10164, %v470_v20   ;;  %v391_v20 = vld [vmem:[%s11623_s27 + $0xb0] sm:$0xff] }
  0x94   : > { %8764 = vmatmul.mubr.msk.bf16.gmra.mrb[56].mxu0 %vm2617_vm1, %v10186_v23 }
  0x95   : > { %2999 = vmatprep.mubr.bf16.mxu0 %v16536_v2 }
  0x96   : > { %1704 = vperm.xlu0 %10165, %v493_v21   ;;  %v389_v21 = vld [vmem:[%s11623_s27 + $0xa0] sm:$0xff] }
  0x97   : > { %1641 = vperm.xlu1 %10164, %v472_v22  }
  0x9a   : > { %1710 = vperm.xlu0 %10165, %v495_v24   ;;  %v393_v24 = vld [vmem:[%s11623_s27 + $0xc0] sm:$0xff] }
  0x9b   : > { %1647 = vperm.xlu1 %10164, %v474_v25   ;;  %v390_v25 = vld [vmem:[%s11623_s27 + $0xa8] sm:$0xff] }
  0x9c   : > { %8765 = vmatmul.mubr.msk.bf16.gmra.mrb[60].mxu0 %vm2617_vm1, %v10187_v28 }
  0x9d   : > { %3009 = vmatprep.mubr.bf16.mxu0 %v16536_v2 }
  0x9e   : > { %10166 = vset.pattern.permute.xlu0 %v16536_v2 }
  0x9f   : > { %1653 = vperm.xlu1 %10164, %v476_v26   ;;  %500 = vperm.xlu0 %10166, %v369_v27   ;;  %v10198_v26 = vld [vmem:[%s11632_s16 + $0xa8] sm:$0xff]  }
  0xa1   : > { %v11762_v31 = vpop.permute.xlu0 %1527  ;;  %v11764_v32 = vpop.permute.xlu1 %506 }
  0xa2   : > { %vm1780_vm2 = vcmp.eq.s32.totalorder %v11822_v7, %v11762_v31 }
  0xa3   : > { %1659 = vperm.xlu1 %10164, %v478_v29   ;;  %503 = vperm.xlu0 %10166, %v370_v30   ;;  %v8620_v16 = vsel %vm1780_vm2, 1.0, %v16534_v15 }
  0xa4   : > { %8766 = vmatmul.mubr.msk.bf16.gmra.mrb[64].mxu0 %vm2617_vm1, %v10188_v37 }
  0xa5   : > { %v11770_v35 = vpop.permute.xlu0 %1536  ;;  %v11772_v36 = vpop.permute.xlu1 %509  ;;  %3019 = vmatprep.mubr.bf16.mxu0 %v16536_v2 }
  0xa6   : > { %vm1783_vm7 = vcmp.eq.s32.totalorder %v11822_v7, %v11770_v35 }
  0xa7   : > { %1665 = vperm.xlu1 %10164, %v480_v33   ;;  %512 = vperm.xlu0 %10166, %v373_v34   ;;  %v395_v33 = vld [vmem:[%s11623_s27 + $0xd0] sm:$0xff]  ;;  %v10200_v34 = vld [vmem:[%s16526_s4 + $0x8] sm:$0xff]   ;;  %v8623_v35 = vsel %vm1783_vm7, 1.0, %v16534_v15 }
  0xa9   : > { %v11777_v40 = vpop.permute.xlu0 %1542  ;;  %v11779_v41 = vpop.permute.xlu1 %515 }
  0xaa   : > { %vm1785_vm9 = vcmp.eq.s32.totalorder %v11822_v7, %v11777_v40 }
  0xab   : > { %1671 = vperm.xlu1 %10164, %v482_v38   ;;  %518 = vperm.xlu0 %10166, %v375_v39   ;;  %v392_v38 = vld [vmem:[%s11623_s27 + $0xb8] sm:$0xff] }
  0xac   : > { %8767 = vmatmul.mubr.msk.bf16.gmra.mrb[68].mxu0 %vm2617_vm1, %v10191_v46  ;;  %v397_v46 = vld [vmem:[%s11623_s27 + $0xe0] sm:$0xff] }
  0xad   : > { %v11785_v44 = vpop.permute.xlu0 %1548  ;;  %v11787_v45 = vpop.permute.xlu1 %521  ;;  %3029 = vmatprep.mubr.bf16.mxu0 %v16536_v2 }
  0xae   : > { %vm1787_vm11 = vcmp.eq.s32.totalorder %v11822_v7, %v11785_v44 }
  0xaf   : > { %1677 = vperm.xlu1 %10164, %v484_v42   ;;  %524 = vperm.xlu0 %10166, %v377_v43   ;;  %v8627_v44 = vsel %vm1787_vm11, 1.0, %v16534_v15 }
  0xb1   : > { %v11792_v50 = vpop.permute.xlu0 %1554  ;;  %v11794_v51 = vpop.permute.xlu1 %527 }
  0xb2   : > { %vm1789_vm13 = vcmp.eq.s32.totalorder %v11822_v7, %v11792_v50 }
  0xb3   : > { %1683 = vperm.xlu1 %10164, %v486_v48   ;;  %530 = vperm.xlu0 %10166, %v379_v49   ;;  %v10199_v48 = vld [vmem:[%s11632_s16 + $0xb0] sm:$0xff]   ;;  %v8629_v50 = vsel %vm1789_vm13, 1.0, %v16534_v15 }
  0xb4   : > { %8768 = vmatmul.mubr.msk.bf16.gmra.mrb[72].mxu0 %vm2617_vm1, %v10194_v56 }
  0xb5   : > { %v11800_v54 = vpop.permute.xlu0 %1560  ;;  %v11802_v55 = vpop.permute.xlu1 %533  ;;  %3039 = vmatprep.mubr.bf16.mxu0 %v16536_v2 }
  0xb6   : > { %vm1791_vm15 = vcmp.eq.s32.totalorder %v11822_v7, %v11800_v54 }
  0xb7   : > { %1689 = vperm.xlu1 %10164, %v488_v52   ;;  %536 = vperm.xlu0 %10166, %v381_v53   ;;  %v394_v52 = vld [vmem:[%s11623_s27 + $0xc8] sm:$0xff]  ;;  %v10205_v53 = vld [vmem:[%s16526_s4 + $0x10] sm:$0xff]   ;;  %v8631_v54 = vsel %vm1791_vm15, 1.0, %v16534_v15 }
  0xb9   : > { %v11807_v59 = vpop.permute.xlu0 %1566  ;;  %v11809_v60 = vpop.permute.xlu1 %539 }
  0xba   : > { %vm1793_vm2 = vcmp.eq.s32.totalorder %v11822_v7, %v11807_v59 }
  0xbb   : > { %1695 = vperm.xlu1 %10164, %v490_v57   ;;  %542 = vperm.xlu0 %10166, %v383_v58   ;;  %v399_v58 = vld [vmem:[%s11623_s27 + $0xf0] sm:$0xff] }
  0xbc   : > { %8769 = vmatmul.mubr.msk.bf16.gmra.mrb[76].mxu0 %vm2617_vm1, %v10196_v4 }
  0xbd   : > { %v11815_v0 = vpop.permute.xlu0 %1572  ;;  %v11817_v3 = vpop.permute.xlu1 %545  ;;  %3049 = vmatprep.mubr.bf16.mxu0 %v16536_v2 }
  0xbf   : > { %1701 = vperm.xlu1 %10164, %v492_v61   ;;  %548 = vperm.xlu0 %10166, %v385_v62   ;;  %v10210_v61 = vld [vmem:[%s16526_s4 + $0x18] sm:$0xff]  }
  0xc1   : > { %v11824_v8 = vpop.permute.xlu0 %1578  ;;  %v11826_v9 = vpop.permute.xlu1 %551 }
  0xc2   : > { %vm1797_vm7 = vcmp.eq.s32.totalorder %v11822_v7, %v11824_v8 }
  0xc3   : > { %1707 = vperm.xlu1 %10164, %v494_v5   ;;  %554 = vperm.xlu0 %10166, %v387_v6  }
  0xc4   : > { %8770 = vmatmul.mubr.msk.bf16.gmra.mrb[80].mxu0 %vm2617_vm1, %v10197_v13 }
  0xc5   : > { %v11834_v12 = vpop.permute.xlu0 %1584  ;;  %3059 = vmatprep.mubr.bf16.mxu0 %v16536_v2 }
  0xc6   : > { %v1525_v14 = vpop.permute.xlu1 %1524 }
  0xc7   : > { %vm1779_vm3 = vcmp.eq.s32.totalorder %v11822_v7, %v1525_v14  ;;  %1713 = vperm.xlu1 %10164, %v496_v10   ;;  %557 = vperm.xlu0 %10166, %v388_v11   ;;  %v401_v10 = vld [vmem:[%s11623_s27 + $0x100] sm:$0xff]  ;;  %v10201_v11 = vld [vmem:[%s11632_s16 + $0xb8] sm:$0xff]   ;;  %v398_v14 = vld [vmem:[%s11623_s27 + $0xe8] sm:$0xff] }
  0xc8   : > { %v8619_v17 = vsel %vm1779_vm3, 1.0, %v16534_v15 }
  0xc9   : > { %v11840_v18 = vpop.permute.xlu0 %1590  ;;  %v2131_v19 = vpack.c.bf16 %v8620_v16, %v8619_v17  ;;  %v10215_v16 = vld [vmem:[%s16528_s6] sm:$0xff]  }
  0xca   : > { %v1531_v22 = vpop.permute.xlu1 %1530  ;;  %vm1801_vm11 = vcmp.eq.s32.totalorder %v11822_v7, %v11840_v18 }
  0xcb   : > { %10167 = vset.pattern.permute.xlu1 %v16536_v2  ;;  %9506 = vmatprep.mubr.msk.bf16.mxu1 %vm4561_vm4, %v2131_v19  ;;  %vm1781_vm5 = vcmp.eq.s32.totalorder %v11822_v7, %v1531_v22 }
  0xcc   : > { %566 = vperm.xlu0 %10166, %v391_v20   ;;  %560 = vperm.xlu1 %10167, %v389_v21   ;;  %v8621_v28 = vsel %vm1781_vm5, 1.0, %v16534_v15  ;;  %v403_v21 = vld [vmem:[%s11623_s27 + $0x110] sm:$0xff]  ;;  %vm1795_vm5 = vcmp.eq.s32.totalorder %v11822_v7, %v11815_v0 }
  0xcd   : > { %v11849_v23 = vpop.permute.xlu0 %1596  ;;  %8771 = vmatmul.mubr.msk.bf16.gmra.mrb[84].mxu0 %vm2617_vm1, %v10198_v26  ;;  %v8635_v0 = vsel %vm1795_vm5, 1.0, %v16534_v15 }
  0xce   : > { %v1534_v27 = vpop.permute.xlu1 %1533  ;;  %3069 = vmatprep.mubr.bf16.mxu0 %v16536_v2  ;;  %vm1803_vm13 = vcmp.eq.s32.totalorder %v11822_v7, %v11849_v23 }
  0xcf   : > { %vm1782_vm6 = vcmp.eq.s32.totalorder %v11822_v7, %v1534_v27  ;;  %v8643_v23 = vsel %vm1803_vm13, 1.0, %v16534_v15 }
  0xd0   : > { %v8622_v29 = vsel %vm1782_vm6, 1.0, %v16534_v15  ;;  %572 = vperm.xlu0 %10166, %v393_v24   ;;  %563 = vperm.xlu1 %10167, %v390_v25   ;;  %v400_v24 = vld [vmem:[%s11623_s27 + $0xf8] sm:$0xff] }
  0xd1   : > { %v2132_v30 = vpack.c.bf16 %v8622_v29, %v8621_v28  ;;  %v11859_v31 = vpop.permute.xlu0 %1602  ;;  %v405_v28 = vld [vmem:[%s11623_s27 + $0x120] sm:$0xff] }
  0xd2   : > { %v1540_v37 = vpop.permute.xlu1 %1539  ;;  %v10202_v29 = vld [vmem:[%s11632_s16 + $0xc0] sm:$0xff]   ;;  %vm1805_vm15 = vcmp.eq.s32.totalorder %v11822_v7, %v11859_v31  ;;  %v416_v31 = vld [vmem:[%s11623_s27 + $0x178] sm:$0xff] }
  0xd3   : > { %vm1784_vm8 = vcmp.eq.s32.totalorder %v11822_v7, %v1540_v37  ;;  %9507 = vmatmul.mubr.msk.bf16.vlgmr.msra.gmra.mrb[0].mxu1 %vm4561_vm4, %v2132_v30 }
  0xd4   : > { %v8624_v39 = vsel %vm1784_vm8, 1.0, %v16534_v15  ;;  %9571 = vmatpush3.bf16.msra.mxu1 %v11695_v47  ;;  %578 = vperm.xlu0 %10166, %v395_v33   ;;  %v8625_v47 = vsel %vm1785_vm9, 1.0, %v16534_v15  ;;  %v402_v33 = vld [vmem:[%s11623_s27 + $0x108] sm:$0xff]  ;;  %vm1799_vm9 = vcmp.eq.s32.totalorder %v11822_v7, %v11834_v12 }
  0xd5   : > { %v2133_v42 = vpack.c.bf16 %v8624_v39, %v8623_v35  ;;  %569 = vperm.xlu1 %10167, %v392_v38   ;;  %v11875_v43 = vpop.permute.xlu0 %1608  ;;  %9572 = vmatprep.subr.bf16.mxu1 %v10200_v34  ;;  %v407_v35 = vld [vmem:[%s11623_s27 + $0x130] sm:$0xff]  ;;  %v8639_v12 = vsel %vm1799_vm9, 1.0, %v16534_v15 }
  0xd6   : > { %v1546_v49 = vpop.permute.xlu1 %1545  ;;  %8772 = vmatmul.mubr.msk.bf16.gmra.mrb[88].mxu0 %vm2617_vm1, %v10199_v48 }
  0xd7   : > { %vm1786_vm10 = vcmp.eq.s32.totalorder %v11822_v7, %v1546_v49  ;;  %9510 = vmatprep.mubr.msk.bf16.mxu1 %vm4561_vm4, %v2133_v42  ;;  %3079 = vmatprep.mubr.bf16.mxu0 %v16536_v2  ;;  %v404_v42 = vld [vmem:[%s11623_s27 + $0x118] sm:$0xff] }
  0xd8   : > { %v8626_v40 = vsel %vm1786_vm10, 1.0, %v16534_v15  ;;  %584 = vperm.xlu0 %10166, %v397_v46   ;;  %9573 = vmatpush3.bf16.msra.mxu1 %v10200_v34  ;;  %v8633_v34 = vsel %vm1793_vm2, 1.0, %v16534_v15  ;;  %vm1807_vm2 = vcmp.eq.s32.totalorder %v11822_v7, %v11875_v43 }
  0xd9   : > { %v2134_v56 = vpack.c.bf16 %v8626_v40, %v8625_v47  ;;  %575 = vperm.xlu1 %10167, %v394_v52   ;;  %v11889_v57 = vpop.permute.xlu0 %1614  ;;  %9574 = vmatprep.subr.bf16.mxu1 %v10205_v53  ;;  %v409_v52 = vld [vmem:[%s11623_s27 + $0x140] sm:$0xff]  ;;  %v406_v40 = vld [vmem:[%s11623_s27 + $0x128] sm:$0xff]  ;;  %v8647_v43 = vsel %vm1807_vm2, 1.0, %v16534_v15 }
  0xda   : > { %v1552_v62 = vpop.permute.xlu1 %1551  ;;  %vm1809_vm5 = vcmp.eq.s32.totalorder %v11822_v7, %v11889_v57 }
  0xdb   : > { %vm1788_vm12 = vcmp.eq.s32.totalorder %v11822_v7, %v1552_v62  ;;  %9511 = vmatmul.mubr.msk.bf16.gmra.mrb[4].mxu1 %vm4561_vm4, %v2134_v56  ;;  %v8637_v56 = vsel %vm1797_vm7, 1.0, %v16534_v15  ;;  %v411_v62 = vld [vmem:[%s11623_s27 + $0x150] sm:$0xff] }
  0xdc   : > { %v8628_v4 = vsel %vm1788_vm12, 1.0, %v16534_v15  ;;  %590 = vperm.xlu0 %10166, %v399_v58   ;;  %9575 = vmatpush3.bf16.msra.mxu1 %v10205_v53  ;;  %v10203_v53 = vld [vmem:[%s11632_s16 + $0xc8] sm:$0xff]  }
  0xdd   : > { %v2135_v5 = vpack.c.bf16 %v8628_v4, %v8627_v44  ;;  %581 = vperm.xlu1 %10167, %v396_v63   ;;  %v11904_v6 = vpop.permute.xlu0 %1620  ;;  %9576 = vmatprep.subr.bf16.mxu1 %v10210_v61  ;;  %v408_v44 = vld [vmem:[%s11623_s27 + $0x138] sm:$0xff] }
  0xde   : > { %v1558_v13 = vpop.permute.xlu1 %1557  ;;  %8773 = vmatmul.mubr.msk.bf16.gmra.mrb[92].mxu0 %vm2617_vm1, %v10201_v11  ;;  %v413_v11 = vld [vmem:[%s11623_s27 + $0x160] sm:$0xff]  ;;  %vm1811_vm7 = vcmp.eq.s32.totalorder %v11822_v7, %v11904_v6 }
  0xdf   : > { %vm1790_vm14 = vcmp.eq.s32.totalorder %v11822_v7, %v1558_v13  ;;  %9514 = vmatprep.mubr.msk.bf16.mxu1 %vm4561_vm4, %v2135_v5  ;;  %3089 = vmatprep.mubr.bf16.mxu0 %v16536_v2  ;;  %v10204_v13 = vld [vmem:[%s11632_s16 + $0xd0] sm:$0xff]   ;;  %v8651_v6 = vsel %vm1811_vm7, 1.0, %v16534_v15 }
  0xe0   : > { %v8630_v17 = vsel %vm1790_vm14, 1.0, %v16534_v15  ;;  %596 = vperm.xlu0 %10166, %v401_v10   ;;  %9577 = vmatpush3.bf16.msra.mxu1 %v10210_v61 }
  0xe1   : > { %v2136_v19 = vpack.c.bf16 %v8630_v17, %v8629_v50  ;;  %587 = vperm.xlu1 %10167, %v398_v14   ;;  %v11918_v20 = vpop.permute.xlu0 %1626  ;;  %9706 = vmatprep.subr.bf16.mxu1 %v10215_v16  ;;  %v410_v16 = vld [vmem:[%s11623_s27 + $0x148] sm:$0xff]  ;;  %v8641_v50 = vsel %vm1801_vm11, 1.0, %v16534_v15 }
  0xe2   : > { %v1564_v22 = vpop.permute.xlu1 %1563  ;;  %vm1813_vm9 = vcmp.eq.s32.totalorder %v11822_v7, %v11918_v20  ;;  %v424_v20 = vld [vmem:[%s11623_s27 + $0x1b8] sm:$0xff] }
  0xe3   : > { %vm1792_vm0 = vcmp.eq.s32.totalorder %v11822_v7, %v1564_v22  ;;  %9515 = vmatmul.mubr.msk.bf16.gmra.mrb[8].mxu1 %vm4561_vm4, %v2136_v19 }
  0xe4   : > { %v8632_v25 = vsel %vm1792_vm0, 1.0, %v16534_v15  ;;  %602 = vperm.xlu0 %10166, %v403_v21   ;;  %v415_v21 = vld [vmem:[%s11623_s27 + $0x170] sm:$0xff] }
  0xe5   : > { %v2137_v26 = vpack.c.bf16 %v8632_v25, %v8631_v54  ;;  %593 = vperm.xlu1 %10167, %v400_v24   ;;  %v11930_v27 = vpop.permute.xlu0 %1632  ;;  %v412_v24 = vld [vmem:[%s11623_s27 + $0x158] sm:$0xff]  ;;  %v11995_v54 = vld [vmem:[%s16525_s3] ss:$0 sm:$0xff] }
  0xe6   : > { %v1570_v30 = vpop.permute.xlu1 %1569  ;;  %8774 = vmatmul.mubr.msk.bf16.gmra.mrb[96].mxu0 %vm2617_vm1, %v10202_v29  ;;  %vm1815_vm11 = vcmp.eq.s32.totalorder %v11822_v7, %v11930_v27 }
  0xe7   : > { %vm1794_vm3 = vcmp.eq.s32.totalorder %v11822_v7, %v1570_v30  ;;  %9518 = vmatprep.mubr.msk.bf16.mxu1 %vm4561_vm4, %v2137_v26  ;;  %3099 = vmatprep.mubr.bf16.mxu0 %v16536_v2  ;;  %v417_v30 = vld [vmem:[%s11623_s27 + $0x180] sm:$0xff]  ;;  %v8655_v27 = vsel %vm1815_vm11, 1.0, %v16534_v15 }
  0xe8   : > { %v8634_v37 = vsel %vm1794_vm3, 1.0, %v16534_v15  ;;  %608 = vperm.xlu0 %10166, %v405_v28  }
  0xe9   : > { %v2138_v59 = vpack.c.bf16 %v8634_v37, %v8633_v34  ;;  %599 = vperm.xlu1 %10167, %v402_v33   ;;  %v11941_v38 = vpop.permute.xlu0 %1638  ;;  %v10206_v37 = vld [vmem:[%s11632_s16 + $0xd8] sm:$0xff]  }
  0xea   : > { %v1576_v39 = vpop.permute.xlu1 %1575  ;;  %vm1817_vm13 = vcmp.eq.s32.totalorder %v11822_v7, %v11941_v38 }
  0xeb   : > { %vm1796_vm6 = vcmp.eq.s32.totalorder %v11822_v7, %v1576_v39  ;;  %9519 = vmatmul.mubr.msk.bf16.gmra.mrb[12].mxu1 %vm4561_vm4, %v2138_v59 }
  0xec   : > { %v8636_v46 = vsel %vm1796_vm6, 1.0, %v16534_v15  ;;  %614 = vperm.xlu0 %10166, %v407_v35   ;;  %v414_v35 = vld [vmem:[%s11623_s27 + $0x168] sm:$0xff] }
  0xed   : > { %v2139_v48 = vpack.c.bf16 %v8636_v46, %v8635_v0  ;;  %605 = vperm.xlu1 %10167, %v404_v42   ;;  %v11953_v49 = vpop.permute.xlu0 %1644 }
  0xee   : > { %v1582_v47 = vpop.permute.xlu1 %1581  ;;  %8775 = vmatmul.mubr.msk.bf16.gmra.mrb[100].mxu0 %vm2617_vm1, %v10203_v53 }
  0xef   : > { %vm1798_vm8 = vcmp.eq.s32.totalorder %v11822_v7, %v1582_v47  ;;  %9522 = vmatprep.mubr.msk.bf16.mxu1 %vm4561_vm4, %v2139_v48  ;;  %3109 = vmatprep.mubr.bf16.mxu0 %v16536_v2  ;;  %v8645_v48 = vsel %vm1805_vm15, 1.0, %v16534_v15  ;;  %vm1819_vm15 = vcmp.eq.s32.totalorder %v11822_v7, %v11953_v49  ;;  %v10211_v49 = vld [vmem:[%s11632_s16 + $0xf8] sm:$0xff]  }
  0xf0   : > { %v8638_v58 = vsel %vm1798_vm8, 1.0, %v16534_v15  ;;  %620 = vperm.xlu0 %10166, %v409_v52  }
  0xf1   : > { %v2140_v8 = vpack.c.bf16 %v8638_v58, %v8637_v56  ;;  %611 = vperm.xlu1 %10167, %v406_v40   ;;  %v11964_v61 = vpop.permute.xlu0 %1650  ;;  %v419_v40 = vld [vmem:[%s11623_s27 + $0x190] sm:$0xff] }
  0xf2   : > { %v1588_v63 = vpop.permute.xlu1 %1587  ;;  %vm1821_vm2 = vcmp.eq.s32.totalorder %v11822_v7, %v11964_v61 }
  0xf3   : > { %vm1800_vm10 = vcmp.eq.s32.totalorder %v11822_v7, %v1588_v63  ;;  %9523 = vmatmul.mubr.msk.bf16.gmra.mrb[16].mxu1 %vm4561_vm4, %v2140_v8 }
  0xf4   : > { %v8640_v4 = vsel %vm1800_vm10, 1.0, %v16534_v15  ;;  %626 = vperm.xlu0 %10166, %v411_v62  }
  0xf5   : > { %v2141_v5 = vpack.c.bf16 %v8640_v4, %v8639_v12  ;;  %617 = vperm.xlu1 %10167, %v408_v44   ;;  %v11976_v10 = vpop.permute.xlu0 %1656  ;;  %v421_v12 = vld [vmem:[%s11623_s27 + $0x1a0] sm:$0xff] }
  0xf6   : > { %v1594_v14 = vpop.permute.xlu1 %1593  ;;  %8776 = vmatmul.mubr.msk.bf16.gmra.mrb[104].mxu0 %vm2617_vm1, %v10204_v13 }
  0xf7   : > { %vm1802_vm12 = vcmp.eq.s32.totalorder %v11822_v7, %v1594_v14  ;;  %9526 = vmatprep.mubr.msk.bf16.mxu1 %vm4561_vm4, %v2141_v5  ;;  %3119 = vmatprep.mubr.bf16.mxu0 %v16536_v2  ;;  %v2851_v26 = vpop.f32.mrb[0].mxu0  ;;  %v418_v14 = vld [vmem:[%s11623_s27 + $0x188] sm:$0xff] }
  0xf8   : > { %v8642_v17 = vsel %vm1802_vm12, 1.0, %v16534_v15  ;;  %632 = vperm.xlu0 %10166, %v413_v11   ;;  %v12008_v33 = vadd.f32 %v11995_v54, %v2851_v26  ;;  %v12010_v34 = vpop.f32.mrb[1].mxu0  ;;  %v10207_v11 = vld [vmem:[%s11632_s16 + $0xe0] sm:$0xff]  }
  0xf9   : > { %v2142_v18 = vpack.c.bf16 %v8642_v17, %v8641_v50  ;;  %623 = vperm.xlu1 %10167, %v410_v16   ;;  %v11987_v19 = vpop.permute.xlu0 %1662  ;;  %16592 = vst [vmem:[#allocation8_spill] sm:$0xff] %v12010_v34  ;;  %v2855_v39 = vpop.f32.mrb[2].mxu0  ;;  %v11309_v34 = vld [vmem:[%s11623_s27 + $0x2e8] sm:$0xff] }
  0xfa   : > { %v1600_v22 = vpop.permute.xlu1 %1599  ;;  %v8815_v42 = vmul.f32 -1.442695, %v12008_v33  ;;  %v12018_v0 = vadd.f32 %v11995_v54, %v2855_v39  ;;  %v12020_v46 = vpop.f32.mrb[3].mxu0  ;;  %vm1825_vm7 = vcmp.eq.s32.totalorder %v11822_v7, %v11987_v19  ;;  %v11279_v19 = vld [vmem:[%s11623_s27 + $0x208] sm:$0xff] }
  0xfb   : > { %vm1804_vm14 = vcmp.eq.s32.totalorder %v11822_v7, %v1600_v22  ;;  %9527 = vmatmul.mubr.msk.bf16.gmra.mrb[20].mxu1 %vm4561_vm4, %v2142_v18  ;;  %16593 = vst [vmem:[#allocation9_spill] sm:$0xff] %v12020_v46  ;;  %v11303_v46 = vld [vmem:[%s11623_s27 + $0x2e0] sm:$0xff] }
  0xfc   : > { %v8644_v25 = vsel %vm1804_vm14, 1.0, %v16534_v15  ;;  %638 = vperm.xlu0 %10166, %v415_v21   ;;  %10252 = vpow2.f32 %v8815_v42  ;;  %v8816_v56 = vmul.f32 -1.442695, %v12018_v0  ;;  %v8649_v21 = vsel %vm1809_vm5, 1.0, %v16534_v15 }
  0xfd   : > { %v2143_v28 = vpack.c.bf16 %v8644_v25, %v8643_v23  ;;  %629 = vperm.xlu1 %10167, %v412_v24   ;;  %v12004_v29 = vpop.permute.xlu0 %1668  ;;  %v423_v25 = vld [vmem:[%s11623_s27 + $0x1b0] sm:$0xff]  ;;  %vm1823_vm5 = vcmp.eq.s32.totalorder %v11822_v7, %v11976_v10 }
  0xfe   : > { %v1606_v59 = vpop.permute.xlu1 %1605  ;;  %8777 = vmatmul.mubr.msk.bf16.gmra.mrb[108].mxu0 %vm2617_vm1, %v10206_v37  ;;  %10254 = vpow2.f32 %v8816_v56  ;;  %v10208_v56 = vld [vmem:[%s11632_s16 + $0xe8] sm:$0xff]  }
  0xff   : > { %vm1806_vm0 = vcmp.eq.s32.totalorder %v11822_v7, %v1606_v59  ;;  %9530 = vmatprep.mubr.msk.bf16.mxu1 %vm4561_vm4, %v2143_v28  ;;  %3129 = vmatprep.mubr.bf16.mxu0 %v16536_v2  ;;  %v2861_v62 = vpop.f32.mrb[4].mxu0 }
 0x100   : > { %v8646_v52 = vsel %vm1806_vm0, 1.0, %v16534_v15  ;;  %644 = vperm.xlu0 %10166, %v417_v30   ;;  %v12046_v4 = vadd.f32 %v11995_v54, %v2861_v62  ;;  %v12048_v5 = vpop.f32.mrb[5].mxu0  ;;  %v420_v30 = vld [vmem:[%s11623_s27 + $0x198] sm:$0xff] }
 0x101   : > { %v2144_v53 = vpack.c.bf16 %v8646_v52, %v8645_v48  ;;  %635 = vperm.xlu1 %10167, %v414_v35   ;;  %v12029_v47 = vpop.permute.xlu0 %1674  ;;  %16594 = vst [vmem:[#allocation10_spill] sm:$0xff] %v12048_v5  ;;  %v2865_v16 = vpop.f32.mrb[6].mxu0  ;;  %v425_v52 = vld [vmem:[%s11623_s27 + $0x1c0] sm:$0xff] }
 0x102   : > { %v1612_v58 = vpop.permute.xlu1 %1611  ;;  %v8817_v50 = vmul.f32 -1.442695, %v12046_v4  ;;  %v12056_v17 = vadd.f32 %v11995_v54, %v2865_v16  ;;  %v12058_v18 = vpop.f32.mrb[7].mxu0  ;;  %vm1829_vm11 = vcmp.eq.s32.totalorder %v11822_v7, %v12029_v47 }
 0x103   : > { %vm1808_vm3 = vcmp.eq.s32.totalorder %v11822_v7, %v1612_v58  ;;  %9531 = vmatmul.mubr.msk.bf16.gmra.mrb[24].mxu1 %vm4561_vm4, %v2144_v53  ;;  %16595 = vst [vmem:[#allocation11_spill] sm:$0xff] %v12058_v18 }
 0x104   : > { %v8648_v8 = vsel %vm1808_vm3, 1.0, %v16534_v15  ;;  %650 = vperm.xlu0 %10166, %v419_v40   ;;  %10256 = vpow2.f32 %v8817_v50  ;;  %v8818_v26 = vmul.f32 -1.442695, %v12056_v17  ;;  %v427_v50 = vld [vmem:[%s11623_s27 + $0x1d0] sm:$0xff] }
 0x105   : > { %v2145_v63 = vpack.c.bf16 %v8648_v8, %v8647_v43  ;;  %641 = vperm.xlu1 %10167, %v416_v31   ;;  %v12042_v44 = vpop.permute.xlu0 %1680  ;;  %v422_v31 = vld [vmem:[%s11623_s27 + $0x1a8] sm:$0xff] }
 0x106   : > { %v1618_v13 = vpop.permute.xlu1 %1617  ;;  %8778 = vmatmul.mubr.msk.bf16.gmra.mrb[112].mxu0 %vm2617_vm1, %v10207_v11  ;;  %v10253_v57 = vpop.eup %10252  ;;  %10258 = vpow2.f32 %v8818_v26  ;;  %v8653_v11 = vsel %vm1813_vm9, 1.0, %v16534_v15  ;;  %vm1827_vm9 = vcmp.eq.s32.totalorder %v11822_v7, %v12004_v29  ;;  %v10213_v29 = vld [vmem:[%s11632_s16 + $0x108] sm:$0xff]  }
 0x107   : > { %vm1810_vm6 = vcmp.eq.s32.totalorder %v11822_v7, %v1618_v13  ;;  %9534 = vmatprep.mubr.msk.bf16.mxu1 %vm4561_vm4, %v2145_v63  ;;  %3139 = vmatprep.mubr.bf16.mxu0 %v16536_v2  ;;  %v4009_v59 = vadd.f32 1.0, %v10253_v57  ;;  %v2871_v35 = vpop.f32.mrb[8].mxu0 }
 0x108   : > { %v8650_v22 = vsel %vm1810_vm6, 1.0, %v16534_v15  ;;  %656 = vperm.xlu0 %10166, %v421_v12   ;;  %v10255_v39 = vpop.eup %10254  ;;  %v12084_v53 = vadd.f32 %v11995_v54, %v2871_v35  ;;  %v12086_v40 = vpop.f32.mrb[9].mxu0 }
 0x109   : > { %v2146_v24 = vpack.c.bf16 %v8650_v22, %v8649_v21  ;;  %647 = vperm.xlu1 %10167, %v418_v14   ;;  %v12067_v23 = vpop.permute.xlu0 %1686  ;;  %16596 = vst [vmem:[#allocation12_spill] sm:$0xff] %v12086_v40  ;;  %10260 = vrcp.f32 %v4009_v59  ;;  %v4010_v43 = vadd.f32 1.0, %v10255_v39  ;;  %v2875_v8 = vpop.f32.mrb[10].mxu0  ;;  %v10209_v39 = vld [vmem:[%s11632_s16 + $0xf0] sm:$0xff]  }
 0x10a   : > { %v1624_v28 = vpop.permute.xlu1 %1623  ;;  %v8819_v62 = vmul.f32 -1.442695, %v12084_v53  ;;  %v12094_v63 = vadd.f32 %v11995_v54, %v2875_v8  ;;  %v12096_v12 = vpop.f32.mrb[11].mxu0 }
 0x10b   : > { %vm1812_vm8 = vcmp.eq.s32.totalorder %v11822_v7, %v1624_v28  ;;  %9535 = vmatmul.mubr.msk.bf16.gmra.mrb[28].mxu1 %vm4561_vm4, %v2146_v24  ;;  %16597 = vst [vmem:[#allocation13_spill] sm:$0xff] %v12096_v12  ;;  %10262 = vrcp.f32 %v4010_v43 }
 0x10c   : > { %v8652_v37 = vsel %vm1812_vm8, 1.0, %v16534_v15  ;;  %662 = vperm.xlu0 %10166, %v423_v25   ;;  %10264 = vpow2.f32 %v8819_v62  ;;  %v8820_v21 = vmul.f32 -1.442695, %v12094_v63 }
 0x10d   : > { %v2147_v42 = vpack.c.bf16 %v8652_v37, %v8651_v6  ;;  %653 = vperm.xlu1 %10167, %v420_v30   ;;  %v12080_v48 = vpop.permute.xlu0 %1692  ;;  %v429_v37 = vld [vmem:[%s11623_s27 + $0x1e0] sm:$0xff] }
 0x10e   : > { %v1630_v58 = vpop.permute.xlu1 %1629  ;;  %8779 = vmatmul.mubr.msk.bf16.gmra.mrb[116].mxu0 %vm2617_vm1, %v10208_v56  ;;  %v10257_v24 = vpop.eup %10256  ;;  %10266 = vpow2.f32 %v8820_v21 }
 0x10f   : > { %vm1814_vm10 = vcmp.eq.s32.totalorder %v11822_v7, %v1630_v58  ;;  %9538 = vmatprep.mubr.msk.bf16.mxu1 %vm4561_vm4, %v2147_v42  ;;  %3149 = vmatprep.mubr.bf16.mxu0 %v16536_v2  ;;  %v4011_v26 = vadd.f32 1.0, %v10257_v24  ;;  %v2881_v28 = vpop.f32.mrb[12].mxu0 }
 0x110   : > { %v8654_v13 = vsel %vm1814_vm10, 1.0, %v16534_v15  ;;  %668 = vperm.xlu0 %10166, %v425_v52   ;;  %v10259_v30 = vpop.eup %10258  ;;  %v12122_v59 = vadd.f32 %v11995_v54, %v2881_v28  ;;  %v12124_v35 = vpop.f32.mrb[13].mxu0  ;;  %v426_v52 = vld [vmem:[%s11623_s27 + $0x1c8] sm:$0xff] }
 0x111   : > { %v2148_v14 = vpack.c.bf16 %v8654_v13, %v8653_v11  ;;  %659 = vperm.xlu1 %10167, %v422_v31   ;;  %v12105_v16 = vpop.permute.xlu0 %1698  ;;  %16598 = vst [vmem:[#allocation14_spill] sm:$0xff] %v12124_v35  ;;  %10268 = vrcp.f32 %v4011_v26  ;;  %v4012_v56 = vadd.f32 1.0, %v10259_v30  ;;  %v2885_v58 = vpop.f32.mrb[14].mxu0  ;;  %v8657_v11 = vsel %vm1817_vm13, 1.0, %v16534_v15 }
 0x112   : > { %v1636_v22 = vpop.permute.xlu1 %1635  ;;  %v8821_v31 = vmul.f32 -1.442695, %v12122_v59  ;;  %v12132_v43 = vadd.f32 %v11995_v54, %v2885_v58  ;;  %v12134_v8 = vpop.f32.mrb[15].mxu0  ;;  %v8659_v26 = vsel %vm1819_vm15, 1.0, %v16534_v15  ;;  %vm1831_vm13 = vcmp.eq.s32.totalorder %v11822_v7, %v12042_v44  ;;  %v10214_v44 = vld [vmem:[%s11632_s16 + $0x110] sm:$0xff]  }
 0x113   : > { %vm1816_vm12 = vcmp.eq.s32.totalorder %v11822_v7, %v1636_v22  ;;  %9539 = vmatmul.mubr.msk.bf16.gmra.mrb[32].mxu1 %vm4561_vm4, %v2148_v14  ;;  %16599 = vst [vmem:[#allocation15_spill] sm:$0xff] %v12134_v8  ;;  %v10261_v62 = vpop.eup %10260  ;;  %10270 = vrcp.f32 %v4012_v56  ;;  %v431_v22 = vld [vmem:[%s11623_s27 + $0x1f0] sm:$0xff]  ;;  %vm1833_vm15 = vcmp.eq.s32.totalorder %v11822_v7, %v12067_v23 }
 0x114   : > { %v8656_v25 = vsel %vm1816_vm12, 1.0, %v16534_v15  ;;  %674 = vperm.xlu0 %10166, %v427_v50   ;;  %v12144_v14 = vmul.f32 %v10261_v62, %v12008_v33  ;;  %10272 = vpow2.f32 %v8821_v31  ;;  %v8822_v38 = vmul.f32 -1.442695, %v12132_v43  ;;  %v430_v31 = vld [vmem:[%s11623_s27 + $0x1e8] sm:$0xff] }
 0x115   : > { %v2149_v57 = vpack.c.bf16 %v8656_v25, %v8655_v27  ;;  %665 = vperm.xlu1 %10167, %v424_v20   ;;  %v12118_v6 = vpop.permute.xlu0 %1704  ;;  %v10263_v20 = vpop.eup %10262  ;;  %v428_v27 = vld [vmem:[%s11623_s27 + $0x1d8] sm:$0xff] }
 0x116   : > { %v1642_v42 = vpop.permute.xlu1 %1641  ;;  %8780 = vmatmul.mubr.msk.bf16.gmra.mrb[120].mxu0 %vm2617_vm1, %v10209_v39  ;;  %v10265_v25 = vpop.eup %10264  ;;  %v12154_v33 = vmul.f32 %v10263_v20, %v12018_v0  ;;  %10274 = vpow2.f32 %v8822_v38  ;;  %v11276_v20 = vld [vmem:[%s11623_s27 + $0x200] sm:$0xff] }
 0x117   : > { %vm1818_vm14 = vcmp.eq.s32.totalorder %v11822_v7, %v1642_v42  ;;  %9542 = vmatprep.mubr.msk.bf16.mxu1 %vm4561_vm4, %v2149_v57  ;;  %3159 = vmatprep.mubr.bf16.mxu0 %v16536_v2  ;;  %v4013_v30 = vadd.f32 1.0, %v10265_v25  ;;  %v2891_v57 = vpop.f32.mrb[16].mxu0 }
 0x118   : > { %v8658_v13 = vsel %vm1818_vm14, 1.0, %v16534_v15  ;;  %680 = vperm.xlu0 %10166, %v429_v37   ;;  %v10267_v37 = vpop.eup %10266  ;;  %v12166_v39 = vadd.f32 %v11995_v54, %v2891_v57  ;;  %v12168_v42 = vpop.f32.mrb[17].mxu0  ;;  %v432_v57 = vld [vmem:[%s11623_s27 + $0x1f8] sm:$0xff] }
 0x119   : > { %v2150_v50 = vpack.c.bf16 %v8658_v13, %v8657_v11  ;;  %671 = vperm.xlu1 %10167, %v426_v52   ;;  %v12146_v21 = vpop.permute.xlu0 %1710  ;;  %16600 = vst [vmem:[#allocation16_spill] sm:$0xff] %v12168_v42  ;;  %10276 = vrcp.f32 %v4013_v30  ;;  %v4014_v62 = vadd.f32 1.0, %v10267_v37  ;;  %v2895_v13 = vpop.f32.mrb[18].mxu0  ;;  %v11282_v52 = vld [vmem:[%s11623_s27 + $0x240] sm:$0xff] }
 0x11a   : > { %v1648_v24 = vpop.permute.xlu1 %1647  ;;  %v8823_v11 = vmul.f32 -1.442695, %v12166_v39 }
 0x11b   : > { %vm1820_vm0 = vcmp.eq.s32.totalorder %v11822_v7, %v1648_v24  ;;  %9543 = vmatmul.mubr.msk.bf16.gmra.mrb[36].mxu1 %vm4561_vm4, %v2150_v50  ;;  %v10269_v50 = vpop.eup %10268  ;;  %10278 = vrcp.f32 %v4014_v62  ;;  %v12186_v24 = vadd.f32 %v11995_v54, %v2895_v13 }
 0x11c   : > { %v8660_v28 = vsel %vm1820_vm0, 1.0, %v16534_v15  ;;  %686 = vperm.xlu0 %10166, %v431_v22   ;;  %v8661_v22 = vsel %vm1821_vm2, 1.0, %v16534_v15  ;;  %v12193_v25 = vmul.f32 %v10269_v50, %v12046_v4  ;;  %10280 = vpow2.f32 %v8823_v11 }
 0x11d   : > { %v2151_v0 = vpack.c.bf16 %v8660_v28, %v8659_v26  ;;  %677 = vperm.xlu1 %10167, %v428_v27   ;;  %v12188_v27 = vpop.f32.mrb[19].mxu0  ;;  %v10271_v61 = vpop.eup %10270  ;;  %v8824_v37 = vmul.f32 -1.442695, %v12186_v24  ;;  %v8663_v4 = vsel %vm1823_vm5, 1.0, %v16534_v15  ;;  %vm1835_vm2 = vcmp.eq.s32.totalorder %v11822_v7, %v12080_v48 }
 0x11e   : > { %v1654_v56 = vpop.permute.xlu1 %1653  ;;  %v12173_v58 = vpop.permute.xlu0 %500  ;;  %16601 = vst [vmem:[#allocation17_spill] sm:$0xff] %v12188_v27  ;;  %8781 = vmatmul.mubr.msk.bf16.gmra.mrb[124].mxu0 %vm2617_vm1, %v10211_v49  ;;  %vm1837_vm5 = vcmp.eq.s32.totalorder %v11822_v7, %v12105_v16 }
 0x11f   : > { %vm1822_vm3 = vcmp.eq.s32.totalorder %v11822_v7, %v1654_v56  ;;  %9546 = vmatprep.mubr.msk.bf16.mxu1 %vm4561_vm4, %v2151_v0  ;;  %3169 = vmatprep.mubr.bf16.mxu0 %v16536_v2  ;;  %v10273_v0 = vpop.eup %10272  ;;  %v12202_v56 = vmul.f32 %v10271_v61, %v12056_v17  ;;  %10282 = vpow2.f32 %v8824_v37  ;;  %v2901_v11 = vpop.f32.mrb[20].mxu0 }
 0x120   : > { %v8662_v38 = vsel %vm1822_vm3, 1.0, %v16534_v15  ;;  %692 = vperm.xlu0 %10166, %v11276_v20   ;;  %v4015_v62 = vadd.f32 1.0, %v10273_v0  ;;  %v10275_v13 = vpop.eup %10274  ;;  %v12217_v10 = vadd.f32 %v11995_v54, %v2901_v11  ;;  %v8665_v0 = vsel %vm1825_vm7, 1.0, %v16534_v15 }
 0x121   : > { %v2152_v26 = vpack.c.bf16 %v8662_v38, %v8661_v22  ;;  %683 = vperm.xlu1 %10167, %v430_v31   ;;  %v11277_v31 = vld [vmem:[%s11623_s27 + $0x210] sm:$0xff]  ;;  %v12219_v22 = vpop.f32.mrb[21].mxu0  ;;  %v10212_v38 = vld [vmem:[%s11632_s16 + $0x100] sm:$0xff]   ;;  %v4016_v61 = vadd.f32 1.0, %v10275_v13  ;;  %vm1839_vm7 = vcmp.eq.s32.totalorder %v11822_v7, %v12118_v6 }
 0x122   : > { %v1660_v28 = vpop.permute.xlu1 %1659  ;;  %v12196_v30 = vpop.permute.xlu0 %503  ;;  %16602 = vst [vmem:[#allocation18_spill] sm:$0xff] %v12219_v22  ;;  %10284 = vrcp.f32 %v4015_v62 }
 0x123   : > { %vm1824_vm6 = vcmp.eq.s32.totalorder %v11822_v7, %v1660_v28  ;;  %9547 = vmatmul.mubr.msk.bf16.gmra.mrb[40].mxu1 %vm4561_vm4, %v2152_v26  ;;  %v8825_v28 = vmul.f32 -1.442695, %v12217_v10  ;;  %v2905_v37 = vpop.f32.mrb[22].mxu0  ;;  %10286 = vrcp.f32 %v4016_v61 }
 0x124   : > { %v8664_v49 = vsel %vm1824_vm6, 1.0, %v16534_v15  ;;  %698 = vperm.xlu0 %10166, %v11277_v31   ;;  %v12234_v31 = vadd.f32 %v11995_v54, %v2905_v37  ;;  %v12236_v62 = vpop.f32.mrb[23].mxu0 }
 0x125   : > { %v2153_v50 = vpack.c.bf16 %v8664_v49, %v8663_v4  ;;  %689 = vperm.xlu1 %10167, %v432_v57   ;;  %v10277_v57 = vpop.eup %10276  ;;  %v11278_v49 = vld [vmem:[%s11623_s27 + $0x220] sm:$0xff]  ;;  %16603 = vst [vmem:[#allocation19_spill] sm:$0xff] %v12236_v62  ;;  %10288 = vpow2.f32 %v8825_v28  ;;  %v10216_v62 = vld [vmem:[%s11632_s16 + $0x118] sm:$0xff]  }
 0x126   : > { %v1666_v20 = vpop.permute.xlu1 %1665  ;;  %v12222_v26 = vpop.permute.xlu0 %512  ;;  %v12241_v11 = vmul.f32 %v10277_v57, %v12084_v53  ;;  %8782 = vmatmul.mubr.msk.bf16.gmra.mrb[128].mxu0 %vm2617_vm1, %v10212_v38  ;;  %v8826_v37 = vmul.f32 -1.442695, %v12234_v31  ;;  %v8667_v38 = vsel %vm1827_vm9, 1.0, %v16534_v15  ;;  %v11280_v57 = vld [vmem:[%s11623_s27 + $0x230] sm:$0xff]  ;;  %vm884_vm9 = vcmp.eq.s32.totalorder %v11822_v7, %v12196_v30 }
 0x127   : > { %vm1826_vm8 = vcmp.eq.s32.totalorder %v11822_v7, %v1666_v20  ;;  %9550 = vmatprep.mubr.msk.bf16.mxu1 %vm4561_vm4, %v2153_v50  ;;  %v10279_v50 = vpop.eup %10278  ;;  %3179 = vmatprep.mubr.bf16.mxu0 %v16536_v2 }
 0x128   : > { %v8666_v4 = vsel %vm1826_vm8, 1.0, %v16534_v15  ;;  %704 = vperm.xlu0 %10166, %v11278_v49   ;;  %v10281_v49 = vpop.eup %10280  ;;  %v12250_v53 = vmul.f32 %v10279_v50, %v12094_v63  ;;  %10290 = vpow2.f32 %v8826_v37  ;;  %vm883_vm8 = vcmp.eq.s32.totalorder %v11822_v7, %v12173_v58 }
 0x129   : > { %v2154_v13 = vpack.c.bf16 %v8666_v4, %v8665_v0  ;;  %695 = vperm.xlu1 %10167, %v11279_v19   ;;  %v4017_v0 = vadd.f32 1.0, %v10281_v49  ;;  %v2911_v4 = vpop.f32.mrb[24].mxu0  ;;  %v11281_v19 = vld [vmem:[%s11623_s27 + $0x218] sm:$0xff] }
 0x12a   : > { %v1672_v20 = vpop.permute.xlu1 %1671  ;;  %v12245_v61 = vpop.permute.xlu0 %518 }
 0x12b   : > { %vm1828_vm10 = vcmp.eq.s32.totalorder %v11822_v7, %v1672_v20  ;;  %9551 = vmatmul.mubr.msk.bf16.gmra.mrb[44].mxu1 %vm4561_vm4, %v2154_v13  ;;  %v12264_v13 = vadd.f32 %v11995_v54, %v2911_v4  ;;  %v12266_v50 = vpop.f32.mrb[25].mxu0  ;;  %10292 = vrcp.f32 %v4017_v0  ;;  %v8669_v20 = vsel %vm1829_vm11, 1.0, %v16534_v15 }
 0x12c   : > { %v8668_v28 = vsel %vm1828_vm10, 1.0, %v16534_v15  ;;  %710 = vperm.xlu0 %10166, %v11280_v57   ;;  %16604 = vst [vmem:[#allocation20_spill] sm:$0xff] %v12266_v50  ;;  %v10283_v57 = vpop.eup %10282  ;;  %v2915_v4 = vpop.f32.mrb[26].mxu0  ;;  %v11287_v50 = vld [vmem:[%s11623_s27 + $0x248] sm:$0xff]  ;;  %vm1841_vm10 = vcmp.eq.s32.totalorder %v11822_v7, %v12146_v21 }
 0x12d   : > { %v2155_v63 = vpack.c.bf16 %v8668_v28, %v8667_v38  ;;  %701 = vperm.xlu1 %10167, %v11281_v19   ;;  %v4018_v38 = vadd.f32 1.0, %v10283_v57  ;;  %v8827_v28 = vmul.f32 -1.442695, %v12264_v13  ;;  %v10285_v19 = vpop.eup %10284  ;;  %v12283_v0 = vadd.f32 %v11995_v54, %v2915_v4 }
 0x12e   : > { %v1678_v49 = vpop.permute.xlu1 %1677  ;;  %v12271_v37 = vpop.permute.xlu0 %524  ;;  %8783 = vmatmul.mubr.msk.bf16.gmra.mrb[132].mxu0 %vm2617_vm1, %v10213_v29 }
 0x12f   : > { %vm1830_vm12 = vcmp.eq.s32.totalorder %v11822_v7, %v1678_v49  ;;  %9554 = vmatprep.mubr.msk.bf16.mxu1 %vm4561_vm4, %v2155_v63  ;;  %v12285_v49 = vpop.f32.mrb[27].mxu0  ;;  %v12290_v63 = vmul.f32 %v10285_v19, %v12122_v59  ;;  %10294 = vrcp.f32 %v4018_v38  ;;  %v10287_v47 = vpop.eup %10286  ;;  %v8828_v4 = vmul.f32 -1.442695, %v12283_v0  ;;  %3189 = vmatprep.mubr.bf16.mxu0 %v16536_v2  ;;  %v11285_v19 = vld [vmem:[%s11623_s27 + $0x238] sm:$0xff] }
 0x130   : > { %v8670_v17 = vsel %vm1830_vm12, 1.0, %v16534_v15  ;;  %716 = vperm.xlu0 %10166, %v11282_v52   ;;  %16605 = vst [vmem:[#allocation21_spill] sm:$0xff] %v12285_v49  ;;  %10296 = vpow2.f32 %v8827_v28  ;;  %v10289_v49 = vpop.eup %10288  ;;  %v12299_v59 = vmul.f32 %v10287_v47, %v12132_v43  ;;  %v2921_v28 = vpop.f32.mrb[28].mxu0 }
 0x131   : > { %v2156_v57 = vpack.c.bf16 %v8670_v17, %v8669_v20  ;;  %707 = vperm.xlu1 %10167, %v11283_v1   ;;  %v16606_v1 = vmov 0.0   ;;  %v11284_v20 = vld [vmem:[%s11623_s27 + $0x250] sm:$0xff]  ;;  %v4019_v38 = vadd.f32 1.0, %v10289_v49  ;;  %10298 = vpow2.f32 %v8828_v4  ;;  %v12315_v47 = vpop.f32.mrb[29].mxu0 }
 0x132   : > { %v1684_v52 = vpop.permute.xlu1 %1683  ;;  %v12294_v15 = vpop.permute.xlu0 %530  ;;  %v8671_v17 = vsel %vm1831_vm13, 1.0, %v16606_v1  ;;  %16607 = vst [vmem:[#allocation22_spill] sm:$0xff] %v12315_v47  ;;  %v8681_v30 = vsel %vm1841_vm10, 1.0, %v16606_v1  ;;  %vm886_vm13 = vcmp.eq.s32.totalorder %v11822_v7, %v11772_v36  ;;  %vm896_vm10 = vcmp.eq.s32.totalorder %v11822_v7, %v11809_v60 }
 0x133   : > { %vm1832_vm14 = vcmp.eq.s32.totalorder %v11822_v7, %v1684_v52  ;;  %9555 = vmatmul.mubr.msk.bf16.gmra.mrb[48].mxu1 %vm4561_vm4, %v2156_v57  ;;  %v12313_v57 = vadd.f32 %v11995_v54, %v2921_v28  ;;  %10300 = vrcp.f32 %v4019_v38  ;;  %v2925_v28 = vpop.f32.mrb[30].mxu0  ;;  %v8673_v52 = vsel %vm1833_vm15, 1.0, %v16606_v1  ;;  %v11286_v38 = vld [vmem:[%s11623_s27 + $0x260] sm:$0xff] }
 0x134   : > { %v8672_v29 = vsel %vm1832_vm14, 1.0, %v16606_v1  ;;  %722 = vperm.xlu0 %10166, %v11284_v20   ;;  %v10291_v20 = vpop.eup %10290  ;;  %vm885_vm14 = vcmp.eq.s32.totalorder %v11822_v7, %v11764_v32  ;;  %vm887_vm15 = vcmp.eq.s32.totalorder %v11822_v7, %v12222_v26 }
 0x135   : > { %v2157_v43 = vpack.c.bf16 %v8672_v29, %v8671_v17  ;;  %713 = vperm.xlu1 %10167, %v11285_v19   ;;  %v4020_v17 = vadd.f32 1.0, %v10291_v20  ;;  %v8829_v29 = vmul.f32 -1.442695, %v12313_v57  ;;  %v10293_v19 = vpop.eup %10292  ;;  %v8429_v36 = vsel %vm885_vm14, 1.0, %v16606_v1 }
 0x136   : > { %v1690_v49 = vpop.permute.xlu1 %1689  ;;  %v12320_v4 = vpop.permute.xlu0 %536  ;;  %8784 = vmatmul.mubr.msk.bf16.gmra.mrb[136].mxu0 %vm2617_vm1, %v10214_v44  ;;  %v12341_v23 = vmul.f32 %v10293_v19, %v12166_v39  ;;  %vm900_vm14 = vcmp.eq.s32.totalorder %v11822_v7, %v11826_v9 }
 0x137   : > { %vm1834_vm0 = vcmp.eq.s32.totalorder %v11822_v7, %v1690_v49  ;;  %9558 = vmatprep.mubr.msk.bf16.mxu1 %vm4561_vm4, %v2157_v43  ;;  %v12334_v49 = vadd.f32 %v11995_v54, %v2925_v28  ;;  %v12336_v43 = vpop.f32.mrb[31].mxu0  ;;  %10302 = vrcp.f32 %v4020_v17 }
 0x138   : > { %v8674_v2 = vsel %vm1834_vm0, 1.0, %v16606_v1  ;;  %728 = vperm.xlu0 %10166, %v11286_v38   ;;  %16608 = vst [vmem:[#allocation23_spill] sm:$0xff] %v12336_v43  ;;  %10304 = vpow2.f32 %v8829_v29  ;;  %v16609_v38 = vmov 0   ;;  %v2931_v17 = vpop.f32.mrb[32].mxu0  ;;  %v11289_v29 = vld [vmem:[%s11623_s27 + $0x258] sm:$0xff]  ;;  %vm888_vm0 = vcmp.eq.s32.totalorder %v11822_v7, %v11779_v41 }
 0x139   : > { %v2158_v20 = vpack.c.bf16 %v8674_v2, %v8673_v52  ;;  %719 = vperm.xlu1 %10167, %v11287_v50   ;;  %v8830_v28 = vmul.f32 -1.442695, %v12334_v49  ;;  %3199 = vmatprep.mubr.bf16.mxu0 %v16609_v38  ;;  %v10295_v43 = vpop.eup %10294  ;;  %v8675_v2 = vsel %vm1835_vm2, 1.0, %v16606_v1  ;;  %v11288_v52 = vld [vmem:[%s11623_s27 + $0x270] sm:$0xff]  ;;  %v12362_v19 = vadd.f32 %v11995_v54, %v2931_v17 }
 0x13a   : > { %v1696_v47 = vpop.permute.xlu1 %1695  ;;  %v12343_v27 = vpop.permute.xlu0 %542  ;;  %v12356_v50 = vmul.f32 %v10295_v43, %v12186_v24  ;;  %v8432_v32 = vsel %vm888_vm0, 1.0, %v16606_v1  ;;  %vm889_vm2 = vcmp.eq.s32.totalorder %v11822_v7, %v12245_v61 }
 0x13b   : > { %vm1836_vm3 = vcmp.eq.s32.totalorder %v11822_v7, %v1696_v47  ;;  %9559 = vmatmul.mubr.msk.bf16.gmra.mrb[52].mxu1 %vm4561_vm4, %v2158_v20  ;;  %v10297_v39 = vpop.eup %10296  ;;  %10306 = vpow2.f32 %v8830_v28  ;;  %v12364_v20 = vpop.f32.mrb[33].mxu0  ;;  %v8677_v28 = vsel %vm1837_vm5, 1.0, %v16606_v1  ;;  %vm890_vm5 = vcmp.eq.s32.totalorder %v11822_v7, %v11787_v45 }
 0x13c   : > { %v8676_v44 = vsel %vm1836_vm3, 1.0, %v16606_v1  ;;  %734 = vperm.xlu0 %10166, %v11288_v52   ;;  %v4021_v47 = vadd.f32 1.0, %v10297_v39  ;;  %16610 = vst [vmem:[#allocation24_spill] sm:$0xff] %v12364_v20  ;;  %v10299_v42 = vpop.eup %10298  ;;  %v2935_v39 = vpop.f32.mrb[34].mxu0  ;;  %v8831_v52 = vmul.f32 -1.442695, %v12362_v19  ;;  %vm891_vm3 = vcmp.eq.s32.totalorder %v11822_v7, %v12271_v37 }
 0x13d   : > { %v2159_v48 = vpack.c.bf16 %v8676_v44, %v8675_v2  ;;  %725 = vperm.xlu1 %10167, %v11289_v29   ;;  %v4022_v2 = vadd.f32 1.0, %v10299_v42  ;;  %v10301_v44 = vpop.eup %10300  ;;  %v11290_v29 = vld [vmem:[%s11623_s27 + $0x280] sm:$0xff]  ;;  %v12383_v16 = vadd.f32 %v11995_v54, %v2935_v39  ;;  %v12385_v20 = vpop.f32.mrb[35].mxu0  ;;  %v8434_v35 = vsel %vm890_vm5, 1.0, %v16606_v1 }
 0x13e   : > { %v1702_v24 = vpop.permute.xlu1 %1701  ;;  %v12367_v43 = vpop.permute.xlu0 %548  ;;  %10308 = vrcp.f32 %v4021_v47  ;;  %16611 = vst [vmem:[#allocation25_spill] sm:$0xff] %v12385_v20  ;;  %8785 = vmatmul.mubr.msk.bf16.gmra.mrb[140].mxu0 %vm2617_vm1, %v10216_v62  ;;  %v12394_v47 = vmul.f32 %v10301_v44, %v12217_v10  ;;  %v8679_v62 = vsel %vm1839_vm7, 1.0, %v16606_v1  ;;  %v11292_v44 = vld [vmem:[%s11623_s27 + $0x290] sm:$0xff]  ;;  %vm893_vm7 = vcmp.eq.s32.totalorder %v11822_v7, %v12294_v15 }
 0x13f   : > { %vm1838_vm6 = vcmp.eq.s32.totalorder %v11822_v7, %v1702_v24  ;;  %9562 = vmatprep.mubr.msk.bf16.mxu1 %vm4561_vm4, %v2159_v48  ;;  %v11291_v48 = vld [vmem:[%s11623_s27 + $0x268] sm:$0xff]  ;;  %10310 = vrcp.f32 %v4022_v2  ;;  %3209 = vmatprep.mubr.bf16.mxu0 %v16609_v38 }
 0x140   : > { %v8678_v17 = vsel %vm1838_vm6, 1.0, %v16606_v1  ;;  %740 = vperm.xlu0 %10166, %v11290_v29   ;;  %10312 = vpow2.f32 %v8831_v52  ;;  %v8832_v29 = vmul.f32 -1.442695, %v12383_v16  ;;  %v8427_v52 = vsel %vm883_vm8, 1.0, %v16606_v1 }
 0x141   : > { %v2160_v42 = vpack.c.bf16 %v8678_v17, %v8677_v28  ;;  %731 = vperm.xlu1 %10167, %v11291_v48   ;;  %v10303_v28 = vpop.eup %10302  ;;  %v2941_v17 = vpop.f32.mrb[36].mxu0  ;;  %vm892_vm6 = vcmp.eq.s32.totalorder %v11822_v7, %v11794_v51  ;;  %v10230_v51 = vld [vmem:[%s16528_s6 + $0x18] sm:$0xff]   ;;  %vm895_vm8 = vcmp.eq.s32.totalorder %v11822_v7, %v12320_v4 }
 0x142   : > { %v1708_v24 = vpop.permute.xlu1 %1707  ;;  %v12396_v39 = vpop.permute.xlu0 %554  ;;  %v12413_v2 = vmul.f32 %v10303_v28, %v12234_v31  ;;  %10314 = vpow2.f32 %v8832_v29  ;;  %v12423_v58 = vadd.f32 %v11995_v54, %v2941_v17  ;;  %v10217_v28 = vld [vmem:[%s11632_s16 + $0x120] sm:$0xff]  }
 0x143   : > { %vm1840_vm11 = vcmp.eq.s32.totalorder %v11822_v7, %v1708_v24  ;;  %9563 = vmatmul.mubr.msk.bf16.gmra.mrb[56].mxu1 %vm4561_vm4, %v2160_v42  ;;  %v10305_v10 = vpop.eup %10304  ;;  %v8428_v42 = vsel %vm884_vm9, 1.0, %v16606_v1  ;;  %v11293_v24 = vld [vmem:[%s11623_s27 + $0x278] sm:$0xff]  ;;  %v12425_v31 = vpop.f32.mrb[37].mxu0  ;;  %vm894_vm9 = vcmp.eq.s32.totalorder %v11822_v7, %v11802_v55 }
 0x144   : > { %v8680_v6 = vsel %vm1840_vm11, 1.0, %v16606_v1  ;;  %746 = vperm.xlu0 %10166, %v11292_v44   ;;  %v4023_v20 = vadd.f32 1.0, %v10305_v10  ;;  %16612 = vst [vmem:[#allocation26_spill] sm:$0xff] %v12425_v31  ;;  %v2945_v10 = vpop.f32.mrb[38].mxu0  ;;  %v8833_v12 = vmul.f32 -1.442695, %v12423_v58  ;;  %vm897_vm11 = vcmp.eq.s32.totalorder %v11822_v7, %v12343_v27 }
 0x145   : > { %v2161_v48 = vpack.c.bf16 %v8680_v6, %v8679_v62  ;;  %737 = vperm.xlu1 %10167, %v11293_v24   ;;  %v10307_v22 = vpop.eup %10306  ;;  %v1267_v6 = vpack.c.bf16 %v8428_v42, %v8427_v52  ;;  %v11294_v24 = vld [vmem:[%s11623_s27 + $0x2a0] sm:$0xff]  ;;  %v12442_v31 = vadd.f32 %v11995_v54, %v2945_v10  ;;  %v12444_v21 = vpop.f32.mrb[39].mxu0  ;;  %v10218_v10 = vld [vmem:[%s11632_s16 + $0x128] sm:$0xff]   ;;  %v8438_v4 = vsel %vm894_vm9, 1.0, %v16606_v1 }
 0x146   : > { %v1714_v44 = vpop.permute.xlu1 %1713  ;;  %v12428_v29 = vpop.permute.xlu0 %557  ;;  %10316 = vrcp.f32 %v4023_v20  ;;  %v4024_v62 = vadd.f32 1.0, %v10307_v22  ;;  %16613 = vst [vmem:[#allocation27_spill] sm:$0xff] %v12444_v21  ;;  %8786 = vmatmul.mubr.msk.bf16.gmra.mrb[144].mxu0 %vm2617_vm1, %v10217_v28  ;;  %v11299_v21 = vld [vmem:[%s11623_s27 + $0x2a8] sm:$0xff] }
 0x147   : > { %vm1842_vm12 = vcmp.eq.s32.totalorder %v11822_v7, %v1714_v44  ;;  %9566 = vmatprep.mubr.msk.bf16.mxu1 %vm4561_vm4, %v2161_v48  ;;  %v11295_v44 = vld [vmem:[%s11623_s27 + $0x288] sm:$0xff]  ;;  %v8834_v20 = vmul.f32 -1.442695, %v12442_v31  ;;  %3219 = vmatprep.mubr.bf16.mxu0 %v16609_v38 }
 0x148   : > { %v8682_v17 = vsel %vm1842_vm12, 1.0, %v16606_v1  ;;  %752 = vperm.xlu0 %10166, %v11294_v24   ;;  %v10309_v8 = vpop.eup %10308  ;;  %10318 = vrcp.f32 %v4024_v62  ;;  %vm899_vm12 = vcmp.eq.s32.totalorder %v11822_v7, %v12367_v43  ;;  %v8444_v43 = vsel %vm900_vm14, 1.0, %v16606_v1 }
 0x149   : > { %v2162_v40 = vpack.c.bf16 %v8682_v17, %v8681_v30  ;;  %743 = vperm.xlu1 %10167, %v11295_v44   ;;  %v12449_v22 = vmul.f32 %v10309_v8, %v12264_v13  ;;  %10320 = vpow2.f32 %v8833_v12  ;;  %v10311_v52 = vpop.eup %10310  ;;  %v11296_v12 = vld [vmem:[%s11623_s27 + $0x2b0] sm:$0xff]  ;;  %v2951_v13 = vpop.f32.mrb[40].mxu0  ;;  %v11298_v44 = vld [vmem:[%s11623_s27 + $0x2c0] sm:$0xff] }
 0x14a   : > { %v10313_v28 = vpop.eup %10312  ;;  %v12461_v8 = vmul.f32 %v10311_v52, %v12283_v0  ;;  %10322 = vpow2.f32 %v8834_v20  ;;  %v12471_v62 = vadd.f32 %v11995_v54, %v2951_v13  ;;  %v12473_v0 = vpop.f32.mrb[41].mxu0 }
 0x14b   : > { %v12455_v42 = vpop.permute.xlu0 %566  ;;  %9567 = vmatmul.mubr.msk.bf16.gmra.mrb[60].mxu1 %vm4561_vm4, %v2162_v40  ;;  %v12458_v48 = vpop.permute.xlu1 %560  ;;  %v11297_v40 = vld [vmem:[%s11623_s27 + $0x298] sm:$0xff]  ;;  %v4025_v30 = vadd.f32 1.0, %v10313_v28  ;;  %16614 = vst [vmem:[#allocation28_spill] sm:$0xff] %v12473_v0 }
 0x14c   : > { %758 = vperm.xlu0 %10166, %v11296_v12   ;;  %9578 = vmatprep.mubr.msk.bf16.mxu1 %vm4561_vm4, %v1267_v6  ;;  %v10315_v17 = vpop.eup %10314  ;;  %v8430_v6 = vsel %vm886_vm13, 1.0, %v16606_v1  ;;  %v2955_v24 = vpop.f32.mrb[42].mxu0  ;;  %v8835_v12 = vmul.f32 -1.442695, %v12471_v62  ;;  %vm898_vm13 = vcmp.eq.s32.totalorder %v11822_v7, %v11817_v3  ;;  %v11313_v3 = vld [vmem:[%s11623_s27 + $0x308] sm:$0xff] }
 0x14d   : > { %749 = vperm.xlu1 %10167, %v11297_v40   ;;  %10324 = vrcp.f32 %v4025_v30  ;;  %v4026_v28 = vadd.f32 1.0, %v10315_v17  ;;  %v12490_v13 = vadd.f32 %v11995_v54, %v2955_v24  ;;  %v8431_v40 = vsel %vm887_vm15, 1.0, %v16606_v1  ;;  %v12501_v0 = vpop.f32.mrb[43].mxu0 }
 0x14e   : > { %16615 = vst [vmem:[#allocation29_spill] sm:$0xff] %v12501_v0  ;;  %v1268_v17 = vpack.c.bf16 %v8430_v6, %v8429_v36  ;;  %8787 = vmatmul.mubr.msk.bf16.gmra.mrb[148].mxu0 %vm2617_vm1, %v10218_v10  ;;  %v11301_v36 = vld [vmem:[%s16528_s6] sm:$0xff]   ;;  %v8442_v27 = vsel %vm898_vm13, 1.0, %v16606_v1  ;;  %vm903_vm15 = vcmp.eq.s32.totalorder %v11822_v7, %v12458_v48 }
 0x14f   : > { %v12484_v20 = vpop.permute.xlu0 %572  ;;  %v12486_v52 = vpop.permute.xlu1 %563  ;;  %10326 = vrcp.f32 %v4026_v28  ;;  %v8836_v24 = vmul.f32 -1.442695, %v12490_v13  ;;  %3229 = vmatprep.mubr.bf16.mxu0 %v16609_v38 }
 0x150   : > { %764 = vperm.xlu0 %10166, %v11298_v44   ;;  %v10317_v30 = vpop.eup %10316  ;;  %10328 = vpow2.f32 %v8835_v12  ;;  %v1269_v44 = vpack.c.bf16 %v8432_v32, %v8431_v40  ;;  %v11300_v12 = vld [vmem:[%s11623_s27 + $0x2d0] sm:$0xff]  ;;  %v2961_v40 = vpop.f32.mrb[44].mxu0  ;;  %vm904_vm0 = vcmp.eq.s32.totalorder %v11822_v7, %v12486_v52 }
 0x151   : > { %755 = vperm.xlu1 %10167, %v11299_v21   ;;  %v12511_v26 = vmul.f32 %v10317_v30, %v12313_v57  ;;  %v10220_v21 = vld [vmem:[%s16528_s6 + $0x8] sm:$0xff]   ;;  %10330 = vpow2.f32 %v8836_v24  ;;  %v11302_v30 = vld [vmem:[%s11623_s27 + $0x2b8] sm:$0xff]  ;;  %v12540_v24 = vpop.f32.mrb[45].mxu0  ;;  %v10219_v32 = vld [vmem:[%s11632_s16 + $0x130] sm:$0xff]  }
 0x152   : > { %v10319_v6 = vpop.eup %10318  ;;  %16616 = vst [vmem:[#allocation30_spill] sm:$0xff] %v12540_v24 }
 0x153   : > { %v12519_v10 = vpop.permute.xlu0 %578  ;;  %9579 = vmatmul.mubr.msk.bf16.vlgmr.msra.gmra.mrb[64].mxu1 %vm4561_vm4, %v1268_v17  ;;  %v10321_v41 = vpop.eup %10320  ;;  %v12525_v57 = vmul.f32 %v10319_v6, %v12334_v49  ;;  %v12538_v49 = vadd.f32 %v11995_v54, %v2961_v40  ;;  %v8435_v40 = vsel %vm891_vm3, 1.0, %v16606_v1  ;;  %vm902_vm3 = vcmp.eq.s32.totalorder %v11822_v7, %v12428_v29 }
 0x154   : > { %v12527_v28 = vpop.permute.xlu1 %569  ;;  %770 = vperm.xlu0 %10166, %v11300_v12   ;;  %9707 = vmatpush3.bf16.msra.mxu1 %v11301_v36  ;;  %v4027_v17 = vadd.f32 1.0, %v10321_v41  ;;  %v10323_v6 = vpop.eup %10322  ;;  %v8433_v12 = vsel %vm889_vm2, 1.0, %v16606_v1  ;;  %vm901_vm2 = vcmp.eq.s32.totalorder %v11822_v7, %v12396_v39  ;;  %v8446_v52 = vsel %vm902_vm3, 1.0, %v16606_v1 }
 0x155   : > { %761 = vperm.xlu1 %10167, %v11302_v30   ;;  %9582 = vmatprep.mubr.msk.bf16.mxu1 %vm4561_vm4, %v1269_v44  ;;  %v2965_v36 = vpop.f32.mrb[46].mxu0  ;;  %v10225_v44 = vld [vmem:[%s16528_s6 + $0x10] sm:$0xff]   ;;  %v4028_v61 = vadd.f32 1.0, %v10323_v6  ;;  %v8837_v0 = vmul.f32 -1.442695, %v12538_v49  ;;  %v1270_v6 = vpack.c.bf16 %v8434_v35, %v8433_v12  ;;  %v8445_v48 = vsel %vm901_vm2, 1.0, %v16606_v1 }
 0x156   : > { %9708 = vmatprep.subr.bf16.mxu1 %v10220_v21  ;;  %10332 = vrcp.f32 %v4027_v17  ;;  %v12561_v24 = vpop.f32.mrb[47].mxu0  ;;  %v12571_v37 = vadd.f32 %v11995_v54, %v2965_v36  ;;  %v8436_v17 = vsel %vm892_vm6, 1.0, %v16606_v1  ;;  %8788 = vmatmul.mubr.msk.bf16.gmra.mrb[152].mxu0 %vm2617_vm1, %v10219_v32  ;;  %v11306_v36 = vld [vmem:[%s11623_s27 + $0x2d8] sm:$0xff]  ;;  %vm906_vm5 = vcmp.eq.s32.totalorder %v11822_v7, %v12527_v28 }
 0x157   : > { %v12558_v30 = vpop.permute.xlu0 %584  ;;  %16617 = vst [vmem:[#allocation31_spill] sm:$0xff] %v12561_v24  ;;  %v10325_v18 = vpop.eup %10324  ;;  %v11304_v24 = vld [vmem:[%s11623_s27 + $0x2c8] sm:$0xff]  ;;  %10334 = vrcp.f32 %v4028_v61  ;;  %v1271_v45 = vpack.c.bf16 %v8436_v17, %v8435_v40  ;;  %3239 = vmatprep.mubr.bf16.mxu0 %v16609_v38 }
 0x158   : > { %v12567_v41 = vpop.permute.xlu1 %575  ;;  %776 = vperm.xlu0 %10166, %v11303_v46   ;;  %9709 = vmatpush3.bf16.msra.mxu1 %v10220_v21  ;;  %v12580_v46 = vmul.f32 %v10325_v18, %v12362_v19  ;;  %10336 = vpow2.f32 %v8837_v0  ;;  %v8838_v54 = vmul.f32 -1.442695, %v12571_v37  ;;  %v2971_v32 = vpop.f32.mrb[48].mxu0 }
 0x159   : > { %767 = vperm.xlu1 %10167, %v11304_v24   ;;  %9710 = vmatprep.subr.bf16.mxu1 %v10225_v44  ;;  %v10327_v35 = vpop.eup %10326  ;;  %v11305_v24 = vld [vmem:[%s11623_s27 + $0x2f0] sm:$0xff]  ;;  %v12612_v17 = vpop.f32.mrb[49].mxu0  ;;  %vm908_vm6 = vcmp.eq.s32.totalorder %v11822_v7, %v12567_v41  ;;  %v11320_v41 = vld [vmem:[%s11623_s27 + $0x360] sm:$0xff] }
 0x15a   : > { %16618 = vst [vmem:[#allocation32_spill] sm:$0xff] %v12580_v46  ;;  %v10329_v18 = vpop.eup %10328  ;;  %v12595_v19 = vmul.f32 %v10327_v35, %v12383_v16  ;;  %10338 = vpow2.f32 %v8838_v54  ;;  %v12607_v16 = vld [vmem:[%s16525_s3] ss:$0 sm:$0xff]  ;;  %16619 = vst [vmem:[#allocation33_spill] sm:$0xff] %v12612_v17  ;;  %v2975_v35 = vpop.f32.mrb[50].mxu0 }
 0x15b   : > { %v12589_v21 = vpop.permute.xlu0 %590  ;;  %9583 = vmatmul.mubr.msk.bf16.gmra.mrb[68].mxu1 %vm4561_vm4, %v1270_v6  ;;  %v10331_v12 = vpop.eup %10330  ;;  %v4029_v40 = vadd.f32 1.0, %v10329_v18  ;;  %v12610_v61 = vadd.f32 %v12607_v16, %v2971_v32  ;;  %v10221_v6 = vld [vmem:[%s11632_s16 + $0x138] sm:$0xff]   ;;  %v12631_v15 = vadd.f32 %v12607_v16, %v2975_v35  ;;  %v11308_v17 = vld [vmem:[%s11623_s27 + $0x300] sm:$0xff]  ;;  %v8440_v35 = vsel %vm896_vm10, 1.0, %v16606_v1 }
 0x15c   : > { %v12597_v0 = vpop.permute.xlu1 %581  ;;  %782 = vperm.xlu0 %10166, %v11305_v24   ;;  %9586 = vmatprep.mubr.msk.bf16.mxu1 %vm4561_vm4, %v1271_v45  ;;  %v8437_v45 = vsel %vm893_vm7, 1.0, %v16606_v1  ;;  %v4030_v54 = vadd.f32 1.0, %v10331_v12  ;;  %v12633_v12 = vpop.f32.mrb[51].mxu0  ;;  %vm905_vm7 = vcmp.eq.s32.totalorder %v11822_v7, %v12455_v42 }
 0x15d   : > { %773 = vperm.xlu1 %10167, %v11306_v36   ;;  %9711 = vmatpush3.bf16.msra.mxu1 %v10225_v44  ;;  %v8439_v44 = vsel %vm895_vm8, 1.0, %v16606_v1  ;;  %10340 = vrcp.f32 %v4029_v40  ;;  %v8839_v32 = vmul.f32 -1.442695, %v12610_v61  ;;  %16620 = vst [vmem:[#allocation34_spill] sm:$0xff] %v12633_v12  ;;  %v10235_v36 = vld [vmem:[%s16528_s6 + $0x20] sm:$0xff]   ;;  %v1272_v12 = vpack.c.bf16 %v8438_v4, %v8437_v45 }
 0x15e   : > { %9712 = vmatprep.subr.bf16.mxu1 %v10230_v51  ;;  %10342 = vrcp.f32 %v4030_v54  ;;  %v8840_v5 = vmul.f32 -1.442695, %v12631_v15  ;;  %8789 = vmatmul.mubr.msk.bf16.gmra.mrb[156].mxu0 %vm2617_vm1, %v10221_v6  ;;  %v1273_v55 = vpack.c.bf16 %v8440_v35, %v8439_v44  ;;  %v11310_v6 = vld [vmem:[%s11623_s27 + $0x310] sm:$0xff]  ;;  %v8441_v4 = vsel %vm897_vm11, 1.0, %v16606_v1 }
 0x15f   : > { %v12627_v24 = vpop.permute.xlu0 %596  ;;  %10344 = vpow2.f32 %v8839_v32  ;;  %3249 = vmatprep.mubr.bf16.mxu0 %v16609_v38  ;;  %v2981_v45 = vpop.f32.mrb[52].mxu0  ;;  %v10222_v32 = vld [vmem:[%s11632_s16 + $0x140] sm:$0xff]   ;;  %vm907_vm8 = vcmp.eq.s32.totalorder %v11822_v7, %v12484_v20  ;;  %vm910_vm9 = vcmp.eq.s32.totalorder %v11822_v7, %v12597_v0  ;;  %vm909_vm11 = vcmp.eq.s32.totalorder %v11822_v7, %v12519_v10 }
 0x160   : > { %v12642_v18 = vpop.permute.xlu1 %587  ;;  %788 = vperm.xlu0 %10166, %v11308_v17   ;;  %v10333_v40 = vpop.eup %10332  ;;  %10346 = vpow2.f32 %v8840_v5  ;;  %v11311_v5 = vld [vmem:[%s11623_s27 + $0x2f8] sm:$0xff]  ;;  %v12676_v44 = vadd.f32 %v12607_v16, %v2981_v45  ;;  %v8453_v0 = vsel %vm909_vm11, 1.0, %v16606_v1 }
 0x161   : > { %779 = vperm.xlu1 %10167, %v11309_v34   ;;  %v12653_v46 = vmul.f32 %v10333_v40, %v12423_v58  ;;  %9713 = vmatpush3.bf16.msra.mxu1 %v10230_v51  ;;  %v10335_v17 = vpop.eup %10334  ;;  %v8443_v40 = vsel %vm899_vm12, 1.0, %v16606_v1  ;;  %vm912_vm10 = vcmp.eq.s32.totalorder %v11822_v7, %v12642_v18  ;;  %vm911_vm12 = vcmp.eq.s32.totalorder %v11822_v7, %v12558_v30 }
 0x162   : > { %9714 = vmatprep.subr.bf16.mxu1 %v10235_v36  ;;  %v10337_v34 = vpop.eup %10336  ;;  %v12664_v58 = vmul.f32 %v10335_v17, %v12442_v31  ;;  %v12678_v31 = vpop.f32.mrb[53].mxu0 }
 0x163   : > { %16621 = vst [vmem:[#allocation35_spill] sm:$0xff] %v12653_v46  ;;  %v12660_v60 = vpop.permute.xlu0 %602  ;;  %9587 = vmatmul.mubr.msk.bf16.gmra.mrb[72].mxu1 %vm4561_vm4, %v1272_v12  ;;  %v4031_v54 = vadd.f32 1.0, %v10337_v34  ;;  %16622 = vst [vmem:[#allocation36_spill] sm:$0xff] %v12678_v31  ;;  %v2985_v35 = vpop.f32.mrb[54].mxu0 }
 0x164   : > { %v12666_v51 = vpop.permute.xlu1 %593  ;;  %794 = vperm.xlu0 %10166, %v11310_v6   ;;  %9590 = vmatprep.mubr.msk.bf16.mxu1 %vm4561_vm4, %v1273_v55  ;;  %v10339_v12 = vpop.eup %10338  ;;  %v8841_v6 = vmul.f32 -1.442695, %v12676_v44  ;;  %v1274_v55 = vpack.c.bf16 %v8442_v27, %v8441_v4 }
 0x165   : > { %785 = vperm.xlu1 %10167, %v11311_v5   ;;  %9715 = vmatpush3.bf16.msra.mxu1 %v10235_v36  ;;  %10348 = vrcp.f32 %v4031_v54  ;;  %v4032_v34 = vadd.f32 1.0, %v10339_v12  ;;  %v12694_v45 = vpop.f32.mrb[55].mxu0  ;;  %v11312_v5 = vld [vmem:[%s11623_s27 + $0x320] sm:$0xff]  ;;  %v12708_v54 = vadd.f32 %v12607_v16, %v2985_v35  ;;  %vm914_vm13 = vcmp.eq.s32.totalorder %v11822_v7, %v12666_v51 }
 0x166   : > { %16623 = vst [vmem:[#allocation37_spill] sm:$0xff] %v12694_v45  ;;  %v1275_v45 = vpack.c.bf16 %v8444_v43, %v8443_v40  ;;  %8790 = vmatmul.mubr.msk.bf16.gmra.mrb[160].mxu0 %vm2617_vm1, %v10222_v32 }
 0x167   : > { %v12691_v17 = vpop.permute.xlu0 %608  ;;  %v10341_v12 = vpop.eup %10340  ;;  %10350 = vrcp.f32 %v4032_v34  ;;  %v8842_v4 = vmul.f32 -1.442695, %v12708_v54  ;;  %3259 = vmatprep.mubr.bf16.mxu0 %v16609_v38  ;;  %v11314_v34 = vld [vmem:[%s11623_s27 + $0x330] sm:$0xff] }
 0x168   : > { %v12704_v36 = vpop.permute.xlu1 %599  ;;  %800 = vperm.xlu0 %10166, %v11312_v5   ;;  %v10343_v9 = vpop.eup %10342  ;;  %v12717_v5 = vmul.f32 %v10341_v12, %v12471_v62  ;;  %10352 = vpow2.f32 %v8841_v6  ;;  %v11315_v12 = vld [vmem:[%s11623_s27 + $0x318] sm:$0xff] }
 0x169   : > { %791 = vperm.xlu1 %10167, %v11313_v3   ;;  %v10345_v40 = vpop.eup %10344  ;;  %v12726_v32 = vmul.f32 %v10343_v9, %v12490_v13  ;;  %10354 = vpow2.f32 %v8842_v4  ;;  %v2991_v27 = vpop.f32.mrb[56].mxu0  ;;  %v8447_v13 = vsel %vm903_vm15, 1.0, %v16606_v1  ;;  %v10223_v9 = vld [vmem:[%s11632_s16 + $0x148] sm:$0xff]   ;;  %vm916_vm14 = vcmp.eq.s32.totalorder %v11822_v7, %v12704_v36 }
 0x16a   : > { %16624 = vst [vmem:[#allocation38_spill] sm:$0xff] %v12717_v5  ;;  %v4033_v6 = vadd.f32 1.0, %v10345_v40  ;;  %v10347_v43 = vpop.eup %10346  ;;  %v12745_v3 = vadd.f32 %v12607_v16, %v2991_v27  ;;  %v11316_v5 = vld [vmem:[%s11623_s27 + $0x340] sm:$0xff]  ;;  %vm913_vm15 = vcmp.eq.s32.totalorder %v11822_v7, %v12589_v21 }
 0x16b   : > { %16625 = vst [vmem:[#allocation39_spill] sm:$0xff] %v12726_v32  ;;  %v12728_v35 = vpop.permute.xlu0 %614  ;;  %9591 = vmatmul.mubr.msk.bf16.gmra.mrb[76].mxu1 %vm4561_vm4, %v1274_v55  ;;  %v8448_v55 = vsel %vm904_vm0, 1.0, %v16606_v1  ;;  %v4034_v40 = vadd.f32 1.0, %v10347_v43  ;;  %v1276_v32 = vpack.c.bf16 %v8446_v52, %v8445_v48  ;;  %v11318_v48 = vld [vmem:[%s11623_s27 + $0x350] sm:$0xff]  ;;  %vm915_vm0 = vcmp.eq.s32.totalorder %v11822_v7, %v12627_v24 }
 0x16c   : > { %v12731_v62 = vpop.permute.xlu1 %605  ;;  %806 = vperm.xlu0 %10166, %v11314_v34   ;;  %9594 = vmatprep.mubr.msk.bf16.mxu1 %vm4561_vm4, %v1275_v45  ;;  %v12747_v45 = vpop.f32.mrb[57].mxu0  ;;  %10356 = vrcp.f32 %v4033_v6  ;;  %v1277_v39 = vpack.c.bf16 %v8448_v55, %v8447_v13  ;;  %v11317_v6 = vld [vmem:[%s11623_s27 + $0x328] sm:$0xff] }
 0x16d   : > { %797 = vperm.xlu1 %10167, %v11315_v12   ;;  %16626 = vst [vmem:[#allocation40_spill] sm:$0xff] %v12747_v45  ;;  %v2995_v34 = vpop.f32.mrb[58].mxu0  ;;  %v8843_v12 = vmul.f32 -1.442695, %v12745_v3  ;;  %10358 = vrcp.f32 %v4034_v40  ;;  %v11319_v40 = vld [vmem:[%s11623_s27 + $0x338] sm:$0xff]  ;;  %vm918_vm2 = vcmp.eq.s32.totalorder %v11822_v7, %v12731_v62 }
 0x16e   : > { %v12764_v4 = vadd.f32 %v12607_v16, %v2995_v34  ;;  %v12766_v45 = vpop.f32.mrb[59].mxu0  ;;  %8791 = vmatmul.mubr.msk.bf16.gmra.mrb[164].mxu0 %vm2617_vm1, %v10223_v9 }
 0x16f   : > { %v12760_v27 = vpop.permute.xlu0 %620  ;;  %16627 = vst [vmem:[#allocation41_spill] sm:$0xff] %v12766_v45  ;;  %v10349_v29 = vpop.eup %10348  ;;  %10360 = vpow2.f32 %v8843_v12  ;;  %3269 = vmatprep.mubr.bf16.mxu0 %v16609_v38 }
 0x170   : > { %v12768_v31 = vpop.permute.xlu1 %611  ;;  %812 = vperm.xlu0 %10166, %v11316_v5   ;;  %v8844_v43 = vmul.f32 -1.442695, %v12764_v4  ;;  %v12775_v34 = vmul.f32 %v10349_v29, %v12538_v49  ;;  %v3001_v52 = vpop.f32.mrb[60].mxu0 }
 0x171   : > { %803 = vperm.xlu1 %10167, %v11317_v6   ;;  %v10351_v13 = vpop.eup %10350  ;;  %v12801_v29 = vpop.f32.mrb[61].mxu0  ;;  %v10224_v6 = vld [vmem:[%s11632_s16 + $0x150] sm:$0xff]   ;;  %vm920_vm3 = vcmp.eq.s32.totalorder %v11822_v7, %v12768_v31 }
 0x172   : > { %16628 = vst [vmem:[#allocation42_spill] sm:$0xff] %v12775_v34  ;;  %10362 = vpow2.f32 %v8844_v43  ;;  %v10353_v55 = vpop.eup %10352  ;;  %v12786_v49 = vmul.f32 %v10351_v13, %v12571_v37  ;;  %v12799_v37 = vadd.f32 %v12607_v16, %v3001_v52  ;;  %16630 = vst [vmem:[#allocation44_spill] sm:$0xff] %v12801_v29  ;;  %v3005_v13 = vpop.f32.mrb[62].mxu0 }
 0x173   : > { %v12780_v5 = vpop.permute.xlu0 %626  ;;  %9595 = vmatmul.mubr.msk.bf16.gmra.mrb[80].mxu1 %vm4561_vm4, %v1276_v32  ;;  %v10240_v32 = vld [vmem:[%s16528_s6 + $0x28] sm:$0xff]   ;;  %v4035_v12 = vadd.f32 1.0, %v10353_v55  ;;  %v10355_v43 = vpop.eup %10354  ;;  %v8449_v55 = vsel %vm905_vm7, 1.0, %v16606_v1 }
 0x174   : > { %16629 = vst [vmem:[#allocation43_spill] sm:$0xff] %v12786_v49  ;;  %v12788_v9 = vpop.permute.xlu1 %617  ;;  %818 = vperm.xlu0 %10166, %v11318_v48   ;;  %9598 = vmatprep.mubr.msk.bf16.mxu1 %vm4561_vm4, %v1277_v39  ;;  %v8450_v39 = vsel %vm906_vm5, 1.0, %v16606_v1  ;;  %v8452_v48 = vsel %vm908_vm6, 1.0, %v16606_v1  ;;  %v8845_v45 = vmul.f32 -1.442695, %v12799_v37  ;;  %v12819_v29 = vpop.f32.mrb[63].mxu0  ;;  %v12829_v49 = vadd.f32 %v12607_v16, %v3005_v13 }
 0x175   : > { %809 = vperm.xlu1 %10167, %v11319_v40   ;;  %9716 = vmatprep.subr.bf16.mxu1 %v10240_v32  ;;  %10364 = vrcp.f32 %v4035_v12  ;;  %v4036_v40 = vadd.f32 1.0, %v10355_v43  ;;  %16631 = vst [vmem:[#allocation45_spill] sm:$0xff] %v12819_v29  ;;  %v8451_v12 = vsel %vm907_vm8, 1.0, %v16606_v1  ;;  %v1278_v43 = vpack.c.bf16 %v8450_v39, %v8449_v55  ;;  %v11321_v29 = vld [vmem:[%s11623_s27 + $0x348] sm:$0xff] }
 0x176   : > { %9717 = vmatpush3.bf16.msra.mxu1 %v10240_v32  ;;  %v10357_v28 = vpop.eup %10356  ;;  %8792 = vmatmul.mubr.msk.bf16.gmra.mrb[168].mxu0 %vm2617_vm1, %v10224_v6  ;;  %v8846_v13 = vmul.f32 -1.442695, %v12829_v49  ;;  %vm917_vm5 = vcmp.eq.s32.totalorder %v11822_v7, %v12660_v60  ;;  %vm919_vm6 = vcmp.eq.s32.totalorder %v11822_v7, %v12691_v17  ;;  %vm922_vm7 = vcmp.eq.s32.totalorder %v11822_v7, %v12788_v9 }
 0x177   : > { %v12816_v52 = vpop.permute.xlu0 %632  ;;  %v12836_v32 = vmul.f32 %v10357_v28, %v12610_v61  ;;  %10366 = vrcp.f32 %v4036_v40  ;;  %v10359_v42 = vpop.eup %10358  ;;  %3279 = vmatprep.mubr.bf16.mxu0 %v16609_v38  ;;  %v8461_v62 = vsel %vm917_vm5, 1.0, %v16606_v1 }
 0x178   : > { %v12825_v34 = vpop.permute.xlu1 %623  ;;  %824 = vperm.xlu0 %10166, %v11320_v41   ;;  %v1279_v41 = vpack.c.bf16 %v8452_v48, %v8451_v12  ;;  %10368 = vpow2.f32 %v8845_v45  ;;  %v12845_v61 = vmul.f32 %v10359_v42, %v12631_v15  ;;  %v3011_v55 = vpop.f32.mrb[64].mxu0  ;;  %v11323_v15 = vld [vmem:[%s11623_s27 + $0x358] sm:$0xff]  ;;  %v8454_v42 = vsel %vm910_vm9, 1.0, %v16606_v1 }
 0x179   : > { %16632 = vst [vmem:[#allocation46_spill] sm:$0xff] %v12836_v32  ;;  %815 = vperm.xlu1 %10167, %v11321_v29   ;;  %v10361_v20 = vpop.eup %10360  ;;  %v11322_v29 = vld [vmem:[%s11623_s27 + $0x370] sm:$0xff]  ;;  %10370 = vpow2.f32 %v8846_v13  ;;  %v12860_v40 = vadd.f32 %v12607_v16, %v3011_v55  ;;  %v12862_v28 = vpop.f32.mrb[65].mxu0  ;;  %v10226_v12 = vld [vmem:[%s11632_s16 + $0x158] sm:$0xff]   ;;  %v11325_v32 = vld [vmem:[%s11623_s27 + $0x368] sm:$0xff]  ;;  %vm924_vm8 = vcmp.eq.s32.totalorder %v11822_v7, %v12825_v34  ;;  %vm921_vm9 = vcmp.eq.s32.totalorder %v11822_v7, %v12728_v35 }
 0x17a   : > { %16633 = vst [vmem:[#allocation47_spill] sm:$0xff] %v12845_v61  ;;  %v4037_v6 = vadd.f32 1.0, %v10361_v20  ;;  %16634 = vst [vmem:[#allocation48_spill] sm:$0xff] %v12862_v28  ;;  %v3015_v13 = vpop.f32.mrb[66].mxu0  ;;  %v8456_v20 = vsel %vm912_vm10, 1.0, %v16606_v1  ;;  %v8455_v28 = vsel %vm911_vm12, 1.0, %v16606_v1  ;;  %vm923_vm10 = vcmp.eq.s32.totalorder %v11822_v7, %v12760_v27 }
 0x17b   : > { %v12847_v39 = vpop.permute.xlu0 %638  ;;  %9599 = vmatmul.mubr.msk.bf16.gmra.mrb[84].mxu1 %vm4561_vm4, %v1278_v43  ;;  %v8847_v55 = vmul.f32 -1.442695, %v12860_v40  ;;  %v12883_v43 = vpop.f32.mrb[67].mxu0  ;;  %v1281_v10 = vpack.c.bf16 %v8456_v20, %v8455_v28  ;;  %v11327_v20 = vld [vmem:[%s11623_s27 + $0x378] sm:$0xff]  ;;  %v11336_v34 = vld [vmem:[%s11623_s27 + $0x3e0] sm:$0xff] }
 0x17c   : > { %v12852_v45 = vpop.permute.xlu1 %629  ;;  %830 = vperm.xlu0 %10166, %v11322_v29   ;;  %9602 = vmatprep.mubr.msk.bf16.mxu1 %vm4561_vm4, %v1279_v41  ;;  %v10363_v48 = vpop.eup %10362  ;;  %10372 = vrcp.f32 %v4037_v6  ;;  %16635 = vst [vmem:[#allocation49_spill] sm:$0xff] %v12883_v43 }
 0x17d   : > { %821 = vperm.xlu1 %10167, %v11323_v15   ;;  %v4038_v41 = vadd.f32 1.0, %v10363_v48  ;;  %v12881_v15 = vadd.f32 %v12607_v16, %v3015_v13  ;;  %v11324_v48 = vld [vmem:[%s11623_s27 + $0x380] sm:$0xff]  ;;  %v1280_v13 = vpack.c.bf16 %v8454_v42, %v8453_v0  ;;  %vm926_vm11 = vcmp.eq.s32.totalorder %v11822_v7, %v12852_v45 }
 0x17e   : > { %8793 = vmatmul.mubr.msk.bf16.gmra.mrb[172].mxu0 %vm2617_vm1, %v10226_v12  ;;  %v11326_v12 = vld [vmem:[%s11623_s27 + $0x390] sm:$0xff] }
 0x17f   : > { %v12877_v29 = vpop.permute.xlu0 %644  ;;  %10374 = vrcp.f32 %v4038_v41  ;;  %v10365_v18 = vpop.eup %10364  ;;  %v8848_v43 = vmul.f32 -1.442695, %v12881_v15  ;;  %3289 = vmatprep.mubr.bf16.mxu0 %v16609_v38 }
 0x180   : > { %v12889_v6 = vpop.permute.xlu1 %635  ;;  %836 = vperm.xlu0 %10166, %v11324_v48   ;;  %10376 = vpow2.f32 %v8847_v55  ;;  %v12900_v61 = vmul.f32 %v10365_v18, %v12676_v44  ;;  %v3021_v42 = vpop.f32.mrb[68].mxu0  ;;  %v8458_v18 = vsel %vm914_vm13, 1.0, %v16606_v1  ;;  %vm925_vm13 = vcmp.eq.s32.totalorder %v11822_v7, %v12780_v5 }
 0x181   : > { %827 = vperm.xlu1 %10167, %v11325_v32   ;;  %v10367_v41 = vpop.eup %10366  ;;  %10378 = vpow2.f32 %v8848_v43  ;;  %v12921_v55 = vadd.f32 %v12607_v16, %v3021_v42  ;;  %v12923_v0 = vpop.f32.mrb[69].mxu0  ;;  %vm928_vm12 = vcmp.eq.s32.totalorder %v11822_v7, %v12889_v6  ;;  %v8469_v45 = vsel %vm925_vm13, 1.0, %v16606_v1 }
 0x182   : > { %16636 = vst [vmem:[#allocation50_spill] sm:$0xff] %v12900_v61  ;;  %v10369_v32 = vpop.eup %10368  ;;  %v12911_v44 = vmul.f32 %v10367_v41, %v12708_v54  ;;  %16638 = vst [vmem:[#allocation52_spill] sm:$0xff] %v12923_v0  ;;  %v10227_v54 = vld [vmem:[%s11632_s16 + $0x160] sm:$0xff]   ;;  %v8460_v41 = vsel %vm916_vm14, 1.0, %v16606_v1  ;;  %vm927_vm14 = vcmp.eq.s32.totalorder %v11822_v7, %v12816_v52  ;;  %v16652_v6 = vmov 1  }
 0x183   : > { %v12905_v30 = vpop.permute.xlu0 %650  ;;  %9603 = vmatmul.mubr.msk.bf16.gmra.mrb[88].mxu1 %vm4561_vm4, %v1280_v13  ;;  %v4039_v43 = vadd.f32 1.0, %v10369_v32  ;;  %v10371_v48 = vpop.eup %10370  ;;  %v8849_v42 = vmul.f32 -1.442695, %v12921_v55  ;;  %v11328_v61 = vld [vmem:[%s11623_s27 + $0x3a0] sm:$0xff] }
 0x184   : > { %16637 = vst [vmem:[#allocation51_spill] sm:$0xff] %v12911_v44  ;;  %v12913_v28 = vpop.permute.xlu1 %641  ;;  %842 = vperm.xlu0 %10166, %v11326_v12   ;;  %9606 = vmatprep.mubr.msk.bf16.mxu1 %vm4561_vm4, %v1281_v10  ;;  %v3025_v13 = vpop.f32.mrb[70].mxu0  ;;  %v4040_v12 = vadd.f32 1.0, %v10371_v48  ;;  %v8457_v10 = vsel %vm913_vm15, 1.0, %v16606_v1  ;;  %v11329_v44 = vld [vmem:[%s11623_s27 + $0x388] sm:$0xff] }
 0x185   : > { %833 = vperm.xlu1 %10167, %v11327_v20   ;;  %10380 = vrcp.f32 %v4039_v43  ;;  %v12941_v20 = vpop.f32.mrb[71].mxu0  ;;  %v12951_v36 = vadd.f32 %v12607_v16, %v3025_v13  ;;  %v8459_v43 = vsel %vm915_vm0, 1.0, %v16606_v1  ;;  %v1282_v48 = vpack.c.bf16 %v8458_v18, %v8457_v10 }
 0x186   : > { %16639 = vst [vmem:[#allocation53_spill] sm:$0xff] %v12941_v20  ;;  %v10373_v51 = vpop.eup %10372  ;;  %10382 = vrcp.f32 %v4040_v12  ;;  %8794 = vmatmul.mubr.msk.bf16.gmra.mrb[176].mxu0 %vm2617_vm1, %v10227_v54  ;;  %v11330_v54 = vld [vmem:[%s11623_s27 + $0x3b0] sm:$0xff]  ;;  %vm930_vm15 = vcmp.eq.s32.totalorder %v11822_v7, %v12913_v28 }
 0x187   : > { %v12938_v32 = vpop.permute.xlu0 %656  ;;  %v12958_v20 = vmul.f32 %v10373_v51, %v12745_v3  ;;  %10384 = vpow2.f32 %v8849_v42  ;;  %v8850_v13 = vmul.f32 -1.442695, %v12951_v36  ;;  %3299 = vmatprep.mubr.bf16.mxu0 %v16609_v38 }
 0x188   : > { %v12947_v0 = vpop.permute.xlu1 %647  ;;  %848 = vperm.xlu0 %10166, %v11328_v61   ;;  %v1283_v61 = vpack.c.bf16 %v8460_v41, %v8459_v43  ;;  %v3031_v41 = vpop.f32.mrb[72].mxu0  ;;  %v10228_v43 = vld [vmem:[%s11632_s16 + $0x168] sm:$0xff]  }
 0x189   : > { %16640 = vst [vmem:[#allocation54_spill] sm:$0xff] %v12958_v20  ;;  %839 = vperm.xlu1 %10167, %v11329_v44   ;;  %v10375_v21 = vpop.eup %10374  ;;  %10386 = vpow2.f32 %v8850_v13  ;;  %v12982_v42 = vadd.f32 %v12607_v16, %v3031_v41  ;;  %v12984_v51 = vpop.f32.mrb[73].mxu0  ;;  %v11333_v20 = vld [vmem:[%s11623_s27 + $0x3a8] sm:$0xff]  ;;  %vm932_vm0 = vcmp.eq.s32.totalorder %v11822_v7, %v12947_v0 }
 0x18a   : > { %v10377_v24 = vpop.eup %10376  ;;  %v12967_v3 = vmul.f32 %v10375_v21, %v12764_v4  ;;  %v11331_v4 = vld [vmem:[%s11623_s27 + $0x398] sm:$0xff]  ;;  %16642 = vst [vmem:[#allocation56_spill] sm:$0xff] %v12984_v51  ;;  %v8462_v21 = vsel %vm918_vm2, 1.0, %v16606_v1  ;;  %v3035_v13 = vpop.f32.mrb[74].mxu0  ;;  %v8463_v51 = vsel %vm919_vm6, 1.0, %v16606_v1  ;;  %vm929_vm2 = vcmp.eq.s32.totalorder %v11822_v7, %v12847_v39 }
 0x18b   : > { %v12969_v18 = vpop.permute.xlu0 %662  ;;  %9607 = vmatmul.mubr.msk.bf16.gmra.mrb[92].mxu1 %vm4561_vm4, %v1282_v48  ;;  %v4041_v10 = vadd.f32 1.0, %v10377_v24  ;;  %v10379_v12 = vpop.eup %10378  ;;  %v8464_v24 = vsel %vm920_vm3, 1.0, %v16606_v1  ;;  %v8851_v41 = vmul.f32 -1.442695, %v12982_v42  ;;  %vm931_vm3 = vcmp.eq.s32.totalorder %v11822_v7, %v12877_v29 }
 0x18c   : > { %16641 = vst [vmem:[#allocation55_spill] sm:$0xff] %v12967_v3  ;;  %v12974_v44 = vpop.permute.xlu1 %653  ;;  %854 = vperm.xlu0 %10166, %v11330_v54   ;;  %9610 = vmatprep.mubr.msk.bf16.mxu1 %vm4561_vm4, %v1283_v61  ;;  %v4042_v61 = vadd.f32 1.0, %v10379_v12  ;;  %v13005_v48 = vpop.f32.mrb[75].mxu0  ;;  %v11332_v12 = vld [vmem:[%s11623_s27 + $0x3c0] sm:$0xff]  ;;  %v1285_v60 = vpack.c.bf16 %v8464_v24, %v8463_v51  ;;  %v10245_v24 = vld [vmem:[%s16528_s6 + $0x30] sm:$0xff]  }
 0x18d   : > { %845 = vperm.xlu1 %10167, %v11331_v4   ;;  %10388 = vrcp.f32 %v4041_v10  ;;  %v13003_v4 = vadd.f32 %v12607_v16, %v3035_v13  ;;  %16643 = vst [vmem:[#allocation57_spill] sm:$0xff] %v13005_v48  ;;  %v1284_v13 = vpack.c.bf16 %v8462_v21, %v8461_v62  ;;  %9718 = vmatprep.subr.bf16.mxu1 %v10245_v24 }
 0x18e   : > { %10390 = vrcp.f32 %v4042_v61  ;;  %8795 = vmatmul.mubr.msk.bf16.gmra.mrb[180].mxu0 %vm2617_vm1, %v10228_v43  ;;  %v11334_v43 = vld [vmem:[%s11623_s27 + $0x3d0] sm:$0xff]  ;;  %9719 = vmatpush3.bf16.msra.mxu1 %v10245_v24  ;;  %vm934_vm5 = vcmp.eq.s32.totalorder %v11822_v7, %v12974_v44 }
 0x18f   : > { %v12999_v54 = vpop.permute.xlu0 %668  ;;  %v10381_v31 = vpop.eup %10380  ;;  %10392 = vpow2.f32 %v8851_v41  ;;  %v8852_v48 = vmul.f32 -1.442695, %v13003_v4  ;;  %3309 = vmatprep.mubr.bf16.mxu0 %v16609_v38 }
 0x190   : > { %v13011_v10 = vpop.permute.xlu1 %659  ;;  %860 = vperm.xlu0 %10166, %v11332_v12   ;;  %v13022_v3 = vmul.f32 %v10381_v31, %v12799_v37  ;;  %v10383_v61 = vpop.eup %10382  ;;  %v10229_v12 = vld [vmem:[%s11632_s16 + $0x170] sm:$0xff]  }
 0x191   : > { %851 = vperm.xlu1 %10167, %v11333_v20   ;;  %10394 = vpow2.f32 %v8852_v48  ;;  %v10385_v20 = vpop.eup %10384  ;;  %v13033_v37 = vmul.f32 %v10383_v61, %v12829_v49  ;;  %v3041_v21 = vpop.f32.mrb[76].mxu0  ;;  %v11335_v48 = vld [vmem:[%s11623_s27 + $0x3b8] sm:$0xff]  ;;  %v8465_v61 = vsel %vm921_vm9, 1.0, %v16606_v1  ;;  %vm936_vm6 = vcmp.eq.s32.totalorder %v11822_v7, %v13011_v10 }
 0x192   : > { %16644 = vst [vmem:[#allocation58_spill] sm:$0xff] %v13022_v3  ;;  %v4043_v41 = vadd.f32 1.0, %v10385_v20  ;;  %v13046_v49 = vadd.f32 %v12607_v16, %v3041_v21  ;;  %v13048_v62 = vpop.f32.mrb[77].mxu0  ;;  %v8468_v20 = vsel %vm924_vm8, 1.0, %v16606_v1  ;;  %vm935_vm8 = vcmp.eq.s32.totalorder %v11822_v7, %v12938_v32 }
 0x193   : > { %v13027_v17 = vpop.permute.xlu0 %674  ;;  %9611 = vmatmul.mubr.msk.bf16.gmra.mrb[96].mxu1 %vm4561_vm4, %v1284_v13  ;;  %16645 = vst [vmem:[#allocation59_spill] sm:$0xff] %v13033_v37  ;;  %16646 = vst [vmem:[#allocation60_spill] sm:$0xff] %v13048_v62  ;;  %v10387_v31 = vpop.eup %10386  ;;  %v8466_v13 = vsel %vm922_vm7, 1.0, %v16606_v1  ;;  %vm933_vm7 = vcmp.eq.s32.totalorder %v11822_v7, %v12905_v30 }
 0x194   : > { %v13035_v51 = vpop.permute.xlu1 %665  ;;  %866 = vperm.xlu0 %10166, %v11334_v43   ;;  %9614 = vmatprep.mubr.msk.bf16.mxu1 %vm4561_vm4, %v1285_v60  ;;  %v3045_v60 = vpop.f32.mrb[78].mxu0  ;;  %10396 = vrcp.f32 %v4043_v41  ;;  %v4044_v21 = vadd.f32 1.0, %v10387_v31  ;;  %v8467_v41 = vsel %vm923_vm10, 1.0, %v16606_v1  ;;  %v1286_v31 = vpack.c.bf16 %v8466_v13, %v8465_v61 }
 0x195   : > { %857 = vperm.xlu1 %10167, %v11335_v48   ;;  %v8853_v48 = vmul.f32 -1.442695, %v13046_v49  ;;  %v13066_v62 = vpop.f32.mrb[79].mxu0  ;;  %v13076_v37 = vadd.f32 %v12607_v16, %v3045_v60  ;;  %vm938_vm9 = vcmp.eq.s32.totalorder %v11822_v7, %v13035_v51 }
 0x196   : > { %16647 = vst [vmem:[#allocation61_spill] sm:$0xff] %v13066_v62  ;;  %v11337_v62 = vld [vmem:[%s11623_s27 + $0x3c8] sm:$0xff]  ;;  %10398 = vrcp.f32 %v4044_v21  ;;  %8796 = vmatmul.mubr.msk.bf16.gmra.mrb[184].mxu0 %vm2617_vm1, %v10229_v12  ;;  %v11338_v12 = vld [vmem:[%s11623_s27 + $0x3f0] sm:$0xff] }
 0x197   : > { %v13063_v43 = vpop.permute.xlu0 %680  ;;  %v10389_v9 = vpop.eup %10388  ;;  %10400 = vpow2.f32 %v8853_v48  ;;  %v8854_v60 = vmul.f32 -1.442695, %v13076_v37  ;;  %3319 = vmatprep.mubr.bf16.mxu0 %v16609_v38 }
 0x198   : > { %v13072_v3 = vpop.permute.xlu1 %671  ;;  %872 = vperm.xlu0 %10166, %v11336_v34   ;;  %v13083_v24 = vmul.f32 %v10389_v9, %v12860_v40  ;;  %v10391_v35 = vpop.eup %10390  ;;  %v1287_v34 = vpack.c.bf16 %v8468_v20, %v8467_v41  ;;  %v10231_v41 = vld [vmem:[%s11632_s16 + $0x178] sm:$0xff]  }
 0x199   : > { %863 = vperm.xlu1 %10167, %v11337_v62   ;;  %v10393_v27 = vpop.eup %10392  ;;  %v13092_v40 = vmul.f32 %v10391_v35, %v12881_v15  ;;  %10402 = vpow2.f32 %v8854_v60  ;;  %v3051_v20 = vpop.f32.mrb[80].mxu0  ;;  %v11339_v15 = vld [vmem:[%s11623_s27 + $0x3d8] sm:$0xff]  ;;  %v8470_v35 = vsel %vm926_vm11, 1.0, %v16606_v1  ;;  %vm940_vm10 = vcmp.eq.s32.totalorder %v11822_v7, %v13072_v3 }
 0x19a   : > { %16648 = vst [vmem:[#allocation62_spill] sm:$0xff] %v13083_v24  ;;  %v4045_v61 = vadd.f32 1.0, %v10393_v27  ;;  %v13107_v48 = vadd.f32 %v12607_v16, %v3051_v20  ;;  %v13109_v9 = vpop.f32.mrb[81].mxu0  ;;  %v8472_v27 = vsel %vm928_vm12, 1.0, %v16606_v1  ;;  %v11340_v24 = vld [vmem:[%s11623_s27 + $0x3e8] sm:$0xff]  ;;  %vm937_vm11 = vcmp.eq.s32.totalorder %v11822_v7, %v12969_v18 }
 0x19b   : > { %16649 = vst [vmem:[#allocation63_spill] sm:$0xff] %v13092_v40  ;;  %v13094_v13 = vpop.permute.xlu0 %686  ;;  %9615 = vmatmul.mubr.msk.bf16.gmra.mrb[100].mxu1 %vm4561_vm4, %v1286_v31  ;;  %v10395_v21 = vpop.eup %10394  ;;  %16650 = vst [vmem:[#allocation64_spill] sm:$0xff] %v13109_v9  ;;  %v8471_v31 = vsel %vm927_vm14, 1.0, %v16606_v1  ;;  %v1288_v9 = vpack.c.bf16 %v8470_v35, %v8469_v45  ;;  %vm939_vm12 = vcmp.eq.s32.totalorder %v11822_v7, %v12999_v54 }
 0x19c   : > { %v13099_v62 = vpop.permute.xlu1 %677  ;;  %878 = vperm.xlu0 %10166, %v11338_v12   ;;  %9618 = vmatprep.mubr.msk.bf16.mxu1 %vm4561_vm4, %v1287_v34  ;;  %10404 = vrcp.f32 %v4045_v61  ;;  %v4046_v34 = vadd.f32 1.0, %v10395_v21  ;;  %v3055_v60 = vpop.f32.mrb[82].mxu0  ;;  %v8855_v20 = vmul.f32 -1.442695, %v13107_v48 }
 0x19d   : > { %869 = vperm.xlu1 %10167, %v11339_v15   ;;  %v13128_v52 = vadd.f32 %v12607_v16, %v3055_v60  ;;  %v13130_v15 = vpop.f32.mrb[83].mxu0  ;;  %vm942_vm13 = vcmp.eq.s32.totalorder %v11822_v7, %v13099_v62 }
 0x19e   : > { %16651 = vst [vmem:[#allocation65_spill] sm:$0xff] %v13130_v15  ;;  %10406 = vrcp.f32 %v4046_v34  ;;  %v10397_v21 = vpop.eup %10396  ;;  %8797 = vmatmul.mubr.msk.bf16.gmra.mrb[188].mxu0 %vm2617_vm1, %v10231_v41  ;;  %v1289_v15 = vpack.c.bf16 %v8472_v27, %v8471_v31  ;;  %v11341_v34 = vld [vmem:[%s11623_s27] sm:$0xff]  ;;  %v11342_v27 = vld [vmem:[%s11623_s27 + $0x3f8] sm:$0xff] }
 0x19f   : > { %v13124_v12 = vpop.permute.xlu0 %692  ;;  %10408 = vpow2.f32 %v8855_v20  ;;  %v8856_v60 = vmul.f32 -1.442695, %v13128_v52  ;;  %v13144_v5 = vmul.f32 %v10397_v21, %v12921_v55  ;;  %3329 = vmatprep.mubr.bf16.mxu0 %v16609_v38  ;;  %v10232_v21 = vld [vmem:[%s11632_s16 + $0x180] sm:$0xff]  }
 0x1a0   : > { %v13136_v61 = vpop.permute.xlu1 %683  ;;  %10168 = vset.pattern.permute.xlu0 %v16652_v6  ;;  %v10399_v40 = vpop.eup %10398 }
 0x1a1   : > { %875 = vperm.xlu1 %10167, %v11340_v24   ;;  %16653 = vst [vmem:[#allocation66_spill] sm:$0xff] %v13144_v5  ;;  %1332 = vperm.xlu0 %10168, %v11341_v34   ;;  %10410 = vpow2.f32 %v8856_v60  ;;  %v10401_v41 = vpop.eup %10400  ;;  %v13156_v55 = vmul.f32 %v10399_v40, %v12951_v36  ;;  %v3061_v35 = vpop.f32.mrb[84].mxu0  ;;  %v8474_v36 = vsel %vm930_vm15, 1.0, %v16606_v1  ;;  %vm944_vm14 = vcmp.eq.s32.totalorder %v11822_v7, %v13136_v61 }
 0x1a2   : > { %v13165_v20 = vadd.f32 %v12607_v16, %v3061_v35  ;;  %v13167_v45 = vpop.f32.mrb[85].mxu0  ;;  %vm941_vm15 = vcmp.eq.s32.totalorder %v11822_v7, %v13027_v17 }
 0x1a3   : > { %v13150_v24 = vpop.permute.xlu0 %698  ;;  %9619 = vmatmul.mubr.msk.bf16.gmra.mrb[104].mxu1 %vm4561_vm4, %v1288_v9  ;;  %16654 = vst [vmem:[#allocation67_spill] sm:$0xff] %v13156_v55  ;;  %v4047_v9 = vadd.f32 1.0, %v10401_v41  ;;  %16655 = vst [vmem:[#allocation68_spill] sm:$0xff] %v13167_v45  ;;  %v10403_v60 = vpop.eup %10402  ;;  %v8476_v41 = vsel %vm932_vm0, 1.0, %v16606_v1  ;;  %v11344_v55 = vld [vmem:[%s11623_s27 + $0x8] sm:$0xff]  ;;  %vm943_vm0 = vcmp.eq.s32.totalorder %v11822_v7, %v13063_v43 }
 0x1a4   : > { %v13158_v31 = vpop.permute.xlu1 %689  ;;  %9622 = vmatprep.mubr.msk.bf16.mxu1 %vm4561_vm4, %v1289_v15  ;;  %v3065_v40 = vpop.f32.mrb[86].mxu0  ;;  %v11343_v15 = vld [vmem:[%s11623_s27 + $0x18] sm:$0xff]  ;;  %v8857_v45 = vmul.f32 -1.442695, %v13165_v20 }
 0x1a5   : > { %881 = vperm.xlu1 %10167, %v11342_v27   ;;  %1341 = vperm.xlu0 %10168, %v11343_v15   ;;  %10412 = vrcp.f32 %v4047_v9  ;;  %v4048_v27 = vadd.f32 1.0, %v10403_v60  ;;  %v13186_v46 = vpop.f32.mrb[87].mxu0  ;;  %v8473_v15 = vsel %vm929_vm2, 1.0, %v16606_v1  ;;  %v13195_v0 = vadd.f32 %v12607_v16, %v3065_v40 }
 0x1a6   : > { %16656 = vst [vmem:[#allocation69_spill] sm:$0xff] %v13186_v46  ;;  %v10405_v28 = vpop.eup %10404  ;;  %v8475_v9 = vsel %vm931_vm3, 1.0, %v16606_v1  ;;  %v1290_v60 = vpack.c.bf16 %v8474_v36, %v8473_v15  ;;  %8798 = vmatmul.mubr.msk.bf16.gmra.mrb[192].mxu0 %vm2617_vm1, %v10232_v21  ;;  %vm946_vm2 = vcmp.eq.s32.totalorder %v11822_v7, %v13158_v31  ;;  %v11360_v31 = vld [vmem:[%s11623_s27 + $0x98] sm:$0xff] }
 0x1a7   : > { %v13183_v35 = vpop.permute.xlu0 %704  ;;  %v13202_v46 = vmul.f32 %v10405_v28, %v12982_v42  ;;  %10414 = vrcp.f32 %v4048_v27  ;;  %v1291_v5 = vpack.c.bf16 %v8476_v41, %v8475_v9  ;;  %v8858_v40 = vmul.f32 -1.442695, %v13195_v0  ;;  %3339 = vmatprep.mubr.bf16.mxu0 %v16609_v38  ;;  %v10233_v28 = vld [vmem:[%s11632_s16 + $0x188] sm:$0xff]  }
 0x1a8   : > { %v13192_v34 = vpop.permute.xlu1 %695  ;;  %v10407_v39 = vpop.eup %10406  ;;  %10416 = vpow2.f32 %v8857_v45 }
 0x1a9   : > { %16657 = vst [vmem:[#allocation70_spill] sm:$0xff] %v13202_v46  ;;  %10169 = vset.pattern.permute.xlu1 %v16652_v6  ;;  %v10409_v29 = vpop.eup %10408  ;;  %v13212_v42 = vmul.f32 %v10407_v39, %v13003_v4  ;;  %v11345_v6 = vld [vmem:[%s11623_s27 + $0x28] sm:$0xff]  ;;  %10418 = vpow2.f32 %v8858_v40  ;;  %v3071_v36 = vpop.f32.mrb[88].mxu0  ;;  %v11346_v39 = vld [vmem:[%s11623_s27 + $0x10] sm:$0xff]  ;;  %v8480_v40 = vsel %vm936_vm6, 1.0, %v16606_v1  ;;  %v11351_v46 = vld [vmem:[%s11623_s27 + $0x58] sm:$0xff]  ;;  %vm948_vm3 = vcmp.eq.s32.totalorder %v11822_v7, %v13192_v34 }
 0x1aa   : > { %1335 = vperm.xlu1 %10169, %v11344_v55   ;;  %1347 = vperm.xlu0 %10168, %v11345_v6   ;;  %v4049_v55 = vadd.f32 1.0, %v10409_v29  ;;  %v13226_v4 = vadd.f32 %v12607_v16, %v3071_v36  ;;  %v13228_v27 = vpop.f32.mrb[89].mxu0  ;;  %vm947_vm6 = vcmp.eq.s32.totalorder %v11822_v7, %v13124_v12 }
 0x1ab   : > { %16658 = vst [vmem:[#allocation71_spill] sm:$0xff] %v13212_v42  ;;  %v13214_v21 = vpop.permute.xlu0 %710  ;;  %9623 = vmatmul.mubr.msk.bf16.gmra.mrb[108].mxu1 %vm4561_vm4, %v1290_v60  ;;  %v10411_v41 = vpop.eup %10410  ;;  %16659 = vst [vmem:[#allocation72_spill] sm:$0xff] %v13228_v27 }
 0x1ac   : > { %v13220_v45 = vpop.permute.xlu1 %701  ;;  %9626 = vmatprep.mubr.msk.bf16.mxu1 %vm4561_vm4, %v1291_v5  ;;  %v8478_v5 = vsel %vm934_vm5, 1.0, %v16606_v1  ;;  %10420 = vrcp.f32 %v4049_v55  ;;  %v4050_v9 = vadd.f32 1.0, %v10411_v41  ;;  %v3075_v60 = vpop.f32.mrb[90].mxu0  ;;  %v8859_v6 = vmul.f32 -1.442695, %v13226_v4  ;;  %v11347_v55 = vld [vmem:[%s11623_s27 + $0x38] sm:$0xff] }
 0x1ad   : > { %v13248_v36 = vadd.f32 %v12607_v16, %v3075_v60  ;;  %v13250_v44 = vpop.f32.mrb[91].mxu0  ;;  %v8477_v41 = vsel %vm933_vm7, 1.0, %v16606_v1  ;;  %v8479_v60 = vsel %vm935_vm8, 1.0, %v16606_v1  ;;  %vm945_vm5 = vcmp.eq.s32.totalorder %v11822_v7, %v13094_v13 }
 0x1ae   : > { %1338 = vperm.xlu1 %10169, %v11346_v39   ;;  %16660 = vst [vmem:[#allocation73_spill] sm:$0xff] %v13250_v44  ;;  %1353 = vperm.xlu0 %10168, %v11347_v55   ;;  %10422 = vrcp.f32 %v4050_v9  ;;  %v1292_v15 = vpack.c.bf16 %v8478_v5, %v8477_v41  ;;  %v1293_v55 = vpack.c.bf16 %v8480_v40, %v8479_v60  ;;  %v11348_v9 = vld [vmem:[%s11623_s27 + $0x20] sm:$0xff]  ;;  %v11349_v5 = vld [vmem:[%s11623_s27 + $0x48] sm:$0xff]  ;;  %v8482_v60 = vsel %vm938_vm9, 1.0, %v16606_v1 }
 0x1af   : > { %v13244_v29 = vpop.permute.xlu0 %716  ;;  %v10413_v10 = vpop.eup %10412  ;;  %10424 = vpow2.f32 %v8859_v6  ;;  %v8860_v44 = vmul.f32 -1.442695, %v13248_v36  ;;  %8799 = vmatmul.mubr.msk.bf16.gmra.mrb[196].mxu0 %vm2617_vm1, %v10233_v28  ;;  %vm950_vm7 = vcmp.eq.s32.totalorder %v11822_v7, %v13220_v45  ;;  %vm949_vm9 = vcmp.eq.s32.totalorder %v11822_v7, %v13150_v24 }
 0x1b0   : > { %v13257_v39 = vpop.permute.xlu1 %707  ;;  %v13266_v30 = vmul.f32 %v10413_v10, %v13046_v49  ;;  %3349 = vmatprep.mubr.bf16.mxu0 %v16609_v38 }
 0x1b1   : > { %v10415_v27 = vpop.eup %10414  ;;  %10426 = vpow2.f32 %v8860_v44  ;;  %v3081_v6 = vpop.f32.mrb[92].mxu0  ;;  %vm952_vm8 = vcmp.eq.s32.totalorder %v11822_v7, %v13257_v39 }
 0x1b2   : > { %16661 = vst [vmem:[#allocation74_spill] sm:$0xff] %v13266_v30  ;;  %1344 = vperm.xlu1 %10169, %v11348_v9   ;;  %1359 = vperm.xlu0 %10168, %v11349_v5   ;;  %v10417_v28 = vpop.eup %10416  ;;  %v13279_v49 = vmul.f32 %v10415_v27, %v13076_v37  ;;  %v13290_v41 = vadd.f32 %v12607_v16, %v3081_v6  ;;  %v13292_v10 = vpop.f32.mrb[93].mxu0  ;;  %v10234_v37 = vld [vmem:[%s11632_s16 + $0x190] sm:$0xff]   ;;  %v8484_v5 = vsel %vm940_vm10, 1.0, %v16606_v1  ;;  %v8481_v16 = vsel %vm937_vm11, 1.0, %v16606_v1 }
 0x1b3   : > { %v13272_v32 = vpop.permute.xlu0 %722  ;;  %9627 = vmatmul.mubr.msk.bf16.gmra.mrb[112].mxu1 %vm4561_vm4, %v1292_v15  ;;  %v10250_v15 = vld [vmem:[%s16528_s6 + $0x38] sm:$0xff]   ;;  %v4051_v44 = vadd.f32 1.0, %v10417_v28  ;;  %16663 = vst [vmem:[#allocation76_spill] sm:$0xff] %v13292_v10  ;;  %v10419_v27 = vpop.eup %10418  ;;  %v11350_v9 = vld [vmem:[%s11623_s27 + $0x30] sm:$0xff]  ;;  %vm951_vm10 = vcmp.eq.s32.totalorder %v11822_v7, %v13183_v35 }
 0x1b4   : > { %16662 = vst [vmem:[#allocation75_spill] sm:$0xff] %v13279_v49  ;;  %v13281_v40 = vpop.permute.xlu1 %713  ;;  %9630 = vmatprep.mubr.msk.bf16.mxu1 %vm4561_vm4, %v1293_v55  ;;  %v3085_v55 = vpop.f32.mrb[94].mxu0  ;;  %9720 = vmatprep.subr.bf16.mxu1 %v10250_v15  ;;  %v4052_v6 = vadd.f32 1.0, %v10419_v27  ;;  %v8861_v10 = vmul.f32 -1.442695, %v13290_v41 }
 0x1b5   : > { %10428 = vrcp.f32 %v4051_v44  ;;  %v13311_v51 = vpop.f32.mrb[95].mxu0  ;;  %9721 = vmatpush3.bf16.msra.mxu1 %v10250_v15  ;;  %v13323_v44 = vld [vmem:[%s16525_s3] ss:$0 sm:$0xff]  ;;  %v1294_v15 = vpack.c.bf16 %v8482_v60, %v8481_v16  ;;  %vm954_vm11 = vcmp.eq.s32.totalorder %v11822_v7, %v13281_v40  ;;  %v11368_v40 = vld [vmem:[%s11623_s27 + $0xd8] sm:$0xff] }
 0x1b6   : > { %1350 = vperm.xlu1 %10169, %v11350_v9   ;;  %16664 = vst [vmem:[#allocation77_spill] sm:$0xff] %v13311_v51  ;;  %1365 = vperm.xlu0 %10168, %v11351_v46   ;;  %v10421_v9 = vpop.eup %10420  ;;  %v13326_v27 = vadd.f32 %v13323_v44, %v3085_v55  ;;  %v8483_v46 = vsel %vm939_vm12, 1.0, %v16606_v1  ;;  %10430 = vrcp.f32 %v4052_v6  ;;  %v11353_v55 = vld [vmem:[%s11623_s27 + $0x40] sm:$0xff] }
 0x1b7   : > { %v13308_v28 = vpop.permute.xlu0 %728  ;;  %v13333_v18 = vmul.f32 %v10421_v9, %v13107_v48  ;;  %8800 = vmatmul.mubr.msk.bf16.gmra.mrb[200].mxu0 %vm2617_vm1, %v10234_v37  ;;  %v1295_v30 = vpack.c.bf16 %v8484_v5, %v8483_v46  ;;  %10432 = vpow2.f32 %v8861_v10  ;;  %v11354_v37 = vld [vmem:[%s11623_s27 + $0x68] sm:$0xff]  ;;  %v11355_v46 = vld [vmem:[%s11623_s27 + $0x50] sm:$0xff] }
 0x1b8   : > { %v13318_v3 = vpop.permute.xlu1 %719  ;;  %v10423_v51 = vpop.eup %10422  ;;  %v8862_v49 = vmul.f32 -1.442695, %v13326_v27  ;;  %3359 = vmatprep.mubr.bf16.mxu0 %v16609_v38 }
 0x1b9   : > { %16665 = vst [vmem:[#allocation78_spill] sm:$0xff] %v13333_v18  ;;  %v10425_v42 = vpop.eup %10424  ;;  %v13342_v54 = vmul.f32 %v10423_v51, %v13128_v52  ;;  %v3091_v16 = vpop.f32.mrb[96].mxu0  ;;  %v10236_v51 = vld [vmem:[%s11632_s16 + $0x198] sm:$0xff]   ;;  %vm956_vm12 = vcmp.eq.s32.totalorder %v11822_v7, %v13318_v3 }
 0x1ba   : > { %1356 = vperm.xlu1 %10169, %v11353_v55   ;;  %1371 = vperm.xlu0 %10168, %v11354_v37   ;;  %v4053_v60 = vadd.f32 1.0, %v10425_v42  ;;  %10434 = vpow2.f32 %v8862_v49  ;;  %v13356_v52 = vadd.f32 %v13323_v44, %v3091_v16  ;;  %v13358_v6 = vpop.f32.mrb[97].mxu0  ;;  %v8486_v42 = vsel %vm942_vm13, 1.0, %v16606_v1 }
 0x1bb   : > { %16666 = vst [vmem:[#allocation79_spill] sm:$0xff] %v13342_v54  ;;  %v13344_v48 = vpop.permute.xlu0 %734  ;;  %9631 = vmatmul.mubr.msk.bf16.gmra.mrb[116].mxu1 %vm4561_vm4, %v1294_v15  ;;  %v10427_v5 = vpop.eup %10426  ;;  %16667 = vst [vmem:[#allocation80_spill] sm:$0xff] %v13358_v6  ;;  %v8488_v15 = vsel %vm944_vm14, 1.0, %v16606_v1  ;;  %vm953_vm13 = vcmp.eq.s32.totalorder %v11822_v7, %v13214_v21  ;;  %vm955_vm14 = vcmp.eq.s32.totalorder %v11822_v7, %v13244_v29 }
 0x1bc   : > { %v13350_v10 = vpop.permute.xlu1 %725  ;;  %9634 = vmatprep.mubr.msk.bf16.mxu1 %vm4561_vm4, %v1295_v30  ;;  %10436 = vrcp.f32 %v4053_v60  ;;  %v4054_v30 = vadd.f32 1.0, %v10427_v5  ;;  %v3095_v49 = vpop.f32.mrb[98].mxu0  ;;  %v8863_v37 = vmul.f32 -1.442695, %v13356_v52  ;;  %v11356_v60 = vld [vmem:[%s11623_s27 + $0x78] sm:$0xff]  ;;  %v8485_v5 = vsel %vm941_vm15, 1.0, %v16606_v1 }
 0x1bd   : > { %v13378_v16 = vadd.f32 %v13323_v44, %v3095_v49  ;;  %v13380_v62 = vpop.f32.mrb[99].mxu0  ;;  %v8487_v49 = vsel %vm943_vm0, 1.0, %v16606_v1  ;;  %v1296_v9 = vpack.c.bf16 %v8486_v42, %v8485_v5  ;;  %v11358_v42 = vld [vmem:[%s11623_s27 + $0x88] sm:$0xff]  ;;  %vm958_vm15 = vcmp.eq.s32.totalorder %v11822_v7, %v13350_v10 }
 0x1be   : > { %1362 = vperm.xlu1 %10169, %v11355_v46   ;;  %16668 = vst [vmem:[#allocation81_spill] sm:$0xff] %v13380_v62  ;;  %1377 = vperm.xlu0 %10168, %v11356_v60   ;;  %10438 = vrcp.f32 %v4054_v30  ;;  %v1297_v60 = vpack.c.bf16 %v8488_v15, %v8487_v49  ;;  %v11357_v30 = vld [vmem:[%s11623_s27 + $0x60] sm:$0xff] }
 0x1bf   : > { %v13374_v55 = vpop.permute.xlu0 %740  ;;  %v10429_v61 = vpop.eup %10428  ;;  %10440 = vpow2.f32 %v8863_v37  ;;  %v8864_v62 = vmul.f32 -1.442695, %v13378_v16  ;;  %8801 = vmatmul.mubr.msk.bf16.gmra.mrb[204].mxu0 %vm2617_vm1, %v10236_v51 }
 0x1c0   : > { %v13387_v46 = vpop.permute.xlu1 %731  ;;  %v13396_v17 = vmul.f32 %v10429_v61, %v13165_v20  ;;  %3369 = vmatprep.mubr.bf16.mxu0 %v16609_v38  ;;  %v10431_v6 = vpop.eup %10430  ;;  %v10237_v61 = vld [vmem:[%s11632_s16 + $0x1a0] sm:$0xff]  }
 0x1c1   : > { %10442 = vpow2.f32 %v8864_v62  ;;  %v10433_v51 = vpop.eup %10432  ;;  %v13409_v20 = vmul.f32 %v10431_v6, %v13195_v0  ;;  %v3101_v37 = vpop.f32.mrb[100].mxu0  ;;  %v8490_v0 = vsel %vm946_vm2, 1.0, %v16606_v1  ;;  %vm960_vm0 = vcmp.eq.s32.totalorder %v11822_v7, %v13387_v46 }
 0x1c2   : > { %16669 = vst [vmem:[#allocation82_spill] sm:$0xff] %v13396_v17  ;;  %1368 = vperm.xlu1 %10169, %v11357_v30   ;;  %1383 = vperm.xlu0 %10168, %v11358_v42   ;;  %v13417_v62 = vadd.f32 %v13323_v44, %v3101_v37  ;;  %v13419_v5 = vpop.f32.mrb[101].mxu0  ;;  %v8492_v42 = vsel %vm948_vm3, 1.0, %v16606_v1  ;;  %v8489_v30 = vsel %vm945_vm5, 1.0, %v16606_v1  ;;  %vm957_vm2 = vcmp.eq.s32.totalorder %v11822_v7, %v13272_v32 }
 0x1c3   : > { %v13402_v43 = vpop.permute.xlu0 %746  ;;  %9635 = vmatmul.mubr.msk.bf16.gmra.mrb[120].mxu1 %vm4561_vm4, %v1296_v9  ;;  %16670 = vst [vmem:[#allocation83_spill] sm:$0xff] %v13409_v20  ;;  %v4055_v9 = vadd.f32 1.0, %v10433_v51  ;;  %16671 = vst [vmem:[#allocation84_spill] sm:$0xff] %v13419_v5  ;;  %v3105_v6 = vpop.f32.mrb[102].mxu0  ;;  %vm959_vm3 = vcmp.eq.s32.totalorder %v11822_v7, %v13308_v28 }
 0x1c4   : > { %v13411_v15 = vpop.permute.xlu1 %737  ;;  %9638 = vmatprep.mubr.msk.bf16.mxu1 %vm4561_vm4, %v1297_v60  ;;  %v10435_v49 = vpop.eup %10434  ;;  %v11359_v60 = vld [vmem:[%s11623_s27 + $0x70] sm:$0xff]  ;;  %v8865_v5 = vmul.f32 -1.442695, %v13417_v62  ;;  %v13448_v34 = vadd.f32 %v13323_v44, %v3105_v6  ;;  %v11361_v6 = vld [vmem:[%s11623_s27 + $0x80] sm:$0xff] }
 0x1c5   : > { %10444 = vrcp.f32 %v4055_v9  ;;  %v4056_v37 = vadd.f32 1.0, %v10435_v49  ;;  %v13438_v18 = vpop.f32.mrb[103].mxu0  ;;  %v8491_v9 = vsel %vm947_vm6, 1.0, %v16606_v1  ;;  %v1298_v49 = vpack.c.bf16 %v8490_v0, %v8489_v30 }
 0x1c6   : > { %1374 = vperm.xlu1 %10169, %v11359_v60   ;;  %16672 = vst [vmem:[#allocation85_spill] sm:$0xff] %v13438_v18  ;;  %1389 = vperm.xlu0 %10168, %v11360_v31   ;;  %v10437_v60 = vpop.eup %10436  ;;  %v1299_v18 = vpack.c.bf16 %v8492_v42, %v8491_v9  ;;  %v8866_v20 = vmul.f32 -1.442695, %v13448_v34  ;;  %vm962_vm5 = vcmp.eq.s32.totalorder %v11822_v7, %v13411_v15  ;;  %v11376_v15 = vld [vmem:[%s11623_s27 + $0x118] sm:$0xff] }
 0x1c7   : > { %v13435_v51 = vpop.permute.xlu0 %752  ;;  %v13455_v31 = vmul.f32 %v10437_v60, %v13226_v4  ;;  %10446 = vrcp.f32 %v4056_v37  ;;  %8802 = vmatmul.mubr.msk.bf16.gmra.mrb[208].mxu0 %vm2617_vm1, %v10237_v61  ;;  %v11362_v61 = vld [vmem:[%s11623_s27 + $0xa8] sm:$0xff] }
 0x1c8   : > { %v13445_v17 = vpop.permute.xlu1 %743  ;;  %v10439_v13 = vpop.eup %10438  ;;  %10448 = vpow2.f32 %v8865_v5  ;;  %3379 = vmatprep.mubr.bf16.mxu0 %v16609_v38  ;;  %v10238_v60 = vld [vmem:[%s11632_s16 + $0x1a8] sm:$0xff]  }
 0x1c9   : > { %16673 = vst [vmem:[#allocation86_spill] sm:$0xff] %v13455_v31  ;;  %v10441_v54 = vpop.eup %10440  ;;  %v13464_v12 = vmul.f32 %v10439_v13, %v13248_v36  ;;  %10450 = vpow2.f32 %v8866_v20  ;;  %v3111_v30 = vpop.f32.mrb[104].mxu0  ;;  %v8496_v13 = vsel %vm952_vm8, 1.0, %v16606_v1  ;;  %vm964_vm6 = vcmp.eq.s32.totalorder %v11822_v7, %v13445_v17 }
 0x1ca   : > { %1380 = vperm.xlu1 %10169, %v11361_v6   ;;  %1395 = vperm.xlu0 %10168, %v11362_v61   ;;  %v4057_v0 = vadd.f32 1.0, %v10441_v54  ;;  %v13478_v36 = vadd.f32 %v13323_v44, %v3111_v30  ;;  %v13480_v37 = vpop.f32.mrb[105].mxu0  ;;  %vm963_vm8 = vcmp.eq.s32.totalorder %v11822_v7, %v13374_v55 }
 0x1cb   : > { %16674 = vst [vmem:[#allocation87_spill] sm:$0xff] %v13464_v12  ;;  %v13466_v4 = vpop.permute.xlu0 %758  ;;  %9639 = vmatmul.mubr.msk.bf16.gmra.mrb[124].mxu1 %vm4561_vm4, %v1298_v49  ;;  %v10443_v42 = vpop.eup %10442  ;;  %16675 = vst [vmem:[#allocation88_spill] sm:$0xff] %v13480_v37  ;;  %v11363_v49 = vld [vmem:[%s11623_s27 + $0x90] sm:$0xff] }
 0x1cc   : > { %v13472_v5 = vpop.permute.xlu1 %749  ;;  %9642 = vmatprep.mubr.msk.bf16.mxu1 %vm4561_vm4, %v1299_v18  ;;  %v8494_v18 = vsel %vm950_vm7, 1.0, %v16606_v1  ;;  %10452 = vrcp.f32 %v4057_v0  ;;  %v4058_v54 = vadd.f32 1.0, %v10443_v42  ;;  %v3115_v20 = vpop.f32.mrb[106].mxu0  ;;  %v8867_v61 = vmul.f32 -1.442695, %v13478_v36  ;;  %v11364_v0 = vld [vmem:[%s11623_s27 + $0xb8] sm:$0xff] }
 0x1cd   : > { %v13500_v30 = vadd.f32 %v13323_v44, %v3115_v20  ;;  %v13502_v45 = vpop.f32.mrb[107].mxu0  ;;  %v8493_v42 = vsel %vm949_vm9, 1.0, %v16606_v1  ;;  %v8495_v20 = vsel %vm951_vm10, 1.0, %v16606_v1  ;;  %vm961_vm7 = vcmp.eq.s32.totalorder %v11822_v7, %v13344_v48 }
 0x1ce   : > { %1386 = vperm.xlu1 %10169, %v11363_v49   ;;  %16676 = vst [vmem:[#allocation89_spill] sm:$0xff] %v13502_v45  ;;  %1401 = vperm.xlu0 %10168, %v11364_v0   ;;  %10454 = vrcp.f32 %v4058_v54  ;;  %v1300_v9 = vpack.c.bf16 %v8494_v18, %v8493_v42  ;;  %v1301_v0 = vpack.c.bf16 %v8496_v13, %v8495_v20  ;;  %v11365_v54 = vld [vmem:[%s11623_s27 + $0xa0] sm:$0xff]  ;;  %v11366_v18 = vld [vmem:[%s11623_s27 + $0xc8] sm:$0xff] }
 0x1cf   : > { %v13496_v6 = vpop.permute.xlu0 %764  ;;  %v10445_v39 = vpop.eup %10444  ;;  %10456 = vpow2.f32 %v8867_v61  ;;  %v8868_v45 = vmul.f32 -1.442695, %v13500_v30  ;;  %8803 = vmatmul.mubr.msk.bf16.gmra.mrb[212].mxu0 %vm2617_vm1, %v10238_v60  ;;  %vm966_vm9 = vcmp.eq.s32.totalorder %v11822_v7, %v13472_v5 }
 0x1d0   : > { %v13509_v49 = vpop.permute.xlu1 %755  ;;  %v13518_v24 = vmul.f32 %v10445_v39, %v13290_v41  ;;  %3389 = vmatprep.mubr.bf16.mxu0 %v16609_v38  ;;  %v10239_v39 = vld [vmem:[%s11632_s16 + $0x1b0] sm:$0xff]  }
 0x1d1   : > { %v10447_v37 = vpop.eup %10446  ;;  %10458 = vpow2.f32 %v8868_v45  ;;  %v3121_v61 = vpop.f32.mrb[108].mxu0  ;;  %vm968_vm10 = vcmp.eq.s32.totalorder %v11822_v7, %v13509_v49 }
 0x1d2   : > { %16677 = vst [vmem:[#allocation90_spill] sm:$0xff] %v13518_v24  ;;  %1392 = vperm.xlu1 %10169, %v11365_v54   ;;  %1407 = vperm.xlu0 %10168, %v11366_v18   ;;  %v10449_v60 = vpop.eup %10448  ;;  %v13531_v41 = vmul.f32 %v10447_v37, %v13326_v27  ;;  %v13539_v45 = vadd.f32 %v13323_v44, %v3121_v61  ;;  %v13541_v42 = vpop.f32.mrb[109].mxu0  ;;  %v8498_v27 = vsel %vm954_vm11, 1.0, %v16606_v1  ;;  %v8500_v18 = vsel %vm956_vm12, 1.0, %v16606_v1 }
 0x1d3   : > { %v13524_v35 = vpop.permute.xlu0 %770  ;;  %9643 = vmatmul.mubr.msk.bf16.gmra.mrb[0].mxu1 %vm4561_vm4, %v1300_v9  ;;  %v4059_v9 = vadd.f32 1.0, %v10449_v60  ;;  %16679 = vst [vmem:[#allocation92_spill] sm:$0xff] %v13541_v42  ;;  %v10451_v20 = vpop.eup %10450  ;;  %v8497_v54 = vsel %vm953_vm13, 1.0, %v16606_v1  ;;  %vm965_vm11 = vcmp.eq.s32.totalorder %v11822_v7, %v13402_v43  ;;  %vm967_vm12 = vcmp.eq.s32.totalorder %v11822_v7, %v13435_v51 }
 0x1d4   : > { %16678 = vst [vmem:[#allocation91_spill] sm:$0xff] %v13531_v41  ;;  %v13533_v13 = vpop.permute.xlu1 %761  ;;  %9646 = vmatprep.mubr.msk.bf16.mxu1 %vm4561_vm4, %v1301_v0  ;;  %v3125_v37 = vpop.f32.mrb[110].mxu0  ;;  %v11367_v0 = vld [vmem:[%s11623_s27 + $0xb0] sm:$0xff]  ;;  %v4060_v61 = vadd.f32 1.0, %v10451_v20  ;;  %v8869_v42 = vmul.f32 -1.442695, %v13539_v45  ;;  %v1302_v20 = vpack.c.bf16 %v8498_v27, %v8497_v54 }
 0x1d5   : > { %10460 = vrcp.f32 %v4059_v9  ;;  %v13560_v31 = vpop.f32.mrb[111].mxu0  ;;  %v13570_v3 = vadd.f32 %v13323_v44, %v3125_v37  ;;  %v8499_v9 = vsel %vm955_vm14, 1.0, %v16606_v1  ;;  %v11369_v37 = vld [vmem:[%s11623_s27 + $0xc0] sm:$0xff]  ;;  %vm970_vm13 = vcmp.eq.s32.totalorder %v11822_v7, %v13533_v13  ;;  %v11384_v13 = vld [vmem:[%s11623_s27 + $0x158] sm:$0xff] }
 0x1d6   : > { %1398 = vperm.xlu1 %10169, %v11367_v0   ;;  %16680 = vst [vmem:[#allocation93_spill] sm:$0xff] %v13560_v31  ;;  %1413 = vperm.xlu0 %10168, %v11368_v40   ;;  %v10453_v0 = vpop.eup %10452  ;;  %10462 = vrcp.f32 %v4060_v61  ;;  %v1303_v31 = vpack.c.bf16 %v8500_v18, %v8499_v9 }
 0x1d7   : > { %v13557_v60 = vpop.permute.xlu0 %776  ;;  %v13577_v40 = vmul.f32 %v10453_v0, %v13356_v52  ;;  %8804 = vmatmul.mubr.msk.bf16.gmra.mrb[216].mxu0 %vm2617_vm1, %v10239_v39  ;;  %10464 = vpow2.f32 %v8869_v42  ;;  %v8870_v41 = vmul.f32 -1.442695, %v13570_v3  ;;  %v11370_v39 = vld [vmem:[%s11623_s27 + $0xe8] sm:$0xff]  ;;  %v10241_v0 = vld [vmem:[%s11632_s16 + $0x1b8] sm:$0xff]  }
 0x1d8   : > { %v13567_v24 = vpop.permute.xlu1 %767  ;;  %v10455_v21 = vpop.eup %10454  ;;  %3399 = vmatprep.mubr.bf16.mxu0 %v16609_v38 }
 0x1d9   : > { %16681 = vst [vmem:[#allocation94_spill] sm:$0xff] %v13577_v40  ;;  %v10457_v12 = vpop.eup %10456  ;;  %v13586_v29 = vmul.f32 %v10455_v21, %v13378_v16  ;;  %10466 = vpow2.f32 %v8870_v41  ;;  %v3131_v54 = vpop.f32.mrb[112].mxu0  ;;  %v8504_v21 = vsel %vm960_vm0, 1.0, %v16606_v1  ;;  %vm972_vm14 = vcmp.eq.s32.totalorder %v11822_v7, %v13567_v24 }
 0x1da   : > { %1404 = vperm.xlu1 %10169, %v11369_v37   ;;  %1419 = vperm.xlu0 %10168, %v11370_v39   ;;  %v4061_v27 = vadd.f32 1.0, %v10457_v12  ;;  %v13600_v16 = vadd.f32 %v13323_v44, %v3131_v54  ;;  %v13602_v61 = vpop.f32.mrb[113].mxu0  ;;  %vm971_vm0 = vcmp.eq.s32.totalorder %v11822_v7, %v13496_v6 }
 0x1db   : > { %16682 = vst [vmem:[#allocation95_spill] sm:$0xff] %v13586_v29  ;;  %v13588_v52 = vpop.permute.xlu0 %782  ;;  %9647 = vmatmul.mubr.msk.bf16.gmra.mrb[4].mxu1 %vm4561_vm4, %v1302_v20  ;;  %v10459_v18 = vpop.eup %10458  ;;  %16683 = vst [vmem:[#allocation96_spill] sm:$0xff] %v13602_v61  ;;  %v11371_v20 = vld [vmem:[%s11623_s27 + $0xd0] sm:$0xff] }
 0x1dc   : > { %v13594_v42 = vpop.permute.xlu1 %773  ;;  %9650 = vmatprep.mubr.msk.bf16.mxu1 %vm4561_vm4, %v1303_v31  ;;  %v8502_v31 = vsel %vm958_vm15, 1.0, %v16606_v1  ;;  %10468 = vrcp.f32 %v4061_v27  ;;  %v4062_v12 = vadd.f32 1.0, %v10459_v18  ;;  %v3135_v41 = vpop.f32.mrb[114].mxu0  ;;  %v8871_v39 = vmul.f32 -1.442695, %v13600_v16  ;;  %v11372_v27 = vld [vmem:[%s11623_s27 + $0xf8] sm:$0xff] }
 0x1dd   : > { %v13622_v54 = vadd.f32 %v13323_v44, %v3135_v41  ;;  %v13624_v10 = vpop.f32.mrb[115].mxu0  ;;  %v8501_v18 = vsel %vm957_vm2, 1.0, %v16606_v1  ;;  %v8503_v41 = vsel %vm959_vm3, 1.0, %v16606_v1  ;;  %vm969_vm15 = vcmp.eq.s32.totalorder %v11822_v7, %v13466_v4 }
 0x1de   : > { %1410 = vperm.xlu1 %10169, %v11371_v20   ;;  %16684 = vst [vmem:[#allocation97_spill] sm:$0xff] %v13624_v10  ;;  %1425 = vperm.xlu0 %10168, %v11372_v27   ;;  %10470 = vrcp.f32 %v4062_v12  ;;  %v1304_v9 = vpack.c.bf16 %v8502_v31, %v8501_v18  ;;  %v1305_v27 = vpack.c.bf16 %v8504_v21, %v8503_v41  ;;  %v11373_v12 = vld [vmem:[%s11623_s27 + $0xe0] sm:$0xff]  ;;  %v11374_v31 = vld [vmem:[%s11623_s27 + $0x108] sm:$0xff] }
 0x1df   : > { %v13618_v37 = vpop.permute.xlu0 %788  ;;  %v10461_v46 = vpop.eup %10460  ;;  %10472 = vpow2.f32 %v8871_v39  ;;  %v8872_v10 = vmul.f32 -1.442695, %v13622_v54  ;;  %8805 = vmatmul.mubr.msk.bf16.gmra.mrb[220].mxu0 %vm2617_vm1, %v10241_v0  ;;  %vm974_vm2 = vcmp.eq.s32.totalorder %v11822_v7, %v13594_v42 }
 0x1e0   : > { %v13631_v20 = vpop.permute.xlu1 %779  ;;  %v13640_v32 = vmul.f32 %v10461_v46, %v13417_v62  ;;  %3409 = vmatprep.mubr.bf16.mxu0 %v16609_v38  ;;  %v10463_v61 = vpop.eup %10462  ;;  %v10242_v46 = vld [vmem:[%s11632_s16 + $0x1c0] sm:$0xff]  }
 0x1e1   : > { %10474 = vpow2.f32 %v8872_v10  ;;  %v10465_v0 = vpop.eup %10464  ;;  %v13653_v62 = vmul.f32 %v10463_v61, %v13448_v34  ;;  %v3141_v39 = vpop.f32.mrb[116].mxu0  ;;  %v8506_v34 = vsel %vm962_vm5, 1.0, %v16606_v1  ;;  %vm976_vm3 = vcmp.eq.s32.totalorder %v11822_v7, %v13631_v20 }
 0x1e2   : > { %16685 = vst [vmem:[#allocation98_spill] sm:$0xff] %v13640_v32  ;;  %1416 = vperm.xlu1 %10169, %v11373_v12   ;;  %1431 = vperm.xlu0 %10168, %v11374_v31   ;;  %v13661_v10 = vadd.f32 %v13323_v44, %v3141_v39  ;;  %v13663_v18 = vpop.f32.mrb[117].mxu0  ;;  %v8508_v31 = vsel %vm964_vm6, 1.0, %v16606_v1  ;;  %v8505_v12 = vsel %vm961_vm7, 1.0, %v16606_v1  ;;  %vm973_vm5 = vcmp.eq.s32.totalorder %v11822_v7, %v13524_v35 }
 0x1e3   : > { %v13646_v28 = vpop.permute.xlu0 %794  ;;  %9651 = vmatmul.mubr.msk.bf16.gmra.mrb[8].mxu1 %vm4561_vm4, %v1304_v9  ;;  %16686 = vst [vmem:[#allocation99_spill] sm:$0xff] %v13653_v62  ;;  %v4063_v9 = vadd.f32 1.0, %v10465_v0  ;;  %16687 = vst [vmem:[#allocation100_spill] sm:$0xff] %v13663_v18  ;;  %v10467_v41 = vpop.eup %10466  ;;  %vm975_vm6 = vcmp.eq.s32.totalorder %v11822_v7, %v13557_v60 }
 0x1e4   : > { %v13655_v21 = vpop.permute.xlu1 %785  ;;  %9654 = vmatprep.mubr.msk.bf16.mxu1 %vm4561_vm4, %v1305_v27  ;;  %v3145_v61 = vpop.f32.mrb[118].mxu0  ;;  %v11375_v27 = vld [vmem:[%s11623_s27 + $0xf0] sm:$0xff]  ;;  %v4064_v39 = vadd.f32 1.0, %v10467_v41  ;;  %v8873_v18 = vmul.f32 -1.442695, %v13661_v10  ;;  %v1306_v41 = vpack.c.bf16 %v8506_v34, %v8505_v12 }
 0x1e5   : > { %10476 = vrcp.f32 %v4063_v9  ;;  %v13682_v40 = vpop.f32.mrb[119].mxu0  ;;  %v13692_v17 = vadd.f32 %v13323_v44, %v3145_v61  ;;  %v8507_v9 = vsel %vm963_vm8, 1.0, %v16606_v1  ;;  %v11377_v61 = vld [vmem:[%s11623_s27 + $0x100] sm:$0xff]  ;;  %vm978_vm7 = vcmp.eq.s32.totalorder %v11822_v7, %v13655_v21  ;;  %v11392_v21 = vld [vmem:[%s11623_s27 + $0x198] sm:$0xff] }
 0x1e6   : > { %1422 = vperm.xlu1 %10169, %v11375_v27   ;;  %16688 = vst [vmem:[#allocation101_spill] sm:$0xff] %v13682_v40  ;;  %1437 = vperm.xlu0 %10168, %v11376_v15   ;;  %v10469_v27 = vpop.eup %10468  ;;  %10478 = vrcp.f32 %v4064_v39  ;;  %v1307_v40 = vpack.c.bf16 %v8508_v31, %v8507_v9 }
 0x1e7   : > { %v13679_v0 = vpop.permute.xlu0 %800  ;;  %v13699_v15 = vmul.f32 %v10469_v27, %v13478_v36  ;;  %8806 = vmatmul.mubr.msk.bf16.gmra.mrb[224].mxu0 %vm2617_vm1, %v10242_v46  ;;  %10480 = vpow2.f32 %v8873_v18  ;;  %v8874_v62 = vmul.f32 -1.442695, %v13692_v17  ;;  %v11378_v46 = vld [vmem:[%s11623_s27 + $0x128] sm:$0xff] }
 0x1e8   : > { %v13689_v32 = vpop.permute.xlu1 %791  ;;  %v10471_v48 = vpop.eup %10470  ;;  %3419 = vmatprep.mubr.bf16.mxu0 %v16609_v38  ;;  %v10243_v27 = vld [vmem:[%s11632_s16 + $0x1c8] sm:$0xff]  }
 0x1e9   : > { %16689 = vst [vmem:[#allocation102_spill] sm:$0xff] %v13699_v15  ;;  %v10473_v29 = vpop.eup %10472  ;;  %v13708_v55 = vmul.f32 %v10471_v48, %v13500_v30  ;;  %10482 = vpow2.f32 %v8874_v62  ;;  %v3151_v12 = vpop.f32.mrb[120].mxu0  ;;  %v8512_v48 = vsel %vm968_vm10, 1.0, %v16606_v1  ;;  %vm980_vm8 = vcmp.eq.s32.totalorder %v11822_v7, %v13689_v32 }
 0x1ea   : > { %1428 = vperm.xlu1 %10169, %v11377_v61   ;;  %1443 = vperm.xlu0 %10168, %v11378_v46   ;;  %v4065_v34 = vadd.f32 1.0, %v10473_v29  ;;  %v13722_v30 = vadd.f32 %v13323_v44, %v3151_v12  ;;  %v13724_v39 = vpop.f32.mrb[121].mxu0  ;;  %vm979_vm10 = vcmp.eq.s32.totalorder %v11822_v7, %v13618_v37 }
 0x1eb   : > { %16690 = vst [vmem:[#allocation103_spill] sm:$0xff] %v13708_v55  ;;  %v13710_v36 = vpop.permute.xlu0 %806  ;;  %9655 = vmatmul.mubr.msk.bf16.gmra.mrb[12].mxu1 %vm4561_vm4, %v1306_v41  ;;  %v10475_v31 = vpop.eup %10474  ;;  %16691 = vst [vmem:[#allocation104_spill] sm:$0xff] %v13724_v39  ;;  %v11379_v41 = vld [vmem:[%s11623_s27 + $0x110] sm:$0xff] }
 0x1ec   : > { %v13716_v18 = vpop.permute.xlu1 %797  ;;  %9658 = vmatprep.mubr.msk.bf16.mxu1 %vm4561_vm4, %v1307_v40  ;;  %v8510_v40 = vsel %vm966_vm9, 1.0, %v16606_v1  ;;  %10484 = vrcp.f32 %v4065_v34  ;;  %v4066_v29 = vadd.f32 1.0, %v10475_v31  ;;  %v3155_v62 = vpop.f32.mrb[122].mxu0  ;;  %v8875_v46 = vmul.f32 -1.442695, %v13722_v30  ;;  %v11380_v34 = vld [vmem:[%s11623_s27 + $0x138] sm:$0xff] }
 0x1ed   : > { %v13744_v12 = vadd.f32 %v13323_v44, %v3155_v62  ;;  %v13746_v5 = vpop.f32.mrb[123].mxu0  ;;  %v8509_v31 = vsel %vm965_vm11, 1.0, %v16606_v1  ;;  %v8511_v62 = vsel %vm967_vm12, 1.0, %v16606_v1  ;;  %vm977_vm9 = vcmp.eq.s32.totalorder %v11822_v7, %v13588_v52 }
 0x1ee   : > { %1434 = vperm.xlu1 %10169, %v11379_v41   ;;  %16692 = vst [vmem:[#allocation105_spill] sm:$0xff] %v13746_v5  ;;  %1449 = vperm.xlu0 %10168, %v11380_v34   ;;  %10486 = vrcp.f32 %v4066_v29  ;;  %v1308_v9 = vpack.c.bf16 %v8510_v40, %v8509_v31  ;;  %v1309_v34 = vpack.c.bf16 %v8512_v48, %v8511_v62  ;;  %v11381_v29 = vld [vmem:[%s11623_s27 + $0x120] sm:$0xff]  ;;  %v11382_v40 = vld [vmem:[%s11623_s27 + $0x148] sm:$0xff] }
 0x1ef   : > { %v13740_v61 = vpop.permute.xlu0 %812  ;;  %v10477_v49 = vpop.eup %10476  ;;  %10488 = vpow2.f32 %v8875_v46  ;;  %v8876_v5 = vmul.f32 -1.442695, %v13744_v12  ;;  %8807 = vmatmul.mubr.msk.bf16.gmra.mrb[228].mxu0 %vm2617_vm1, %v10243_v27  ;;  %vm982_vm11 = vcmp.eq.s32.totalorder %v11822_v7, %v13716_v18 }
 0x1f0   : > { %v13753_v41 = vpop.permute.xlu1 %803  ;;  %v13762_v43 = vmul.f32 %v10477_v49, %v13539_v45  ;;  %3429 = vmatprep.mubr.bf16.mxu0 %v16609_v38  ;;  %v10479_v39 = vpop.eup %10478  ;;  %v10244_v49 = vld [vmem:[%s11632_s16 + $0x1d0] sm:$0xff]  }
 0x1f1   : > { %10490 = vpow2.f32 %v8876_v5  ;;  %v10481_v27 = vpop.eup %10480  ;;  %v13775_v45 = vmul.f32 %v10479_v39, %v13570_v3  ;;  %v3161_v46 = vpop.f32.mrb[124].mxu0  ;;  %v8514_v3 = vsel %vm970_vm13, 1.0, %v16606_v1  ;;  %vm984_vm12 = vcmp.eq.s32.totalorder %v11822_v7, %v13753_v41 }
 0x1f2   : > { %16693 = vst [vmem:[#allocation106_spill] sm:$0xff] %v13762_v43  ;;  %1440 = vperm.xlu1 %10169, %v11381_v29   ;;  %1455 = vperm.xlu0 %10168, %v11382_v40   ;;  %v13783_v5 = vadd.f32 %v13323_v44, %v3161_v46  ;;  %v13785_v31 = vpop.f32.mrb[125].mxu0  ;;  %v8516_v40 = vsel %vm972_vm14, 1.0, %v16606_v1  ;;  %v8513_v29 = vsel %vm969_vm15, 1.0, %v16606_v1  ;;  %vm981_vm13 = vcmp.eq.s32.totalorder %v11822_v7, %v13646_v28 }
 0x1f3   : > { %v13768_v51 = vpop.permute.xlu0 %818  ;;  %9659 = vmatmul.mubr.msk.bf16.gmra.mrb[16].mxu1 %vm4561_vm4, %v1308_v9  ;;  %16694 = vst [vmem:[#allocation107_spill] sm:$0xff] %v13775_v45  ;;  %v4067_v9 = vadd.f32 1.0, %v10481_v27  ;;  %16695 = vst [vmem:[#allocation108_spill] sm:$0xff] %v13785_v31  ;;  %v10483_v62 = vpop.eup %10482  ;;  %vm983_vm14 = vcmp.eq.s32.totalorder %v11822_v7, %v13679_v0 }
 0x1f4   : > { %v13777_v48 = vpop.permute.xlu1 %809  ;;  %9662 = vmatprep.mubr.msk.bf16.mxu1 %vm4561_vm4, %v1309_v34  ;;  %v3165_v39 = vpop.f32.mrb[126].mxu0  ;;  %v11383_v34 = vld [vmem:[%s11623_s27 + $0x130] sm:$0xff]  ;;  %v4068_v46 = vadd.f32 1.0, %v10483_v62  ;;  %v8877_v31 = vmul.f32 -1.442695, %v13783_v5  ;;  %v1310_v62 = vpack.c.bf16 %v8514_v3, %v8513_v29 }
 0x1f5   : > { %10492 = vrcp.f32 %v4067_v9  ;;  %v13804_v15 = vpop.f32.mrb[127].mxu0  ;;  %v13814_v24 = vadd.f32 %v13323_v44, %v3165_v39  ;;  %v8515_v9 = vsel %vm971_vm0, 1.0, %v16606_v1  ;;  %v11385_v39 = vld [vmem:[%s11623_s27 + $0x140] sm:$0xff]  ;;  %vm986_vm15 = vcmp.eq.s32.totalorder %v11822_v7, %v13777_v48  ;;  %v11400_v48 = vld [vmem:[%s11623_s27 + $0x1d8] sm:$0xff] }
 0x1f6   : > { %1446 = vperm.xlu1 %10169, %v11383_v34   ;;  %16696 = vst [vmem:[#allocation109_spill] sm:$0xff] %v13804_v15  ;;  %1461 = vperm.xlu0 %10168, %v11384_v13   ;;  %v10485_v34 = vpop.eup %10484  ;;  %10494 = vrcp.f32 %v4068_v46  ;;  %v1311_v15 = vpack.c.bf16 %v8516_v40, %v8515_v9 }
 0x1f7   : > { %v13801_v27 = vpop.permute.xlu0 %824  ;;  %v13821_v13 = vmul.f32 %v10485_v34, %v13600_v16  ;;  %8808 = vmatmul.mubr.msk.bf16.gmra.mrb[232].mxu0 %vm2617_vm1, %v10244_v49  ;;  %10496 = vpow2.f32 %v8877_v31  ;;  %v8878_v45 = vmul.f32 -1.442695, %v13814_v24  ;;  %v11386_v49 = vld [vmem:[%s11623_s27 + $0x168] sm:$0xff]  ;;  %v10246_v34 = vld [vmem:[%s11632_s16 + $0x1d8] sm:$0xff]  }
 0x1f8   : > { %v13811_v43 = vpop.permute.xlu1 %815  ;;  %v10487_v4 = vpop.eup %10486  ;;  %3439 = vmatprep.mubr.bf16.mxu0 %v16609_v38 }
 0x1f9   : > { %16697 = vst [vmem:[#allocation110_spill] sm:$0xff] %v13821_v13  ;;  %v10489_v55 = vpop.eup %10488  ;;  %v13830_v6 = vmul.f32 %v10487_v4, %v13622_v54  ;;  %10498 = vpow2.f32 %v8878_v45  ;;  %v3171_v29 = vpop.f32.mrb[128].mxu0  ;;  %v8520_v4 = vsel %vm976_vm3, 1.0, %v16606_v1  ;;  %vm988_vm0 = vcmp.eq.s32.totalorder %v11822_v7, %v13811_v43  ;;  %v14060_v43 = vld [vmem:[%s16525_s3] ss:$0 sm:$0xff] }
 0x1fa   : > { %1452 = vperm.xlu1 %10169, %v11385_v39   ;;  %1467 = vperm.xlu0 %10168, %v11386_v49   ;;  %v4069_v3 = vadd.f32 1.0, %v10489_v55  ;;  %v13844_v54 = vadd.f32 %v13323_v44, %v3171_v29  ;;  %v13846_v46 = vpop.f32.mrb[129].mxu0  ;;  %vm987_vm3 = vcmp.eq.s32.totalorder %v11822_v7, %v13740_v61 }
 0x1fb   : > { %16698 = vst [vmem:[#allocation111_spill] sm:$0xff] %v13830_v6  ;;  %v13832_v16 = vpop.permute.xlu0 %830  ;;  %9663 = vmatmul.mubr.msk.bf16.gmra.mrb[20].mxu1 %vm4561_vm4, %v1310_v62  ;;  %v10491_v40 = vpop.eup %10490  ;;  %16699 = vst [vmem:[#allocation112_spill] sm:$0xff] %v13846_v46  ;;  %v11387_v62 = vld [vmem:[%s11623_s27 + $0x150] sm:$0xff] }
 0x1fc   : > { %v13838_v31 = vpop.permute.xlu1 %821  ;;  %9666 = vmatprep.mubr.msk.bf16.mxu1 %vm4561_vm4, %v1311_v15  ;;  %v8518_v15 = vsel %vm974_vm2, 1.0, %v16606_v1  ;;  %10500 = vrcp.f32 %v4069_v3  ;;  %v4070_v55 = vadd.f32 1.0, %v10491_v40  ;;  %v3175_v45 = vpop.f32.mrb[130].mxu0  ;;  %v8879_v49 = vmul.f32 -1.442695, %v13844_v54  ;;  %v11388_v3 = vld [vmem:[%s11623_s27 + $0x178] sm:$0xff] }
 0x1fd   : > { %v13866_v29 = vadd.f32 %v13323_v44, %v3175_v45  ;;  %v13868_v42 = vpop.f32.mrb[131].mxu0  ;;  %v8517_v40 = vsel %vm973_vm5, 1.0, %v16606_v1  ;;  %v8519_v45 = vsel %vm975_vm6, 1.0, %v16606_v1  ;;  %vm985_vm2 = vcmp.eq.s32.totalorder %v11822_v7, %v13710_v36 }
 0x1fe   : > { %1458 = vperm.xlu1 %10169, %v11387_v62   ;;  %16700 = vst [vmem:[#allocation113_spill] sm:$0xff] %v13868_v42  ;;  %1473 = vperm.xlu0 %10168, %v11388_v3   ;;  %10502 = vrcp.f32 %v4070_v55  ;;  %v1312_v9 = vpack.c.bf16 %v8518_v15, %v8517_v40  ;;  %v1313_v3 = vpack.c.bf16 %v8520_v4, %v8519_v45  ;;  %v11389_v55 = vld [vmem:[%s11623_s27 + $0x160] sm:$0xff]  ;;  %v11390_v15 = vld [vmem:[%s11623_s27 + $0x188] sm:$0xff] }
 0x1ff   : > { %v13862_v39 = vpop.permute.xlu0 %836  ;;  %v10493_v20 = vpop.eup %10492  ;;  %10504 = vpow2.f32 %v8879_v49  ;;  %v8880_v42 = vmul.f32 -1.442695, %v13866_v29  ;;  %8809 = vmatmul.mubr.msk.bf16.gmra.mrb[236].mxu0 %vm2617_vm1, %v10246_v34  ;;  %vm990_vm5 = vcmp.eq.s32.totalorder %v11822_v7, %v13838_v31 }
 0x200   : > { %v13875_v62 = vpop.permute.xlu1 %827  ;;  %v13884_v35 = vmul.f32 %v10493_v20, %v13661_v10  ;;  %3449 = vmatprep.mubr.bf16.mxu0 %v16609_v38  ;;  %v10495_v46 = vpop.eup %10494  ;;  %v10247_v20 = vld [vmem:[%s11632_s16 + $0x1e0] sm:$0xff]  }
 0x201   : > { %10506 = vpow2.f32 %v8880_v42  ;;  %v10497_v34 = vpop.eup %10496  ;;  %v13897_v10 = vmul.f32 %v10495_v46, %v13692_v17  ;;  %v3181_v49 = vpop.f32.mrb[132].mxu0  ;;  %v8522_v17 = vsel %vm978_vm7, 1.0, %v16606_v1  ;;  %vm992_vm6 = vcmp.eq.s32.totalorder %v11822_v7, %v13875_v62 }
 0x202   : > { %16701 = vst [vmem:[#allocation114_spill] sm:$0xff] %v13884_v35  ;;  %1464 = vperm.xlu1 %10169, %v11389_v55   ;;  %1479 = vperm.xlu0 %10168, %v11390_v15   ;;  %v13905_v42 = vadd.f32 %v13323_v44, %v3181_v49  ;;  %v13907_v40 = vpop.f32.mrb[133].mxu0  ;;  %v8524_v15 = vsel %vm980_vm8, 1.0, %v16606_v1  ;;  %v8521_v55 = vsel %vm977_vm9, 1.0, %v16606_v1  ;;  %vm989_vm7 = vcmp.eq.s32.totalorder %v11822_v7, %v13768_v51 }
 0x203   : > { %v13890_v60 = vpop.permute.xlu0 %842  ;;  %9667 = vmatmul.mubr.msk.bf16.gmra.mrb[24].mxu1 %vm4561_vm4, %v1312_v9  ;;  %16702 = vst [vmem:[#allocation115_spill] sm:$0xff] %v13897_v10  ;;  %v4071_v9 = vadd.f32 1.0, %v10497_v34  ;;  %16703 = vst [vmem:[#allocation116_spill] sm:$0xff] %v13907_v40  ;;  %v10499_v45 = vpop.eup %10498  ;;  %vm991_vm8 = vcmp.eq.s32.totalorder %v11822_v7, %v13801_v27  ;;  %v8533_v31 = vsel %vm989_vm7, 1.0, %v16606_v1 }
 0x204   : > { %v13899_v4 = vpop.permute.xlu1 %833  ;;  %9670 = vmatprep.mubr.msk.bf16.mxu1 %vm4561_vm4, %v1313_v3  ;;  %v3185_v46 = vpop.f32.mrb[134].mxu0  ;;  %v11391_v3 = vld [vmem:[%s11623_s27 + $0x170] sm:$0xff]  ;;  %v4072_v49 = vadd.f32 1.0, %v10499_v45  ;;  %v8881_v40 = vmul.f32 -1.442695, %v13905_v42  ;;  %v1314_v45 = vpack.c.bf16 %v8522_v17, %v8521_v55  ;;  %v8535_v62 = vsel %vm991_vm8, 1.0, %v16606_v1 }
 0x205   : > { %10508 = vrcp.f32 %v4071_v9  ;;  %v13926_v13 = vpop.f32.mrb[135].mxu0  ;;  %v13936_v32 = vadd.f32 %v13323_v44, %v3185_v46  ;;  %v8523_v9 = vsel %vm979_vm10, 1.0, %v16606_v1  ;;  %v11393_v46 = vld [vmem:[%s11623_s27 + $0x180] sm:$0xff]  ;;  %vm994_vm9 = vcmp.eq.s32.totalorder %v11822_v7, %v13899_v4 }
 0x206   : > { %1470 = vperm.xlu1 %10169, %v11391_v3   ;;  %16704 = vst [vmem:[#allocation117_spill] sm:$0xff] %v13926_v13  ;;  %1485 = vperm.xlu0 %10168, %v11392_v21   ;;  %v10501_v3 = vpop.eup %10500  ;;  %10510 = vrcp.f32 %v4072_v49  ;;  %v1315_v13 = vpack.c.bf16 %v8524_v15, %v8523_v9  ;;  %vm993_vm10 = vcmp.eq.s32.totalorder %v11822_v7, %v13832_v16 }
 0x207   : > { %v13923_v34 = vpop.permute.xlu0 %848  ;;  %v13943_v21 = vmul.f32 %v10501_v3, %v13722_v30  ;;  %8810 = vmatmul.mubr.msk.bf16.gmra.mrb[240].mxu0 %vm2617_vm1, %v10247_v20  ;;  %10512 = vpow2.f32 %v8881_v40  ;;  %v8882_v10 = vmul.f32 -1.442695, %v13936_v32  ;;  %v11394_v20 = vld [vmem:[%s11623_s27 + $0x1a8] sm:$0xff] }
 0x208   : > { %v13933_v35 = vpop.permute.xlu1 %839  ;;  %v10503_v52 = vpop.eup %10502  ;;  %3459 = vmatprep.mubr.bf16.mxu0 %v16609_v38  ;;  %v10248_v3 = vld [vmem:[%s11632_s16 + $0x1e8] sm:$0xff]  }
 0x209   : > { %16705 = vst [vmem:[#allocation118_spill] sm:$0xff] %v13943_v21  ;;  %v10505_v6 = vpop.eup %10504  ;;  %v13952_v37 = vmul.f32 %v10503_v52, %v13744_v12  ;;  %10514 = vpow2.f32 %v8882_v10  ;;  %v3191_v55 = vpop.f32.mrb[136].mxu0  ;;  %v8528_v52 = vsel %vm984_vm12, 1.0, %v16606_v1  ;;  %vm995_vm12 = vcmp.eq.s32.totalorder %v11822_v7, %v13862_v39 }
 0x20a   : > { %1476 = vperm.xlu1 %10169, %v11393_v46   ;;  %1491 = vperm.xlu0 %10168, %v11394_v20   ;;  %v4073_v17 = vadd.f32 1.0, %v10505_v6  ;;  %v13966_v12 = vadd.f32 %v13323_v44, %v3191_v55  ;;  %v13968_v49 = vpop.f32.mrb[137].mxu0 }
 0x20b   : > { %16706 = vst [vmem:[#allocation119_spill] sm:$0xff] %v13952_v37  ;;  %v13954_v30 = vpop.permute.xlu0 %854  ;;  %9671 = vmatmul.mubr.msk.bf16.gmra.mrb[28].mxu1 %vm4561_vm4, %v1314_v45  ;;  %v10507_v15 = vpop.eup %10506  ;;  %16707 = vst [vmem:[#allocation120_spill] sm:$0xff] %v13968_v49  ;;  %v11395_v45 = vld [vmem:[%s11623_s27 + $0x190] sm:$0xff] }
 0x20c   : > { %v13960_v40 = vpop.permute.xlu1 %845  ;;  %9674 = vmatprep.mubr.msk.bf16.mxu1 %vm4561_vm4, %v1315_v13  ;;  %v8526_v13 = vsel %vm982_vm11, 1.0, %v16606_v1  ;;  %10516 = vrcp.f32 %v4073_v17  ;;  %v4074_v6 = vadd.f32 1.0, %v10507_v15  ;;  %v3195_v10 = vpop.f32.mrb[138].mxu0  ;;  %v8883_v20 = vmul.f32 -1.442695, %v13966_v12  ;;  %v11396_v17 = vld [vmem:[%s11623_s27 + $0x1b8] sm:$0xff] }
 0x20d   : > { %v13988_v55 = vadd.f32 %v13323_v44, %v3195_v10  ;;  %v13990_v18 = vpop.f32.mrb[139].mxu0  ;;  %v8525_v15 = vsel %vm981_vm13, 1.0, %v16606_v1  ;;  %v8527_v10 = vsel %vm983_vm14, 1.0, %v16606_v1  ;;  %vm996_vm11 = vcmp.eq.s32.totalorder %v11822_v7, %v13933_v35 }
 0x20e   : > { %1482 = vperm.xlu1 %10169, %v11395_v45   ;;  %16708 = vst [vmem:[#allocation121_spill] sm:$0xff] %v13990_v18  ;;  %1497 = vperm.xlu0 %10168, %v11396_v17   ;;  %10518 = vrcp.f32 %v4074_v6  ;;  %v1316_v9 = vpack.c.bf16 %v8526_v13, %v8525_v15  ;;  %v1317_v17 = vpack.c.bf16 %v8528_v52, %v8527_v10  ;;  %v11397_v6 = vld [vmem:[%s11623_s27 + $0x1a0] sm:$0xff]  ;;  %v11398_v13 = vld [vmem:[%s11623_s27 + $0x1c8] sm:$0xff]  ;;  %v8540_v4 = vsel %vm996_vm11, 1.0, %v16606_v1 }
 0x20f   : > { %v13984_v46 = vpop.permute.xlu0 %860  ;;  %v10509_v41 = vpop.eup %10508  ;;  %10520 = vpow2.f32 %v8883_v20  ;;  %v8884_v18 = vmul.f32 -1.442695, %v13988_v55  ;;  %8811 = vmatmul.mubr.msk.bf16.gmra.mrb[244].mxu0 %vm2617_vm1, %v10248_v3  ;;  %vm999_vm14 = vcmp.eq.s32.totalorder %v11822_v7, %v13923_v34 }
 0x210   : > { %v13997_v45 = vpop.permute.xlu1 %851  ;;  %v14006_v28 = vmul.f32 %v10509_v41, %v13783_v5  ;;  %3469 = vmatprep.mubr.bf16.mxu0 %v16609_v38  ;;  %v10511_v49 = vpop.eup %10510  ;;  %v10249_v41 = vld [vmem:[%s11632_s16 + $0x1f0] sm:$0xff]  }
 0x211   : > { %10522 = vpow2.f32 %v8884_v18  ;;  %v10513_v3 = vpop.eup %10512  ;;  %v14019_v5 = vmul.f32 %v10511_v49, %v13814_v24  ;;  %v3201_v20 = vpop.f32.mrb[140].mxu0  ;;  %v8530_v24 = vsel %vm986_vm15, 1.0, %v16606_v1  ;;  %vm1001_vm15 = vcmp.eq.s32.totalorder %v11822_v7, %v13954_v30 }
 0x212   : > { %16709 = vst [vmem:[#allocation122_spill] sm:$0xff] %v14006_v28  ;;  %1488 = vperm.xlu1 %10169, %v11397_v6   ;;  %1503 = vperm.xlu0 %10168, %v11398_v13   ;;  %v14027_v18 = vadd.f32 %v13323_v44, %v3201_v20  ;;  %v14029_v15 = vpop.f32.mrb[141].mxu0  ;;  %v8532_v6 = vsel %vm988_vm0, 1.0, %v16606_v1  ;;  %v8529_v44 = vsel %vm985_vm2, 1.0, %v16606_v1  ;;  %vm998_vm0 = vcmp.eq.s32.totalorder %v11822_v7, %v13960_v40 }
 0x213   : > { %v14012_v0 = vpop.permute.xlu0 %866  ;;  %9675 = vmatmul.mubr.msk.bf16.gmra.mrb[32].mxu1 %vm4561_vm4, %v1316_v9  ;;  %16710 = vst [vmem:[#allocation123_spill] sm:$0xff] %v14019_v5  ;;  %v4075_v9 = vadd.f32 1.0, %v10513_v3  ;;  %16711 = vst [vmem:[#allocation124_spill] sm:$0xff] %v14029_v15  ;;  %v10515_v10 = vpop.eup %10514 }
 0x214   : > { %v14021_v52 = vpop.permute.xlu1 %857  ;;  %9678 = vmatprep.mubr.msk.bf16.mxu1 %vm4561_vm4, %v1317_v17  ;;  %v3205_v49 = vpop.f32.mrb[142].mxu0  ;;  %v11399_v17 = vld [vmem:[%s11623_s27 + $0x1b0] sm:$0xff]  ;;  %v4076_v3 = vadd.f32 1.0, %v10515_v10  ;;  %v8885_v20 = vmul.f32 -1.442695, %v14027_v18  ;;  %v8531_v10 = vsel %vm987_vm3, 1.0, %v16606_v1 }
 0x215   : > { %10524 = vrcp.f32 %v4075_v9  ;;  %v14048_v15 = vpop.f32.mrb[143].mxu0  ;;  %v14063_v9 = vadd.f32 %v14060_v43, %v3205_v49  ;;  %v1319_v5 = vpack.c.bf16 %v8532_v6, %v8531_v10  ;;  %v11402_v49 = vld [vmem:[%s11623_s27 + $0x1c0] sm:$0xff]  ;;  %v8536_v10 = vsel %vm992_vm6, 1.0, %v16606_v1 }
 0x216   : > { %1494 = vperm.xlu1 %10169, %v11399_v17   ;;  %16712 = vst [vmem:[#allocation125_spill] sm:$0xff] %v14048_v15  ;;  %1509 = vperm.xlu0 %10168, %v11400_v48   ;;  %v10517_v17 = vpop.eup %10516  ;;  %v1318_v48 = vpack.c.bf16 %v8530_v24, %v8529_v44  ;;  %10526 = vrcp.f32 %v4076_v3  ;;  %vm1002_vm8 = vcmp.eq.s32.totalorder %v11822_v7, %v14021_v52 }
 0x217   : > { %v14045_v13 = vpop.permute.xlu0 %872  ;;  %v14070_v36 = vmul.f32 %v10517_v17, %v13844_v54  ;;  %8812 = vmatmul.mubr.msk.bf16.gmra.mrb[248].mxu0 %vm2617_vm1, %v10249_v41  ;;  %10528 = vpow2.f32 %v8885_v20  ;;  %v8886_v21 = vmul.f32 -1.442695, %v14063_v9  ;;  %v11403_v54 = vld [vmem:[%s11623_s27 + $0x1e8] sm:$0xff]  ;;  %v11404_v17 = vld [vmem:[%s11623_s27 + $0x1d0] sm:$0xff] }
 0x218   : > { %v14055_v28 = vpop.permute.xlu1 %863  ;;  %v10519_v15 = vpop.eup %10518  ;;  %3479 = vmatprep.mubr.bf16.mxu0 %v16609_v38 }
 0x219   : > { %v10521_v37 = vpop.eup %10520  ;;  %v14079_v61 = vmul.f32 %v10519_v15, %v13866_v29  ;;  %10530 = vpow2.f32 %v8886_v21  ;;  %v3211_v24 = vpop.f32.mrb[144].mxu0 }
 0x21a   : > { %1500 = vperm.xlu1 %10169, %v11402_v49   ;;  %1515 = vperm.xlu0 %10168, %v11403_v54   ;;  %v4077_v38 = vadd.f32 1.0, %v10521_v37  ;;  %v14095_v15 = vadd.f32 %v14060_v43, %v3211_v24  ;;  %v14097_v6 = vpop.f32.mrb[145].mxu0  ;;  %v8534_v37 = vsel %vm990_vm5, 1.0, %v16606_v1  ;;  %v11405_v24 = vld [vmem:[%s11623_s27 + $0x1f8] sm:$0xff]  ;;  %vm1000_vm5 = vcmp.eq.s32.totalorder %v11822_v7, %v13997_v45 }
 0x21b   : > { %9679 = vmatmul.mubr.msk.bf16.gmra.mrb[36].mxu1 %vm4561_vm4, %v1318_v48  ;;  %v10523_v44 = vpop.eup %10522  ;;  %v14092_v29 = vpop.permute.xlu0 %878  ;;  %16713 = vst [vmem:[#allocation126_spill] sm:$0xff] %v14097_v6 }
 0x21c   : > { %v14085_v41 = vpop.permute.xlu1 %869  ;;  %9682 = vmatprep.mubr.msk.bf16.mxu1 %vm4561_vm4, %v1319_v5  ;;  %v10251_v5 = vld [vmem:[%s11632_s16 + $0x1f8] sm:$0xff]   ;;  %10532 = vrcp.f32 %v4077_v38  ;;  %v4078_v3 = vadd.f32 1.0, %v10523_v44  ;;  %v3215_v20 = vpop.f32.mrb[146].mxu0  ;;  %v8887_v48 = vmul.f32 -1.442695, %v14095_v15  ;;  %s8277_s16 = scalar_lea.sflag [#allocation3], %s15301_s24 }
 0x21d   : > { %v14113_v49 = vadd.f32 %v14060_v43, %v3215_v20  ;;  %v14115_v54 = vpop.f32.mrb[147].mxu0  ;;  %v1320_v20 = vpack.c.bf16 %v8534_v37, %v8533_v31  ;;  %v11406_v37 = vld [vmem:[%s11623_s27 + $0x1e0] sm:$0xff] }
 0x21e   : > { %1506 = vperm.xlu1 %10169, %v11404_v17   ;;  %16714 = vst [vmem:[#allocation127_spill] sm:$0xff] %v14115_v54  ;;  %1521 = vperm.xlu0 %10168, %v11405_v24   ;;  %10534 = vrcp.f32 %v4078_v3  ;;  %v1321_v24 = vpack.c.bf16 %v8536_v10, %v8535_v62  ;;  %v8537_v62 = vsel %vm993_vm10, 1.0, %v16606_v1  ;;  %vm1004_vm10 = vcmp.eq.s32.totalorder %v11822_v7, %v14055_v28 }
 0x21f   : > { %v10525_v44 = vpop.eup %10524  ;;  %10536 = vpow2.f32 %v8887_v48  ;;  %v8888_v17 = vmul.f32 -1.442695, %v14113_v49  ;;  %8813 = vmatmul.mubr.msk.bf16.gmra.mrb[252].mxu0 %vm2617_vm1, %v10251_v5  ;;  %vm997_vm1 = vcmp.eq.s32.totalorder %v11822_v7, %v13890_v60 }
 0x220   : > { %v14126_v38 = vpop.permute.xlu1 %875  ;;  %v1333_v51 = vpop.permute.xlu0 %1332  ;;  %v14137_v27 = vmul.f32 %v10525_v44, %v13905_v42  ;;  %v8538_v42 = vsel %vm994_vm9, 1.0, %v16606_v1  ;;  %v14176_v16 = vsel %vm997_vm1, 1.0, %v16606_v1  ;;  %vm1003_vm9 = vcmp.eq.s32.totalorder %v11822_v7, %v13984_v46 }
 0x221   : > { %v10527_v3 = vpop.eup %10526  ;;  %10538 = vpow2.f32 %v8888_v17  ;;  %v3221_v31 = vpop.f32.mrb[148].mxu0  ;;  %vm1715_vm13 = vcmp.eq.s32.totalorder %v11822_v7, %v1333_v51  ;;  %vm1005_vm1 = vcmp.eq.s32.totalorder %v11822_v7, %v14012_v0 }
 0x222   : > { %1512 = vperm.xlu1 %10169, %v11406_v37   ;;  %v10529_v5 = vpop.eup %10528  ;;  %v14150_v10 = vmul.f32 %v10527_v3, %v13936_v32  ;;  %v14166_v32 = vpop.f32.mrb[149].mxu0  ;;  %v11407_v3 = vld [vmem:[%s11623_s27 + $0x1f0] sm:$0xff]  ;;  %s16446_s27 = scalar_lea.hbm %s16531_s9, %s9224_s22 }
 0x223   : > { %9683 = vmatmul.mubr.msk.bf16.gmra.mrb[40].mxu1 %vm4561_vm4, %v1320_v20  ;;  %v4079_v44 = vadd.f32 1.0, %v10529_v5  ;;  %v14164_v20 = vadd.f32 %v14060_v43, %v3221_v31  ;;  %16715 = vst [vmem:[#allocation128_spill] sm:$0xff] %v14166_v32  ;;  %v10531_v37 = vpop.eup %10530  ;;  %v3225_v35 = vpop.f32.mrb[150].mxu0  ;;  %v1322_v31 = vpack.c.bf16 %v8538_v42, %v8537_v62 }
 0x224   : > { %v14152_v48 = vpop.permute.xlu1 %881  ;;  %9686 = vmatprep.mubr.msk.bf16.mxu1 %vm4561_vm4, %v1321_v24  ;;  %v1342_v17 = vpop.permute.xlu0 %1341  ;;  %v8539_v24 = vsel %vm995_vm12, 1.0, %v16606_v1  ;;  %v4080_v21 = vadd.f32 1.0, %v10531_v37 }
 0x225   : > { %10540 = vrcp.f32 %v4079_v44  ;;  %v8889_v39 = vmul.f32 -1.442695, %v14164_v20  ;;  %v14183_v54 = vpop.f32.mrb[151].mxu0  ;;  %v1323_v60 = vpack.c.bf16 %v8540_v4, %v8539_v24  ;;  %v8555_v44 = vsel %vm1715_vm13, 1.0, %v16606_v1 }
 0x226   : > { %1518 = vperm.xlu1 %10169, %v11407_v3   ;;  %16716 = vst [vmem:[#allocation129_spill] sm:$0xff] %v14183_v54  ;;  %v10533_v6 = vpop.eup %10532  ;;  %v14190_v3 = vadd.f32 %v14060_v43, %v3225_v35  ;;  %10542 = vrcp.f32 %v4080_v21  ;;  %vm1718_vm3 = vcmp.eq.s32.totalorder %v11822_v7, %v1342_v17 }
 0x227   : > { %v14195_v42 = vmul.f32 %v10533_v6, %v13966_v12  ;;  %10544 = vpow2.f32 %v8889_v39  ;;  %v8543_v12 = vsel %vm999_vm14, 1.0, %v16606_v1  ;;  %v14208_v6 = vsel %vm1001_vm15, 1.0, %v16606_v1 }
 0x228   : > { %v10535_v37 = vpop.eup %10534  ;;  %v8890_v4 = vmul.f32 -1.442695, %v14190_v3  ;;  %vm1006_vm15 = vcmp.eq.s32.totalorder %v11822_v7, %v14085_v41 }
 0x229   : > { %v1336_v62 = vpop.permute.xlu1 %1335  ;;  %v1348_v30 = vpop.permute.xlu0 %1347  ;;  %v14211_v21 = vmul.f32 %v10535_v37, %v13988_v55  ;;  %v8542_v55 = vsel %vm998_vm0, 1.0, %v16606_v1  ;;  %vm1008_vm0 = vcmp.eq.s32.totalorder %v11822_v7, %v14126_v38 }
 0x22a   : > { %vm1716_vm2 = vcmp.eq.s32.totalorder %v11822_v7, %v1336_v62  ;;  %v10537_v24 = vpop.eup %10536  ;;  %10546 = vpow2.f32 %v8890_v4  ;;  %v3231_v39 = vpop.f32.mrb[152].mxu0  ;;  %vm1720_vm7 = vcmp.eq.s32.totalorder %v11822_v7, %v1348_v30 }
 0x22b   : > { %9687 = vmatmul.mubr.msk.bf16.gmra.mrb[44].mxu1 %vm4561_vm4, %v1322_v31  ;;  %v8556_v51 = vsel %vm1716_vm2, 1.0, %v16606_v1  ;;  %v4081_v35 = vadd.f32 1.0, %v10537_v24  ;;  %v10539_v62 = vpop.eup %10538  ;;  %v14223_v37 = vadd.f32 %v14060_v43, %v3231_v39  ;;  %v14225_v31 = vpop.f32.mrb[153].mxu0 }
 0x22c   : > { %9690 = vmatprep.mubr.msk.bf16.mxu1 %vm4561_vm4, %v1323_v60  ;;  %v2099_v34 = vpack.c.bf16 %v8556_v51, %v8555_v44  ;;  %16717 = vst [vmem:[#allocation130_spill] sm:$0xff] %v14225_v31  ;;  %v8558_v60 = vsel %vm1718_vm3, 1.0, %v16606_v1  ;;  %v4082_v44 = vadd.f32 1.0, %v10539_v62  ;;  %v3235_v24 = vpop.f32.mrb[154].mxu0  ;;  %v8544_v51 = vsel %vm1000_vm5, 1.0, %v16606_v1 }
 0x22d   : > { %v1339_v5 = vpop.permute.xlu1 %1338  ;;  %10548 = vrcp.f32 %v4081_v35  ;;  %v1354_v40 = vpop.permute.xlu0 %1353  ;;  %v8891_v17 = vmul.f32 -1.442695, %v14223_v37  ;;  %v14241_v39 = vadd.f32 %v14060_v43, %v3235_v24  ;;  %v1325_v31 = vpack.c.bf16 %v8544_v51, %v8543_v12 }
 0x22e   : > { %vm1717_vm6 = vcmp.eq.s32.totalorder %v11822_v7, %v1339_v5  ;;  %9442 = vmatprep.mubr.msk.bf16.mxu0 %vm4561_vm4, %v2099_v34  ;;  %v14243_v35 = vpop.f32.mrb[155].mxu0  ;;  %v1324_v5 = vpack.c.bf16 %v8542_v55, %v14176_v16  ;;  %10550 = vrcp.f32 %v4082_v44  ;;  %v8546_v44 = vsel %vm1002_vm8, 1.0, %v16606_v1 }
 0x22f   : > { %16718 = vst [vmem:[#allocation131_spill] sm:$0xff] %v14243_v35  ;;  %v8557_v62 = vsel %vm1717_vm6, 1.0, %v16606_v1  ;;  %v10541_v4 = vpop.eup %10540  ;;  %10552 = vpow2.f32 %v8891_v17  ;;  %v8892_v45 = vmul.f32 -1.442695, %v14241_v39  ;;  %v8560_v35 = vsel %vm1720_vm7, 1.0, %v16606_v1 }
 0x230   : > { %v2100_v34 = vpack.c.bf16 %v8558_v60, %v8557_v62  ;;  %v14258_v16 = vmul.f32 %v10541_v4, %v14027_v18  ;;  %v10543_v60 = vpop.eup %10542  ;;  %vm1722_vm12 = vcmp.eq.s32.totalorder %v11822_v7, %v1354_v40  ;;  %v8547_v12 = vsel %vm1003_vm9, 1.0, %v16606_v1 }
 0x231   : > { %v1345_v24 = vpop.permute.xlu1 %1344  ;;  %v1360_v55 = vpop.permute.xlu0 %1359  ;;  %10554 = vpow2.f32 %v8892_v45  ;;  %v14276_v4 = vmul.f32 %v10543_v60, %v14063_v9  ;;  %v8548_v17 = vsel %vm1004_vm10, 1.0, %v16606_v1  ;;  %v1326_v45 = vpack.c.bf16 %v8546_v44, %v14208_v6 }
 0x232   : > { %vm1719_vm11 = vcmp.eq.s32.totalorder %v11822_v7, %v1345_v24  ;;  %9443 = vmatmul.mubr.msk.bf16.vlgmr.msra.gmra.mrb[0].mxu0 %vm4561_vm4, %v2100_v34  ;;  %v10545_v18 = vpop.eup %10544  ;;  %v3241_v52 = vpop.f32.mrb[156].mxu0  ;;  %vm1724_vm13 = vcmp.eq.s32.totalorder %v11822_v7, %v1360_v55  ;;  %v8562_v28 = vsel %vm1722_vm12, 1.0, %v16606_v1  ;;  %vm1007_vm5 = vcmp.eq.s32.totalorder %v11822_v7, %v14045_v13 }
 0x233   : > { %9691 = vmatmul.mubr.msk.bf16.gmra.mrb[48].mxu1 %vm4561_vm4, %v1324_v5  ;;  %v8559_v30 = vsel %vm1719_vm11, 1.0, %v16606_v1  ;;  %v4083_v62 = vadd.f32 1.0, %v10545_v18  ;;  %v14284_v5 = vadd.f32 %v14060_v43, %v3241_v52  ;;  %v14286_v46 = vpop.f32.mrb[157].mxu0  ;;  %v1327_v52 = vpack.c.bf16 %v8548_v17, %v8547_v12 }
 0x234   : > { %9694 = vmatprep.mubr.msk.bf16.mxu1 %vm4561_vm4, %v1325_v31  ;;  %v2101_v51 = vpack.c.bf16 %v8560_v35, %v8559_v30  ;;  %16719 = vst [vmem:[#allocation132_spill] sm:$0xff] %v14286_v46  ;;  %v10547_v9 = vpop.eup %10546  ;;  %v3245_v31 = vpop.f32.mrb[158].mxu0  ;;  %vm1009_vm8 = vcmp.eq.s32.totalorder %v11822_v7, %v14092_v29  ;;  %vm1010_vm9 = vcmp.eq.s32.totalorder %v11822_v7, %v14152_v48 }
 0x235   : > { %v1351_v34 = vpop.permute.xlu1 %1350  ;;  %v1366_v35 = vpop.permute.xlu0 %1365  ;;  %10556 = vrcp.f32 %v4083_v62  ;;  %v4084_v60 = vadd.f32 1.0, %v10547_v9  ;;  %v8893_v30 = vmul.f32 -1.442695, %v14284_v5  ;;  %v14299_v18 = vadd.f32 %v14060_v43, %v3245_v31 }
 0x236   : > { %vm1721_vm14 = vcmp.eq.s32.totalorder %v11822_v7, %v1351_v34  ;;  %9446 = vmatprep.mubr.msk.bf16.mxu0 %vm4561_vm4, %v2101_v51  ;;  %v14301_v6 = vpop.f32.mrb[159].mxu0  ;;  %v8564_v51 = vsel %vm1724_vm13, 1.0, %v16606_v1  ;;  %vm1726_vm3 = vcmp.eq.s32.totalorder %v11822_v7, %v1366_v35 }
 0x237   : > { %16720 = vst [vmem:[#allocation133_spill] sm:$0xff] %v14301_v6  ;;  %v10549_v44 = vpop.eup %10548  ;;  %v8561_v40 = vsel %vm1721_vm14, 1.0, %v16606_v1  ;;  %10558 = vrcp.f32 %v4084_v60  ;;  %v8894_v34 = vmul.f32 -1.442695, %v14299_v18  ;;  %v8550_v60 = vsel %vm1006_vm15, 1.0, %v16606_v1 }
 0x238   : > { %v14310_v62 = vmul.f32 %v10549_v44, %v14095_v15  ;;  %v2102_v9 = vpack.c.bf16 %v8562_v28, %v8561_v40  ;;  %v10551_v24 = vpop.eup %10550  ;;  %10560 = vpow2.f32 %v8893_v30  ;;  %v8549_v15 = vsel %vm1005_vm1, 1.0, %v16606_v1 }
 0x239   : > { %v1357_v31 = vpop.permute.xlu1 %1356  ;;  %v1372_v12 = vpop.permute.xlu0 %1371  ;;  %v14322_v17 = vmul.f32 %v10551_v24, %v14113_v49  ;;  %10562 = vpow2.f32 %v8894_v34  ;;  %v8566_v41 = vsel %vm1726_vm3, 1.0, %v16606_v1 }
 0x23a   : > { %vm1723_vm2 = vcmp.eq.s32.totalorder %v11822_v7, %v1357_v31  ;;  %v10553_v55 = vpop.eup %10552  ;;  %9447 = vmatmul.mubr.msk.bf16.gmra.mrb[4].mxu0 %vm4561_vm4, %v2102_v9  ;;  %v3251_v49 = vpop.f32.mrb[160].mxu0  ;;  %vm1728_vm7 = vcmp.eq.s32.totalorder %v11822_v7, %v1372_v12  ;;  %v8551_v31 = vsel %vm1007_vm5, 1.0, %v16606_v1 }
 0x23b   : > { %9695 = vmatmul.mubr.msk.bf16.gmra.mrb[52].mxu1 %vm4561_vm4, %v1326_v45  ;;  %v8563_v28 = vsel %vm1723_vm2, 1.0, %v16606_v1  ;;  %v4085_v0 = vadd.f32 1.0, %v10553_v55  ;;  %v10555_v30 = vpop.eup %10554  ;;  %v8552_v45 = vsel %vm1008_vm0, 1.0, %v16606_v1  ;;  %v14339_v44 = vadd.f32 %v14060_v43, %v3251_v49  ;;  %v14341_v40 = vpop.f32.mrb[161].mxu0 }
 0x23c   : > { %9698 = vmatprep.mubr.msk.bf16.mxu1 %vm4561_vm4, %v1327_v52  ;;  %v2103_v24 = vpack.c.bf16 %v8564_v51, %v8563_v28  ;;  %16721 = vst [vmem:[#allocation134_spill] sm:$0xff] %v14341_v40  ;;  %v4086_v51 = vadd.f32 1.0, %v10555_v30  ;;  %v3255_v9 = vpop.f32.mrb[162].mxu0  ;;  %v1328_v49 = vpack.c.bf16 %v8550_v60, %v8549_v15 }
 0x23d   : > { %v1363_v34 = vpop.permute.xlu1 %1362  ;;  %10564 = vrcp.f32 %v4085_v0  ;;  %v1378_v38 = vpop.permute.xlu0 %1377  ;;  %v8895_v35 = vmul.f32 -1.442695, %v14339_v44  ;;  %v14357_v55 = vadd.f32 %v14060_v43, %v3255_v9  ;;  %v8568_v9 = vsel %vm1728_vm7, 1.0, %v16606_v1 }
 0x23e   : > { %vm1725_vm6 = vcmp.eq.s32.totalorder %v11822_v7, %v1363_v34  ;;  %9450 = vmatprep.mubr.msk.bf16.mxu0 %vm4561_vm4, %v2103_v24  ;;  %v14359_v28 = vpop.f32.mrb[163].mxu0  ;;  %10566 = vrcp.f32 %v4086_v51  ;;  %v1329_v34 = vpack.c.bf16 %v8552_v45, %v8551_v31  ;;  %vm1730_vm11 = vcmp.eq.s32.totalorder %v11822_v7, %v1378_v38 }
 0x23f   : > { %16722 = vst [vmem:[#allocation135_spill] sm:$0xff] %v14359_v28  ;;  %v8565_v0 = vsel %vm1725_vm6, 1.0, %v16606_v1  ;;  %v10557_v30 = vpop.eup %10556  ;;  %10568 = vpow2.f32 %v8895_v35  ;;  %v8896_v13 = vmul.f32 -1.442695, %v14357_v55  ;;  %v8554_v35 = vsel %vm1010_vm9, 1.0, %v16606_v1 }
 0x240   : > { %v2104_v24 = vpack.c.bf16 %v8566_v41, %v8565_v0  ;;  %v14371_v28 = vmul.f32 %v10557_v30, %v14164_v20  ;;  %v8553_v20 = vsel %vm1009_vm8, 1.0, %v16606_v1 }
 0x241   : > { %v1369_v52 = vpop.permute.xlu1 %1368  ;;  %v1384_v15 = vpop.permute.xlu0 %1383  ;;  %10570 = vpow2.f32 %v8896_v13 }
 0x242   : > { %vm1727_vm10 = vcmp.eq.s32.totalorder %v11822_v7, %v1369_v52  ;;  %v10559_v60 = vpop.eup %10558  ;;  %9451 = vmatmul.mubr.msk.bf16.gmra.mrb[8].mxu0 %vm4561_vm4, %v2104_v24  ;;  %v3261_v52 = vpop.f32.mrb[164].mxu0  ;;  %vm1732_vm1 = vcmp.eq.s32.totalorder %v11822_v7, %v1384_v15  ;;  %v16725_v15 = vpack.c.bf16 %v12154_v33, %v12144_v14 }
 0x243   : > { %9699 = vmatmul.mubr.msk.bf16.gmra.mrb[56].mxu1 %vm4561_vm4, %v1328_v49  ;;  %v8567_v45 = vsel %vm1727_vm10, 1.0, %v16606_v1  ;;  %v10561_v12 = vpop.eup %10560  ;;  %v14383_v41 = vmul.f32 %v10559_v60, %v14190_v3  ;;  %v14391_v49 = vadd.f32 %v14060_v43, %v3261_v52  ;;  %v14393_v24 = vpop.f32.mrb[165].mxu0  ;;  %v8570_v3 = vsel %vm1730_vm11, 1.0, %v16606_v1 }
 0x244   : > { %9702 = vmatprep.mubr.msk.bf16.mxu1 %vm4561_vm4, %v1329_v34  ;;  %v2105_v51 = vpack.c.bf16 %v8568_v9, %v8567_v45  ;;  %v10563_v31 = vpop.eup %10562  ;;  %v4087_v0 = vadd.f32 1.0, %v10561_v12  ;;  %16723 = vst [vmem:[#allocation136_spill] sm:$0xff] %v14393_v24  ;;  %v3265_v34 = vpop.f32.mrb[166].mxu0  ;;  %v1330_v52 = vpack.c.bf16 %v8554_v35, %v8553_v20 }
 0x245   : > { %v1375_v29 = vpop.permute.xlu1 %1374  ;;  %v4088_v30 = vadd.f32 1.0, %v10563_v31  ;;  %v1390_v48 = vpop.permute.xlu0 %1389  ;;  %v8897_v9 = vmul.f32 -1.442695, %v14391_v49  ;;  %v14405_v60 = vadd.f32 %v14060_v43, %v3265_v34  ;;  %v8572_v34 = vsel %vm1732_vm1, 1.0, %v16606_v1 }
 0x246   : > { %vm1729_vm12 = vcmp.eq.s32.totalorder %v11822_v7, %v1375_v29  ;;  %9454 = vmatprep.mubr.msk.bf16.mxu0 %vm4561_vm4, %v2105_v51  ;;  %10572 = vrcp.f32 %v4087_v0  ;;  %v14407_v38 = vpop.f32.mrb[167].mxu0  ;;  %vm1734_vm14 = vcmp.eq.s32.totalorder %v11822_v7, %v1390_v48 }
 0x247   : > { %16724 = vst [vmem:[#allocation137_spill] sm:$0xff] %v14407_v38  ;;  %v8569_v45 = vsel %vm1729_vm12, 1.0, %v16606_v1  ;;  %v10565_v12 = vpop.eup %10564  ;;  %10574 = vrcp.f32 %v4088_v30  ;;  %v8898_v29 = vmul.f32 -1.442695, %v14405_v60 }
 0x248   : > { %v2106_v51 = vpack.c.bf16 %v8570_v3, %v8569_v45  ;;  %v14411_v31 = vmul.f32 %v10565_v12, %v14223_v37  ;;  %10576 = vpow2.f32 %v8897_v9  ;;  %v10567_v13 = vpop.eup %10566 }
 0x249   : > { %v1381_v0 = vpop.permute.xlu1 %1380  ;;  %v1396_v38 = vpop.permute.xlu0 %1395  ;;  %v14420_v35 = vmul.f32 %v10567_v13, %v14241_v39  ;;  %10578 = vpow2.f32 %v8898_v29 }
 0x24a   : > { %vm1731_vm13 = vcmp.eq.s32.totalorder %v11822_v7, %v1381_v0  ;;  %v10569_v20 = vpop.eup %10568  ;;  %9455 = vmatmul.mubr.msk.bf16.gmra.mrb[12].mxu0 %vm4561_vm4, %v2106_v51  ;;  %v3271_v30 = vpop.f32.mrb[168].mxu0  ;;  %vm1736_vm0 = vcmp.eq.s32.totalorder %v11822_v7, %v1396_v38 }
 0x24b   : > { %9703 = vmatmul.mubr.msk.bf16.gmra.mrb[60].mxu1 %vm4561_vm4, %v1330_v52  ;;  %v8571_v37 = vsel %vm1731_vm13, 1.0, %v16606_v1  ;;  %v4089_v3 = vadd.f32 1.0, %v10569_v20  ;;  %v10571_v45 = vpop.eup %10570  ;;  %v14429_v12 = vadd.f32 %v14060_v43, %v3271_v30  ;;  %v14431_v39 = vpop.f32.mrb[169].mxu0  ;;  %v8574_v52 = vsel %vm1734_vm14, 1.0, %v16606_v1 }
 0x24c   : > { %9722 = vmatprep.mubr.bf16.mxu1 %v16725_v15  ;;  %v2107_v9 = vpack.c.bf16 %v8572_v34, %v8571_v37  ;;  %16726 = vst [vmem:[#allocation138_spill] sm:$0xff] %v14431_v39  ;;  %v4090_v14 = vadd.f32 1.0, %v10571_v45  ;;  %v3275_v33 = vpop.f32.mrb[170].mxu0 }
 0x24d   : > { %v1387_v13 = vpop.permute.xlu1 %1386  ;;  %10580 = vrcp.f32 %v4089_v3  ;;  %v1402_v29 = vpop.permute.xlu0 %1401  ;;  %v8899_v0 = vmul.f32 -1.442695, %v14429_v12  ;;  %v14443_v34 = vadd.f32 %v14060_v43, %v3275_v33 }
 0x24e   : > { %vm1733_vm15 = vcmp.eq.s32.totalorder %v11822_v7, %v1387_v13  ;;  %9458 = vmatprep.mubr.msk.bf16.mxu0 %vm4561_vm4, %v2107_v9  ;;  %v14445_v48 = vpop.f32.mrb[171].mxu0  ;;  %10582 = vrcp.f32 %v4090_v14  ;;  %v8576_v9 = vsel %vm1736_vm0, 1.0, %v16606_v1  ;;  %vm1738_vm3 = vcmp.eq.s32.totalorder %v11822_v7, %v1402_v29 }
 0x24f   : > { %16727 = vst [vmem:[#allocation139_spill] sm:$0xff] %v14445_v48  ;;  %v8573_v20 = vsel %vm1733_vm15, 1.0, %v16606_v1  ;;  %10584 = vpow2.f32 %v8899_v0  ;;  %v8900_v3 = vmul.f32 -1.442695, %v14443_v34 }
 0x250   : > { %v2108_v37 = vpack.c.bf16 %v8574_v52, %v8573_v20  ;;  %v10573_v15 = vpop.eup %10572  ;;  %v16728_v52 = vpack.c.bf16 %v12202_v56, %v12193_v25  ;;  %v8578_v56 = vsel %vm1738_vm3, 1.0, %v16606_v1 }
 0x251   : > { %v1393_v30 = vpop.permute.xlu1 %1392  ;;  %v10575_v38 = vpop.eup %10574  ;;  %v14451_v45 = vmul.f32 %v10573_v15, %v14284_v5  ;;  %10586 = vpow2.f32 %v8900_v3  ;;  %v16729_v5 = vpack.c.bf16 %v12250_v53, %v12241_v11 }
 0x252   : > { %vm1735_vm2 = vcmp.eq.s32.totalorder %v11822_v7, %v1393_v30  ;;  %v1408_v13 = vpop.permute.xlu0 %1407  ;;  %v10577_v33 = vpop.eup %10576  ;;  %v14456_v14 = vmul.f32 %v10575_v38, %v14299_v18  ;;  %9459 = vmatmul.mubr.msk.bf16.gmra.mrb[16].mxu0 %vm4561_vm4, %v2108_v37 }
 0x253   : > { %9723 = vmatmul.mubr.bf16.vlgmr.msra.gmra.mrb[64].mxu1 %v16728_v52  ;;  %v8575_v0 = vsel %vm1735_vm2, 1.0, %v16606_v1  ;;  %v4091_v20 = vadd.f32 1.0, %v10577_v33  ;;  %v3281_v15 = vpop.f32.mrb[172].mxu0  ;;  %v10579_v51 = vpop.eup %10578  ;;  %vm1740_vm6 = vcmp.eq.s32.totalorder %v11822_v7, %v1408_v13 }
 0x254   : > { %9726 = vmatprep.mubr.bf16.mxu1 %v16729_v5  ;;  %v2109_v30 = vpack.c.bf16 %v8576_v9, %v8575_v0  ;;  %v14467_v18 = vadd.f32 %v14060_v43, %v3281_v15  ;;  %v14469_v38 = vpop.f32.mrb[173].mxu0  ;;  %v4092_v11 = vadd.f32 1.0, %v10579_v51  ;;  %v8580_v15 = vsel %vm1740_vm6, 1.0, %v16606_v1 }
 0x255   : > { %16730 = vst [vmem:[#allocation140_spill] sm:$0xff] %v14469_v38  ;;  %v1399_v25 = vpop.permute.xlu1 %1398  ;;  %10588 = vrcp.f32 %v4091_v20  ;;  %v3285_v53 = vpop.f32.mrb[174].mxu0 }
 0x256   : > { %vm1737_vm5 = vcmp.eq.s32.totalorder %v11822_v7, %v1399_v25  ;;  %9462 = vmatprep.mubr.msk.bf16.mxu0 %vm4561_vm4, %v2109_v30  ;;  %v1414_v3 = vpop.permute.xlu0 %1413  ;;  %v8901_v9 = vmul.f32 -1.442695, %v14467_v18  ;;  %v14481_v33 = vadd.f32 %v14060_v43, %v3285_v53  ;;  %v14483_v29 = vpop.f32.mrb[175].mxu0  ;;  %10590 = vrcp.f32 %v4092_v11 }
 0x257   : > { %16731 = vst [vmem:[#allocation141_spill] sm:$0xff] %v14483_v29  ;;  %v8577_v52 = vsel %vm1737_vm5, 1.0, %v16606_v1  ;;  %v10581_v0 = vpop.eup %10580  ;;  %vm1742_vm8 = vcmp.eq.s32.totalorder %v11822_v7, %v1414_v3  ;;  %v16733_v11 = vpack.c.bf16 %v12356_v50, %v12341_v23 }
 0x258   : > { %v2110_v51 = vpack.c.bf16 %v8578_v56, %v8577_v52  ;;  %v14487_v5 = vmul.f32 %v10581_v0, %v14339_v44  ;;  %10592 = vpow2.f32 %v8901_v9  ;;  %v8902_v20 = vmul.f32 -1.442695, %v14481_v33  ;;  %v10583_v30 = vpop.eup %10582 }
 0x259   : > { %v1405_v13 = vpop.permute.xlu1 %1404  ;;  %v10585_v53 = vpop.eup %10584  ;;  %v14494_v37 = vmul.f32 %v10583_v30, %v14357_v55  ;;  %v16732_v44 = vpack.c.bf16 %v12299_v59, %v12290_v63  ;;  %v8582_v59 = vsel %vm1742_vm8, 1.0, %v16606_v1 }
 0x25a   : > { %vm1739_vm7 = vcmp.eq.s32.totalorder %v11822_v7, %v1405_v13  ;;  %v1420_v25 = vpop.permute.xlu0 %1419  ;;  %10594 = vpow2.f32 %v8902_v20  ;;  %9463 = vmatmul.mubr.msk.bf16.gmra.mrb[20].mxu0 %vm4561_vm4, %v2110_v51  ;;  %v4093_v9 = vadd.f32 1.0, %v10585_v53  ;;  %v3291_v52 = vpop.f32.mrb[176].mxu0 }
 0x25b   : > { %9727 = vmatmul.mubr.bf16.gmra.mrb[68].mxu1 %v16732_v44  ;;  %v8579_v56 = vsel %vm1739_vm7, 1.0, %v16606_v1  ;;  %v10587_v13 = vpop.eup %10586  ;;  %v14505_v55 = vadd.f32 %v14060_v43, %v3291_v52  ;;  %v14507_v30 = vpop.f32.mrb[177].mxu0  ;;  %vm1744_vm10 = vcmp.eq.s32.totalorder %v11822_v7, %v1420_v25 }
 0x25c   : > { %9730 = vmatprep.mubr.bf16.mxu1 %v16733_v11  ;;  %v2111_v0 = vpack.c.bf16 %v8580_v15, %v8579_v56  ;;  %16734 = vst [vmem:[#allocation142_spill] sm:$0xff] %v14507_v30  ;;  %10596 = vrcp.f32 %v4093_v9  ;;  %v4094_v23 = vadd.f32 1.0, %v10587_v13  ;;  %v3295_v50 = vpop.f32.mrb[178].mxu0 }
 0x25d   : > { %v1411_v63 = vpop.permute.xlu1 %1410  ;;  %v8903_v15 = vmul.f32 -1.442695, %v14505_v55  ;;  %v14519_v53 = vadd.f32 %v14060_v43, %v3295_v50  ;;  %v14521_v3 = vpop.f32.mrb[179].mxu0 }
 0x25e   : > { %vm1741_vm9 = vcmp.eq.s32.totalorder %v11822_v7, %v1411_v63  ;;  %9466 = vmatprep.mubr.msk.bf16.mxu0 %vm4561_vm4, %v2111_v0  ;;  %v1426_v20 = vpop.permute.xlu0 %1425  ;;  %16735 = vst [vmem:[#allocation143_spill] sm:$0xff] %v14521_v3  ;;  %10598 = vrcp.f32 %v4094_v23  ;;  %v8584_v0 = vsel %vm1744_vm10, 1.0, %v16606_v1  ;;  %v16737_v23 = vpack.c.bf16 %v12461_v8, %v12449_v22 }
 0x25f   : > { %v8581_v44 = vsel %vm1741_vm9, 1.0, %v16606_v1  ;;  %v10589_v56 = vpop.eup %10588  ;;  %10600 = vpow2.f32 %v8903_v15  ;;  %v8904_v52 = vmul.f32 -1.442695, %v14519_v53  ;;  %vm1746_vm12 = vcmp.eq.s32.totalorder %v11822_v7, %v1426_v20 }
 0x260   : > { %v2112_v11 = vpack.c.bf16 %v8582_v59, %v8581_v44  ;;  %v14525_v9 = vmul.f32 %v10589_v56, %v14391_v49  ;;  %v10591_v13 = vpop.eup %10590  ;;  %v16736_v49 = vpack.c.bf16 %v12413_v2, %v12394_v47  ;;  %v8586_v2 = vsel %vm1746_vm12, 1.0, %v16606_v1 }
 0x261   : > { %v1417_v25 = vpop.permute.xlu1 %1416  ;;  %v14532_v51 = vmul.f32 %v10591_v13, %v14405_v60  ;;  %10602 = vpow2.f32 %v8904_v52  ;;  %v3301_v44 = vpop.f32.mrb[180].mxu0 }
 0x262   : > { %vm1743_vm11 = vcmp.eq.s32.totalorder %v11822_v7, %v1417_v25  ;;  %v1432_v63 = vpop.permute.xlu0 %1431  ;;  %v10593_v50 = vpop.eup %10592  ;;  %9467 = vmatmul.mubr.msk.bf16.gmra.mrb[24].mxu0 %vm4561_vm4, %v2112_v11  ;;  %v14543_v60 = vadd.f32 %v14060_v43, %v3301_v44 }
 0x263   : > { %9731 = vmatmul.mubr.bf16.gmra.mrb[72].mxu1 %v16736_v49  ;;  %v8583_v59 = vsel %vm1743_vm11, 1.0, %v16606_v1  ;;  %v4095_v15 = vadd.f32 1.0, %v10593_v50  ;;  %v14545_v13 = vpop.f32.mrb[181].mxu0  ;;  %vm1748_vm13 = vcmp.eq.s32.totalorder %v11822_v7, %v1432_v63 }
 0x264   : > { %9734 = vmatprep.mubr.bf16.mxu1 %v16737_v23  ;;  %v2113_v56 = vpack.c.bf16 %v8584_v0, %v8583_v59  ;;  %v10595_v25 = vpop.eup %10594  ;;  %16738 = vst [vmem:[#allocation144_spill] sm:$0xff] %v14545_v13  ;;  %v3305_v8 = vpop.f32.mrb[182].mxu0  ;;  %v8905_v0 = vmul.f32 -1.442695, %v14543_v60 }
 0x265   : > { %v1423_v47 = vpop.permute.xlu1 %1422  ;;  %10604 = vrcp.f32 %v4095_v15  ;;  %v4096_v22 = vadd.f32 1.0, %v10595_v25  ;;  %v14557_v50 = vadd.f32 %v14060_v43, %v3305_v8  ;;  %v14559_v20 = vpop.f32.mrb[183].mxu0 }
 0x266   : > { %vm1745_vm1 = vcmp.eq.s32.totalorder %v11822_v7, %v1423_v47  ;;  %9470 = vmatprep.mubr.msk.bf16.mxu0 %vm4561_vm4, %v2113_v56  ;;  %v1438_v52 = vpop.permute.xlu0 %1437  ;;  %16739 = vst [vmem:[#allocation145_spill] sm:$0xff] %v14559_v20  ;;  %v10597_v59 = vpop.eup %10596  ;;  %v8588_v56 = vsel %vm1748_vm13, 1.0, %v16606_v1 }
 0x267   : > { %v8585_v49 = vsel %vm1745_vm1, 1.0, %v16606_v1  ;;  %10606 = vrcp.f32 %v4096_v22  ;;  %v14563_v15 = vmul.f32 %v10597_v59, %v14429_v12  ;;  %v8906_v44 = vmul.f32 -1.442695, %v14557_v50  ;;  %v16741_v22 = vld [vmem:[#allocation32_spill] sm:$0xff] }
 0x268   : > { %v2114_v23 = vpack.c.bf16 %v8586_v2, %v8585_v49  ;;  %10608 = vpow2.f32 %v8905_v0  ;;  %v10599_v25 = vpop.eup %10598  ;;  %vm1750_vm15 = vcmp.eq.s32.totalorder %v11822_v7, %v1438_v52  ;;  %v16740_v12 = vpack.c.bf16 %v12525_v57, %v12511_v26 }
 0x269   : > { %v1429_v63 = vpop.permute.xlu1 %1428  ;;  %v10601_v8 = vpop.eup %10600  ;;  %v14570_v11 = vmul.f32 %v10599_v25, %v14443_v34  ;;  %10610 = vpow2.f32 %v8906_v44  ;;  %v16742_v0 = vpack.c.bf16 %v12595_v19, %v16741_v22  ;;  %v8590_v57 = vsel %vm1750_vm15, 1.0, %v16606_v1 }
 0x26a   : > { %vm1747_vm14 = vcmp.eq.s32.totalorder %v11822_v7, %v1429_v63  ;;  %v1444_v47 = vpop.permute.xlu0 %1443  ;;  %9471 = vmatmul.mubr.msk.bf16.gmra.mrb[28].mxu0 %vm4561_vm4, %v2114_v23  ;;  %v4097_v49 = vadd.f32 1.0, %v10601_v8  ;;  %v3311_v59 = vpop.f32.mrb[184].mxu0 }
 0x26b   : > { %9735 = vmatmul.mubr.bf16.gmra.mrb[76].mxu1 %v16740_v12  ;;  %v8587_v2 = vsel %vm1747_vm14, 1.0, %v16606_v1  ;;  %v10603_v3 = vpop.eup %10602  ;;  %v14581_v34 = vadd.f32 %v14060_v43, %v3311_v59  ;;  %v14583_v25 = vpop.f32.mrb[185].mxu0  ;;  %vm1752_vm2 = vcmp.eq.s32.totalorder %v11822_v7, %v1444_v47 }
 0x26c   : > { %9738 = vmatprep.mubr.bf16.mxu1 %v16742_v0  ;;  %v2115_v63 = vpack.c.bf16 %v8588_v56, %v8587_v2  ;;  %16743 = vst [vmem:[#allocation32_spill] sm:$0xff] %v14583_v25  ;;  %10612 = vrcp.f32 %v4097_v49  ;;  %v4098_v19 = vadd.f32 1.0, %v10603_v3  ;;  %v3315_v44 = vpop.f32.mrb[186].mxu0  ;;  %v8592_v59 = vsel %vm1752_vm2, 1.0, %v16606_v1 }
 0x26d   : > { %v1435_v26 = vpop.permute.xlu1 %1434  ;;  %v8907_v8 = vmul.f32 -1.442695, %v14581_v34  ;;  %v14595_v12 = vadd.f32 %v14060_v43, %v3315_v44  ;;  %v14597_v52 = vpop.f32.mrb[187].mxu0 }
 0x26e   : > { %vm1749_vm0 = vcmp.eq.s32.totalorder %v11822_v7, %v1435_v26  ;;  %9474 = vmatprep.mubr.msk.bf16.mxu0 %vm4561_vm4, %v2115_v63  ;;  %v1450_v56 = vpop.permute.xlu0 %1449  ;;  %16744 = vst [vmem:[#allocation146_spill] sm:$0xff] %v14597_v52  ;;  %10614 = vrcp.f32 %v4098_v19 }
 0x26f   : > { %v8589_v2 = vsel %vm1749_vm0, 1.0, %v16606_v1  ;;  %v10605_v22 = vpop.eup %10604  ;;  %10616 = vpow2.f32 %v8907_v8  ;;  %v8908_v49 = vmul.f32 -1.442695, %v14595_v12  ;;  %vm1754_vm5 = vcmp.eq.s32.totalorder %v11822_v7, %v1450_v56  ;;  %v16747_v8 = vld [vmem:[#allocation39_spill] sm:$0xff] }
 0x270   : > { %v2116_v3 = vpack.c.bf16 %v8590_v57, %v8589_v2  ;;  %v14601_v0 = vmul.f32 %v10605_v22, %v14467_v18  ;;  %v16745_v57 = vld [vmem:[#allocation35_spill] sm:$0xff]  ;;  %v16748_v2 = vld [vmem:[#allocation38_spill] sm:$0xff] }
 0x271   : > { %v1441_v47 = vpop.permute.xlu1 %1440  ;;  %v10607_v63 = vpop.eup %10606  ;;  %v16746_v18 = vpack.c.bf16 %v12664_v58, %v16745_v57  ;;  %10618 = vpow2.f32 %v8908_v49  ;;  %v16749_v22 = vpack.c.bf16 %v16747_v8, %v16748_v2  ;;  %v8594_v49 = vsel %vm1754_vm5, 1.0, %v16606_v1 }
 0x272   : > { %vm1751_vm3 = vcmp.eq.s32.totalorder %v11822_v7, %v1441_v47  ;;  %v1456_v26 = vpop.permute.xlu0 %1455  ;;  %v10609_v44 = vpop.eup %10608  ;;  %v14608_v23 = vmul.f32 %v10607_v63, %v14481_v33  ;;  %9475 = vmatmul.mubr.msk.bf16.gmra.mrb[32].mxu0 %vm4561_vm4, %v2116_v3 }
 0x273   : > { %9739 = vmatmul.mubr.bf16.gmra.mrb[80].mxu1 %v16746_v18  ;;  %v8591_v19 = vsel %vm1751_vm3, 1.0, %v16606_v1  ;;  %v4099_v47 = vadd.f32 1.0, %v10609_v44  ;;  %v3321_v52 = vpop.f32.mrb[188].mxu0  ;;  %v10611_v20 = vpop.eup %10610  ;;  %vm1756_vm7 = vcmp.eq.s32.totalorder %v11822_v7, %v1456_v26 }
 0x274   : > { %9742 = vmatprep.mubr.bf16.mxu1 %v16749_v22  ;;  %v2117_v25 = vpack.c.bf16 %v8592_v59, %v8591_v19  ;;  %v14619_v33 = vadd.f32 %v14060_v43, %v3321_v52  ;;  %v14621_v63 = vpop.f32.mrb[189].mxu0  ;;  %v4100_v57 = vadd.f32 1.0, %v10611_v20  ;;  %v8596_v22 = vsel %vm1756_vm7, 1.0, %v16606_v1 }
 0x275   : > { %16750 = vst [vmem:[#allocation35_spill] sm:$0xff] %v14621_v63  ;;  %v1447_v58 = vpop.permute.xlu1 %1446  ;;  %10620 = vrcp.f32 %v4099_v47  ;;  %v3325_v18 = vpop.f32.mrb[190].mxu0 }
 0x276   : > { %vm1753_vm6 = vcmp.eq.s32.totalorder %v11822_v7, %v1447_v58  ;;  %9478 = vmatprep.mubr.msk.bf16.mxu0 %vm4561_vm4, %v2117_v25  ;;  %v1462_v52 = vpop.permute.xlu0 %1461  ;;  %v8909_v59 = vmul.f32 -1.442695, %v14619_v33  ;;  %v14633_v44 = vadd.f32 %v14060_v43, %v3325_v18  ;;  %v14635_v56 = vpop.f32.mrb[191].mxu0  ;;  %10622 = vrcp.f32 %v4100_v57  ;;  %v16753_v57 = vld [vmem:[#allocation42_spill] sm:$0xff] }
 0x277   : > { %16751 = vst [vmem:[#allocation39_spill] sm:$0xff] %v14635_v56  ;;  %v8593_v19 = vsel %vm1753_vm6, 1.0, %v16606_v1  ;;  %v10613_v8 = vpop.eup %10612  ;;  %vm1758_vm9 = vcmp.eq.s32.totalorder %v11822_v7, %v1462_v52 }
 0x278   : > { %v2118_v20 = vpack.c.bf16 %v8594_v49, %v8593_v19  ;;  %v14639_v2 = vmul.f32 %v10613_v8, %v14505_v55  ;;  %10624 = vpow2.f32 %v8909_v59  ;;  %v8910_v25 = vmul.f32 -1.442695, %v14633_v44  ;;  %v10615_v47 = vpop.eup %10614  ;;  %v16752_v49 = vld [vmem:[#allocation43_spill] sm:$0xff]  ;;  %v16756_v8 = vld [vmem:[#allocation46_spill] sm:$0xff] }
 0x279   : > { %v1453_v26 = vpop.permute.xlu1 %1452  ;;  %v10617_v58 = vpop.eup %10616  ;;  %v14646_v18 = vmul.f32 %v10615_v47, %v14519_v53  ;;  %v16754_v55 = vpack.c.bf16 %v16752_v49, %v16753_v57  ;;  %v16755_v19 = vld [vmem:[#allocation47_spill] sm:$0xff]  ;;  %v14659_v53 = vld [vmem:[%s16525_s3] ss:$0 sm:$0xff] }
 0x27a   : > { %vm1755_vm8 = vcmp.eq.s32.totalorder %v11822_v7, %v1453_v26  ;;  %v1468_v43 = vpop.permute.xlu0 %1467  ;;  %10626 = vpow2.f32 %v8910_v25  ;;  %9479 = vmatmul.mubr.msk.bf16.gmra.mrb[36].mxu0 %vm4561_vm4, %v2118_v20  ;;  %v16757_v3 = vpack.c.bf16 %v16755_v19, %v16756_v8  ;;  %v4101_v26 = vadd.f32 1.0, %v10617_v58  ;;  %v3331_v56 = vpop.f32.mrb[192].mxu0 }
 0x27b   : > { %9743 = vmatmul.mubr.bf16.gmra.mrb[84].mxu1 %v16754_v55  ;;  %v8595_v59 = vsel %vm1755_vm8, 1.0, %v16606_v1  ;;  %v10619_v30 = vpop.eup %10618  ;;  %v14662_v47 = vadd.f32 %v14659_v53, %v3331_v56  ;;  %v14664_v25 = vpop.f32.mrb[193].mxu0  ;;  %v8598_v20 = vsel %vm1758_vm9, 1.0, %v16606_v1  ;;  %vm1760_vm11 = vcmp.eq.s32.totalorder %v11822_v7, %v1468_v43 }
 0x27c   : > { %9746 = vmatprep.mubr.bf16.mxu1 %v16757_v3  ;;  %v2119_v63 = vpack.c.bf16 %v8596_v22, %v8595_v59  ;;  %16758 = vst [vmem:[#allocation38_spill] sm:$0xff] %v14664_v25  ;;  %10628 = vrcp.f32 %v4101_v26  ;;  %v4102_v22 = vadd.f32 1.0, %v10619_v30  ;;  %v3335_v58 = vpop.f32.mrb[194].mxu0  ;;  %v8600_v26 = vsel %vm1760_vm11, 1.0, %v16606_v1 }
 0x27d   : > { %v1459_v49 = vpop.permute.xlu1 %1458  ;;  %v8911_v57 = vmul.f32 -1.442695, %v14662_v47  ;;  %v14676_v55 = vadd.f32 %v14659_v53, %v3335_v58  ;;  %v14678_v52 = vpop.f32.mrb[195].mxu0 }
 0x27e   : > { %vm1757_vm10 = vcmp.eq.s32.totalorder %v11822_v7, %v1459_v49  ;;  %9482 = vmatprep.mubr.msk.bf16.mxu0 %vm4561_vm4, %v2119_v63  ;;  %v1474_v56 = vpop.permute.xlu0 %1473  ;;  %16759 = vst [vmem:[#allocation43_spill] sm:$0xff] %v14678_v52  ;;  %10630 = vrcp.f32 %v4102_v22  ;;  %v16761_v22 = vld [vmem:[#allocation50_spill] sm:$0xff] }
 0x27f   : > { %v8597_v59 = vsel %vm1757_vm10, 1.0, %v16606_v1  ;;  %v10621_v19 = vpop.eup %10620  ;;  %10632 = vpow2.f32 %v8911_v57  ;;  %v8912_v63 = vmul.f32 -1.442695, %v14676_v55  ;;  %vm1762_vm1 = vcmp.eq.s32.totalorder %v11822_v7, %v1474_v56 }
 0x280   : > { %v2120_v30 = vpack.c.bf16 %v8598_v20, %v8597_v59  ;;  %v14682_v8 = vmul.f32 %v10621_v19, %v14543_v60  ;;  %v10623_v49 = vpop.eup %10622  ;;  %v16760_v20 = vld [vmem:[#allocation51_spill] sm:$0xff]  ;;  %v16764_v19 = vld [vmem:[#allocation54_spill] sm:$0xff] }
 0x281   : > { %v1465_v43 = vpop.permute.xlu1 %1464  ;;  %v14689_v52 = vmul.f32 %v10623_v49, %v14557_v50  ;;  %v16762_v60 = vpack.c.bf16 %v16760_v20, %v16761_v22  ;;  %10634 = vpow2.f32 %v8912_v63  ;;  %v16763_v59 = vld [vmem:[#allocation55_spill] sm:$0xff]  ;;  %v8602_v63 = vsel %vm1762_vm1, 1.0, %v16606_v1 }
 0x282   : > { %vm1759_vm12 = vcmp.eq.s32.totalorder %v11822_v7, %v1465_v43  ;;  %v1480_v58 = vpop.permute.xlu0 %1479  ;;  %v10625_v3 = vpop.eup %10624  ;;  %9483 = vmatmul.mubr.msk.bf16.gmra.mrb[40].mxu0 %vm4561_vm4, %v2120_v30  ;;  %v16765_v25 = vpack.c.bf16 %v16763_v59, %v16764_v19 }
 0x283   : > { %9747 = vmatmul.mubr.bf16.gmra.mrb[88].mxu1 %v16762_v60  ;;  %v8599_v57 = vsel %vm1759_vm12, 1.0, %v16606_v1  ;;  %v4103_v43 = vadd.f32 1.0, %v10625_v3  ;;  %v3341_v13 = vpop.f32.mrb[196].mxu0  ;;  %vm1764_vm14 = vcmp.eq.s32.totalorder %v11822_v7, %v1480_v58 }
 0x284   : > { %9750 = vmatprep.mubr.bf16.mxu1 %v16765_v25  ;;  %v2121_v48 = vpack.c.bf16 %v8600_v26, %v8599_v57  ;;  %v10627_v29 = vpop.eup %10626  ;;  %v14700_v50 = vadd.f32 %v14659_v53, %v3341_v13  ;;  %v14702_v49 = vpop.f32.mrb[197].mxu0  ;;  %v8604_v19 = vsel %vm1764_vm14, 1.0, %v16606_v1 }
 0x285   : > { %16766 = vst [vmem:[#allocation42_spill] sm:$0xff] %v14702_v49  ;;  %v1471_v20 = vpop.permute.xlu1 %1470  ;;  %10636 = vrcp.f32 %v4103_v43  ;;  %v4104_v22 = vadd.f32 1.0, %v10627_v29  ;;  %v3345_v25 = vpop.f32.mrb[198].mxu0 }
 0x286   : > { %vm1761_vm13 = vcmp.eq.s32.totalorder %v11822_v7, %v1471_v20  ;;  %9486 = vmatprep.mubr.msk.bf16.mxu0 %vm4561_vm4, %v2121_v48  ;;  %v1486_v13 = vpop.permute.xlu0 %1485  ;;  %v8913_v3 = vmul.f32 -1.442695, %v14700_v50  ;;  %v14714_v26 = vadd.f32 %v14659_v53, %v3345_v25  ;;  %v14716_v56 = vpop.f32.mrb[199].mxu0 }
 0x287   : > { %16767 = vst [vmem:[#allocation47_spill] sm:$0xff] %v14716_v56  ;;  %v8601_v60 = vsel %vm1761_vm13, 1.0, %v16606_v1  ;;  %v10629_v57 = vpop.eup %10628  ;;  %10638 = vrcp.f32 %v4104_v22  ;;  %vm1766_vm0 = vcmp.eq.s32.totalorder %v11822_v7, %v1486_v13  ;;  %v16769_v22 = vld [vmem:[#allocation58_spill] sm:$0xff] }
 0x288   : > { %v2122_v29 = vpack.c.bf16 %v8602_v63, %v8601_v60  ;;  %v14720_v59 = vmul.f32 %v10629_v57, %v14581_v34  ;;  %10640 = vpow2.f32 %v8913_v3  ;;  %v8914_v48 = vmul.f32 -1.442695, %v14714_v26  ;;  %v10631_v43 = vpop.eup %10630  ;;  %v16768_v63 = vld [vmem:[#allocation59_spill] sm:$0xff]  ;;  %v16772_v57 = vld [vmem:[#allocation62_spill] sm:$0xff] }
 0x289   : > { %v1477_v58 = vpop.permute.xlu1 %1476  ;;  %v10633_v25 = vpop.eup %10632  ;;  %v14727_v30 = vmul.f32 %v10631_v43, %v14595_v12  ;;  %v16770_v34 = vpack.c.bf16 %v16768_v63, %v16769_v22  ;;  %v16771_v60 = vld [vmem:[#allocation63_spill] sm:$0xff] }
 0x28a   : > { %vm1763_vm15 = vcmp.eq.s32.totalorder %v11822_v7, %v1477_v58  ;;  %v1492_v20 = vpop.permute.xlu0 %1491  ;;  %10642 = vpow2.f32 %v8914_v48  ;;  %9487 = vmatmul.mubr.msk.bf16.gmra.mrb[44].mxu0 %vm4561_vm4, %v2122_v29  ;;  %v16773_v56 = vpack.c.bf16 %v16771_v60, %v16772_v57  ;;  %v4105_v58 = vadd.f32 1.0, %v10633_v25  ;;  %v3351_v49 = vpop.f32.mrb[200].mxu0 }
 0x28b   : > { %9751 = vmatmul.mubr.bf16.gmra.mrb[92].mxu1 %v16770_v34  ;;  %v8603_v3 = vsel %vm1763_vm15, 1.0, %v16606_v1  ;;  %v10635_v38 = vpop.eup %10634  ;;  %v14738_v12 = vadd.f32 %v14659_v53, %v3351_v49  ;;  %v14740_v43 = vpop.f32.mrb[201].mxu0  ;;  %v8606_v48 = vsel %vm1766_vm0, 1.0, %v16606_v1  ;;  %vm1768_vm3 = vcmp.eq.s32.totalorder %v11822_v7, %v1492_v20 }
 0x28c   : > { %9754 = vmatprep.mubr.bf16.mxu1 %v16773_v56  ;;  %v2123_v39 = vpack.c.bf16 %v8604_v19, %v8603_v3  ;;  %16774 = vst [vmem:[#allocation46_spill] sm:$0xff] %v14740_v43  ;;  %10644 = vrcp.f32 %v4105_v58  ;;  %v4106_v22 = vadd.f32 1.0, %v10635_v38  ;;  %v3355_v56 = vpop.f32.mrb[202].mxu0  ;;  %v8608_v57 = vsel %vm1768_vm3, 1.0, %v16606_v1 }
 0x28d   : > { %v1483_v63 = vpop.permute.xlu1 %1482  ;;  %v8915_v19 = vmul.f32 -1.442695, %v14738_v12  ;;  %v14752_v25 = vadd.f32 %v14659_v53, %v3355_v56  ;;  %v14754_v13 = vpop.f32.mrb[203].mxu0 }
 0x28e   : > { %vm1765_vm2 = vcmp.eq.s32.totalorder %v11822_v7, %v1483_v63  ;;  %9490 = vmatprep.mubr.msk.bf16.mxu0 %vm4561_vm4, %v2123_v39  ;;  %v1498_v49 = vpop.permute.xlu0 %1497  ;;  %16775 = vst [vmem:[#allocation51_spill] sm:$0xff] %v14754_v13  ;;  %10646 = vrcp.f32 %v4106_v22  ;;  %v16777_v22 = vld [vmem:[#allocation66_spill] sm:$0xff] }
 0x28f   : > { %v8605_v34 = vsel %vm1765_vm2, 1.0, %v16606_v1  ;;  %v10637_v3 = vpop.eup %10636  ;;  %10648 = vpow2.f32 %v8915_v19  ;;  %v8916_v39 = vmul.f32 -1.442695, %v14752_v25  ;;  %vm1770_vm6 = vcmp.eq.s32.totalorder %v11822_v7, %v1498_v49 }
 0x290   : > { %v2124_v38 = vpack.c.bf16 %v8606_v48, %v8605_v34  ;;  %v14758_v60 = vmul.f32 %v10637_v3, %v14619_v33  ;;  %v16776_v48 = vld [vmem:[#allocation67_spill] sm:$0xff]  ;;  %v16780_v3 = vld [vmem:[#allocation70_spill] sm:$0xff] }
 0x291   : > { %v1489_v20 = vpop.permute.xlu1 %1488  ;;  %v10639_v58 = vpop.eup %10638  ;;  %v16778_v33 = vpack.c.bf16 %v16776_v48, %v16777_v22  ;;  %10650 = vpow2.f32 %v8916_v39  ;;  %v16779_v34 = vld [vmem:[#allocation71_spill] sm:$0xff]  ;;  %v8610_v39 = vsel %vm1770_vm6, 1.0, %v16606_v1 }
 0x292   : > { %vm1767_vm5 = vcmp.eq.s32.totalorder %v11822_v7, %v1489_v20  ;;  %v1504_v63 = vpop.permute.xlu0 %1503  ;;  %v10641_v56 = vpop.eup %10640  ;;  %v14765_v29 = vmul.f32 %v10639_v58, %v14633_v44  ;;  %9491 = vmatmul.mubr.msk.bf16.gmra.mrb[48].mxu0 %vm4561_vm4, %v2124_v38  ;;  %v16781_v13 = vpack.c.bf16 %v16779_v34, %v16780_v3 }
 0x293   : > { %9755 = vmatmul.mubr.bf16.gmra.mrb[96].mxu1 %v16778_v33  ;;  %v8607_v19 = vsel %vm1767_vm5, 1.0, %v16606_v1  ;;  %v4107_v20 = vadd.f32 1.0, %v10641_v56  ;;  %v3361_v43 = vpop.f32.mrb[204].mxu0  ;;  %vm1772_vm8 = vcmp.eq.s32.totalorder %v11822_v7, %v1504_v63 }
 0x294   : > { %9758 = vmatprep.mubr.bf16.mxu1 %v16781_v13  ;;  %v2125_v40 = vpack.c.bf16 %v8608_v57, %v8607_v19  ;;  %v10643_v24 = vpop.eup %10642  ;;  %v14776_v44 = vadd.f32 %v14659_v53, %v3361_v43  ;;  %v14778_v58 = vpop.f32.mrb[205].mxu0  ;;  %v8612_v3 = vsel %vm1772_vm8, 1.0, %v16606_v1 }
 0x295   : > { %16782 = vst [vmem:[#allocation50_spill] sm:$0xff] %v14778_v58  ;;  %v1495_v48 = vpop.permute.xlu1 %1494  ;;  %10652 = vrcp.f32 %v4107_v20  ;;  %v4108_v22 = vadd.f32 1.0, %v10643_v24  ;;  %v3365_v13 = vpop.f32.mrb[206].mxu0 }
 0x296   : > { %vm1769_vm7 = vcmp.eq.s32.totalorder %v11822_v7, %v1495_v48  ;;  %9494 = vmatprep.mubr.msk.bf16.mxu0 %vm4561_vm4, %v2125_v40  ;;  %v1510_v43 = vpop.permute.xlu0 %1509  ;;  %v8917_v57 = vmul.f32 -1.442695, %v14776_v44  ;;  %v14790_v56 = vadd.f32 %v14659_v53, %v3365_v13  ;;  %v14792_v49 = vpop.f32.mrb[207].mxu0 }
 0x297   : > { %16783 = vst [vmem:[#allocation55_spill] sm:$0xff] %v14792_v49  ;;  %v8609_v33 = vsel %vm1769_vm7, 1.0, %v16606_v1  ;;  %v10645_v19 = vpop.eup %10644  ;;  %10654 = vrcp.f32 %v4108_v22  ;;  %vm1774_vm10 = vcmp.eq.s32.totalorder %v11822_v7, %v1510_v43  ;;  %v16785_v22 = vld [vmem:[#allocation74_spill] sm:$0xff] }
 0x298   : > { %v2126_v24 = vpack.c.bf16 %v8610_v39, %v8609_v33  ;;  %v14796_v34 = vmul.f32 %v10645_v19, %v14662_v47  ;;  %10656 = vpow2.f32 %v8917_v57  ;;  %v8918_v40 = vmul.f32 -1.442695, %v14790_v56  ;;  %v10647_v20 = vpop.eup %10646  ;;  %v16784_v39 = vld [vmem:[#allocation75_spill] sm:$0xff]  ;;  %v16788_v19 = vld [vmem:[#allocation78_spill] sm:$0xff] }
 0x299   : > { %v1501_v63 = vpop.permute.xlu1 %1500  ;;  %v10649_v13 = vpop.eup %10648  ;;  %v14803_v38 = vmul.f32 %v10647_v20, %v14676_v55  ;;  %v16786_v47 = vpack.c.bf16 %v16784_v39, %v16785_v22  ;;  %v16787_v33 = vld [vmem:[#allocation79_spill] sm:$0xff] }
 0x29a   : > { %vm1771_vm9 = vcmp.eq.s32.totalorder %v11822_v7, %v1501_v63  ;;  %v1516_v48 = vpop.permute.xlu0 %1515  ;;  %10658 = vpow2.f32 %v8918_v40  ;;  %9495 = vmatmul.mubr.msk.bf16.gmra.mrb[52].mxu0 %vm4561_vm4, %v2126_v24  ;;  %v16789_v49 = vpack.c.bf16 %v16787_v33, %v16788_v19  ;;  %v4109_v63 = vadd.f32 1.0, %v10649_v13  ;;  %v3371_v58 = vpop.f32.mrb[208].mxu0 }
 0x29b   : > { %9759 = vmatmul.mubr.bf16.gmra.mrb[100].mxu1 %v16786_v47  ;;  %v8611_v57 = vsel %vm1771_vm9, 1.0, %v16606_v1  ;;  %v10651_v46 = vpop.eup %10650  ;;  %v14814_v55 = vadd.f32 %v14659_v53, %v3371_v58  ;;  %v14816_v20 = vpop.f32.mrb[209].mxu0  ;;  %v8614_v40 = vsel %vm1774_vm10, 1.0, %v16606_v1  ;;  %vm1776_vm12 = vcmp.eq.s32.totalorder %v11822_v7, %v1516_v48 }
 0x29c   : > { %9762 = vmatprep.mubr.bf16.mxu1 %v16789_v49  ;;  %v2127_v6 = vpack.c.bf16 %v8612_v3, %v8611_v57  ;;  %16790 = vst [vmem:[#allocation54_spill] sm:$0xff] %v14816_v20  ;;  %10660 = vrcp.f32 %v4109_v63  ;;  %v4110_v22 = vadd.f32 1.0, %v10651_v46  ;;  %v3375_v49 = vpop.f32.mrb[210].mxu0  ;;  %v8616_v19 = vsel %vm1776_vm12, 1.0, %v16606_v1 }
 0x29d   : > { %v1507_v39 = vpop.permute.xlu1 %1506  ;;  %v8919_v58 = vmul.f32 -1.442695, %v14814_v55  ;;  %v14828_v3 = vadd.f32 %v14659_v53, %v3375_v49  ;;  %v14830_v13 = vpop.f32.mrb[211].mxu0 }
 0x29e   : > { %vm1773_vm11 = vcmp.eq.s32.totalorder %v11822_v7, %v1507_v39  ;;  %9498 = vmatprep.mubr.msk.bf16.mxu0 %vm4561_vm4, %v2127_v6  ;;  %16791 = vst [vmem:[#allocation59_spill] sm:$0xff] %v14830_v13  ;;  %v1522_v47 = vpop.permute.xlu0 %1521  ;;  %10662 = vrcp.f32 %v4110_v22  ;;  %v16792_v22 = vld [vmem:[#allocation83_spill] sm:$0xff] }
 0x29f   : > { %v8613_v43 = vsel %vm1773_vm11, 1.0, %v16606_v1  ;;  %v10653_v57 = vpop.eup %10652  ;;  %10664 = vpow2.f32 %v8919_v58  ;;  %v8920_v6 = vmul.f32 -1.442695, %v14828_v3  ;;  %vm1778_vm13 = vcmp.eq.s32.totalorder %v11822_v7, %v1522_v47  ;;  %v16795_v58 = vld [vmem:[#allocation87_spill] sm:$0xff] }
 0x2a0   : > { %v2128_v46 = vpack.c.bf16 %v8614_v40, %v8613_v43  ;;  %v14834_v33 = vmul.f32 %v10653_v57, %v14700_v50  ;;  %v16793_v40 = vld [vmem:[#allocation82_spill] sm:$0xff] }
 0x2a1   : > { %v1513_v48 = vpop.permute.xlu1 %1512  ;;  %v10655_v63 = vpop.eup %10654  ;;  %v16794_v43 = vpack.c.bf16 %v16792_v22, %v16793_v40  ;;  %10666 = vpow2.f32 %v8920_v6  ;;  %v16796_v57 = vld [vmem:[#allocation86_spill] sm:$0xff]  ;;  %v8618_v6 = vsel %vm1778_vm13, 1.0, %v16606_v1 }
 0x2a2   : > { %vm1775_vm1 = vcmp.eq.s32.totalorder %v11822_v7, %v1513_v48  ;;  %v10657_v39 = vpop.eup %10656  ;;  %v14841_v49 = vmul.f32 %v10655_v63, %v14714_v26  ;;  %9499 = vmatmul.mubr.msk.bf16.gmra.mrb[56].mxu0 %vm4561_vm4, %v2128_v46  ;;  %v16797_v24 = vpack.c.bf16 %v16795_v58, %v16796_v57  ;;  %v3381_v13 = vpop.f32.mrb[212].mxu0 }
 0x2a3   : > { %9763 = vmatmul.mubr.bf16.gmra.mrb[104].mxu1 %v16794_v43  ;;  %v8615_v50 = vsel %vm1775_vm1, 1.0, %v16606_v1  ;;  %v4111_v48 = vadd.f32 1.0, %v10657_v39  ;;  %v14852_v26 = vadd.f32 %v14659_v53, %v3381_v13  ;;  %v14854_v63 = vpop.f32.mrb[213].mxu0 }
 0x2a4   : > { %9766 = vmatprep.mubr.bf16.mxu1 %v16797_v24  ;;  %v2129_v47 = vpack.c.bf16 %v8616_v19, %v8615_v50  ;;  %v10659_v20 = vpop.eup %10658  ;;  %16798 = vst [vmem:[#allocation58_spill] sm:$0xff] %v14854_v63  ;;  %v3385_v43 = vpop.f32.mrb[214].mxu0 }
 0x2a5   : > { %v1519_v22 = vpop.permute.xlu1 %1518  ;;  %10668 = vrcp.f32 %v4111_v48  ;;  %v4112_v46 = vadd.f32 1.0, %v10659_v20  ;;  %v8921_v24 = vmul.f32 -1.442695, %v14852_v26  ;;  %v14863_v13 = vadd.f32 %v14659_v53, %v3385_v43  ;;  %v14865_v19 = vpop.f32.mrb[215].mxu0  ;;  %v16801_v43 = vld [vmem:[#allocation90_spill] sm:$0xff] }
 0x2a6   : > { %vm1777_vm14 = vcmp.eq.s32.totalorder %v11822_v7, %v1519_v22  ;;  %9502 = vmatprep.mubr.msk.bf16.mxu0 %vm4561_vm4, %v2129_v47  ;;  %16799 = vst [vmem:[#allocation63_spill] sm:$0xff] %v14865_v19  ;;  %v10661_v50 = vpop.eup %10660  ;;  %v16800_v22 = vld [vmem:[#allocation91_spill] sm:$0xff] }
 0x2a7   : > { %v8617_v39 = vsel %vm1777_vm14, 1.0, %v16606_v1  ;;  %10670 = vrcp.f32 %v4112_v46  ;;  %v14869_v57 = vmul.f32 %v10661_v50, %v14738_v12  ;;  %v8922_v7 = vmul.f32 -1.442695, %v14863_v13  ;;  %v16803_v1 = vld [vmem:[#allocation95_spill] sm:$0xff] }
 0x2a8   : > { %v2130_v58 = vpack.c.bf16 %v8618_v6, %v8617_v39  ;;  %10672 = vpow2.f32 %v8921_v24  ;;  %v10663_v20 = vpop.eup %10662  ;;  %v16802_v40 = vpack.c.bf16 %v16800_v22, %v16801_v43  ;;  %v16804_v6 = vld [vmem:[#allocation94_spill] sm:$0xff] }
 0x2a9   : > { %v10665_v48 = vpop.eup %10664  ;;  %v14873_v47 = vmul.f32 %v10663_v20, %v14752_v25  ;;  %10674 = vpow2.f32 %v8922_v7  ;;  %v16805_v46 = vpack.c.bf16 %v16803_v1, %v16804_v6 }
 0x2aa   : > { %9503 = vmatmul.mubr.msk.bf16.gmra.mrb[60].mxu0 %vm4561_vm4, %v2130_v58  ;;  %v4113_v12 = vadd.f32 1.0, %v10665_v48  ;;  %v3391_v24 = vpop.f32.mrb[216].mxu0 }
 0x2ab   : > { %9767 = vmatmul.mubr.bf16.gmra.mrb[108].mxu1 %v16802_v40  ;;  %v10667_v39 = vpop.eup %10666  ;;  %v14883_v50 = vadd.f32 %v14659_v53, %v3391_v24  ;;  %v14885_v19 = vpop.f32.mrb[217].mxu0  ;;  %v16808_v24 = vld [vmem:[#allocation99_spill] sm:$0xff] }
 0x2ac   : > { %9770 = vmatprep.mubr.bf16.mxu1 %v16805_v46  ;;  %16806 = vst [vmem:[#allocation62_spill] sm:$0xff] %v14885_v19  ;;  %10676 = vrcp.f32 %v4113_v12  ;;  %v4114_v40 = vadd.f32 1.0, %v10667_v39  ;;  %v3395_v7 = vpop.f32.mrb[218].mxu0  ;;  %v16809_v39 = vld [vmem:[#allocation98_spill] sm:$0xff] }
 0x2ad   : > { %v8923_v58 = vmul.f32 -1.442695, %v14883_v50  ;;  %v14891_v20 = vadd.f32 %v14659_v53, %v3395_v7  ;;  %v14893_v22 = vpop.f32.mrb[219].mxu0  ;;  %v16810_v25 = vpack.c.bf16 %v16808_v24, %v16809_v39  ;;  %v16811_v7 = vld [vmem:[#allocation103_spill] sm:$0xff] }
 0x2ae   : > { %16807 = vst [vmem:[#allocation67_spill] sm:$0xff] %v14893_v22  ;;  %10678 = vrcp.f32 %v4114_v40  ;;  %v16812_v22 = vld [vmem:[#allocation102_spill] sm:$0xff] }
 0x2af   : > { %v10669_v48 = vpop.eup %10668  ;;  %10680 = vpow2.f32 %v8923_v58  ;;  %v8924_v1 = vmul.f32 -1.442695, %v14891_v20  ;;  %v16813_v19 = vpack.c.bf16 %v16811_v7, %v16812_v22 }
 0x2b0   : > { %v14896_v43 = vmul.f32 %v10669_v48, %v14776_v44 }
 0x2b1   : > { %v10671_v6 = vpop.eup %10670  ;;  %10682 = vpow2.f32 %v8924_v1 }
 0x2b2   : > { %v10673_v46 = vpop.eup %10672  ;;  %v14900_v12 = vmul.f32 %v10671_v6, %v14790_v56  ;;  %v3401_v44 = vpop.f32.mrb[220].mxu0  ;;  %v16819_v56 = vld [vmem:[#allocation106_spill] sm:$0xff] }
 0x2b3   : > { %9771 = vmatmul.mubr.bf16.gmra.mrb[112].mxu1 %v16810_v25  ;;  %v4115_v40 = vadd.f32 1.0, %v10673_v46  ;;  %v10675_v48 = vpop.eup %10674  ;;  %v14909_v58 = vadd.f32 %v14659_v53, %v3401_v44  ;;  %v14911_v63 = vpop.f32.mrb[221].mxu0 }
 0x2b4   : > { %9774 = vmatprep.mubr.bf16.mxu1 %v16813_v19  ;;  %16814 = vst [vmem:[#allocation66_spill] sm:$0xff] %v14911_v63  ;;  %v4116_v6 = vadd.f32 1.0, %v10675_v48  ;;  %v3405_v24 = vpop.f32.mrb[222].mxu0  ;;  %v16818_v48 = vld [vmem:[#allocation107_spill] sm:$0xff] }
 0x2b5   : > { %10684 = vrcp.f32 %v4115_v40  ;;  %v8925_v25 = vmul.f32 -1.442695, %v14909_v58  ;;  %v14917_v1 = vadd.f32 %v14659_v53, %v3405_v24  ;;  %v14919_v19 = vpop.f32.mrb[223].mxu0  ;;  %v16820_v63 = vpack.c.bf16 %v16818_v48, %v16819_v56  ;;  %v16821_v24 = vld [vmem:[#allocation111_spill] sm:$0xff] }
 0x2b6   : > { %16815 = vst [vmem:[#allocation71_spill] sm:$0xff] %v14919_v19  ;;  %v10677_v22 = vpop.eup %10676  ;;  %10686 = vrcp.f32 %v4116_v6  ;;  %v16822_v19 = vld [vmem:[#allocation110_spill] sm:$0xff] }
 0x2b7   : > { %v14922_v46 = vmul.f32 %v10677_v22, %v14814_v55  ;;  %10688 = vpow2.f32 %v8925_v25  ;;  %v8926_v39 = vmul.f32 -1.442695, %v14917_v1  ;;  %v16823_v54 = vpack.c.bf16 %v16821_v24, %v16822_v19 }
 0x2b8   : > { %v10679_v7 = vpop.eup %10678 }
 0x2b9   : > { %16816 = vst [vmem:[#allocation70_spill] sm:$0xff] %v14922_v46  ;;  %v10681_v44 = vpop.eup %10680  ;;  %v14926_v40 = vmul.f32 %v10679_v7, %v14828_v3  ;;  %10690 = vpow2.f32 %v8926_v39  ;;  %v16827_v3 = vld [vmem:[#allocation114_spill] sm:$0xff] }
 0x2ba   : > { %v4117_v6 = vadd.f32 1.0, %v10681_v44  ;;  %v3411_v55 = vpop.f32.mrb[224].mxu0 }
 0x2bb   : > { %16817 = vst [vmem:[#allocation75_spill] sm:$0xff] %v14926_v40  ;;  %9775 = vmatmul.mubr.bf16.gmra.mrb[116].mxu1 %v16820_v63  ;;  %v10683_v22 = vpop.eup %10682  ;;  %v14935_v25 = vadd.f32 %v14659_v53, %v3411_v55  ;;  %v14937_v32 = vpop.f32.mrb[225].mxu0 }
 0x2bc   : > { %9778 = vmatprep.mubr.bf16.mxu1 %v16823_v54  ;;  %16824 = vst [vmem:[#allocation74_spill] sm:$0xff] %v14937_v32  ;;  %10692 = vrcp.f32 %v4117_v6  ;;  %v4118_v7 = vadd.f32 1.0, %v10683_v22  ;;  %v3415_v56 = vpop.f32.mrb[226].mxu0  ;;  %v16826_v22 = vld [vmem:[#allocation115_spill] sm:$0xff] }
 0x2bd   : > { %v8927_v63 = vmul.f32 -1.442695, %v14935_v25  ;;  %v14943_v39 = vadd.f32 %v14659_v53, %v3415_v56  ;;  %v14945_v54 = vpop.f32.mrb[227].mxu0  ;;  %v16828_v32 = vpack.c.bf16 %v16826_v22, %v16827_v3  ;;  %v16829_v56 = vld [vmem:[#allocation119_spill] sm:$0xff] }
 0x2be   : > { %16825 = vst [vmem:[#allocation79_spill] sm:$0xff] %v14945_v54  ;;  %10694 = vrcp.f32 %v4118_v7  ;;  %v16830_v54 = vld [vmem:[#allocation118_spill] sm:$0xff] }
 0x2bf   : > { %v10685_v19 = vpop.eup %10684  ;;  %10696 = vpow2.f32 %v8927_v63  ;;  %v8928_v48 = vmul.f32 -1.442695, %v14943_v39  ;;  %v16831_v46 = vpack.c.bf16 %v16829_v56, %v16830_v54 }
 0x2c0   : > { %v14948_v44 = vmul.f32 %v10685_v19, %v14852_v26  ;;  %v10687_v24 = vpop.eup %10686 }
 0x2c1   : > { %v10689_v55 = vpop.eup %10688  ;;  %v14952_v6 = vmul.f32 %v10687_v24, %v14863_v13  ;;  %10698 = vpow2.f32 %v8928_v48  ;;  %v16835_v13 = vld [vmem:[#allocation122_spill] sm:$0xff] }
 0x2c2   : > { %v4119_v7 = vadd.f32 1.0, %v10689_v55  ;;  %v3421_v26 = vpop.f32.mrb[228].mxu0 }
 0x2c3   : > { %9779 = vmatmul.mubr.bf16.gmra.mrb[120].mxu1 %v16828_v32  ;;  %v10691_v19 = vpop.eup %10690  ;;  %v14961_v63 = vadd.f32 %v14659_v53, %v3421_v26  ;;  %v14963_v40 = vpop.f32.mrb[229].mxu0 }
 0x2c4   : > { %9782 = vmatprep.mubr.bf16.mxu1 %v16831_v46  ;;  %16832 = vst [vmem:[#allocation78_spill] sm:$0xff] %v14963_v40  ;;  %10700 = vrcp.f32 %v4119_v7  ;;  %v4120_v24 = vadd.f32 1.0, %v10691_v19  ;;  %v3425_v3 = vpop.f32.mrb[230].mxu0  ;;  %v16834_v19 = vld [vmem:[#allocation123_spill] sm:$0xff] }
 0x2c5   : > { %v8929_v32 = vmul.f32 -1.442695, %v14961_v63  ;;  %v14969_v48 = vadd.f32 %v14659_v53, %v3425_v3  ;;  %v14971_v46 = vpop.f32.mrb[231].mxu0  ;;  %v16836_v40 = vpack.c.bf16 %v16834_v19, %v16835_v13  ;;  %v16837_v3 = vpack.c.bf16 %v14079_v61, %v14070_v36 }
 0x2c6   : > { %16833 = vst [vmem:[#allocation83_spill] sm:$0xff] %v14971_v46  ;;  %v10693_v54 = vpop.eup %10692  ;;  %10702 = vrcp.f32 %v4120_v24 }
 0x2c7   : > { %v14974_v55 = vmul.f32 %v10693_v54, %v14883_v50  ;;  %10704 = vpow2.f32 %v8929_v32  ;;  %v8930_v22 = vmul.f32 -1.442695, %v14969_v48 }
 0x2c8   : > { %v10695_v56 = vpop.eup %10694 }
 0x2c9   : > { %v10697_v26 = vpop.eup %10696  ;;  %v14978_v7 = vmul.f32 %v10695_v56, %v14891_v20  ;;  %10706 = vpow2.f32 %v8930_v22 }
 0x2ca   : > { %v4121_v24 = vadd.f32 1.0, %v10697_v26  ;;  %v3431_v50 = vpop.f32.mrb[232].mxu0 }
 0x2cb   : > { %9783 = vmatmul.mubr.bf16.gmra.mrb[124].mxu1 %v16836_v40  ;;  %v10699_v54 = vpop.eup %10698  ;;  %v14987_v32 = vadd.f32 %v14659_v53, %v3431_v50  ;;  %v14989_v46 = vpop.f32.mrb[233].mxu0 }
 0x2cc   : > { %9786 = vmatprep.mubr.bf16.mxu1 %v16837_v3  ;;  %10708 = vrcp.f32 %v4121_v24  ;;  %v4122_v56 = vadd.f32 1.0, %v10699_v54  ;;  %v3435_v13 = vpop.f32.mrb[234].mxu0  ;;  %v16838_v54 = vpack.c.bf16 %v14150_v10, %v14137_v27 }
 0x2cd   : > { %v8931_v40 = vmul.f32 -1.442695, %v14987_v32  ;;  %v14995_v22 = vadd.f32 %v14659_v53, %v3435_v13  ;;  %v14997_v36 = vpop.f32.mrb[235].mxu0  ;;  %v16839_v13 = vpack.c.bf16 %v14211_v21, %v14195_v42 }
 0x2ce   : > { %v10701_v61 = vpop.eup %10700  ;;  %10710 = vrcp.f32 %v4122_v56 }
 0x2cf   : > { %v15000_v26 = vmul.f32 %v10701_v61, %v14909_v58  ;;  %10712 = vpow2.f32 %v8931_v40  ;;  %v8932_v19 = vmul.f32 -1.442695, %v14995_v22 }
 0x2d0   : > { %v10703_v3 = vpop.eup %10702 }
 0x2d1   : > { %v10705_v50 = vpop.eup %10704  ;;  %v15004_v24 = vmul.f32 %v10703_v3, %v14917_v1  ;;  %10714 = vpow2.f32 %v8932_v19 }
 0x2d2   : > { %v4123_v56 = vadd.f32 1.0, %v10705_v50  ;;  %v3441_v58 = vpop.f32.mrb[236].mxu0 }
 0x2d3   : > { %9787 = vmatmul.mubr.bf16.gmra.mrb[0].mxu1 %v16838_v54  ;;  %v10707_v61 = vpop.eup %10706  ;;  %v15013_v40 = vadd.f32 %v14659_v53, %v3441_v58  ;;  %v15015_v20 = vpop.f32.mrb[237].mxu0 }
 0x2d4   : > { %9790 = vmatprep.mubr.bf16.mxu1 %v16839_v13  ;;  %10716 = vrcp.f32 %v4123_v56  ;;  %v4124_v3 = vadd.f32 1.0, %v10707_v61  ;;  %v3445_v27 = vpop.f32.mrb[238].mxu0  ;;  %v16840_v61 = vpack.c.bf16 %v14276_v4, %v14258_v16 }
 0x2d5   : > { %v8933_v10 = vmul.f32 -1.442695, %v15013_v40  ;;  %v15021_v19 = vadd.f32 %v14659_v53, %v3445_v27  ;;  %v15023_v42 = vpop.f32.mrb[239].mxu0  ;;  %v16841_v27 = vpack.c.bf16 %v14322_v17, %v14310_v62 }
 0x2d6   : > { %v10709_v21 = vpop.eup %10708  ;;  %10718 = vrcp.f32 %v4124_v3 }
 0x2d7   : > { %v15026_v50 = vmul.f32 %v10709_v21, %v14935_v25  ;;  %10720 = vpow2.f32 %v8933_v10  ;;  %v8934_v54 = vmul.f32 -1.442695, %v15021_v19 }
 0x2d8   : > { %v10711_v13 = vpop.eup %10710 }
 0x2d9   : > { %v10713_v58 = vpop.eup %10712  ;;  %v15030_v56 = vmul.f32 %v10711_v13, %v14943_v39  ;;  %10722 = vpow2.f32 %v8934_v54 }
 0x2da   : > { %v4125_v3 = vadd.f32 1.0, %v10713_v58  ;;  %v3451_v25 = vpop.f32.mrb[240].mxu0 }
 0x2db   : > { %9791 = vmatmul.mubr.bf16.gmra.mrb[4].mxu1 %v16840_v61  ;;  %v10715_v21 = vpop.eup %10714  ;;  %v15039_v10 = vadd.f32 %v14659_v53, %v3451_v25  ;;  %v15041_v1 = vpop.f32.mrb[241].mxu0 }
 0x2dc   : > { %9794 = vmatprep.mubr.bf16.mxu1 %v16841_v27  ;;  %10724 = vrcp.f32 %v4125_v3  ;;  %v4126_v13 = vadd.f32 1.0, %v10715_v21  ;;  %v3455_v16 = vpop.f32.mrb[242].mxu0  ;;  %v16842_v21 = vpack.c.bf16 %v14383_v41, %v14371_v28 }
 0x2dd   : > { %v8935_v4 = vmul.f32 -1.442695, %v15039_v10  ;;  %v15047_v54 = vadd.f32 %v14659_v53, %v3455_v16  ;;  %v15049_v62 = vpop.f32.mrb[243].mxu0  ;;  %v16843_v16 = vpack.c.bf16 %v14420_v35, %v14411_v31 }
 0x2de   : > { %v10717_v17 = vpop.eup %10716  ;;  %10726 = vrcp.f32 %v4126_v13 }
 0x2df   : > { %v15052_v58 = vmul.f32 %v10717_v17, %v14961_v63  ;;  %10728 = vpow2.f32 %v8935_v4  ;;  %v8936_v61 = vmul.f32 -1.442695, %v15047_v54 }
 0x2e0   : > { %v10719_v27 = vpop.eup %10718 }
 0x2e1   : > { %v10721_v25 = vpop.eup %10720  ;;  %v15056_v3 = vmul.f32 %v10719_v27, %v14969_v48  ;;  %10730 = vpow2.f32 %v8936_v61 }
 0x2e2   : > { %v4127_v13 = vadd.f32 1.0, %v10721_v25  ;;  %v3461_v63 = vpop.f32.mrb[244].mxu0 }
 0x2e3   : > { %9795 = vmatmul.mubr.bf16.gmra.mrb[8].mxu1 %v16842_v21  ;;  %v10723_v17 = vpop.eup %10722  ;;  %v15065_v4 = vadd.f32 %v14659_v53, %v3461_v63  ;;  %v15067_v39 = vpop.f32.mrb[245].mxu0 }
 0x2e4   : > { %9798 = vmatprep.mubr.bf16.mxu1 %v16843_v16  ;;  %10732 = vrcp.f32 %v4127_v13  ;;  %v4128_v27 = vadd.f32 1.0, %v10723_v17  ;;  %v3465_v28 = vpop.f32.mrb[246].mxu0  ;;  %v16844_v17 = vpack.c.bf16 %v14456_v14, %v14451_v45 }
 0x2e5   : > { %v8937_v41 = vmul.f32 -1.442695, %v15065_v4  ;;  %v15073_v61 = vadd.f32 %v14659_v53, %v3465_v28  ;;  %v15075_v31 = vpop.f32.mrb[247].mxu0  ;;  %v16845_v28 = vpack.c.bf16 %v14494_v37, %v14487_v5 }
 0x2e6   : > { %v10725_v35 = vpop.eup %10724  ;;  %10734 = vrcp.f32 %v4128_v27 }
 0x2e7   : > { %v15078_v25 = vmul.f32 %v10725_v35, %v14987_v32  ;;  %10736 = vpow2.f32 %v8937_v41  ;;  %v8938_v21 = vmul.f32 -1.442695, %v15073_v61 }
 0x2e8   : > { %v10727_v16 = vpop.eup %10726 }
 0x2e9   : > { %v10729_v63 = vpop.eup %10728  ;;  %v15082_v13 = vmul.f32 %v10727_v16, %v14995_v22  ;;  %10738 = vpow2.f32 %v8938_v21 }
 0x2ea   : > { %v4129_v27 = vadd.f32 1.0, %v10729_v63  ;;  %v3471_v32 = vpop.f32.mrb[248].mxu0 }
 0x2eb   : > { %9799 = vmatmul.mubr.bf16.gmra.mrb[12].mxu1 %v16844_v17  ;;  %v10731_v35 = vpop.eup %10730  ;;  %v15091_v41 = vadd.f32 %v14659_v53, %v3471_v32  ;;  %v15093_v48 = vpop.f32.mrb[249].mxu0 }
 0x2ec   : > { %9802 = vmatprep.mubr.bf16.mxu1 %v16845_v28  ;;  %10740 = vrcp.f32 %v4129_v27  ;;  %v4130_v16 = vadd.f32 1.0, %v10731_v35  ;;  %v3475_v45 = vpop.f32.mrb[250].mxu0  ;;  %v16847_v27 = vpack.c.bf16 %v14532_v51, %v14525_v9  ;;  %v16848_v35 = vpack.c.bf16 %v14570_v11, %v14563_v15 }
 0x2ed   : > { %v8939_v14 = vmul.f32 -1.442695, %v15091_v41  ;;  %v3622_v21 = vadd.f32 %v14659_v53, %v3475_v45  ;;  %v15099_v37 = vpop.f32.mrb[251].mxu0 }
 0x2ee   : > { %16846 = vst [vmem:[#allocation82_spill] sm:$0xff] %v15099_v37  ;;  %v10733_v5 = vpop.eup %10732  ;;  %10742 = vrcp.f32 %v4130_v16 }
 0x2ef   : > { %v15102_v63 = vmul.f32 %v10733_v5, %v15013_v40  ;;  %10744 = vpow2.f32 %v8939_v14  ;;  %v8940_v17 = vmul.f32 -1.442695, %v3622_v21 }
 0x2f0   : > { %v10735_v28 = vpop.eup %10734 }
 0x2f1   : > { %v10737_v32 = vpop.eup %10736  ;;  %v15105_v22 = vmul.f32 %v10735_v28, %v15021_v19  ;;  %10746 = vpow2.f32 %v8940_v17 }
 0x2f2   : > { %v4131_v16 = vadd.f32 1.0, %v10737_v32  ;;  %v3481_v45 = vpop.f32.mrb[252].mxu0 }
 0x2f3   : > { %9803 = vmatmul.mubr.bf16.gmra.mrb[16].mxu1 %v16847_v27  ;;  %v10739_v40 = vpop.eup %10738  ;;  %v3623_v14 = vadd.f32 %v14659_v53, %v3481_v45  ;;  %v15114_v5 = vpop.f32.mrb[253].mxu0  ;;  %v6119_v19 = vpack.c.bf16 %v15105_v22, %v15102_v63 }
 0x2f4   : > { %9806 = vmatprep.mubr.bf16.mxu1 %v16848_v35  ;;  %10748 = vrcp.f32 %v4131_v16  ;;  %v4132_v28 = vadd.f32 1.0, %v10739_v40  ;;  %v3485_v37 = vpop.f32.mrb[254].mxu0  ;;  %v16850_v16 = vpack.c.bf16 %v14608_v23, %v14601_v0 }
 0x2f5   : > { %v8941_v51 = vmul.f32 -1.442695, %v3623_v14  ;;  %v3624_v9 = vadd.f32 %v14659_v53, %v3485_v37  ;;  %v15119_v17 = vpop.f32.mrb[255].mxu0  ;;  %v16851_v53 = vpack.c.bf16 %v14646_v18, %v14639_v2  ;;  %v16852_v2 = vpack.c.bf16 %v14689_v52, %v14682_v8 }
 0x2f6   : > { %16849 = vst [vmem:[#allocation87_spill] sm:$0xff] %v15119_v17  ;;  %v10741_v11 = vpop.eup %10740  ;;  %10750 = vrcp.f32 %v4132_v28  ;;  %v16853_v18 = vpack.c.bf16 %v14727_v30, %v14720_v59  ;;  %v16854_v30 = vpack.c.bf16 %v14765_v29, %v14758_v60  ;;  %v16855_v59 = vpack.c.bf16 %v14803_v38, %v14796_v34 }
 0x2f7   : > { %v15122_v15 = vmul.f32 %v10741_v11, %v15039_v10  ;;  %10752 = vpow2.f32 %v8941_v51  ;;  %v8942_v32 = vmul.f32 -1.442695, %v3624_v9  ;;  %v16856_v29 = vpack.c.bf16 %v14841_v49, %v14834_v33  ;;  %v16859_v33 = vld [vmem:[#allocation75_spill] sm:$0xff]  ;;  %v16860_v49 = vld [vmem:[#allocation70_spill] sm:$0xff] }
 0x2f8   : > { %v10743_v27 = vpop.eup %10742  ;;  %v16857_v60 = vpack.c.bf16 %v14873_v47, %v14869_v57 }
 0x2f9   : > { %v10745_v35 = vpop.eup %10744  ;;  %v15125_v45 = vmul.f32 %v10743_v27, %v15047_v54  ;;  %10754 = vpow2.f32 %v8942_v32 }
 0x2fa   : > { %v4133_v37 = vadd.f32 1.0, %v10745_v35 }
 0x2fb   : > { %9807 = vmatmul.mubr.bf16.gmra.mrb[20].mxu1 %v16850_v16  ;;  %v10747_v40 = vpop.eup %10746 }
 0x2fc   : > { %9810 = vmatprep.mubr.bf16.mxu1 %v16851_v53  ;;  %10756 = vrcp.f32 %v4133_v37  ;;  %v4134_v28 = vadd.f32 1.0, %v10747_v40 }
 0x2fe   : > { %v10749_v51 = vpop.eup %10748  ;;  %10758 = vrcp.f32 %v4134_v28 }
 0x2ff   : > { %v15136_v54 = vmul.f32 %v10749_v51, %v15065_v4 }
 0x300   : > { %v10751_v11 = vpop.eup %10750 }
 0x301   : > { %v10753_v23 = vpop.eup %10752  ;;  %v15139_v0 = vmul.f32 %v10751_v11, %v15073_v61 }
 0x302   : > { %v4135_v32 = vadd.f32 1.0, %v10753_v23 }
 0x303   : > { %9811 = vmatmul.mubr.bf16.gmra.mrb[24].mxu1 %v16852_v2  ;;  %v10755_v27 = vpop.eup %10754 }
 0x304   : > { %9814 = vmatprep.mubr.bf16.mxu1 %v16853_v18  ;;  %10760 = vrcp.f32 %v4135_v32  ;;  %v4136_v16 = vadd.f32 1.0, %v10755_v27 }
 0x305   : > { %v9444_v35 = vpop.f32.mrb[0].mxu0 }
 0x306   : > { %v4788_v53 = vpop.f32.mrb[1].mxu0  ;;  %v10757_v61 = vpop.eup %10756  ;;  %10762 = vrcp.f32 %v4136_v16 }
 0x307   : > { %v9445_v37 = vpop.f32.mrb[2].mxu0  ;;  %v15150_v52 = vmul.f32 %v10757_v61, %v15091_v41 }
 0x308   : > { %v4791_v40 = vpop.f32.mrb[3].mxu0  ;;  %v10759_v8 = vpop.eup %10758 }
 0x309   : > { %v15152_v28 = vmul.f32 %v10759_v8, %v3622_v21  ;;  %v16861_v8 = vpack.c.bf16 %v16859_v33, %v16860_v49 }
 0x30b   : > { %9815 = vmatmul.mubr.bf16.gmra.mrb[28].mxu1 %v16854_v30 }
 0x30c   : > { %9818 = vmatprep.mubr.bf16.mxu1 %v16855_v59 }
 0x30d   : > { %v9448_v11 = vpop.f32.mrb[4].mxu0 }
 0x30e   : > { %v4804_v23 = vpop.f32.mrb[5].mxu0  ;;  %v10761_v2 = vpop.eup %10760 }
 0x30f   : > { %v9449_v18 = vpop.f32.mrb[6].mxu0  ;;  %v15162_v41 = vmul.f32 %v10761_v2, %v3623_v14  ;;  %v16862_v2 = vpack.c.bf16 %v14952_v6, %v14948_v44 }
 0x310   : > { %v4807_v32 = vpop.f32.mrb[7].mxu0  ;;  %v10763_v21 = vpop.eup %10762 }
 0x311   : > { %v15164_v27 = vmul.f32 %v10763_v21, %v3624_v9  ;;  %v16858_v9 = vpack.c.bf16 %v14900_v12, %v14896_v43  ;;  %v16863_v43 = vpack.c.bf16 %v14978_v7, %v14974_v55  ;;  %v15205_v21 = vld [vmem:[%s16529_s7] ss:$0 sm:$0xff] }
 0x313   : > { %9819 = vmatmul.mubr.bf16.gmra.mrb[32].mxu1 %v16856_v29 }
 0x314   : > { %9822 = vmatprep.mubr.bf16.mxu1 %v16857_v60 }
 0x315   : > { %v15174_v34 = vpop.f32.mrb[8].mxu0 }
 0x316   : > { %v15176_v16 = vpop.f32.mrb[9].mxu0 }
 0x317   : > { %v15178_v14 = vpop.f32.mrb[10].mxu0 }
 0x318   : > { %v15180_v61 = vpop.f32.mrb[11].mxu0 }
 0x31b   : > { %9823 = vmatmul.mubr.bf16.gmra.mrb[36].mxu1 %v16858_v9 }
 0x31c   : > { %9826 = vmatprep.mubr.bf16.mxu1 %v16861_v8 }
 0x31d   : > { %v15188_v57 = vpop.f32.mrb[12].mxu0 }
 0x31e   : > { %v15190_v47 = vpop.f32.mrb[13].mxu0 }
 0x31f   : > { %v15192_v30 = vpop.f32.mrb[14].mxu0 }
 0x320   : > { %v15194_v59 = vpop.f32.mrb[15].mxu0 }
 0x323   : > { %9827 = vmatmul.mubr.bf16.gmra.mrb[40].mxu1 %v16862_v2 }
 0x324   : > { %9830 = vmatprep.mubr.bf16.mxu1 %v16863_v43 }
 0x325   : > { %v15207_v29 = vpop.f32.mrb[16].mxu0 }
 0x326   : > { %v9724_v12 = vpop.f32.mrb[64].mxu1  ;;  %v15209_v33 = vpop.f32.mrb[17].mxu0 }
 0x327   : > { %v9858_v60 = vadd.f32 %v9724_v12, %v9444_v35  ;;  %v6222_v9 = vpop.f32.mrb[65].mxu1  ;;  %v15211_v44 = vpop.f32.mrb[18].mxu0 }
 0x328   : > { %v9859_v49 = vadd.f32 %v6222_v9, %v4788_v53  ;;  %v9725_v8 = vpop.f32.mrb[66].mxu1  ;;  %v15216_v2 = vpop.f32.mrb[19].mxu0  ;;  %v16864_v53 = vpack.c.bf16 %v15004_v24, %v15000_v26  ;;  %v16865_v9 = vpack.c.bf16 %v15030_v56, %v15026_v50 }
 0x329   : > { %v15214_v6 = vadd.f32 %v9858_v60, %v15205_v21  ;;  %v9860_v55 = vadd.f32 %v9725_v8, %v9445_v37  ;;  %v6225_v7 = vpop.f32.mrb[67].mxu1 }
 0x32a   : > { %v15219_v43 = vadd.f32 %v9859_v49, %v15205_v21  ;;  %v9861_v38 = vadd.f32 %v6225_v7, %v4791_v40 }
 0x32b   : > { %v9090_v35 = vmul.f32 -1.442695, %v15214_v6  ;;  %v15223_v12 = vadd.f32 %v9860_v55, %v15205_v21  ;;  %9831 = vmatmul.mubr.bf16.gmra.mrb[44].mxu1 %v16864_v53 }
 0x32c   : > { %v9088_v60 = vmul.f32 -1.442695, %v15219_v43  ;;  %v15230_v37 = vadd.f32 %v9861_v38, %v15205_v21  ;;  %9834 = vmatprep.mubr.bf16.mxu1 %v16865_v9 }
 0x32d   : > { %10764 = vpow2.f32 %v9090_v35  ;;  %v9091_v40 = vmul.f32 -1.442695, %v15223_v12  ;;  %v15237_v55 = vpop.f32.mrb[20].mxu0 }
 0x32e   : > { %10766 = vpow2.f32 %v9088_v60  ;;  %v9089_v49 = vmul.f32 -1.442695, %v15230_v37  ;;  %v9728_v8 = vpop.f32.mrb[68].mxu1  ;;  %v15239_v7 = vpop.f32.mrb[21].mxu0 }
 0x32f   : > { %10768 = vpow2.f32 %v9091_v40  ;;  %v9862_v26 = vadd.f32 %v9728_v8, %v9448_v11  ;;  %v6238_v24 = vpop.f32.mrb[69].mxu1  ;;  %v15241_v51 = vpop.f32.mrb[22].mxu0 }
 0x330   : > { %10770 = vpow2.f32 %v9089_v49  ;;  %v9863_v38 = vadd.f32 %v6238_v24, %v4804_v23  ;;  %v9729_v53 = vpop.f32.mrb[70].mxu1  ;;  %v15246_v60 = vpop.f32.mrb[23].mxu0  ;;  %v16866_v23 = vpack.c.bf16 %v15056_v3, %v15052_v58 }
 0x331   : > { %v15244_v50 = vadd.f32 %v9862_v26, %v15205_v21  ;;  %v9864_v56 = vadd.f32 %v9729_v53, %v9449_v18  ;;  %v6241_v35 = vpop.f32.mrb[71].mxu1  ;;  %v16867_v26 = vpack.c.bf16 %v15082_v13, %v15078_v25 }
 0x332   : > { %v15249_v9 = vadd.f32 %v9863_v38, %v15205_v21  ;;  %v9865_v40 = vadd.f32 %v6241_v35, %v4807_v32 }
 0x333   : > { %v9094_v11 = vmul.f32 -1.442695, %v15244_v50  ;;  %v15253_v8 = vadd.f32 %v9864_v56, %v15205_v21  ;;  %9835 = vmatmul.mubr.bf16.gmra.mrb[48].mxu1 %v16866_v23 }
 0x334   : > { %v9092_v49 = vmul.f32 -1.442695, %v15249_v9  ;;  %v15260_v18 = vadd.f32 %v9865_v40, %v15205_v21  ;;  %9838 = vmatprep.mubr.bf16.mxu1 %v16867_v26 }
 0x335   : > { %10772 = vpow2.f32 %v9094_v11  ;;  %v9095_v32 = vmul.f32 -1.442695, %v15253_v8  ;;  %v15267_v53 = vpop.f32.mrb[24].mxu0 }
 0x336   : > { %10774 = vpow2.f32 %v9092_v49  ;;  %v9093_v24 = vmul.f32 -1.442695, %v15260_v18  ;;  %v9732_v38 = vpop.f32.mrb[72].mxu1  ;;  %v15270_v35 = vpop.f32.mrb[25].mxu0 }
 0x337   : > { %v10765_v58 = vpop.eup %10764  ;;  %10776 = vpow2.f32 %v9095_v32  ;;  %v9866_v3 = vadd.f32 %v9732_v38, %v15174_v34  ;;  %v6254_v56 = vpop.f32.mrb[73].mxu1 }
 0x338   : > { %v10767_v40 = vpop.eup %10766  ;;  %v7382_v23 = vadd.f32 1.0, %v10765_v58  ;;  %10778 = vpow2.f32 %v9093_v24  ;;  %v9867_v25 = vadd.f32 %v6254_v56, %v15176_v16  ;;  %v9733_v13 = vpop.f32.mrb[74].mxu1 }
 0x339   : > { %v15273_v11 = vpop.f32.mrb[26].mxu0  ;;  %v10769_v49 = vpop.eup %10768  ;;  %v7380_v26 = vadd.f32 1.0, %v10767_v40  ;;  %v15276_v4 = vadd.f32 %v9866_v3, %v15205_v21  ;;  %v9868_v32 = vadd.f32 %v9733_v13, %v15178_v14 }
 0x33a   : > { %v6257_v10 = vpop.f32.mrb[75].mxu1  ;;  %v15279_v34 = vpop.f32.mrb[27].mxu0  ;;  %10780 = vrcp.f32 %v7382_v23  ;;  %v7383_v58 = vadd.f32 1.0, %v10769_v49  ;;  %v15282_v24 = vadd.f32 %v9867_v25, %v15205_v21 }
 0x33b   : > { %v10771_v38 = vpop.eup %10770  ;;  %v9869_v16 = vadd.f32 %v6257_v10, %v15180_v61  ;;  %10782 = vrcp.f32 %v7380_v26  ;;  %v9098_v40 = vmul.f32 -1.442695, %v15276_v4  ;;  %v15287_v3 = vadd.f32 %v9868_v32, %v15205_v21  ;;  %9839 = vmatmul.mubr.bf16.gmra.mrb[52].mxu1 %v6119_v19 }
 0x33c   : > { %v7381_v56 = vadd.f32 1.0, %v10771_v38  ;;  %10784 = vrcp.f32 %v7383_v58  ;;  %v9096_v14 = vmul.f32 -1.442695, %v15282_v24  ;;  %v16868_v10 = vpack.c.bf16 %v15125_v45, %v15122_v15 }
 0x33d   : > { %v15294_v23 = vadd.f32 %v9869_v16, %v15205_v21  ;;  %v9099_v61 = vmul.f32 -1.442695, %v15287_v3  ;;  %v15304_v19 = vpop.f32.mrb[28].mxu0 }
 0x33e   : > { %9842 = vmatprep.mubr.bf16.mxu1 %v16868_v10  ;;  %10786 = vrcp.f32 %v7381_v56  ;;  %v9736_v63 = vpop.f32.mrb[76].mxu1  ;;  %v15307_v26 = vpop.f32.mrb[29].mxu0 }
 0x33f   : > { %10788 = vpow2.f32 %v9098_v40  ;;  %v9097_v22 = vmul.f32 -1.442695, %v15294_v23  ;;  %v10773_v25 = vpop.eup %10772  ;;  %v9870_v13 = vadd.f32 %v9736_v63, %v15188_v57  ;;  %v6270_v49 = vpop.f32.mrb[77].mxu1 }
 0x340   : > { %10790 = vpow2.f32 %v9096_v14  ;;  %v10775_v15 = vpop.eup %10774  ;;  %v7386_v45 = vadd.f32 1.0, %v10773_v25  ;;  %v9871_v32 = vadd.f32 %v6270_v49, %v15190_v47  ;;  %v9737_v38 = vpop.f32.mrb[78].mxu1 }
 0x341   : > { %10792 = vpow2.f32 %v9099_v61  ;;  %v15310_v58 = vpop.f32.mrb[30].mxu0  ;;  %v10777_v16 = vpop.eup %10776  ;;  %v7384_v56 = vadd.f32 1.0, %v10775_v15  ;;  %v15314_v40 = vadd.f32 %v9870_v13, %v15205_v21  ;;  %v9872_v57 = vadd.f32 %v9737_v38, %v15192_v30 }
 0x342   : > { %10794 = vpow2.f32 %v9097_v22  ;;  %v6273_v14 = vpop.f32.mrb[79].mxu1  ;;  %v15317_v10 = vpop.f32.mrb[31].mxu0  ;;  %v7387_v61 = vadd.f32 1.0, %v10777_v16  ;;  %v15320_v47 = vadd.f32 %v9871_v32, %v15205_v21  ;;  %v16869_v30 = vpack.c.bf16 %v15139_v0, %v15136_v54 }
 0x343   : > { %v10779_v63 = vpop.eup %10778  ;;  %10796 = vrcp.f32 %v7386_v45  ;;  %v9873_v25 = vadd.f32 %v6273_v14, %v15194_v59  ;;  %v9102_v22 = vmul.f32 -1.442695, %v15314_v40  ;;  %v15325_v13 = vadd.f32 %v9872_v57, %v15205_v21 }
 0x344   : > { %10798 = vrcp.f32 %v7384_v56  ;;  %v7385_v49 = vadd.f32 1.0, %v10779_v63  ;;  %9843 = vmatmul.mubr.bf16.gmra.mrb[56].mxu1 %v16869_v30  ;;  %v10781_v15 = vpop.eup %10780  ;;  %v9100_v45 = vmul.f32 -1.442695, %v15320_v47  ;;  %v16870_v59 = vpack.c.bf16 %v15152_v28, %v15150_v52 }
 0x345   : > { %10800 = vrcp.f32 %v7387_v61  ;;  %v15332_v32 = vadd.f32 %v9873_v25, %v15205_v21  ;;  %v10783_v38 = vpop.eup %10782  ;;  %v7766_v16 = vmul.f32 %v10781_v15, %v15214_v6  ;;  %v9103_v56 = vmul.f32 -1.442695, %v15325_v13  ;;  %v15341_v63 = vpop.f32.mrb[32].mxu0  ;;  %v16871_v25 = vld [vmem:[#allocation10_spill] sm:$0xff] }
 0x346   : > { %9846 = vmatprep.mubr.bf16.mxu1 %v16870_v59  ;;  %10802 = vrcp.f32 %v7385_v49  ;;  %v10785_v54 = vpop.eup %10784  ;;  %v7764_v0 = vmul.f32 %v10783_v38, %v15219_v43  ;;  %v9740_v14 = vpop.f32.mrb[80].mxu1 }
 0x347   : > { %10804 = vpow2.f32 %v9102_v22  ;;  %v9101_v57 = vmul.f32 -1.442695, %v15332_v32  ;;  %v7894_v30 = vmul.f32 %v7766_v16, %v16871_v25  ;;  %8022 = vst [vmem:[%s15346_s26 + $0x10] sm:$0xff] %v7766_v16  ;;  %v7767_v52 = vmul.f32 %v10785_v54, %v15223_v12  ;;  %v6286_v6 = vpop.f32.mrb[81].mxu1  ;;  %v15351_v43 = vpop.f32.mrb[33].mxu0  ;;  %v16872_v22 = vld [vmem:[#allocation8_spill] sm:$0xff] }
 0x348   : > { %v10787_v61 = vpop.eup %10786  ;;  %10806 = vpow2.f32 %v9100_v45  ;;  %v9874_v28 = vadd.f32 %v9740_v14, %v15207_v29  ;;  %v7892_v15 = vmul.f32 %v7764_v0, %v16872_v22  ;;  %8020 = vst [vmem:[%s15346_s26] sm:$0xff] %v7764_v0  ;;  %v9875_v38 = vadd.f32 %v6286_v6, %v15209_v33  ;;  %v9741_v16 = vpop.f32.mrb[82].mxu1  ;;  %v16873_v29 = vld [vmem:[#allocation11_spill] sm:$0xff]  ;;  %v16874_v14 = vld [vmem:[#allocation9_spill] sm:$0xff] }
 0x349   : > { %v10789_v49 = vpop.eup %10788  ;;  %v7765_v59 = vmul.f32 %v10787_v61, %v15230_v37  ;;  %10808 = vpow2.f32 %v9103_v56  ;;  %v15357_v25 = vpop.f32.mrb[34].mxu0  ;;  %8150 = vst [vmem:[%s15361_s28 + $0x10] sm:$0xff] %v7894_v30  ;;  %v7895_v45 = vmul.f32 %v7767_v52, %v16873_v29  ;;  %8023 = vst [vmem:[%s15346_s26 + $0x18] sm:$0xff] %v7767_v52  ;;  %v9876_v52 = vadd.f32 %v9741_v16, %v15211_v44 }
 0x34a   : > { %v10791_v12 = vpop.eup %10790  ;;  %v7390_v54 = vadd.f32 1.0, %v10789_v49  ;;  %10810 = vpow2.f32 %v9101_v57  ;;  %v15367_v37 = vadd.f32 %v9874_v28, %v15205_v21  ;;  %v6289_v33 = vpop.f32.mrb[83].mxu1  ;;  %8148 = vst [vmem:[%s15361_s28] sm:$0xff] %v7892_v15  ;;  %v15375_v30 = vadd.f32 %v9875_v38, %v15205_v21 }
 0x34b   : > { %v15369_v56 = vpop.f32.mrb[35].mxu0  ;;  %v10793_v0 = vpop.eup %10792  ;;  %v7893_v61 = vmul.f32 %v7765_v59, %v16874_v14  ;;  %8021 = vst [vmem:[%s15346_s26 + $0x8] sm:$0xff] %v7765_v59  ;;  %v7388_v6 = vadd.f32 1.0, %v10791_v12  ;;  %8151 = vst [vmem:[%s15361_s28 + $0x18] sm:$0xff] %v7895_v45  ;;  %v9877_v22 = vadd.f32 %v6289_v33, %v15216_v2  ;;  %v16875_v15 = vpack.c.bf16 %v15164_v27, %v15162_v41  ;;  %v16876_v14 = vld [vmem:[#allocation14_spill] sm:$0xff] }
 0x34c   : > { %v10795_v49 = vpop.eup %10794  ;;  %10812 = vrcp.f32 %v7390_v54  ;;  %v7391_v57 = vadd.f32 1.0, %v10793_v0  ;;  %v9106_v28 = vmul.f32 -1.442695, %v15367_v37  ;;  %v9104_v38 = vmul.f32 -1.442695, %v15375_v30 }
 0x34d   : > { %9847 = vmatmul.mubr.bf16.gmra.mrb[60].mxu1 %v16875_v15  ;;  %v10797_v29 = vpop.eup %10796  ;;  %8149 = vst [vmem:[%s15361_s28 + $0x8] sm:$0xff] %v7893_v61  ;;  %10814 = vrcp.f32 %v7388_v6  ;;  %v7389_v59 = vadd.f32 1.0, %v10795_v49  ;;  %v15387_v44 = vadd.f32 %v9876_v52, %v15205_v21  ;;  %v15391_v2 = vadd.f32 %v9877_v22, %v15205_v21  ;;  %v15395_v33 = vpop.f32.mrb[36].mxu0 }
 0x34e   : > { %v10799_v16 = vpop.eup %10798  ;;  %v7770_v12 = vmul.f32 %v10797_v29, %v15244_v50  ;;  %10816 = vrcp.f32 %v7391_v57  ;;  %v9744_v54 = vpop.f32.mrb[84].mxu1  ;;  %v16877_v57 = vld [vmem:[#allocation12_spill] sm:$0xff] }
 0x34f   : > { %v10801_v45 = vpop.eup %10800  ;;  %v7768_v41 = vmul.f32 %v10799_v16, %v15249_v9  ;;  %10818 = vrcp.f32 %v7389_v59  ;;  %v9107_v27 = vmul.f32 -1.442695, %v15387_v44  ;;  %v9105_v6 = vmul.f32 -1.442695, %v15391_v2  ;;  %v6302_v52 = vpop.f32.mrb[85].mxu1  ;;  %v16878_v16 = vld [vmem:[#allocation15_spill] sm:$0xff] }
 0x350   : > { %v10803_v0 = vpop.eup %10802  ;;  %v7898_v61 = vmul.f32 %v7770_v12, %v16876_v14  ;;  %8026 = vst [vmem:[%s15346_s26 + $0x30] sm:$0xff] %v7770_v12  ;;  %v7771_v50 = vmul.f32 %v10801_v45, %v15253_v8  ;;  %10820 = vpow2.f32 %v9106_v28  ;;  %v15401_v49 = vpop.f32.mrb[37].mxu0  ;;  %v9878_v29 = vadd.f32 %v9744_v54, %v15237_v55  ;;  %v16879_v55 = vld [vmem:[#allocation13_spill] sm:$0xff] }
 0x351   : > { %v10805_v9 = vpop.eup %10804  ;;  %v7896_v22 = vmul.f32 %v7768_v41, %v16877_v57  ;;  %8024 = vst [vmem:[%s15346_s26 + $0x20] sm:$0xff] %v7768_v41  ;;  %v7769_v15 = vmul.f32 %v10803_v0, %v15260_v18  ;;  %10822 = vpow2.f32 %v9104_v38  ;;  %v9745_v59 = vpop.f32.mrb[86].mxu1  ;;  %v9879_v41 = vadd.f32 %v6302_v52, %v15239_v7 }
 0x352   : > { %v15407_v8 = vpop.f32.mrb[38].mxu0  ;;  %v10807_v28 = vpop.eup %10806  ;;  %8154 = vst [vmem:[%s15361_s28 + $0x30] sm:$0xff] %v7898_v61  ;;  %v7899_v12 = vmul.f32 %v7771_v50, %v16878_v16  ;;  %8027 = vst [vmem:[%s15346_s26 + $0x38] sm:$0xff] %v7771_v50  ;;  %v7394_v45 = vadd.f32 1.0, %v10805_v9  ;;  %10824 = vpow2.f32 %v9107_v27  ;;  %v15419_v61 = vadd.f32 %v9878_v29, %v15205_v21 }
 0x353   : > { %v6305_v14 = vpop.f32.mrb[87].mxu1  ;;  %v15413_v18 = vpop.f32.mrb[39].mxu0  ;;  %8152 = vst [vmem:[%s15361_s28 + $0x20] sm:$0xff] %v7896_v22  ;;  %v7897_v54 = vmul.f32 %v7769_v15, %v16879_v55  ;;  %8025 = vst [vmem:[%s15346_s26 + $0x28] sm:$0xff] %v7769_v15  ;;  %v7392_v0 = vadd.f32 1.0, %v10807_v28  ;;  %10826 = vpow2.f32 %v9105_v6  ;;  %v15423_v7 = vadd.f32 %v9879_v41, %v15205_v21 }
 0x354   : > { %v10809_v38 = vpop.eup %10808  ;;  %8155 = vst [vmem:[%s15361_s28 + $0x38] sm:$0xff] %v7899_v12  ;;  %10828 = vrcp.f32 %v7394_v45  ;;  %v9880_v50 = vadd.f32 %v9745_v59, %v15241_v51  ;;  %v9110_v9 = vmul.f32 -1.442695, %v15419_v61  ;;  %v9881_v22 = vadd.f32 %v6305_v14, %v15246_v60 }
 0x355   : > { %v10811_v57 = vpop.eup %10810  ;;  %v7395_v27 = vadd.f32 1.0, %v10809_v38  ;;  %8153 = vst [vmem:[%s15361_s28 + $0x28] sm:$0xff] %v7897_v54  ;;  %10830 = vrcp.f32 %v7392_v0  ;;  %v9108_v15 = vmul.f32 -1.442695, %v15423_v7  ;;  %v15437_v12 = vpop.f32.mrb[40].mxu0  ;;  %v16880_v54 = vld [vmem:[#allocation18_spill] sm:$0xff] }
 0x356   : > { %v7393_v52 = vadd.f32 1.0, %v10811_v57  ;;  %v10813_v6 = vpop.eup %10812  ;;  %v15431_v29 = vadd.f32 %v9880_v50, %v15205_v21  ;;  %v15435_v51 = vadd.f32 %v9881_v22, %v15205_v21  ;;  %v9748_v59 = vpop.f32.mrb[88].mxu1 }
 0x357   : > { %10832 = vrcp.f32 %v7395_v27  ;;  %v10815_v28 = vpop.eup %10814  ;;  %v7774_v16 = vmul.f32 %v10813_v6, %v15276_v4  ;;  %v9882_v14 = vadd.f32 %v9748_v59, %v15267_v53  ;;  %v6318_v38 = vpop.f32.mrb[89].mxu1 }
 0x358   : > { %10834 = vrcp.f32 %v7393_v52  ;;  %v10817_v45 = vpop.eup %10816  ;;  %v7772_v60 = vmul.f32 %v10815_v28, %v15282_v24  ;;  %v9111_v41 = vmul.f32 -1.442695, %v15431_v29  ;;  %v15442_v55 = vpop.f32.mrb[41].mxu0  ;;  %v9109_v24 = vmul.f32 -1.442695, %v15435_v51 }
 0x359   : > { %10836 = vpow2.f32 %v9110_v9  ;;  %v10819_v4 = vpop.eup %10818  ;;  %v7902_v0 = vmul.f32 %v7774_v16, %v16880_v54  ;;  %8030 = vst [vmem:[%s15346_s26 + $0x50] sm:$0xff] %v7774_v16  ;;  %v7775_v57 = vmul.f32 %v10817_v45, %v15287_v3  ;;  %v9749_v27 = vpop.f32.mrb[90].mxu1  ;;  %v16881_v9 = vld [vmem:[#allocation16_spill] sm:$0xff]  ;;  %v15454_v6 = vadd.f32 %v9882_v14, %v15205_v21  ;;  %v16882_v16 = vld [vmem:[#allocation19_spill] sm:$0xff] }
 0x35a   : > { %10838 = vpow2.f32 %v9108_v15  ;;  %v15448_v50 = vpop.f32.mrb[42].mxu0  ;;  %v10821_v52 = vpop.eup %10820  ;;  %v7900_v53 = vmul.f32 %v7772_v60, %v16881_v9  ;;  %8028 = vst [vmem:[%s15346_s26 + $0x40] sm:$0xff] %v7772_v60  ;;  %v7773_v22 = vmul.f32 %v10819_v4, %v15294_v23  ;;  %v9883_v60 = vadd.f32 %v6318_v38, %v15270_v35  ;;  %v16883_v23 = vld [vmem:[#allocation17_spill] sm:$0xff] }
 0x35b   : > { %10840 = vpow2.f32 %v9111_v41  ;;  %v6321_v3 = vpop.f32.mrb[91].mxu1  ;;  %v15456_v28 = vpop.f32.mrb[43].mxu0  ;;  %8158 = vst [vmem:[%s15361_s28 + $0x50] sm:$0xff] %v7902_v0  ;;  %v7903_v59 = vmul.f32 %v7775_v57, %v16882_v16  ;;  %8031 = vst [vmem:[%s15346_s26 + $0x58] sm:$0xff] %v7775_v57  ;;  %v7398_v45 = vadd.f32 1.0, %v10821_v52  ;;  %v9884_v9 = vadd.f32 %v9749_v27, %v15273_v11 }
 0x35c   : > { %v10823_v15 = vpop.eup %10822  ;;  %10842 = vpow2.f32 %v9109_v24  ;;  %8156 = vst [vmem:[%s15361_s28 + $0x40] sm:$0xff] %v7900_v53  ;;  %v7901_v41 = vmul.f32 %v7773_v22, %v16883_v23  ;;  %8029 = vst [vmem:[%s15346_s26 + $0x48] sm:$0xff] %v7773_v22  ;;  %v9114_v4 = vmul.f32 -1.442695, %v15454_v6  ;;  %v15469_v57 = vadd.f32 %v9883_v60, %v15205_v21 }
 0x35d   : > { %v10825_v54 = vpop.eup %10824  ;;  %v7396_v14 = vadd.f32 1.0, %v10823_v15  ;;  %8159 = vst [vmem:[%s15361_s28 + $0x58] sm:$0xff] %v7903_v59  ;;  %10844 = vrcp.f32 %v7398_v45  ;;  %v9885_v24 = vadd.f32 %v6321_v3, %v15279_v34  ;;  %v15474_v52 = vadd.f32 %v9884_v9, %v15205_v21  ;;  %v15481_v16 = vpop.f32.mrb[44].mxu0 }
 0x35e   : > { %v10827_v17 = vpop.eup %10826  ;;  %v7399_v0 = vadd.f32 1.0, %v10825_v54  ;;  %8157 = vst [vmem:[%s15361_s28 + $0x48] sm:$0xff] %v7901_v41  ;;  %v9112_v27 = vmul.f32 -1.442695, %v15469_v57  ;;  %v9752_v15 = vpop.f32.mrb[92].mxu1  ;;  %v16884_v54 = vld [vmem:[#allocation22_spill] sm:$0xff] }
 0x35f   : > { %v10829_v35 = vpop.eup %10828  ;;  %10846 = vrcp.f32 %v7396_v14  ;;  %v7397_v38 = vadd.f32 1.0, %v10827_v17  ;;  %v15479_v22 = vadd.f32 %v9885_v24, %v15205_v21  ;;  %v9115_v17 = vmul.f32 -1.442695, %v15474_v52  ;;  %v6334_v45 = vpop.f32.mrb[93].mxu1  ;;  %v16885_v24 = vld [vmem:[#allocation20_spill] sm:$0xff] }
 0x360   : > { %v10831_v53 = vpop.eup %10830  ;;  %v7778_v11 = vmul.f32 %v10829_v35, %v15314_v40  ;;  %10848 = vrcp.f32 %v7399_v0  ;;  %v9886_v59 = vadd.f32 %v9752_v15, %v15304_v19  ;;  %v15486_v40 = vpop.f32.mrb[45].mxu0 }
 0x361   : > { %v10833_v34 = vpop.eup %10832  ;;  %v7776_v3 = vmul.f32 %v10831_v53, %v15320_v47  ;;  %10850 = vrcp.f32 %v7397_v38  ;;  %v9113_v47 = vmul.f32 -1.442695, %v15479_v22  ;;  %v9753_v14 = vpop.f32.mrb[94].mxu1 }
 0x362   : > { %v10835_v60 = vpop.eup %10834  ;;  %v7906_v23 = vmul.f32 %v7778_v11, %v16884_v54  ;;  %8034 = vst [vmem:[%s15346_s26 + $0x70] sm:$0xff] %v7778_v11  ;;  %v7779_v41 = vmul.f32 %v10833_v34, %v15325_v13  ;;  %10852 = vpow2.f32 %v9114_v4  ;;  %v15492_v9 = vpop.f32.mrb[46].mxu0  ;;  %v15498_v38 = vadd.f32 %v9886_v59, %v15205_v21  ;;  %v16886_v11 = vld [vmem:[#allocation23_spill] sm:$0xff] }
 0x363   : > { %v10837_v0 = vpop.eup %10836  ;;  %v7904_v19 = vmul.f32 %v7776_v3, %v16885_v24  ;;  %8032 = vst [vmem:[%s15346_s26 + $0x60] sm:$0xff] %v7776_v3  ;;  %v7777_v35 = vmul.f32 %v10835_v60, %v15332_v32  ;;  %10854 = vpow2.f32 %v9112_v27  ;;  %v6337_v13 = vpop.f32.mrb[95].mxu1  ;;  %v9887_v3 = vadd.f32 %v6334_v45, %v15307_v26  ;;  %v16887_v32 = vld [vmem:[#allocation21_spill] sm:$0xff] }
 0x364   : > { %v15500_v53 = vpop.f32.mrb[47].mxu0  ;;  %v10839_v4 = vpop.eup %10838  ;;  %8162 = vst [vmem:[%s15361_s28 + $0x70] sm:$0xff] %v7906_v23  ;;  %v7907_v15 = vmul.f32 %v7779_v41, %v16886_v11  ;;  %8035 = vst [vmem:[%s15346_s26 + $0x78] sm:$0xff] %v7779_v41  ;;  %v7402_v34 = vadd.f32 1.0, %v10837_v0  ;;  %10856 = vpow2.f32 %v9115_v17  ;;  %v9118_v60 = vmul.f32 -1.442695, %v15498_v38 }
 0x365   : > { %v10841_v54 = vpop.eup %10840  ;;  %8160 = vst [vmem:[%s15361_s28 + $0x60] sm:$0xff] %v7904_v19  ;;  %v7905_v27 = vmul.f32 %v7777_v35, %v16887_v32  ;;  %8033 = vst [vmem:[%s15346_s26 + $0x68] sm:$0xff] %v7777_v35  ;;  %v7400_v59 = vadd.f32 1.0, %v10839_v4  ;;  %10858 = vpow2.f32 %v9113_v47  ;;  %v15512_v41 = vadd.f32 %v9887_v3, %v15205_v21  ;;  %v15521_v4 = vpop.f32.mrb[48].mxu0 }
 0x366   : > { %v10843_v24 = vpop.eup %10842  ;;  %8163 = vst [vmem:[%s15361_s28 + $0x78] sm:$0xff] %v7907_v15  ;;  %10860 = vrcp.f32 %v7402_v34  ;;  %v7403_v23 = vadd.f32 1.0, %v10841_v54  ;;  %v9888_v17 = vadd.f32 %v9753_v14, %v15310_v58  ;;  %v9889_v45 = vadd.f32 %v6337_v13, %v15317_v10  ;;  %v9756_v35 = vpop.f32.mrb[96].mxu1 }
 0x367   : > { %8161 = vst [vmem:[%s15361_s28 + $0x68] sm:$0xff] %v7905_v27  ;;  %10862 = vrcp.f32 %v7400_v59  ;;  %v7401_v26 = vadd.f32 1.0, %v10843_v24  ;;  %v10845_v0 = vpop.eup %10844  ;;  %v9116_v47 = vmul.f32 -1.442695, %v15512_v41  ;;  %v9890_v10 = vadd.f32 %v9756_v35, %v15341_v63  ;;  %v6350_v14 = vpop.f32.mrb[97].mxu1  ;;  %v16888_v24 = vld [vmem:[#allocation26_spill] sm:$0xff] }
 0x368   : > { %10864 = vrcp.f32 %v7403_v23  ;;  %v15519_v19 = vadd.f32 %v9888_v17, %v15205_v21  ;;  %v7782_v15 = vmul.f32 %v10845_v0, %v15367_v37  ;;  %v15525_v58 = vadd.f32 %v9889_v45, %v15205_v21  ;;  %v15528_v13 = vpop.f32.mrb[49].mxu0  ;;  %v9757_v27 = vpop.f32.mrb[98].mxu1 }
 0x369   : > { %v10847_v11 = vpop.eup %10846  ;;  %10866 = vrcp.f32 %v7401_v26  ;;  %v9891_v32 = vadd.f32 %v6350_v14, %v15351_v43  ;;  %v15533_v37 = vpop.f32.mrb[50].mxu0  ;;  %v16889_v43 = vld [vmem:[#allocation24_spill] sm:$0xff]  ;;  %v15545_v35 = vadd.f32 %v9890_v10, %v15205_v21  ;;  %v9892_v10 = vadd.f32 %v9757_v27, %v15357_v25 }
 0x36a   : > { %v10849_v34 = vpop.eup %10848  ;;  %v7780_v3 = vmul.f32 %v10847_v11, %v15375_v30  ;;  %10868 = vpow2.f32 %v9118_v60  ;;  %v9119_v54 = vmul.f32 -1.442695, %v15519_v19  ;;  %v7910_v23 = vmul.f32 %v7782_v15, %v16888_v24  ;;  %8038 = vst [vmem:[%s15346_s26 + $0x90] sm:$0xff] %v7782_v15  ;;  %v6353_v17 = vpop.f32.mrb[99].mxu1 }
 0x36b   : > { %v10851_v59 = vpop.eup %10850  ;;  %v7783_v63 = vmul.f32 %v10849_v34, %v15387_v44  ;;  %10870 = vpow2.f32 %v9116_v47  ;;  %v9117_v30 = vmul.f32 -1.442695, %v15525_v58  ;;  %v15539_v60 = vpop.f32.mrb[51].mxu0  ;;  %v16890_v47 = vld [vmem:[#allocation27_spill] sm:$0xff]  ;;  %v15551_v14 = vadd.f32 %v9891_v32, %v15205_v21 }
 0x36c   : > { %v10853_v26 = vpop.eup %10852  ;;  %v7908_v45 = vmul.f32 %v7780_v3, %v16889_v43  ;;  %8036 = vst [vmem:[%s15346_s26 + $0x80] sm:$0xff] %v7780_v3  ;;  %v7781_v0 = vmul.f32 %v10851_v59, %v15391_v2  ;;  %10872 = vpow2.f32 %v9119_v54  ;;  %8166 = vst [vmem:[%s15361_s28 + $0x90] sm:$0xff] %v7910_v23  ;;  %v16891_v3 = vld [vmem:[#allocation25_spill] sm:$0xff]  ;;  %v9122_v23 = vmul.f32 -1.442695, %v15545_v35 }
 0x36d   : > { %v10855_v44 = vpop.eup %10854  ;;  %v7911_v11 = vmul.f32 %v7783_v63, %v16890_v47  ;;  %8039 = vst [vmem:[%s15346_s26 + $0x98] sm:$0xff] %v7783_v63  ;;  %v7406_v15 = vadd.f32 1.0, %v10853_v26  ;;  %10874 = vpow2.f32 %v9117_v30  ;;  %v9893_v63 = vadd.f32 %v6353_v17, %v15369_v56 }
 0x36e   : > { %v10857_v34 = vpop.eup %10856  ;;  %8164 = vst [vmem:[%s15361_s28 + $0x80] sm:$0xff] %v7908_v45  ;;  %v7909_v2 = vmul.f32 %v7781_v0, %v16891_v3  ;;  %8037 = vst [vmem:[%s15346_s26 + $0x88] sm:$0xff] %v7781_v0  ;;  %v7404_v54 = vadd.f32 1.0, %v10855_v44  ;;  %v9120_v26 = vmul.f32 -1.442695, %v15551_v14  ;;  %v15563_v43 = vadd.f32 %v9892_v10, %v15205_v21  ;;  %v9760_v45 = vpop.f32.mrb[100].mxu1 }
 0x36f   : > { %v10859_v59 = vpop.eup %10858  ;;  %8167 = vst [vmem:[%s15361_s28 + $0x98] sm:$0xff] %v7911_v11  ;;  %10876 = vrcp.f32 %v7406_v15  ;;  %v7407_v24 = vadd.f32 1.0, %v10857_v34  ;;  %v15565_v0 = vpop.f32.mrb[52].mxu0  ;;  %v15569_v44 = vadd.f32 %v9893_v63, %v15205_v21  ;;  %v9894_v56 = vadd.f32 %v9760_v45, %v15395_v33  ;;  %v16892_v10 = vld [vmem:[#allocation30_spill] sm:$0xff] }
 0x370   : > { %v10861_v30 = vpop.eup %10860  ;;  %8165 = vst [vmem:[%s15361_s28 + $0x88] sm:$0xff] %v7909_v2  ;;  %10878 = vrcp.f32 %v7404_v54  ;;  %v7405_v32 = vadd.f32 1.0, %v10859_v59  ;;  %v6366_v17 = vpop.f32.mrb[101].mxu1  ;;  %v9123_v34 = vmul.f32 -1.442695, %v15563_v43 }
 0x371   : > { %v10863_v25 = vpop.eup %10862  ;;  %v7786_v27 = vmul.f32 %v10861_v30, %v15419_v61  ;;  %10880 = vrcp.f32 %v7407_v24  ;;  %v15572_v47 = vpop.f32.mrb[53].mxu0  ;;  %v9895_v3 = vadd.f32 %v6366_v17, %v15401_v49  ;;  %v16893_v49 = vld [vmem:[#allocation28_spill] sm:$0xff] }
 0x372   : > { %v10865_v11 = vpop.eup %10864  ;;  %v7784_v15 = vmul.f32 %v10863_v25, %v15423_v7  ;;  %10882 = vrcp.f32 %v7405_v32  ;;  %v9761_v2 = vpop.f32.mrb[102].mxu1  ;;  %v9121_v7 = vmul.f32 -1.442695, %v15569_v44  ;;  %v15589_v25 = vadd.f32 %v9894_v56, %v15205_v21 }
 0x373   : > { %v15577_v61 = vpop.f32.mrb[54].mxu0  ;;  %v10867_v54 = vpop.eup %10866  ;;  %v7914_v59 = vmul.f32 %v7786_v27, %v16892_v10  ;;  %8042 = vst [vmem:[%s15346_s26 + $0xb0] sm:$0xff] %v7786_v27  ;;  %v7787_v33 = vmul.f32 %v10865_v11, %v15431_v29  ;;  %10884 = vpow2.f32 %v9122_v23  ;;  %v16894_v23 = vld [vmem:[#allocation31_spill] sm:$0xff]  ;;  %v15595_v11 = vadd.f32 %v9895_v3, %v15205_v21 }
 0x374   : > { %v6369_v24 = vpop.f32.mrb[103].mxu1  ;;  %v15583_v63 = vpop.f32.mrb[55].mxu0  ;;  %v7912_v32 = vmul.f32 %v7784_v15, %v16893_v49  ;;  %8040 = vst [vmem:[%s15346_s26 + $0xa0] sm:$0xff] %v7784_v15  ;;  %v7785_v45 = vmul.f32 %v10867_v54, %v15435_v51  ;;  %10886 = vpow2.f32 %v9120_v26  ;;  %v16895_v15 = vld [vmem:[#allocation29_spill] sm:$0xff] }
 0x375   : > { %v10869_v30 = vpop.eup %10868  ;;  %8170 = vst [vmem:[%s15361_s28 + $0xb0] sm:$0xff] %v7914_v59  ;;  %v7915_v27 = vmul.f32 %v7787_v33, %v16894_v23  ;;  %8043 = vst [vmem:[%s15346_s26 + $0xb8] sm:$0xff] %v7787_v33  ;;  %10888 = vpow2.f32 %v9123_v34  ;;  %v9126_v59 = vmul.f32 -1.442695, %v15589_v25  ;;  %v9896_v33 = vadd.f32 %v9761_v2, %v15407_v8 }
 0x376   : > { %v10871_v29 = vpop.eup %10870  ;;  %v7410_v17 = vadd.f32 1.0, %v10869_v30  ;;  %8168 = vst [vmem:[%s15361_s28 + $0xa0] sm:$0xff] %v7912_v32  ;;  %v7913_v51 = vmul.f32 %v7785_v45, %v16895_v15  ;;  %8041 = vst [vmem:[%s15346_s26 + $0xa8] sm:$0xff] %v7785_v45  ;;  %10890 = vpow2.f32 %v9121_v7  ;;  %v9124_v3 = vmul.f32 -1.442695, %v15595_v11  ;;  %v9764_v49 = vpop.f32.mrb[104].mxu1 }
 0x377   : > { %v10873_v10 = vpop.eup %10872  ;;  %v7408_v26 = vadd.f32 1.0, %v10871_v29  ;;  %8171 = vst [vmem:[%s15361_s28 + $0xb8] sm:$0xff] %v7915_v27  ;;  %v9897_v30 = vadd.f32 %v6369_v24, %v15413_v18  ;;  %v15606_v32 = vpop.f32.mrb[56].mxu0  ;;  %v15609_v7 = vadd.f32 %v9896_v33, %v15205_v21  ;;  %v9898_v29 = vadd.f32 %v9764_v49, %v15437_v12 }
 0x378   : > { %v10875_v56 = vpop.eup %10874  ;;  %10892 = vrcp.f32 %v7410_v17  ;;  %v7411_v54 = vadd.f32 1.0, %v10873_v10  ;;  %8169 = vst [vmem:[%s15361_s28 + $0xa8] sm:$0xff] %v7913_v51  ;;  %v6382_v23 = vpop.f32.mrb[105].mxu1 }
 0x379   : > { %10894 = vrcp.f32 %v7408_v26  ;;  %v7409_v34 = vadd.f32 1.0, %v10875_v56  ;;  %v10877_v45 = vpop.eup %10876  ;;  %v15612_v27 = vpop.f32.mrb[57].mxu0  ;;  %v15616_v18 = vadd.f32 %v9897_v30, %v15205_v21  ;;  %v9899_v24 = vadd.f32 %v6382_v23, %v15442_v55  ;;  %v16896_v55 = vld [vmem:[#allocation36_spill] sm:$0xff]  ;;  %v16897_v30 = vld [vmem:[#allocation33_spill] sm:$0xff] }
 0x37a   : > { %10896 = vrcp.f32 %v7411_v54  ;;  %v10879_v8 = vpop.eup %10878  ;;  %v7790_v2 = vmul.f32 %v10877_v45, %v15454_v6  ;;  %v9765_v17 = vpop.f32.mrb[106].mxu1  ;;  %v9127_v51 = vmul.f32 -1.442695, %v15609_v7  ;;  %v15624_v26 = vadd.f32 %v9898_v29, %v15205_v21 }
 0x37b   : > { %10898 = vrcp.f32 %v7409_v34  ;;  %v15619_v10 = vpop.f32.mrb[58].mxu0  ;;  %v10881_v15 = vpop.eup %10880  ;;  %v7788_v12 = vmul.f32 %v10879_v8, %v15469_v57  ;;  %v9125_v57 = vmul.f32 -1.442695, %v15616_v18  ;;  %v16898_v8 = vld [vmem:[#allocation37_spill] sm:$0xff] }
 0x37c   : > { %10900 = vpow2.f32 %v9126_v59  ;;  %v6385_v6 = vpop.f32.mrb[107].mxu1  ;;  %v15626_v56 = vpop.f32.mrb[59].mxu0  ;;  %v7918_v33 = vmul.f32 %v7790_v2, %v16896_v55  ;;  %8046 = vst [vmem:[%s15346_s26 + $0xd0] sm:$0xff] %v7790_v2  ;;  %v7791_v34 = vmul.f32 %v10881_v15, %v15474_v52  ;;  %v9130_v29 = vmul.f32 -1.442695, %v15624_v26 }
 0x37d   : > { %v10883_v54 = vpop.eup %10882  ;;  %10902 = vpow2.f32 %v9124_v3  ;;  %v7916_v49 = vmul.f32 %v7788_v12, %v16897_v30  ;;  %8044 = vst [vmem:[%s15346_s26 + $0xc0] sm:$0xff] %v7788_v12  ;;  %v15640_v3 = vadd.f32 %v9899_v24, %v15205_v21  ;;  %v16899_v12 = vld [vmem:[#allocation34_spill] sm:$0xff]  ;;  %v15649_v24 = vpop.f32.mrb[60].mxu0 }
 0x37e   : > { %v10885_v59 = vpop.eup %10884  ;;  %v7789_v45 = vmul.f32 %v10883_v54, %v15479_v22  ;;  %10904 = vpow2.f32 %v9127_v51  ;;  %8174 = vst [vmem:[%s15361_s28 + $0xd0] sm:$0xff] %v7918_v33  ;;  %v7919_v2 = vmul.f32 %v7791_v34, %v16898_v8  ;;  %8047 = vst [vmem:[%s15346_s26 + $0xd8] sm:$0xff] %v7791_v34  ;;  %v9900_v51 = vadd.f32 %v9765_v17, %v15448_v50  ;;  %v9768_v21 = vpop.f32.mrb[108].mxu1 }
 0x37f   : > { %v10887_v23 = vpop.eup %10886  ;;  %v7414_v52 = vadd.f32 1.0, %v10885_v59  ;;  %10906 = vpow2.f32 %v9125_v57  ;;  %8172 = vst [vmem:[%s15361_s28 + $0xc0] sm:$0xff] %v7916_v49  ;;  %v9128_v34 = vmul.f32 -1.442695, %v15640_v3  ;;  %v9901_v57 = vadd.f32 %v6385_v6, %v15456_v28  ;;  %v15655_v49 = vld [vmem:[%s16529_s7] ss:$0 sm:$0xff] }
 0x380   : > { %v10889_v15 = vpop.eup %10888  ;;  %v7917_v55 = vmul.f32 %v7789_v45, %v16899_v12  ;;  %8045 = vst [vmem:[%s15346_s26 + $0xc8] sm:$0xff] %v7789_v45  ;;  %v7412_v22 = vadd.f32 1.0, %v10887_v23  ;;  %10908 = vpow2.f32 %v9130_v29  ;;  %8175 = vst [vmem:[%s15361_s28 + $0xd8] sm:$0xff] %v7919_v2  ;;  %v15658_v50 = vadd.f32 %v15655_v49, %v9900_v51  ;;  %v6398_v45 = vpop.f32.mrb[109].mxu1 }
 0x381   : > { %v10891_v54 = vpop.eup %10890  ;;  %10910 = vrcp.f32 %v7414_v52  ;;  %v7415_v33 = vadd.f32 1.0, %v10889_v15  ;;  %v9902_v17 = vadd.f32 %v9768_v21, %v15481_v16  ;;  %v15661_v29 = vpop.f32.mrb[61].mxu0  ;;  %v15665_v23 = vadd.f32 %v15655_v49, %v9901_v57  ;;  %v16901_v21 = vld [vmem:[#allocation40_spill] sm:$0xff] }
 0x382   : > { %v10893_v59 = vpop.eup %10892  ;;  %8173 = vst [vmem:[%s15361_s28 + $0xc8] sm:$0xff] %v7917_v55  ;;  %10912 = vrcp.f32 %v7412_v22  ;;  %v7413_v30 = vadd.f32 1.0, %v10891_v54  ;;  %v9903_v8 = vadd.f32 %v6398_v45, %v15486_v40  ;;  %v9769_v2 = vpop.f32.mrb[110].mxu1  ;;  %v9131_v12 = vmul.f32 -1.442695, %v15658_v50  ;;  %v16900_v40 = vld [vmem:[#allocation44_spill] sm:$0xff] }
 0x383   : > { %v10895_v28 = vpop.eup %10894  ;;  %v7794_v6 = vmul.f32 %v10893_v59, %v15498_v38  ;;  %10914 = vrcp.f32 %v7415_v33  ;;  %v15668_v52 = vpop.f32.mrb[62].mxu0  ;;  %v15673_v55 = vadd.f32 %v15655_v49, %v9902_v17 }
 0x384   : > { %v10897_v15 = vpop.eup %10896  ;;  %v7792_v16 = vmul.f32 %v10895_v28, %v15512_v41  ;;  %10916 = vrcp.f32 %v7413_v30  ;;  %v6401_v38 = vpop.f32.mrb[111].mxu1  ;;  %v9129_v41 = vmul.f32 -1.442695, %v15665_v23  ;;  %v16902_v28 = vld [vmem:[#allocation45_spill] sm:$0xff] }
 0x385   : > { %v15675_v22 = vpop.f32.mrb[63].mxu0  ;;  %v10899_v51 = vpop.eup %10898  ;;  %v7922_v54 = vmul.f32 %v7794_v6, %v16900_v40  ;;  %8050 = vst [vmem:[%s15346_s26 + $0xf0] sm:$0xff] %v7794_v6  ;;  %v7795_v33 = vmul.f32 %v10897_v15, %v15519_v19  ;;  %10918 = vpow2.f32 %v9128_v34  ;;  %v9134_v17 = vmul.f32 -1.442695, %v15673_v55 }
 0x386   : > { %v10901_v57 = vpop.eup %10900  ;;  %v7920_v59 = vmul.f32 %v7792_v16, %v16901_v21  ;;  %8048 = vst [vmem:[%s15346_s26 + $0xe0] sm:$0xff] %v7792_v16  ;;  %v7793_v30 = vmul.f32 %v10899_v51, %v15525_v58  ;;  %10920 = vpow2.f32 %v9131_v12  ;;  %v15689_v34 = vadd.f32 %v15655_v49, %v9903_v8  ;;  %v16903_v16 = vld [vmem:[#allocation41_spill] sm:$0xff]  ;;  %v9772_v8 = vpop.f32.mrb[112].mxu1 }
 0x387   : > { %v10903_v45 = vpop.eup %10902  ;;  %8178 = vst [vmem:[%s15361_s28 + $0xf0] sm:$0xff] %v7922_v54  ;;  %v7923_v6 = vmul.f32 %v7795_v33, %v16902_v28  ;;  %8051 = vst [vmem:[%s15346_s26 + $0xf8] sm:$0xff] %v7795_v33  ;;  %v7418_v19 = vadd.f32 1.0, %v10901_v57  ;;  %10922 = vpow2.f32 %v9129_v41  ;;  %v9904_v12 = vadd.f32 %v9769_v2, %v15492_v9 }
 0x388   : > { %v10905_v15 = vpop.eup %10904  ;;  %8176 = vst [vmem:[%s15361_s28 + $0xe0] sm:$0xff] %v7920_v59  ;;  %v7921_v40 = vmul.f32 %v7793_v30, %v16903_v16  ;;  %8049 = vst [vmem:[%s15346_s26 + $0xe8] sm:$0xff] %v7793_v30  ;;  %v7416_v58 = vadd.f32 1.0, %v10903_v45  ;;  %10924 = vpow2.f32 %v9134_v17  ;;  %v9132_v33 = vmul.f32 -1.442695, %v15689_v34  ;;  %v6414_v17 = vpop.f32.mrb[113].mxu1 }
 0x389   : > { %v10907_v51 = vpop.eup %10906  ;;  %8179 = vst [vmem:[%s15361_s28 + $0xf8] sm:$0xff] %v7923_v6  ;;  %10926 = vrcp.f32 %v7418_v19  ;;  %v7419_v54 = vadd.f32 1.0, %v10905_v15  ;;  %v9905_v41 = vadd.f32 %v6401_v38, %v15500_v53  ;;  %v15700_v59 = vadd.f32 %v15655_v49, %v9904_v12  ;;  %v9773_v38 = vpop.f32.mrb[114].mxu1  ;;  %v16904_v12 = vld [vmem:[#allocation52_spill] sm:$0xff] }
 0x38a   : > { %v10909_v57 = vpop.eup %10908  ;;  %8177 = vst [vmem:[%s15361_s28 + $0xe8] sm:$0xff] %v7921_v40  ;;  %10928 = vrcp.f32 %v7416_v58  ;;  %v7417_v21 = vadd.f32 1.0, %v10907_v51  ;;  %v9906_v30 = vadd.f32 %v9772_v8, %v15521_v4  ;;  %v9907_v53 = vadd.f32 %v6414_v17, %v15528_v13  ;;  %v6417_v15 = vpop.f32.mrb[115].mxu1 }
 0x38b   : > { %v10911_v9 = vpop.eup %10910  ;;  %10930 = vrcp.f32 %v7419_v54  ;;  %v7422_v2 = vadd.f32 1.0, %v10909_v57  ;;  %v15704_v45 = vadd.f32 %v15655_v49, %v9905_v41  ;;  %v9135_v19 = vmul.f32 -1.442695, %v15700_v59 }
 0x38c   : > { %v10913_v28 = vpop.eup %10912  ;;  %v7798_v6 = vmul.f32 %v10911_v9, %v15545_v35  ;;  %10932 = vrcp.f32 %v7417_v21  ;;  %v15710_v4 = vadd.f32 %v15655_v49, %v9906_v30  ;;  %v15715_v13 = vadd.f32 %v15655_v49, %v9907_v53  ;;  %v16906_v9 = vld [vmem:[#allocation53_spill] sm:$0xff] }
 0x38d   : > { %v10915_v16 = vpop.eup %10914  ;;  %v7796_v40 = vmul.f32 %v10913_v28, %v15551_v14  ;;  %10934 = vrcp.f32 %v7422_v2  ;;  %v9133_v58 = vmul.f32 -1.442695, %v15704_v45  ;;  %v16905_v14 = vld [vmem:[#allocation48_spill] sm:$0xff]  ;;  %v16907_v28 = vld [vmem:[#allocation49_spill] sm:$0xff] }
 0x38e   : > { %v10917_v35 = vpop.eup %10916  ;;  %v7926_v51 = vmul.f32 %v7798_v6, %v16904_v12  ;;  %8054 = vst [vmem:[%s15346_s26 + $0x110] sm:$0xff] %v7798_v6  ;;  %v7799_v54 = vmul.f32 %v10915_v16, %v15563_v43  ;;  %10936 = vpow2.f32 %v9132_v33  ;;  %v9138_v41 = vmul.f32 -1.442695, %v15710_v4  ;;  %v9776_v16 = vpop.f32.mrb[116].mxu1 }
 0x38f   : > { %v10919_v8 = vpop.eup %10918  ;;  %v7924_v57 = vmul.f32 %v7796_v40, %v16905_v14  ;;  %8052 = vst [vmem:[%s15346_s26 + $0x100] sm:$0xff] %v7796_v40  ;;  %v7797_v21 = vmul.f32 %v10917_v35, %v15569_v44  ;;  %10938 = vpow2.f32 %v9135_v19  ;;  %v9136_v30 = vmul.f32 -1.442695, %v15715_v13 }
 0x390   : > { %v10921_v17 = vpop.eup %10920  ;;  %8182 = vst [vmem:[%s15361_s28 + $0x110] sm:$0xff] %v7926_v51  ;;  %v7927_v2 = vmul.f32 %v7799_v54, %v16906_v9  ;;  %8055 = vst [vmem:[%s15346_s26 + $0x118] sm:$0xff] %v7799_v54  ;;  %v7420_v43 = vadd.f32 1.0, %v10919_v8  ;;  %10940 = vpow2.f32 %v9133_v58  ;;  %v9908_v33 = vadd.f32 %v9773_v38, %v15533_v37  ;;  %v6430_v38 = vpop.f32.mrb[117].mxu1 }
 0x391   : > { %v10923_v53 = vpop.eup %10922  ;;  %8180 = vst [vmem:[%s15361_s28 + $0x100] sm:$0xff] %v7924_v57  ;;  %v7925_v6 = vmul.f32 %v7797_v21, %v16907_v28  ;;  %8053 = vst [vmem:[%s15346_s26 + $0x108] sm:$0xff] %v7797_v21  ;;  %v7423_v44 = vadd.f32 1.0, %v10921_v17  ;;  %10942 = vpow2.f32 %v9138_v41  ;;  %v9909_v19 = vadd.f32 %v6417_v15, %v15539_v60  ;;  %v9777_v15 = vpop.f32.mrb[118].mxu1 }
 0x392   : > { %v10925_v40 = vpop.eup %10924  ;;  %8183 = vst [vmem:[%s15361_s28 + $0x118] sm:$0xff] %v7927_v2  ;;  %10944 = vrcp.f32 %v7420_v43  ;;  %v7421_v35 = vadd.f32 1.0, %v10923_v53  ;;  %v15735_v12 = vadd.f32 %v15655_v49, %v9908_v33  ;;  %v9910_v37 = vadd.f32 %v9776_v16, %v15565_v0  ;;  %v6433_v57 = vpop.f32.mrb[119].mxu1  ;;  %v16908_v2 = vld [vmem:[#allocation60_spill] sm:$0xff] }
 0x393   : > { %v10927_v58 = vpop.eup %10926  ;;  %8181 = vst [vmem:[%s15361_s28 + $0x108] sm:$0xff] %v7925_v6  ;;  %10946 = vrcp.f32 %v7423_v44  ;;  %v7426_v51 = vadd.f32 1.0, %v10925_v40  ;;  %v15740_v54 = vadd.f32 %v15655_v49, %v9909_v19  ;;  %v9911_v60 = vadd.f32 %v6430_v38, %v15572_v47  ;;  %v16910_v40 = vld [vmem:[#allocation61_spill] sm:$0xff] }
 0x394   : > { %v10929_v41 = vpop.eup %10928  ;;  %v7802_v8 = vmul.f32 %v10927_v58, %v15589_v25  ;;  %10948 = vrcp.f32 %v7421_v35  ;;  %v9139_v14 = vmul.f32 -1.442695, %v15735_v12  ;;  %v15746_v0 = vadd.f32 %v15655_v49, %v9910_v37  ;;  %v16911_v38 = vld [vmem:[#allocation57_spill] sm:$0xff] }
 0x395   : > { %v10931_v21 = vpop.eup %10930  ;;  %v7800_v17 = vmul.f32 %v10929_v41, %v15595_v11  ;;  %10950 = vrcp.f32 %v7426_v51  ;;  %v9137_v9 = vmul.f32 -1.442695, %v15740_v54  ;;  %v15751_v47 = vadd.f32 %v15655_v49, %v9911_v60  ;;  %v16909_v11 = vld [vmem:[#allocation56_spill] sm:$0xff] }
 0x396   : > { %v10933_v25 = vpop.eup %10932  ;;  %v7930_v43 = vmul.f32 %v7802_v8, %v16908_v2  ;;  %8058 = vst [vmem:[%s15346_s26 + $0x130] sm:$0xff] %v7802_v8  ;;  %v7803_v33 = vmul.f32 %v10931_v21, %v15609_v7  ;;  %10952 = vpow2.f32 %v9136_v30  ;;  %v9142_v53 = vmul.f32 -1.442695, %v15746_v0  ;;  %v9780_v60 = vpop.f32.mrb[120].mxu1  ;;  %v16912_v8 = vld [vmem:[#allocation68_spill] sm:$0xff] }
 0x397   : > { %v10935_v28 = vpop.eup %10934  ;;  %v7928_v6 = vmul.f32 %v7800_v17, %v16909_v11  ;;  %8056 = vst [vmem:[%s15346_s26 + $0x120] sm:$0xff] %v7800_v17  ;;  %v7801_v44 = vmul.f32 %v10933_v25, %v15616_v18  ;;  %10954 = vpow2.f32 %v9139_v14  ;;  %v9140_v19 = vmul.f32 -1.442695, %v15751_v47 }
 0x398   : > { %v10937_v16 = vpop.eup %10936  ;;  %8186 = vst [vmem:[%s15361_s28 + $0x130] sm:$0xff] %v7930_v43  ;;  %v7931_v35 = vmul.f32 %v7803_v33, %v16910_v40  ;;  %8059 = vst [vmem:[%s15346_s26 + $0x138] sm:$0xff] %v7803_v33  ;;  %v7806_v7 = vmul.f32 %v10935_v28, %v15624_v26  ;;  %10956 = vpow2.f32 %v9137_v9  ;;  %v9912_v30 = vadd.f32 %v9777_v15, %v15577_v61  ;;  %v6446_v15 = vpop.f32.mrb[121].mxu1 }
 0x399   : > { %v10939_v37 = vpop.eup %10938  ;;  %8184 = vst [vmem:[%s15361_s28 + $0x120] sm:$0xff] %v7928_v6  ;;  %v7929_v18 = vmul.f32 %v7801_v44, %v16911_v38  ;;  %8057 = vst [vmem:[%s15346_s26 + $0x128] sm:$0xff] %v7801_v44  ;;  %v7424_v58 = vadd.f32 1.0, %v10937_v16  ;;  %10958 = vpow2.f32 %v9142_v53  ;;  %v9913_v51 = vadd.f32 %v6433_v57, %v15583_v63  ;;  %v9781_v57 = vpop.f32.mrb[122].mxu1 }
 0x39a   : > { %v10941_v41 = vpop.eup %10940  ;;  %8187 = vst [vmem:[%s15361_s28 + $0x138] sm:$0xff] %v7931_v35  ;;  %v7934_v14 = vmul.f32 %v7806_v7, %v16912_v8  ;;  %8062 = vst [vmem:[%s15346_s26 + $0x150] sm:$0xff] %v7806_v7  ;;  %v7427_v26 = vadd.f32 1.0, %v10939_v37  ;;  %10960 = vpow2.f32 %v9140_v19  ;;  %v15774_v61 = vadd.f32 %v15655_v49, %v9912_v30  ;;  %v6449_v53 = vpop.f32.mrb[123].mxu1 }
 0x39b   : > { %v10943_v21 = vpop.eup %10942  ;;  %8185 = vst [vmem:[%s15361_s28 + $0x128] sm:$0xff] %v7929_v18  ;;  %10962 = vrcp.f32 %v7424_v58  ;;  %v7425_v17 = vadd.f32 1.0, %v10941_v41  ;;  %v15778_v9 = vadd.f32 %v15655_v49, %v9913_v51  ;;  %v9914_v63 = vadd.f32 %v9780_v60, %v15606_v32  ;;  %v16915_v51 = vld [vmem:[#allocation65_spill] sm:$0xff] }
 0x39c   : > { %v10945_v25 = vpop.eup %10944  ;;  %8190 = vst [vmem:[%s15361_s28 + $0x150] sm:$0xff] %v7934_v14  ;;  %10964 = vrcp.f32 %v7427_v26  ;;  %v7430_v2 = vadd.f32 1.0, %v10943_v21  ;;  %v9143_v43 = vmul.f32 -1.442695, %v15774_v61  ;;  %v9915_v33 = vadd.f32 %v6446_v15, %v15612_v27  ;;  %v16916_v26 = vld [vmem:[#allocation76_spill] sm:$0xff] }
 0x39d   : > { %v10947_v28 = vpop.eup %10946  ;;  %v7804_v11 = vmul.f32 %v10945_v25, %v15640_v3  ;;  %10966 = vrcp.f32 %v7425_v17  ;;  %v9141_v6 = vmul.f32 -1.442695, %v15778_v9  ;;  %v15787_v32 = vadd.f32 %v15655_v49, %v9914_v63  ;;  %v16913_v3 = vld [vmem:[#allocation64_spill] sm:$0xff] }
 0x39e   : > { %v10949_v44 = vpop.eup %10948  ;;  %v7807_v19 = vmul.f32 %v10947_v28, %v15658_v50  ;;  %10968 = vrcp.f32 %v7430_v2  ;;  %v15791_v16 = vadd.f32 %v15655_v49, %v9915_v33  ;;  %v9916_v27 = vadd.f32 %v9781_v57, %v15619_v10  ;;  %v16914_v50 = vld [vmem:[#allocation69_spill] sm:$0xff]  ;;  %v9784_v8 = vpop.f32.mrb[124].mxu1 }
 0x39f   : > { %v10951_v40 = vpop.eup %10950  ;;  %v7932_v35 = vmul.f32 %v7804_v11, %v16913_v3  ;;  %8060 = vst [vmem:[%s15346_s26 + $0x140] sm:$0xff] %v7804_v11  ;;  %v7805_v7 = vmul.f32 %v10949_v44, %v15665_v23  ;;  %10970 = vpow2.f32 %v9143_v43  ;;  %v9146_v30 = vmul.f32 -1.442695, %v15787_v32  ;;  %v6462_v17 = vpop.f32.mrb[125].mxu1 }
 0x3a0   : > { %v10953_v37 = vpop.eup %10952  ;;  %v7935_v38 = vmul.f32 %v7807_v19, %v16914_v50  ;;  %8063 = vst [vmem:[%s15346_s26 + $0x158] sm:$0xff] %v7807_v19  ;;  %v7810_v18 = vmul.f32 %v10951_v40, %v15673_v55  ;;  %10972 = vpow2.f32 %v9141_v6  ;;  %v9144_v10 = vmul.f32 -1.442695, %v15791_v16  ;;  %v9785_v43 = vpop.f32.mrb[126].mxu1  ;;  %v16917_v50 = vld [vmem:[#allocation72_spill] sm:$0xff] }
 0x3a1   : > { %v10955_v58 = vpop.eup %10954  ;;  %8188 = vst [vmem:[%s15361_s28 + $0x140] sm:$0xff] %v7932_v35  ;;  %v7933_v60 = vmul.f32 %v7805_v7, %v16915_v51  ;;  %8061 = vst [vmem:[%s15346_s26 + $0x148] sm:$0xff] %v7805_v7  ;;  %v7428_v23 = vadd.f32 1.0, %v10953_v37  ;;  %10974 = vpow2.f32 %v9146_v30  ;;  %v15806_v41 = vadd.f32 %v15655_v49, %v9916_v27 }
 0x3a2   : > { %v10957_v14 = vpop.eup %10956  ;;  %8191 = vst [vmem:[%s15361_s28 + $0x158] sm:$0xff] %v7935_v38  ;;  %v7938_v55 = vmul.f32 %v7810_v18, %v16916_v26  ;;  %8066 = vst [vmem:[%s15346_s26 + $0x170] sm:$0xff] %v7810_v18  ;;  %v7431_v15 = vadd.f32 1.0, %v10955_v58  ;;  %10976 = vpow2.f32 %v9144_v10  ;;  %v9917_v21 = vadd.f32 %v6449_v53, %v15626_v56  ;;  %v6465_v56 = vpop.f32.mrb[127].mxu1  ;;  %v16918_v58 = vld [vmem:[#allocation77_spill] sm:$0xff] }
 0x3a3   : > { %v10959_v63 = vpop.eup %10958  ;;  %8189 = vst [vmem:[%s15361_s28 + $0x148] sm:$0xff] %v7933_v60  ;;  %10978 = vrcp.f32 %v7428_v23  ;;  %v7429_v57 = vadd.f32 1.0, %v10957_v14  ;;  %v9147_v25 = vmul.f32 -1.442695, %v15806_v41  ;;  %v9918_v2 = vadd.f32 %v9784_v8, %v15649_v24  ;;  %v16919_v14 = vld [vmem:[#allocation73_spill] sm:$0xff] }
 0x3a4   : > { %v10961_v33 = vpop.eup %10960  ;;  %8194 = vst [vmem:[%s15361_s28 + $0x170] sm:$0xff] %v7938_v55  ;;  %10980 = vrcp.f32 %v7431_v15  ;;  %v7434_v28 = vadd.f32 1.0, %v10959_v63  ;;  %v15817_v11 = vadd.f32 %v15655_v49, %v9917_v21  ;;  %v9919_v6 = vadd.f32 %v6462_v17, %v15661_v29  ;;  %v16920_v17 = vld [vmem:[#allocation84_spill] sm:$0xff] }
 0x3a5   : > { %v10963_v53 = vpop.eup %10962  ;;  %10982 = vrcp.f32 %v7429_v57  ;;  %v7432_v44 = vadd.f32 1.0, %v10961_v33  ;;  %v15821_v19 = vadd.f32 %v15655_v49, %v9918_v2  ;;  %v9920_v24 = vadd.f32 %v9785_v43, %v15668_v52 }
 0x3a6   : > { %v10965_v27 = vpop.eup %10964  ;;  %v7808_v40 = vmul.f32 %v10963_v53, %v15689_v34  ;;  %10984 = vrcp.f32 %v7434_v28  ;;  %v9145_v3 = vmul.f32 -1.442695, %v15817_v11  ;;  %v15827_v35 = vadd.f32 %v15655_v49, %v9919_v6  ;;  %v9788_v23 = vpop.f32.mrb[0].mxu1 }
 0x3a7   : > { %v10967_v29 = vpop.eup %10966  ;;  %v7811_v7 = vmul.f32 %v10965_v27, %v15700_v59  ;;  %10986 = vrcp.f32 %v7432_v44  ;;  %v9150_v30 = vmul.f32 -1.442695, %v15821_v19  ;;  %v15832_v37 = vadd.f32 %v15655_v49, %v9920_v24  ;;  %v6478_v15 = vpop.f32.mrb[1].mxu1 }
 0x3a8   : > { %v10969_v52 = vpop.eup %10968  ;;  %v7936_v34 = vmul.f32 %v7808_v40, %v16917_v50  ;;  %8064 = vst [vmem:[%s15346_s26 + $0x160] sm:$0xff] %v7808_v40  ;;  %v7809_v38 = vmul.f32 %v10967_v29, %v15704_v45  ;;  %10988 = vpow2.f32 %v9147_v25  ;;  %v9148_v18 = vmul.f32 -1.442695, %v15827_v35  ;;  %v9789_v25 = vpop.f32.mrb[2].mxu1 }
 0x3a9   : > { %v10971_v10 = vpop.eup %10970  ;;  %v7939_v59 = vmul.f32 %v7811_v7, %v16918_v58  ;;  %8067 = vst [vmem:[%s15346_s26 + $0x178] sm:$0xff] %v7811_v7  ;;  %v7814_v51 = vmul.f32 %v10969_v52, %v15710_v4  ;;  %10990 = vpow2.f32 %v9145_v3  ;;  %v9151_v60 = vmul.f32 -1.442695, %v15832_v37  ;;  %v6481_v28 = vpop.f32.mrb[3].mxu1  ;;  %v16921_v52 = vld [vmem:[#allocation80_spill] sm:$0xff] }
 0x3aa   : > { %v10973_v8 = vpop.eup %10972  ;;  %8192 = vst [vmem:[%s15361_s28 + $0x160] sm:$0xff] %v7936_v34  ;;  %v7937_v45 = vmul.f32 %v7809_v38, %v16919_v14  ;;  %8065 = vst [vmem:[%s15346_s26 + $0x168] sm:$0xff] %v7809_v38  ;;  %v7435_v26 = vadd.f32 1.0, %v10971_v10  ;;  %10992 = vpow2.f32 %v9150_v30  ;;  %v9921_v55 = vadd.f32 %v6465_v56, %v15675_v22 }
 0x3ab   : > { %v10975_v21 = vpop.eup %10974  ;;  %8195 = vst [vmem:[%s15361_s28 + $0x178] sm:$0xff] %v7939_v59  ;;  %v7942_v4 = vmul.f32 %v7814_v51, %v16920_v17  ;;  %8070 = vst [vmem:[%s15346_s26 + $0x190] sm:$0xff] %v7814_v51  ;;  %v7433_v63 = vadd.f32 1.0, %v10973_v8  ;;  %10994 = vpow2.f32 %v9148_v18  ;;  %v15850_v57 = vadd.f32 %v15655_v49, %v9788_v23  ;;  %v16922_v18 = vld [vmem:[#allocation85_spill] sm:$0xff] }
 0x3ac   : > { %v10977_v2 = vpop.eup %10976  ;;  %8193 = vst [vmem:[%s15361_s28 + $0x168] sm:$0xff] %v7937_v45  ;;  %10996 = vrcp.f32 %v7435_v26  ;;  %v7438_v43 = vadd.f32 1.0, %v10975_v21  ;;  %v15854_v33 = vadd.f32 %v15655_v49, %v9921_v55  ;;  %v15857_v22 = vadd.f32 %v15655_v49, %v6478_v15  ;;  %v16923_v23 = vld [vmem:[#allocation81_spill] sm:$0xff]  ;;  %v16924_v45 = vld [vmem:[#allocation92_spill] sm:$0xff] }
 0x3ad   : > { %v10979_v6 = vpop.eup %10978  ;;  %8198 = vst [vmem:[%s15361_s28 + $0x190] sm:$0xff] %v7942_v4  ;;  %10998 = vrcp.f32 %v7433_v63  ;;  %v7436_v56 = vadd.f32 1.0, %v10977_v2  ;;  %v15861_v53 = vadd.f32 %v15655_v49, %v9789_v25  ;;  %v9154_v40 = vmul.f32 -1.442695, %v15850_v57 }
 0x3ae   : > { %v10981_v44 = vpop.eup %10980  ;;  %v7812_v24 = vmul.f32 %v10979_v6, %v15715_v13  ;;  %11000 = vrcp.f32 %v7438_v43  ;;  %v9149_v27 = vmul.f32 -1.442695, %v15854_v33  ;;  %v9152_v7 = vmul.f32 -1.442695, %v15857_v22  ;;  %v9792_v59 = vpop.f32.mrb[4].mxu1 }
 0x3af   : > { %v10983_v3 = vpop.eup %10982  ;;  %v7815_v29 = vmul.f32 %v10981_v44, %v15735_v12  ;;  %11002 = vrcp.f32 %v7436_v56  ;;  %v9155_v34 = vmul.f32 -1.442695, %v15861_v53  ;;  %v15876_v58 = vadd.f32 %v15655_v49, %v6481_v28  ;;  %v6494_v14 = vpop.f32.mrb[5].mxu1 }
 0x3b0   : > { %v10985_v30 = vpop.eup %10984  ;;  %v7940_v50 = vmul.f32 %v7812_v24, %v16921_v52  ;;  %8068 = vst [vmem:[%s15346_s26 + $0x180] sm:$0xff] %v7812_v24  ;;  %v7813_v13 = vmul.f32 %v10983_v3, %v15740_v54  ;;  %11004 = vpow2.f32 %v9151_v60  ;;  %v15883_v8 = vadd.f32 %v15655_v49, %v9792_v59  ;;  %v9793_v21 = vpop.f32.mrb[6].mxu1 }
 0x3b1   : > { %v10987_v38 = vpop.eup %10986  ;;  %v7943_v10 = vmul.f32 %v7815_v29, %v16922_v18  ;;  %8071 = vst [vmem:[%s15346_s26 + $0x198] sm:$0xff] %v7815_v29  ;;  %v7818_v12 = vmul.f32 %v10985_v30, %v15746_v0  ;;  %11006 = vpow2.f32 %v9149_v27  ;;  %v15889_v15 = vadd.f32 %v15655_v49, %v6494_v14  ;;  %v6497_v25 = vpop.f32.mrb[7].mxu1  ;;  %v16927_v18 = vld [vmem:[#allocation89_spill] sm:$0xff] }
 0x3b2   : > { %v10989_v51 = vpop.eup %10988  ;;  %8196 = vst [vmem:[%s15361_s28 + $0x180] sm:$0xff] %v7940_v50  ;;  %v7941_v54 = vmul.f32 %v7813_v13, %v16923_v23  ;;  %8069 = vst [vmem:[%s15346_s26 + $0x188] sm:$0xff] %v7813_v13  ;;  %v7816_v60 = vmul.f32 %v10987_v38, %v15751_v47  ;;  %11008 = vpow2.f32 %v9154_v40  ;;  %v16925_v47 = vld [vmem:[#allocation88_spill] sm:$0xff]  ;;  %v9153_v28 = vmul.f32 -1.442695, %v15876_v58  ;;  %v16926_v50 = vld [vmem:[#allocation93_spill] sm:$0xff] }
 0x3b3   : > { %v10991_v0 = vpop.eup %10990  ;;  %8199 = vst [vmem:[%s15361_s28 + $0x198] sm:$0xff] %v7943_v10  ;;  %v7946_v26 = vmul.f32 %v7818_v12, %v16924_v45  ;;  %8074 = vst [vmem:[%s15346_s26 + $0x1b0] sm:$0xff] %v7818_v12  ;;  %v7439_v55 = vadd.f32 1.0, %v10989_v51  ;;  %11010 = vpow2.f32 %v9152_v7  ;;  %v15897_v6 = vadd.f32 %v15655_v49, %v9793_v21  ;;  %v16928_v23 = vld [vmem:[#allocation100_spill] sm:$0xff] }
 0x3b4   : > { %v10993_v17 = vpop.eup %10992  ;;  %8197 = vst [vmem:[%s15361_s28 + $0x188] sm:$0xff] %v7941_v54  ;;  %v7944_v4 = vmul.f32 %v7816_v60, %v16925_v47  ;;  %8072 = vst [vmem:[%s15346_s26 + $0x1a0] sm:$0xff] %v7816_v60  ;;  %v7437_v63 = vadd.f32 1.0, %v10991_v0  ;;  %11012 = vpow2.f32 %v9155_v34  ;;  %v9158_v24 = vmul.f32 -1.442695, %v15883_v8 }
 0x3b5   : > { %v10995_v2 = vpop.eup %10994  ;;  %8202 = vst [vmem:[%s15361_s28 + $0x1b0] sm:$0xff] %v7946_v26  ;;  %11014 = vrcp.f32 %v7439_v55  ;;  %v7442_v43 = vadd.f32 1.0, %v10993_v17  ;;  %v9156_v3 = vmul.f32 -1.442695, %v15889_v15  ;;  %v9159_v30 = vmul.f32 -1.442695, %v15897_v6 }
 0x3b6   : > { %v10997_v56 = vpop.eup %10996  ;;  %8200 = vst [vmem:[%s15361_s28 + $0x1a0] sm:$0xff] %v7944_v4  ;;  %11016 = vrcp.f32 %v7437_v63  ;;  %v7440_v44 = vadd.f32 1.0, %v10995_v2  ;;  %v9796_v38 = vpop.f32.mrb[8].mxu1  ;;  %v15912_v12 = vadd.f32 %v15655_v49, %v6497_v25 }
 0x3b7   : > { %v10999_v27 = vpop.eup %10998  ;;  %v7819_v40 = vmul.f32 %v10997_v56, %v15774_v61  ;;  %11018 = vrcp.f32 %v7442_v43  ;;  %v6510_v59 = vpop.f32.mrb[9].mxu1  ;;  %v15918_v60 = vadd.f32 %v15655_v49, %v9796_v38 }
 0x3b8   : > { %v11001_v29 = vpop.eup %11000  ;;  %v7817_v7 = vmul.f32 %v10999_v27, %v15778_v9  ;;  %11020 = vrcp.f32 %v7440_v44  ;;  %v9797_v14 = vpop.f32.mrb[10].mxu1  ;;  %v15924_v55 = vadd.f32 %v15655_v49, %v6510_v59  ;;  %v9157_v2 = vmul.f32 -1.442695, %v15912_v12 }
 0x3b9   : > { %v11003_v52 = vpop.eup %11002  ;;  %v7947_v13 = vmul.f32 %v7819_v40, %v16926_v50  ;;  %8075 = vst [vmem:[%s15346_s26 + $0x1b8] sm:$0xff] %v7819_v40  ;;  %v7822_v34 = vmul.f32 %v11001_v29, %v15787_v32  ;;  %11022 = vpow2.f32 %v9153_v28  ;;  %v6513_v21 = vpop.f32.mrb[11].mxu1  ;;  %v15928_v4 = vadd.f32 %v15655_v49, %v9797_v14  ;;  %v16930_v50 = vld [vmem:[#allocation101_spill] sm:$0xff] }
 0x3ba   : > { %v11005_v61 = vpop.eup %11004  ;;  %v7945_v10 = vmul.f32 %v7817_v7, %v16927_v18  ;;  %8073 = vst [vmem:[%s15346_s26 + $0x1a8] sm:$0xff] %v7817_v7  ;;  %v7820_v9 = vmul.f32 %v11003_v52, %v15791_v16  ;;  %11024 = vpow2.f32 %v9158_v24  ;;  %v16929_v16 = vld [vmem:[#allocation96_spill] sm:$0xff]  ;;  %v9162_v56 = vmul.f32 -1.442695, %v15918_v60 }
 0x3bb   : > { %v11007_v51 = vpop.eup %11006  ;;  %8203 = vst [vmem:[%s15361_s28 + $0x1b8] sm:$0xff] %v7947_v13  ;;  %v7950_v32 = vmul.f32 %v7822_v34, %v16928_v23  ;;  %8078 = vst [vmem:[%s15346_s26 + $0x1d0] sm:$0xff] %v7822_v34  ;;  %v7443_v54 = vadd.f32 1.0, %v11005_v61  ;;  %11026 = vpow2.f32 %v9156_v3  ;;  %v9160_v27 = vmul.f32 -1.442695, %v15924_v55  ;;  %v16931_v61 = vld [vmem:[#allocation97_spill] sm:$0xff] }
 0x3bc   : > { %v11009_v0 = vpop.eup %11008  ;;  %8201 = vst [vmem:[%s15361_s28 + $0x1a8] sm:$0xff] %v7945_v10  ;;  %v7948_v45 = vmul.f32 %v7820_v9, %v16929_v16  ;;  %8076 = vst [vmem:[%s15346_s26 + $0x1c0] sm:$0xff] %v7820_v9  ;;  %v7441_v26 = vadd.f32 1.0, %v11007_v51  ;;  %11028 = vpow2.f32 %v9159_v30  ;;  %v9163_v29 = vmul.f32 -1.442695, %v15928_v4  ;;  %v16932_v51 = vld [vmem:[#allocation108_spill] sm:$0xff] }
 0x3bd   : > { %v11011_v17 = vpop.eup %11010  ;;  %8206 = vst [vmem:[%s15361_s28 + $0x1d0] sm:$0xff] %v7950_v32  ;;  %11030 = vrcp.f32 %v7443_v54  ;;  %v7446_v47 = vadd.f32 1.0, %v11009_v0  ;;  %v15938_v7 = vadd.f32 %v15655_v49, %v6513_v21 }
 0x3be   : > { %v11013_v63 = vpop.eup %11012  ;;  %8204 = vst [vmem:[%s15361_s28 + $0x1c0] sm:$0xff] %v7948_v45  ;;  %11032 = vrcp.f32 %v7441_v26  ;;  %v7444_v25 = vadd.f32 1.0, %v11011_v17  ;;  %v9800_v30 = vpop.f32.mrb[12].mxu1 }
 0x3bf   : > { %v11015_v43 = vpop.eup %11014  ;;  %11034 = vrcp.f32 %v7446_v47  ;;  %v7447_v28 = vadd.f32 1.0, %v11013_v63  ;;  %v6526_v34 = vpop.f32.mrb[13].mxu1  ;;  %v15947_v10 = vadd.f32 %v15655_v49, %v9800_v30  ;;  %v9161_v45 = vmul.f32 -1.442695, %v15938_v7 }
 0x3c0   : > { %v11017_v44 = vpop.eup %11016  ;;  %v7823_v24 = vmul.f32 %v11015_v43, %v15806_v41  ;;  %11036 = vrcp.f32 %v7444_v25  ;;  %v9801_v9 = vpop.f32.mrb[14].mxu1  ;;  %v15953_v32 = vadd.f32 %v15655_v49, %v6526_v34 }
 0x3c1   : > { %v11019_v40 = vpop.eup %11018  ;;  %v7821_v3 = vmul.f32 %v11017_v44, %v15817_v11  ;;  %11038 = vrcp.f32 %v7447_v28  ;;  %v6529_v54 = vpop.f32.mrb[15].mxu1  ;;  %v15961_v17 = vadd.f32 %v15655_v49, %v9801_v9 }
 0x3c2   : > { %v11021_v52 = vpop.eup %11020  ;;  %v7951_v13 = vmul.f32 %v7823_v24, %v16930_v50  ;;  %8079 = vst [vmem:[%s15346_s26 + $0x1d8] sm:$0xff] %v7823_v24  ;;  %v7826_v41 = vmul.f32 %v11019_v40, %v15821_v19  ;;  %11040 = vpow2.f32 %v9157_v2  ;;  %v15964_v47 = vadd.f32 %v15655_v49, %v6529_v54 }
 0x3c3   : > { %v11023_v38 = vpop.eup %11022  ;;  %v7949_v11 = vmul.f32 %v7821_v3, %v16931_v61  ;;  %8077 = vst [vmem:[%s15346_s26 + $0x1c8] sm:$0xff] %v7821_v3  ;;  %v7824_v18 = vmul.f32 %v11021_v52, %v15827_v35  ;;  %11042 = vpow2.f32 %v9162_v56  ;;  %v16933_v35 = vld [vmem:[#allocation104_spill] sm:$0xff]  ;;  %v9166_v2 = vmul.f32 -1.442695, %v15947_v10 }
 0x3c4   : > { %v11025_v59 = vpop.eup %11024  ;;  %8207 = vst [vmem:[%s15361_s28 + $0x1d8] sm:$0xff] %v7951_v13  ;;  %v7954_v19 = vmul.f32 %v7826_v41, %v16932_v51  ;;  %8082 = vst [vmem:[%s15346_s26 + $0x1f0] sm:$0xff] %v7826_v41  ;;  %v7445_v23 = vadd.f32 1.0, %v11023_v38  ;;  %11044 = vpow2.f32 %v9160_v27  ;;  %v9164_v56 = vmul.f32 -1.442695, %v15953_v32  ;;  %v16935_v41 = vld [vmem:[#allocation105_spill] sm:$0xff] }
 0x3c5   : > { %v11027_v14 = vpop.eup %11026  ;;  %8205 = vst [vmem:[%s15361_s28 + $0x1c8] sm:$0xff] %v7949_v11  ;;  %v7952_v0 = vmul.f32 %v7824_v18, %v16933_v35  ;;  %8080 = vst [vmem:[%s15346_s26 + $0x1e0] sm:$0xff] %v7824_v18  ;;  %v7450_v16 = vadd.f32 1.0, %v11025_v59  ;;  %11046 = vpow2.f32 %v9163_v29  ;;  %v9167_v27 = vmul.f32 -1.442695, %v15961_v17  ;;  %v16934_v29 = vld [vmem:[#allocation109_spill] sm:$0xff] }
 0x3c6   : > { %v11029_v26 = vpop.eup %11028  ;;  %8210 = vst [vmem:[%s15361_s28 + $0x1f0] sm:$0xff] %v7954_v19  ;;  %11048 = vrcp.f32 %v7445_v23  ;;  %v7448_v21 = vadd.f32 1.0, %v11027_v14  ;;  %v9804_v40 = vpop.f32.mrb[16].mxu1  ;;  %v16937_v19 = vld [vmem:[#allocation112_spill] sm:$0xff]  ;;  %v16938_v35 = vld [vmem:[#allocation117_spill] sm:$0xff] }
 0x3c7   : > { %v11031_v63 = vpop.eup %11030  ;;  %8208 = vst [vmem:[%s15361_s28 + $0x1e0] sm:$0xff] %v7952_v0  ;;  %11050 = vrcp.f32 %v7450_v16  ;;  %v7451_v25 = vadd.f32 1.0, %v11029_v26  ;;  %v6542_v50 = vpop.f32.mrb[17].mxu1  ;;  %v15980_v38 = vadd.f32 %v15655_v49, %v9804_v40 }
 0x3c8   : > { %v11033_v43 = vpop.eup %11032  ;;  %v7827_v28 = vmul.f32 %v11031_v63, %v15832_v37  ;;  %11052 = vrcp.f32 %v7448_v21  ;;  %v9165_v37 = vmul.f32 -1.442695, %v15964_v47  ;;  %v9805_v61 = vpop.f32.mrb[18].mxu1  ;;  %v15987_v59 = vadd.f32 %v15655_v49, %v6542_v50 }
 0x3c9   : > { %v11035_v44 = vpop.eup %11034  ;;  %v7825_v24 = vmul.f32 %v11033_v43, %v15854_v33  ;;  %11054 = vrcp.f32 %v7451_v25  ;;  %v15996_v16 = vadd.f32 %v15655_v49, %v9805_v61  ;;  %v9170_v21 = vmul.f32 -1.442695, %v15980_v38 }
 0x3ca   : > { %v11037_v3 = vpop.eup %11036  ;;  %v7955_v30 = vmul.f32 %v7827_v28, %v16934_v29  ;;  %8083 = vst [vmem:[%s15346_s26 + $0x1f8] sm:$0xff] %v7827_v28  ;;  %v7830_v52 = vmul.f32 %v11035_v44, %v15850_v57  ;;  %11056 = vpow2.f32 %v9161_v45  ;;  %v16936_v57 = vld [vmem:[#allocation116_spill] sm:$0xff]  ;;  %v9168_v43 = vmul.f32 -1.442695, %v15987_v59 }
 0x3cb   : > { %v11039_v13 = vpop.eup %11038  ;;  %v7953_v33 = vmul.f32 %v7825_v24, %v16935_v41  ;;  %8081 = vst [vmem:[%s15346_s26 + $0x1e8] sm:$0xff] %v7825_v24  ;;  %v7828_v34 = vmul.f32 %v11037_v3, %v15857_v22  ;;  %11058 = vpow2.f32 %v9166_v2  ;;  %v6545_v22 = vpop.f32.mrb[19].mxu1  ;;  %v9171_v44 = vmul.f32 -1.442695, %v15996_v16 }
 0x3cc   : > { %v11041_v11 = vpop.eup %11040  ;;  %8211 = vst [vmem:[%s15361_s28 + $0x1f8] sm:$0xff] %v7955_v30  ;;  %v7958_v18 = vmul.f32 %v7830_v52, %v16936_v57  ;;  %8086 = vst [vmem:[%s15346_s26 + $0x210] sm:$0xff] %v7830_v52  ;;  %v7831_v9 = vmul.f32 %v11039_v13, %v15861_v53  ;;  %11060 = vpow2.f32 %v9164_v56  ;;  %v16001_v63 = vadd.f32 %v15655_v49, %v6545_v22  ;;  %v16939_v30 = vld [vmem:[#allocation113_spill] sm:$0xff]  ;;  %v16940_v13 = vld [vmem:[#allocation124_spill] sm:$0xff] }
 0x3cd   : > { %v11043_v51 = vpop.eup %11042  ;;  %8209 = vst [vmem:[%s15361_s28 + $0x1e8] sm:$0xff] %v7953_v33  ;;  %v7956_v23 = vmul.f32 %v7828_v34, %v16937_v19  ;;  %8084 = vst [vmem:[%s15346_s26 + $0x200] sm:$0xff] %v7828_v34  ;;  %v7449_v54 = vadd.f32 1.0, %v11041_v11  ;;  %11062 = vpow2.f32 %v9167_v27  ;;  %v16018_v33 = vld [vmem:[%s16529_s7] ss:$0 sm:$0xff]  ;;  %v16942_v22 = vld [vmem:[#allocation125_spill] sm:$0xff] }
 0x3ce   : > { %v11045_v14 = vpop.eup %11044  ;;  %8214 = vst [vmem:[%s15361_s28 + $0x210] sm:$0xff] %v7958_v18  ;;  %v7959_v0 = vmul.f32 %v7831_v9, %v16938_v35  ;;  %8087 = vst [vmem:[%s15346_s26 + $0x218] sm:$0xff] %v7831_v9  ;;  %v7454_v53 = vadd.f32 1.0, %v11043_v51  ;;  %11064 = vpow2.f32 %v9165_v37  ;;  %v9808_v24 = vpop.f32.mrb[20].mxu1  ;;  %v9169_v49 = vmul.f32 -1.442695, %v16001_v63 }
 0x3cf   : > { %v11047_v45 = vpop.eup %11046  ;;  %8212 = vst [vmem:[%s15361_s28 + $0x200] sm:$0xff] %v7956_v23  ;;  %11066 = vrcp.f32 %v7449_v54  ;;  %v7452_v26 = vadd.f32 1.0, %v11045_v14  ;;  %v6558_v3 = vpop.f32.mrb[21].mxu1  ;;  %v16021_v34 = vadd.f32 %v16018_v33, %v9808_v24  ;;  %v16941_v11 = vld [vmem:[#allocation120_spill] sm:$0xff] }
 0x3d0   : > { %v11049_v25 = vpop.eup %11048  ;;  %8215 = vst [vmem:[%s15361_s28 + $0x218] sm:$0xff] %v7959_v0  ;;  %11068 = vrcp.f32 %v7454_v53  ;;  %v7455_v2 = vadd.f32 1.0, %v11047_v45  ;;  %v9809_v37 = vpop.f32.mrb[22].mxu1 }
 0x3d1   : > { %v11051_v28 = vpop.eup %11050  ;;  %v7829_v56 = vmul.f32 %v11049_v25, %v15876_v58  ;;  %11070 = vrcp.f32 %v7452_v26  ;;  %v16033_v23 = vadd.f32 %v16018_v33, %v9809_v37  ;;  %v9174_v45 = vmul.f32 -1.442695, %v16021_v34 }
 0x3d2   : > { %v11053_v27 = vpop.eup %11052  ;;  %v7834_v40 = vmul.f32 %v11051_v28, %v15883_v8  ;;  %11072 = vrcp.f32 %v7455_v2 }
 0x3d3   : > { %v11055_v29 = vpop.eup %11054  ;;  %v7957_v52 = vmul.f32 %v7829_v56, %v16939_v30  ;;  %8085 = vst [vmem:[%s15346_s26 + $0x208] sm:$0xff] %v7829_v56  ;;  %v7832_v58 = vmul.f32 %v11053_v27, %v15889_v15  ;;  %11074 = vpow2.f32 %v9170_v21  ;;  %v6561_v15 = vpop.f32.mrb[23].mxu1  ;;  %v9175_v56 = vmul.f32 -1.442695, %v16033_v23 }
 0x3d4   : > { %v11057_v50 = vpop.eup %11056  ;;  %v7962_v41 = vmul.f32 %v7834_v40, %v16940_v13  ;;  %8090 = vst [vmem:[%s15346_s26 + $0x230] sm:$0xff] %v7834_v40  ;;  %v7835_v8 = vmul.f32 %v11055_v29, %v15897_v6  ;;  %11076 = vpow2.f32 %v9168_v43  ;;  %v16027_v6 = vadd.f32 %v16018_v33, %v6558_v3  ;;  %v16943_v29 = vld [vmem:[#allocation121_spill] sm:$0xff] }
 0x3d5   : > { %v11059_v61 = vpop.eup %11058  ;;  %8213 = vst [vmem:[%s15361_s28 + $0x208] sm:$0xff] %v7957_v52  ;;  %v7960_v57 = vmul.f32 %v7832_v58, %v16941_v11  ;;  %8088 = vst [vmem:[%s15346_s26 + $0x220] sm:$0xff] %v7832_v58  ;;  %v7453_v18 = vadd.f32 1.0, %v11057_v50  ;;  %11078 = vpow2.f32 %v9171_v44  ;;  %v16037_v35 = vadd.f32 %v16018_v33, %v6561_v15 }
 0x3d6   : > { %v11061_v9 = vpop.eup %11060  ;;  %8218 = vst [vmem:[%s15361_s28 + $0x230] sm:$0xff] %v7962_v41  ;;  %v7963_v51 = vmul.f32 %v7835_v8, %v16942_v22  ;;  %8091 = vst [vmem:[%s15346_s26 + $0x238] sm:$0xff] %v7835_v8  ;;  %v7458_v19 = vadd.f32 1.0, %v11059_v61  ;;  %11080 = vpow2.f32 %v9169_v49  ;;  %v9172_v25 = vmul.f32 -1.442695, %v16027_v6  ;;  %v9812_v2 = vpop.f32.mrb[24].mxu1 }
 0x3d7   : > { %v11063_v54 = vpop.eup %11062  ;;  %8216 = vst [vmem:[%s15361_s28 + $0x220] sm:$0xff] %v7960_v57  ;;  %11082 = vrcp.f32 %v7453_v18  ;;  %v7456_v14 = vadd.f32 1.0, %v11061_v9  ;;  %v6574_v44 = vpop.f32.mrb[25].mxu1  ;;  %v9173_v40 = vmul.f32 -1.442695, %v16037_v35  ;;  %v16050_v52 = vadd.f32 %v16018_v33, %v9812_v2  ;;  %v16946_v18 = vld [vmem:[#allocation129_spill] sm:$0xff] }
 0x3d8   : > { %v11065_v0 = vpop.eup %11064  ;;  %8219 = vst [vmem:[%s15361_s28 + $0x238] sm:$0xff] %v7963_v51  ;;  %11084 = vrcp.f32 %v7458_v19  ;;  %v7459_v53 = vadd.f32 1.0, %v11063_v54  ;;  %v9813_v49 = vpop.f32.mrb[26].mxu1  ;;  %v16056_v41 = vadd.f32 %v16018_v33, %v6574_v44 }
 0x3d9   : > { %v11067_v26 = vpop.eup %11066  ;;  %11086 = vrcp.f32 %v7456_v14  ;;  %v7457_v21 = vadd.f32 1.0, %v11065_v0  ;;  %v6577_v58 = vpop.f32.mrb[27].mxu1  ;;  %v16062_v11 = vadd.f32 %v16018_v33, %v9813_v49  ;;  %v9178_v54 = vmul.f32 -1.442695, %v16050_v52 }
 0x3da   : > { %v11069_v43 = vpop.eup %11068  ;;  %v7833_v28 = vmul.f32 %v11067_v26, %v15912_v12  ;;  %11088 = vrcp.f32 %v7459_v53  ;;  %v16068_v22 = vadd.f32 %v16018_v33, %v6577_v58  ;;  %v9176_v53 = vmul.f32 -1.442695, %v16056_v41 }
 0x3db   : > { %v11071_v24 = vpop.eup %11070  ;;  %v7838_v27 = vmul.f32 %v11069_v43, %v15918_v60  ;;  %11090 = vrcp.f32 %v7457_v21  ;;  %v16944_v60 = vld [vmem:[#allocation128_spill] sm:$0xff] }
 0x3dc   : > { %v11073_v3 = vpop.eup %11072  ;;  %v7961_v30 = vmul.f32 %v7833_v28, %v16943_v29  ;;  %8089 = vst [vmem:[%s15346_s26 + $0x228] sm:$0xff] %v7833_v28  ;;  %v7836_v12 = vmul.f32 %v11071_v24, %v15924_v55  ;;  %11092 = vpow2.f32 %v9174_v45  ;;  %v16945_v55 = vld [vmem:[#allocation126_spill] sm:$0xff]  ;;  %v9177_v44 = vmul.f32 -1.442695, %v16068_v22 }
 0x3dd   : > { %v11075_v37 = vpop.eup %11074  ;;  %v7966_v50 = vmul.f32 %v7838_v27, %v16944_v60  ;;  %8094 = vst [vmem:[%s15346_s26 + $0x250] sm:$0xff] %v7838_v27  ;;  %v7839_v13 = vmul.f32 %v11073_v3, %v15928_v4  ;;  %11094 = vpow2.f32 %v9172_v25  ;;  %v9179_v25 = vmul.f32 -1.442695, %v16062_v11 }
 0x3de   : > { %v11077_v8 = vpop.eup %11076  ;;  %8217 = vst [vmem:[%s15361_s28 + $0x228] sm:$0xff] %v7961_v30  ;;  %v7964_v15 = vmul.f32 %v7836_v12, %v16945_v55  ;;  %8092 = vst [vmem:[%s15346_s26 + $0x240] sm:$0xff] %v7836_v12  ;;  %v7462_v61 = vadd.f32 1.0, %v11075_v37  ;;  %11096 = vpow2.f32 %v9175_v56  ;;  %v9816_v45 = vpop.f32.mrb[28].mxu1  ;;  %v16948_v12 = vld [vmem:[#allocation132_spill] sm:$0xff] }
 0x3df   : > { %v11079_v57 = vpop.eup %11078  ;;  %8222 = vst [vmem:[%s15361_s28 + $0x250] sm:$0xff] %v7966_v50  ;;  %v7967_v4 = vmul.f32 %v7839_v13, %v16946_v18  ;;  %8095 = vst [vmem:[%s15346_s26 + $0x258] sm:$0xff] %v7839_v13  ;;  %v7460_v9 = vadd.f32 1.0, %v11077_v8  ;;  %11098 = vpow2.f32 %v9173_v40  ;;  %v16077_v2 = vadd.f32 %v16018_v33, %v9816_v45  ;;  %v6590_v43 = vpop.f32.mrb[29].mxu1  ;;  %v16947_v40 = vld [vmem:[#allocation127_spill] sm:$0xff] }
 0x3e0   : > { %v11081_v51 = vpop.eup %11080  ;;  %8220 = vst [vmem:[%s15361_s28 + $0x240] sm:$0xff] %v7964_v15  ;;  %11100 = vrcp.f32 %v7462_v61  ;;  %v7463_v19 = vadd.f32 1.0, %v11079_v57  ;;  %v9817_v24 = vpop.f32.mrb[30].mxu1  ;;  %v16089_v37 = vadd.f32 %v16018_v33, %v6590_v43 }
 0x3e1   : > { %v11083_v14 = vpop.eup %11082  ;;  %8223 = vst [vmem:[%s15361_s28 + $0x258] sm:$0xff] %v7967_v4  ;;  %11102 = vrcp.f32 %v7460_v9  ;;  %v7461_v0 = vadd.f32 1.0, %v11081_v51  ;;  %v9182_v3 = vmul.f32 -1.442695, %v16077_v2  ;;  %v6593_v29 = vpop.f32.mrb[31].mxu1  ;;  %v16096_v8 = vadd.f32 %v16018_v33, %v9817_v24  ;;  %v16951_v4 = vld [vmem:[#allocation131_spill] sm:$0xff] }
 0x3e2   : > { %v11085_v26 = vpop.eup %11084  ;;  %v7837_v21 = vmul.f32 %v11083_v14, %v15938_v7  ;;  %11104 = vrcp.f32 %v7463_v19  ;;  %v16102_v57 = vadd.f32 %v16018_v33, %v6593_v29 }
 0x3e3   : > { %v11087_v28 = vpop.eup %11086  ;;  %v7842_v56 = vmul.f32 %v11085_v26, %v15947_v10  ;;  %11106 = vrcp.f32 %v7461_v0  ;;  %v9183_v45 = vmul.f32 -1.442695, %v16096_v8 }
 0x3e4   : > { %v11089_v27 = vpop.eup %11088  ;;  %v7965_v7 = vmul.f32 %v7837_v21, %v16947_v40  ;;  %8093 = vst [vmem:[%s15346_s26 + $0x248] sm:$0xff] %v7837_v21  ;;  %v7840_v49 = vmul.f32 %v11087_v28, %v15953_v32  ;;  %11108 = vpow2.f32 %v9178_v54  ;;  %v16949_v32 = vld [vmem:[#allocation130_spill] sm:$0xff]  ;;  %v9180_v54 = vmul.f32 -1.442695, %v16089_v37 }
 0x3e5   : > { %v11091_v30 = vpop.eup %11090  ;;  %v7970_v10 = vmul.f32 %v7842_v56, %v16948_v12  ;;  %8098 = vst [vmem:[%s15346_s26 + $0x270] sm:$0xff] %v7842_v56  ;;  %v7843_v58 = vmul.f32 %v11089_v27, %v15961_v17  ;;  %11110 = vpow2.f32 %v9176_v53  ;;  %v16950_v17 = vld [vmem:[#allocation133_spill] sm:$0xff]  ;;  %v9181_v28 = vmul.f32 -1.442695, %v16102_v57 }
 0x3e6   : > { %v11093_v60 = vpop.eup %11092  ;;  %8221 = vst [vmem:[%s15361_s28 + $0x248] sm:$0xff] %v7965_v7  ;;  %v7968_v50 = vmul.f32 %v7840_v49, %v16949_v32  ;;  %8096 = vst [vmem:[%s15346_s26 + $0x260] sm:$0xff] %v7840_v49  ;;  %v7841_v13 = vmul.f32 %v11091_v30, %v15964_v47  ;;  %11112 = vpow2.f32 %v9179_v25  ;;  %v9820_v14 = vpop.f32.mrb[32].mxu1  ;;  %v16952_v49 = vld [vmem:[#allocation136_spill] sm:$0xff]  ;;  %v16953_v30 = vld [vmem:[#allocation134_spill] sm:$0xff] }
 0x3e7   : > { %v11095_v55 = vpop.eup %11094  ;;  %8226 = vst [vmem:[%s15361_s28 + $0x270] sm:$0xff] %v7970_v10  ;;  %v7971_v15 = vmul.f32 %v7843_v58, %v16950_v17  ;;  %8099 = vst [vmem:[%s15346_s26 + $0x278] sm:$0xff] %v7843_v58  ;;  %v7466_v61 = vadd.f32 1.0, %v11093_v60  ;;  %11114 = vpow2.f32 %v9177_v44  ;;  %v16112_v26 = vadd.f32 %v16018_v33, %v9820_v14  ;;  %v6606_v21 = vpop.f32.mrb[33].mxu1  ;;  %v16954_v60 = vld [vmem:[#allocation137_spill] sm:$0xff] }
 0x3e8   : > { %v11097_v18 = vpop.eup %11096  ;;  %8224 = vst [vmem:[%s15361_s28 + $0x260] sm:$0xff] %v7968_v50  ;;  %v7969_v47 = vmul.f32 %v7841_v13, %v16951_v4  ;;  %8097 = vst [vmem:[%s15346_s26 + $0x268] sm:$0xff] %v7841_v13  ;;  %v7464_v9 = vadd.f32 1.0, %v11095_v55  ;;  %11116 = vpow2.f32 %v9182_v3  ;;  %v9821_v56 = vpop.f32.mrb[34].mxu1  ;;  %v16125_v10 = vadd.f32 %v16018_v33, %v6606_v21  ;;  %v16955_v55 = vld [vmem:[#allocation135_spill] sm:$0xff] }
 0x3e9   : > { %v11099_v51 = vpop.eup %11098  ;;  %8227 = vst [vmem:[%s15361_s28 + $0x278] sm:$0xff] %v7971_v15  ;;  %11118 = vrcp.f32 %v7466_v61  ;;  %v7467_v19 = vadd.f32 1.0, %v11097_v18  ;;  %v9186_v27 = vmul.f32 -1.442695, %v16112_v26  ;;  %v6609_v40 = vpop.f32.mrb[35].mxu1  ;;  %v16131_v50 = vadd.f32 %v16018_v33, %v9821_v56 }
 0x3ea   : > { %v11101_v0 = vpop.eup %11100  ;;  %8225 = vst [vmem:[%s15361_s28 + $0x268] sm:$0xff] %v7969_v47  ;;  %11120 = vrcp.f32 %v7464_v9  ;;  %v7465_v53 = vadd.f32 1.0, %v11099_v51  ;;  %v16137_v15 = vadd.f32 %v16018_v33, %v6609_v40  ;;  %v9184_v51 = vmul.f32 -1.442695, %v16125_v10  ;;  %v16956_v40 = vld [vmem:[#allocation140_spill] sm:$0xff] }
 0x3eb   : > { %v11103_v25 = vpop.eup %11102  ;;  %v7846_v43 = vmul.f32 %v11101_v0, %v15980_v38  ;;  %11122 = vrcp.f32 %v7467_v19 }
 0x3ec   : > { %v11105_v44 = vpop.eup %11104  ;;  %v7844_v24 = vmul.f32 %v11103_v25, %v15987_v59  ;;  %11124 = vrcp.f32 %v7465_v53  ;;  %v9187_v53 = vmul.f32 -1.442695, %v16131_v50 }
 0x3ed   : > { %v11107_v7 = vpop.eup %11106  ;;  %v7974_v3 = vmul.f32 %v7846_v43, %v16952_v49  ;;  %8102 = vst [vmem:[%s15346_s26 + $0x290] sm:$0xff] %v7846_v43  ;;  %v7847_v38 = vmul.f32 %v11105_v44, %v15996_v16  ;;  %11126 = vpow2.f32 %v9180_v54  ;;  %v9185_v43 = vmul.f32 -1.442695, %v16137_v15 }
 0x3ee   : > { %v11109_v29 = vpop.eup %11108  ;;  %v7972_v12 = vmul.f32 %v7844_v24, %v16953_v30  ;;  %8100 = vst [vmem:[%s15346_s26 + $0x280] sm:$0xff] %v7844_v24  ;;  %v7845_v59 = vmul.f32 %v11107_v7, %v16001_v63  ;;  %11128 = vpow2.f32 %v9183_v45  ;;  %v9824_v4 = vpop.f32.mrb[36].mxu1 }
 0x3ef   : > { %v11111_v58 = vpop.eup %11110  ;;  %8230 = vst [vmem:[%s15361_s28 + $0x290] sm:$0xff] %v7974_v3  ;;  %v7975_v32 = vmul.f32 %v7847_v38, %v16954_v60  ;;  %8103 = vst [vmem:[%s15346_s26 + $0x298] sm:$0xff] %v7847_v38  ;;  %v7470_v16 = vadd.f32 1.0, %v11109_v29  ;;  %11130 = vpow2.f32 %v9181_v28  ;;  %v16143_v19 = vadd.f32 %v16018_v33, %v9824_v4  ;;  %v6622_v54 = vpop.f32.mrb[37].mxu1  ;;  %v16957_v38 = vld [vmem:[#allocation138_spill] sm:$0xff] }
 0x3f0   : > { %v11113_v13 = vpop.eup %11112  ;;  %8228 = vst [vmem:[%s15361_s28 + $0x280] sm:$0xff] %v7972_v12  ;;  %v7973_v63 = vmul.f32 %v7845_v59, %v16955_v55  ;;  %8101 = vst [vmem:[%s15346_s26 + $0x288] sm:$0xff] %v7845_v59  ;;  %v7468_v17 = vadd.f32 1.0, %v11111_v58  ;;  %11132 = vpow2.f32 %v9186_v27  ;;  %v9825_v45 = vpop.f32.mrb[38].mxu1 }
 0x3f1   : > { %v11115_v61 = vpop.eup %11114  ;;  %8231 = vst [vmem:[%s15361_s28 + $0x298] sm:$0xff] %v7975_v32  ;;  %11134 = vrcp.f32 %v7470_v16  ;;  %v7471_v18 = vadd.f32 1.0, %v11113_v13  ;;  %v6625_v28 = vpop.f32.mrb[39].mxu1  ;;  %v9190_v24 = vmul.f32 -1.442695, %v16143_v19  ;;  %v16160_v30 = vadd.f32 %v16018_v33, %v9825_v45  ;;  %v16959_v16 = vld [vmem:[#allocation139_spill] sm:$0xff] }
 0x3f2   : > { %v11117_v47 = vpop.eup %11116  ;;  %8229 = vst [vmem:[%s15361_s28 + $0x288] sm:$0xff] %v7973_v63  ;;  %11136 = vrcp.f32 %v7468_v17  ;;  %v7469_v9 = vadd.f32 1.0, %v11115_v61  ;;  %v16166_v60 = vadd.f32 %v16018_v33, %v6625_v28 }
 0x3f3   : > { %v11119_v14 = vpop.eup %11118  ;;  %11138 = vrcp.f32 %v7471_v18  ;;  %v7474_v0 = vadd.f32 1.0, %v11117_v47 }
 0x3f4   : > { %v11121_v21 = vpop.eup %11120  ;;  %v7850_v25 = vmul.f32 %v11119_v14, %v16021_v34  ;;  %11140 = vrcp.f32 %v7469_v9  ;;  %v16154_v34 = vadd.f32 %v16018_v33, %v6622_v54  ;;  %v9189_v45 = vmul.f32 -1.442695, %v16166_v60 }
 0x3f5   : > { %v11123_v56 = vpop.eup %11122  ;;  %v7848_v44 = vmul.f32 %v11121_v21, %v16027_v6  ;;  %11142 = vrcp.f32 %v7474_v0 }
 0x3f6   : > { %v11125_v27 = vpop.eup %11124  ;;  %v7978_v7 = vmul.f32 %v7850_v25, %v16956_v40  ;;  %8106 = vst [vmem:[%s15346_s26 + $0x2b0] sm:$0xff] %v7850_v25  ;;  %v7851_v49 = vmul.f32 %v11123_v56, %v16033_v23  ;;  %11144 = vpow2.f32 %v9184_v51  ;;  %v16958_v23 = vld [vmem:[#allocation141_spill] sm:$0xff]  ;;  %v9828_v55 = vpop.f32.mrb[40].mxu1  ;;  %v9188_v61 = vmul.f32 -1.442695, %v16154_v34 }
 0x3f7   : > { %v11127_v3 = vpop.eup %11126  ;;  %v7976_v6 = vmul.f32 %v7848_v44, %v16957_v38  ;;  %8104 = vst [vmem:[%s15346_s26 + $0x2a0] sm:$0xff] %v7848_v44  ;;  %v7849_v29 = vmul.f32 %v11125_v27, %v16037_v35  ;;  %11146 = vpow2.f32 %v9187_v53  ;;  %v16174_v18 = vadd.f32 %v16018_v33, %v9828_v55  ;;  %v6638_v4 = vpop.f32.mrb[41].mxu1  ;;  %v16960_v44 = vld [vmem:[#allocation144_spill] sm:$0xff] }
 0x3f8   : > { %v11129_v12 = vpop.eup %11128  ;;  %8234 = vst [vmem:[%s15361_s28 + $0x2b0] sm:$0xff] %v7978_v7  ;;  %v7979_v59 = vmul.f32 %v7851_v49, %v16958_v23  ;;  %8107 = vst [vmem:[%s15346_s26 + $0x2b8] sm:$0xff] %v7851_v49  ;;  %v7472_v58 = vadd.f32 1.0, %v11127_v3  ;;  %11148 = vpow2.f32 %v9185_v43  ;;  %v9191_v51 = vmul.f32 -1.442695, %v16160_v30  ;;  %v9829_v14 = vpop.f32.mrb[42].mxu1 }
 0x3f9   : > { %v11131_v32 = vpop.eup %11130  ;;  %8232 = vst [vmem:[%s15361_s28 + $0x2a0] sm:$0xff] %v7976_v6  ;;  %v7977_v35 = vmul.f32 %v7849_v29, %v16959_v16  ;;  %8105 = vst [vmem:[%s15346_s26 + $0x2a8] sm:$0xff] %v7849_v29  ;;  %v7475_v13 = vadd.f32 1.0, %v11129_v12  ;;  %11150 = vpow2.f32 %v9190_v24  ;;  %v16179_v54 = vadd.f32 %v16018_v33, %v6638_v4  ;;  %v6641_v21 = vpop.f32.mrb[43].mxu1  ;;  %v16961_v7 = vld [vmem:[#allocation142_spill] sm:$0xff]  ;;  %v16962_v6 = vld [vmem:[#allocation145_spill] sm:$0xff] }
 0x3fa   : > { %v11133_v63 = vpop.eup %11132  ;;  %8235 = vst [vmem:[%s15361_s28 + $0x2b8] sm:$0xff] %v7979_v59  ;;  %11152 = vrcp.f32 %v7472_v58  ;;  %v7473_v17 = vadd.f32 1.0, %v11131_v32  ;;  %v9194_v28 = vmul.f32 -1.442695, %v16174_v18  ;;  %v16193_v3 = vadd.f32 %v16018_v33, %v9829_v14 }
 0x3fb   : > { %v11135_v47 = vpop.eup %11134  ;;  %8233 = vst [vmem:[%s15361_s28 + $0x2a8] sm:$0xff] %v7977_v35  ;;  %11154 = vrcp.f32 %v7475_v13  ;;  %v7478_v9 = vadd.f32 1.0, %v11133_v63  ;;  %v16200_v12 = vadd.f32 %v16018_v33, %v6641_v21  ;;  %v16964_v35 = vld [vmem:[#allocation35_spill] sm:$0xff] }
 0x3fc   : > { %v11137_v0 = vpop.eup %11136  ;;  %v7854_v53 = vmul.f32 %v11135_v47, %v16050_v52  ;;  %11156 = vrcp.f32 %v7473_v17  ;;  %v9192_v52 = vmul.f32 -1.442695, %v16179_v54  ;;  %v9195_v4 = vmul.f32 -1.442695, %v16193_v3 }
 0x3fd   : > { %v11139_v25 = vpop.eup %11138  ;;  %v7852_v43 = vmul.f32 %v11137_v0, %v16056_v41  ;;  %11158 = vrcp.f32 %v7478_v9  ;;  %v9193_v0 = vmul.f32 -1.442695, %v16200_v12 }
 0x3fe   : > { %v11141_v56 = vpop.eup %11140  ;;  %v7982_v24 = vmul.f32 %v7854_v53, %v16960_v44  ;;  %8110 = vst [vmem:[%s15346_s26 + $0x2d0] sm:$0xff] %v7854_v53  ;;  %v7855_v27 = vmul.f32 %v11139_v25, %v16062_v11  ;;  %11160 = vpow2.f32 %v9188_v61  ;;  %v9832_v32 = vpop.f32.mrb[44].mxu1 }
 0x3ff   : > { %v11143_v40 = vpop.eup %11142  ;;  %v7980_v49 = vmul.f32 %v7852_v43, %v16961_v7  ;;  %8108 = vst [vmem:[%s15346_s26 + $0x2c0] sm:$0xff] %v7852_v43  ;;  %v7853_v41 = vmul.f32 %v11141_v56, %v16068_v22  ;;  %11162 = vpow2.f32 %v9191_v51  ;;  %v16963_v22 = vld [vmem:[#allocation143_spill] sm:$0xff]  ;;  %v16209_v55 = vadd.f32 %v16018_v33, %v9832_v32  ;;  %v6654_v63 = vpop.f32.mrb[45].mxu1 }
 0x400   : > { %v11145_v38 = vpop.eup %11144  ;;  %8238 = vst [vmem:[%s15361_s28 + $0x2d0] sm:$0xff] %v7982_v24  ;;  %v7983_v11 = vmul.f32 %v7855_v27, %v16962_v6  ;;  %8111 = vst [vmem:[%s15346_s26 + $0x2d8] sm:$0xff] %v7855_v27  ;;  %v7858_v29 = vmul.f32 %v11143_v40, %v16077_v2  ;;  %11164 = vpow2.f32 %v9189_v45  ;;  %v16214_v47 = vadd.f32 %v16018_v33, %v6654_v63  ;;  %v9833_v9 = vpop.f32.mrb[46].mxu1  ;;  %v16965_v24 = vld [vmem:[#allocation32_spill] sm:$0xff]  ;;  %v16966_v40 = vld [vmem:[#allocation39_spill] sm:$0xff] }
 0x401   : > { %v11147_v23 = vpop.eup %11146  ;;  %8236 = vst [vmem:[%s15361_s28 + $0x2c0] sm:$0xff] %v7980_v49  ;;  %v7981_v59 = vmul.f32 %v7853_v41, %v16963_v22  ;;  %8109 = vst [vmem:[%s15346_s26 + $0x2c8] sm:$0xff] %v7853_v41  ;;  %v7476_v58 = vadd.f32 1.0, %v11145_v38  ;;  %11166 = vpow2.f32 %v9194_v28  ;;  %v6657_v53 = vpop.f32.mrb[47].mxu1  ;;  %v9198_v25 = vmul.f32 -1.442695, %v16209_v55 }
 0x402   : > { %v11149_v16 = vpop.eup %11148  ;;  %8239 = vst [vmem:[%s15361_s28 + $0x2d8] sm:$0xff] %v7983_v11  ;;  %v7986_v13 = vmul.f32 %v7858_v29, %v16964_v35  ;;  %8114 = vst [vmem:[%s15346_s26 + $0x2f0] sm:$0xff] %v7858_v29  ;;  %v7479_v2 = vadd.f32 1.0, %v11147_v23  ;;  %11168 = vpow2.f32 %v9192_v52  ;;  %v9196_v56 = vmul.f32 -1.442695, %v16214_v47  ;;  %v16967_v38 = vld [vmem:[#allocation146_spill] sm:$0xff] }
 0x403   : > { %v11151_v17 = vpop.eup %11150  ;;  %8237 = vst [vmem:[%s15361_s28 + $0x2c8] sm:$0xff] %v7981_v59  ;;  %11170 = vrcp.f32 %v7476_v58  ;;  %v7477_v61 = vadd.f32 1.0, %v11149_v16  ;;  %v16235_v11 = vadd.f32 %v16018_v33, %v6657_v53 }
 0x404   : > { %v11153_v51 = vpop.eup %11152  ;;  %8242 = vst [vmem:[%s15361_s28 + $0x2f0] sm:$0xff] %v7986_v13  ;;  %11172 = vrcp.f32 %v7479_v2  ;;  %v7482_v14 = vadd.f32 1.0, %v11151_v17 }
 0x405   : > { %v11155_v45 = vpop.eup %11154  ;;  %v7856_v21 = vmul.f32 %v11153_v51, %v16089_v37  ;;  %11174 = vrcp.f32 %v7477_v61 }
 0x406   : > { %v11157_v43 = vpop.eup %11156  ;;  %v7859_v28 = vmul.f32 %v11155_v45, %v16096_v8  ;;  %11176 = vrcp.f32 %v7482_v14  ;;  %v16229_v8 = vadd.f32 %v16018_v33, %v9833_v9  ;;  %v9836_v29 = vpop.f32.mrb[48].mxu1  ;;  %v9197_v14 = vmul.f32 -1.442695, %v16235_v11 }
 0x407   : > { %v11159_v44 = vpop.eup %11158  ;;  %v7984_v27 = vmul.f32 %v7856_v21, %v16965_v24  ;;  %8112 = vst [vmem:[%s15346_s26 + $0x2e0] sm:$0xff] %v7856_v21  ;;  %v7857_v52 = vmul.f32 %v11157_v43, %v16102_v57  ;;  %11178 = vpow2.f32 %v9195_v4  ;;  %v16241_v58 = vadd.f32 %v16018_v33, %v9836_v29  ;;  %v6670_v32 = vpop.f32.mrb[49].mxu1 }
 0x408   : > { %v11161_v37 = vpop.eup %11160  ;;  %v7987_v7 = vmul.f32 %v7859_v28, %v16966_v40  ;;  %8115 = vst [vmem:[%s15346_s26 + $0x2f8] sm:$0xff] %v7859_v28  ;;  %v7862_v49 = vmul.f32 %v11159_v44, %v16112_v26  ;;  %11180 = vpow2.f32 %v9193_v0  ;;  %v16968_v26 = vld [vmem:[#allocation42_spill] sm:$0xff]  ;;  %v16245_v13 = vadd.f32 %v16018_v33, %v6670_v32  ;;  %v9837_v2 = vpop.f32.mrb[50].mxu1 }
 0x409   : > { %v11163_v41 = vpop.eup %11162  ;;  %8240 = vst [vmem:[%s15361_s28 + $0x2e0] sm:$0xff] %v7984_v27  ;;  %v7985_v6 = vmul.f32 %v7857_v52, %v16967_v38  ;;  %8113 = vst [vmem:[%s15346_s26 + $0x2e8] sm:$0xff] %v7857_v52  ;;  %v7480_v57 = vadd.f32 1.0, %v11161_v37  ;;  %11182 = vpow2.f32 %v9198_v25  ;;  %v9199_v61 = vmul.f32 -1.442695, %v16229_v8  ;;  %v6673_v4 = vpop.f32.mrb[51].mxu1 }
 0x40a   : > { %v11165_v23 = vpop.eup %11164  ;;  %8243 = vst [vmem:[%s15361_s28 + $0x2f8] sm:$0xff] %v7987_v7  ;;  %v7990_v22 = vmul.f32 %v7862_v49, %v16968_v26  ;;  %8118 = vst [vmem:[%s15346_s26 + $0x310] sm:$0xff] %v7862_v49  ;;  %v7483_v59 = vadd.f32 1.0, %v11163_v41  ;;  %11184 = vpow2.f32 %v9196_v56  ;;  %v9202_v45 = vmul.f32 -1.442695, %v16241_v58  ;;  %v16969_v56 = vld [vmem:[#allocation38_spill] sm:$0xff] }
 0x40b   : > { %v11167_v16 = vpop.eup %11166  ;;  %8241 = vst [vmem:[%s15361_s28 + $0x2e8] sm:$0xff] %v7985_v6  ;;  %11186 = vrcp.f32 %v7480_v57  ;;  %v7481_v35 = vadd.f32 1.0, %v11165_v23  ;;  %v9200_v43 = vmul.f32 -1.442695, %v16245_v13  ;;  %v16970_v52 = vld [vmem:[#allocation47_spill] sm:$0xff]  ;;  %v16264_v40 = vadd.f32 %v16018_v33, %v6673_v4 }
 0x40c   : > { %v11169_v63 = vpop.eup %11168  ;;  %8246 = vst [vmem:[%s15361_s28 + $0x310] sm:$0xff] %v7990_v22  ;;  %11188 = vrcp.f32 %v7483_v59  ;;  %v7486_v17 = vadd.f32 1.0, %v11167_v16 }
 0x40d   : > { %v11171_v9 = vpop.eup %11170  ;;  %11190 = vrcp.f32 %v7481_v35  ;;  %v7484_v51 = vadd.f32 1.0, %v11169_v63  ;;  %v9201_v4 = vmul.f32 -1.442695, %v16264_v40 }
 0x40e   : > { %v11173_v0 = vpop.eup %11172  ;;  %v7860_v53 = vmul.f32 %v11171_v9, %v16125_v10  ;;  %11192 = vrcp.f32 %v7486_v17  ;;  %v16258_v10 = vadd.f32 %v16018_v33, %v9837_v2  ;;  %v9840_v7 = vpop.f32.mrb[52].mxu1 }
 0x40f   : > { %v11175_v21 = vpop.eup %11174  ;;  %v7863_v25 = vmul.f32 %v11173_v0, %v16131_v50  ;;  %11194 = vrcp.f32 %v7484_v51  ;;  %v16270_v6 = vadd.f32 %v16018_v33, %v9840_v7  ;;  %v6686_v57 = vpop.f32.mrb[53].mxu1 }
 0x410   : > { %v11177_v28 = vpop.eup %11176  ;;  %v7988_v44 = vmul.f32 %v7860_v53, %v16969_v56  ;;  %8116 = vst [vmem:[%s15346_s26 + $0x300] sm:$0xff] %v7860_v53  ;;  %v7861_v24 = vmul.f32 %v11175_v21, %v16137_v15  ;;  %11196 = vpow2.f32 %v9199_v61  ;;  %v16971_v15 = vld [vmem:[#allocation43_spill] sm:$0xff]  ;;  %v16276_v22 = vadd.f32 %v16018_v33, %v6686_v57  ;;  %v9841_v59 = vpop.f32.mrb[54].mxu1 }
 0x411   : > { %v11179_v27 = vpop.eup %11178  ;;  %v7991_v37 = vmul.f32 %v7863_v25, %v16970_v52  ;;  %8119 = vst [vmem:[%s15346_s26 + $0x318] sm:$0xff] %v7863_v25  ;;  %v7866_v50 = vmul.f32 %v11177_v28, %v16143_v19  ;;  %11198 = vpow2.f32 %v9197_v14  ;;  %v16972_v19 = vld [vmem:[#allocation50_spill] sm:$0xff]  ;;  %v9203_v35 = vmul.f32 -1.442695, %v16258_v10  ;;  %v6689_v63 = vpop.f32.mrb[55].mxu1 }
 0x412   : > { %v11181_v49 = vpop.eup %11180  ;;  %8244 = vst [vmem:[%s15361_s28 + $0x300] sm:$0xff] %v7988_v44  ;;  %v7989_v41 = vmul.f32 %v7861_v24, %v16971_v15  ;;  %8117 = vst [vmem:[%s15346_s26 + $0x308] sm:$0xff] %v7861_v24  ;;  %v7487_v38 = vadd.f32 1.0, %v11179_v27  ;;  %11200 = vpow2.f32 %v9202_v45  ;;  %v16281_v2 = vadd.f32 %v16018_v33, %v9841_v59  ;;  %v16973_v25 = vld [vmem:[#allocation46_spill] sm:$0xff]  ;;  %v16974_v44 = vld [vmem:[#allocation55_spill] sm:$0xff] }
 0x413   : > { %v11183_v29 = vpop.eup %11182  ;;  %8247 = vst [vmem:[%s15361_s28 + $0x318] sm:$0xff] %v7991_v37  ;;  %v7994_v23 = vmul.f32 %v7866_v50, %v16972_v19  ;;  %8122 = vst [vmem:[%s15346_s26 + $0x330] sm:$0xff] %v7866_v50  ;;  %v7485_v26 = vadd.f32 1.0, %v11181_v49  ;;  %11202 = vpow2.f32 %v9200_v43  ;;  %v9206_v14 = vmul.f32 -1.442695, %v16270_v6  ;;  %v16975_v50 = vld [vmem:[#allocation51_spill] sm:$0xff] }
 0x414   : > { %v11185_v32 = vpop.eup %11184  ;;  %8245 = vst [vmem:[%s15361_s28 + $0x308] sm:$0xff] %v7989_v41  ;;  %11204 = vrcp.f32 %v7487_v38  ;;  %v7490_v16 = vadd.f32 1.0, %v11183_v29  ;;  %v9204_v45 = vmul.f32 -1.442695, %v16276_v22  ;;  %v16297_v27 = vadd.f32 %v16018_v33, %v6689_v63  ;;  %v16976_v41 = vld [vmem:[#allocation58_spill] sm:$0xff] }
 0x415   : > { %v11187_v17 = vpop.eup %11186  ;;  %8250 = vst [vmem:[%s15361_s28 + $0x330] sm:$0xff] %v7994_v23  ;;  %11206 = vrcp.f32 %v7485_v26  ;;  %v7488_v61 = vadd.f32 1.0, %v11185_v32 }
 0x416   : > { %v11189_v9 = vpop.eup %11188  ;;  %v7864_v51 = vmul.f32 %v11187_v17, %v16154_v34  ;;  %11208 = vrcp.f32 %v7490_v16  ;;  %v9207_v34 = vmul.f32 -1.442695, %v16281_v2  ;;  %v9205_v63 = vmul.f32 -1.442695, %v16297_v27 }
 0x417   : > { %v11191_v0 = vpop.eup %11190  ;;  %v7867_v53 = vmul.f32 %v11189_v9, %v16160_v30  ;;  %11210 = vrcp.f32 %v7488_v61  ;;  %v9844_v52 = vpop.f32.mrb[56].mxu1 }
 0x418   : > { %v11193_v21 = vpop.eup %11192  ;;  %v7992_v43 = vmul.f32 %v7864_v51, %v16973_v25  ;;  %8120 = vst [vmem:[%s15346_s26 + $0x320] sm:$0xff] %v7864_v51  ;;  %v7865_v28 = vmul.f32 %v11191_v0, %v16166_v60  ;;  %11212 = vpow2.f32 %v9203_v35  ;;  %v16304_v49 = vadd.f32 %v16018_v33, %v9844_v52  ;;  %v6702_v15 = vpop.f32.mrb[57].mxu1 }
 0x419   : > { %v11195_v56 = vpop.eup %11194  ;;  %v7995_v24 = vmul.f32 %v7867_v53, %v16974_v44  ;;  %8123 = vst [vmem:[%s15346_s26 + $0x338] sm:$0xff] %v7867_v53  ;;  %v7870_v30 = vmul.f32 %v11193_v21, %v16174_v18  ;;  %11214 = vpow2.f32 %v9201_v4  ;;  %v16310_v29 = vadd.f32 %v16018_v33, %v6702_v15  ;;  %v9845_v19 = vpop.f32.mrb[58].mxu1  ;;  %v16979_v44 = vld [vmem:[#allocation59_spill] sm:$0xff] }
 0x41a   : > { %v11197_v37 = vpop.eup %11196  ;;  %8248 = vst [vmem:[%s15361_s28 + $0x320] sm:$0xff] %v7992_v43  ;;  %v7993_v60 = vmul.f32 %v7865_v28, %v16975_v50  ;;  %8121 = vst [vmem:[%s15346_s26 + $0x328] sm:$0xff] %v7865_v28  ;;  %v7868_v7 = vmul.f32 %v11195_v56, %v16179_v54  ;;  %11216 = vpow2.f32 %v9206_v14  ;;  %v16977_v54 = vld [vmem:[#allocation54_spill] sm:$0xff]  ;;  %v6705_v32 = vpop.f32.mrb[59].mxu1  ;;  %v16318_v17 = vadd.f32 %v16018_v33, %v9845_v19  ;;  %v16978_v43 = vld [vmem:[#allocation63_spill] sm:$0xff] }
 0x41b   : > { %v11199_v18 = vpop.eup %11198  ;;  %8251 = vst [vmem:[%s15361_s28 + $0x338] sm:$0xff] %v7995_v24  ;;  %v7998_v38 = vmul.f32 %v7870_v30, %v16976_v41  ;;  %8126 = vst [vmem:[%s15346_s26 + $0x350] sm:$0xff] %v7870_v30  ;;  %v7491_v57 = vadd.f32 1.0, %v11197_v37  ;;  %11218 = vpow2.f32 %v9204_v45  ;;  %v9210_v9 = vmul.f32 -1.442695, %v16304_v49  ;;  %v16980_v50 = vld [vmem:[#allocation66_spill] sm:$0xff] }
 0x41c   : > { %v11201_v23 = vpop.eup %11200  ;;  %8249 = vst [vmem:[%s15361_s28 + $0x328] sm:$0xff] %v7993_v60  ;;  %v7996_v26 = vmul.f32 %v7868_v7, %v16977_v54  ;;  %8124 = vst [vmem:[%s15346_s26 + $0x340] sm:$0xff] %v7868_v7  ;;  %v7489_v59 = vadd.f32 1.0, %v11199_v18  ;;  %11220 = vpow2.f32 %v9207_v34  ;;  %v9208_v0 = vmul.f32 -1.442695, %v16310_v29 }
 0x41d   : > { %v11203_v16 = vpop.eup %11202  ;;  %8254 = vst [vmem:[%s15361_s28 + $0x350] sm:$0xff] %v7998_v38  ;;  %11222 = vrcp.f32 %v7491_v57  ;;  %v7494_v35 = vadd.f32 1.0, %v11201_v23  ;;  %v9211_v21 = vmul.f32 -1.442695, %v16318_v17  ;;  %v16333_v30 = vadd.f32 %v16018_v33, %v6705_v32 }
 0x41e   : > { %v11205_v61 = vpop.eup %11204  ;;  %8252 = vst [vmem:[%s15361_s28 + $0x340] sm:$0xff] %v7996_v26  ;;  %11224 = vrcp.f32 %v7489_v59  ;;  %v7492_v4 = vadd.f32 1.0, %v11203_v16 }
 0x41f   : > { %v11207_v51 = vpop.eup %11206  ;;  %v7871_v14 = vmul.f32 %v11205_v61, %v16193_v3  ;;  %11226 = vrcp.f32 %v7494_v35  ;;  %v9209_v16 = vmul.f32 -1.442695, %v16333_v30 }
 0x420   : > { %v11209_v53 = vpop.eup %11208  ;;  %v7869_v45 = vmul.f32 %v11207_v51, %v16200_v12  ;;  %11228 = vrcp.f32 %v7492_v4  ;;  %v9848_v56 = vpop.f32.mrb[60].mxu1 }
 0x421   : > { %v11211_v25 = vpop.eup %11210  ;;  %v7999_v28 = vmul.f32 %v7871_v14, %v16978_v43  ;;  %8127 = vst [vmem:[%s15346_s26 + $0x358] sm:$0xff] %v7871_v14  ;;  %v7874_v34 = vmul.f32 %v11209_v53, %v16209_v55  ;;  %11230 = vpow2.f32 %v9205_v63  ;;  %v6718_v52 = vpop.f32.mrb[61].mxu1  ;;  %v16339_v7 = vadd.f32 %v16018_v33, %v9848_v56 }
 0x422   : > { %v11213_v3 = vpop.eup %11212  ;;  %v7997_v24 = vmul.f32 %v7869_v45, %v16979_v44  ;;  %8125 = vst [vmem:[%s15346_s26 + $0x348] sm:$0xff] %v7869_v45  ;;  %v7872_v12 = vmul.f32 %v11211_v25, %v16214_v47  ;;  %11232 = vpow2.f32 %v9210_v9  ;;  %v9849_v15 = vpop.f32.mrb[62].mxu1  ;;  %v16981_v47 = vld [vmem:[#allocation62_spill] sm:$0xff]  ;;  %v16345_v57 = vadd.f32 %v16018_v33, %v6718_v52  ;;  %v16982_v45 = vld [vmem:[#allocation71_spill] sm:$0xff] }
 0x423   : > { %v11215_v37 = vpop.eup %11214  ;;  %8255 = vst [vmem:[%s15361_s28 + $0x358] sm:$0xff] %v7999_v28  ;;  %v8002_v55 = vmul.f32 %v7874_v34, %v16980_v50  ;;  %8130 = vst [vmem:[%s15346_s26 + $0x370] sm:$0xff] %v7874_v34  ;;  %v7495_v60 = vadd.f32 1.0, %v11213_v3  ;;  %11234 = vpow2.f32 %v9208_v0  ;;  %v6721_v19 = vpop.f32.mrb[63].mxu1  ;;  %v16349_v26 = vadd.f32 %v16018_v33, %v9849_v15  ;;  %v16983_v28 = vld [vmem:[#allocation67_spill] sm:$0xff]  ;;  %v16985_v52 = vld [vmem:[#allocation74_spill] sm:$0xff] }
 0x424   : > { %v11217_v18 = vpop.eup %11216  ;;  %8253 = vst [vmem:[%s15361_s28 + $0x348] sm:$0xff] %v7997_v24  ;;  %v8000_v41 = vmul.f32 %v7872_v12, %v16981_v47  ;;  %8128 = vst [vmem:[%s15346_s26 + $0x360] sm:$0xff] %v7872_v12  ;;  %v7493_v38 = vadd.f32 1.0, %v11215_v37  ;;  %11236 = vpow2.f32 %v9211_v21  ;;  %v9214_v61 = vmul.f32 -1.442695, %v16339_v7 }
 0x425   : > { %v11219_v23 = vpop.eup %11218  ;;  %8258 = vst [vmem:[%s15361_s28 + $0x370] sm:$0xff] %v8002_v55  ;;  %11238 = vrcp.f32 %v7495_v60  ;;  %v7498_v54 = vadd.f32 1.0, %v11217_v18  ;;  %v9212_v33 = vmul.f32 -1.442695, %v16345_v57  ;;  %v9215_v0 = vmul.f32 -1.442695, %v16349_v26 }
 0x426   : > { %v11221_v59 = vpop.eup %11220  ;;  %8256 = vst [vmem:[%s15361_s28 + $0x360] sm:$0xff] %v8000_v41  ;;  %11240 = vrcp.f32 %v7493_v38  ;;  %v7496_v32 = vadd.f32 1.0, %v11219_v23 }
 0x427   : > { %v11223_v35 = vpop.eup %11222  ;;  %11242 = vrcp.f32 %v7498_v54  ;;  %v7499_v63 = vadd.f32 1.0, %v11221_v59  ;;  %v16986_v54 = vld [vmem:[#allocation83_spill] sm:$0xff] }
 0x428   : > { %v11225_v4 = vpop.eup %11224  ;;  %v7875_v9 = vmul.f32 %v11223_v35, %v16229_v8  ;;  %11244 = vrcp.f32 %v7496_v32  ;;  %v11411_v8 = vld [vmem:[%s16529_s7] ss:$0 sm:$0xff]  ;;  %v16987_v35 = vld [vmem:[#allocation79_spill] sm:$0xff] }
 0x429   : > { %v11227_v51 = vpop.eup %11226  ;;  %v7873_v14 = vmul.f32 %v11225_v4, %v16235_v11  ;;  %11246 = vrcp.f32 %v7499_v63  ;;  %v16364_v43 = vadd.f32 %v11411_v8, %v6721_v19 }
 0x42a   : > { %v11229_v53 = vpop.eup %11228  ;;  %v8003_v21 = vmul.f32 %v7875_v9, %v16982_v45  ;;  %8131 = vst [vmem:[%s15346_s26 + $0x378] sm:$0xff] %v7875_v9  ;;  %v7878_v25 = vmul.f32 %v11227_v51, %v16241_v58  ;;  %11248 = vpow2.f32 %v9209_v16  ;;  %v16984_v58 = vld [vmem:[#allocation78_spill] sm:$0xff] }
 0x42b   : > { %v11231_v11 = vpop.eup %11230  ;;  %v8001_v34 = vmul.f32 %v7873_v14, %v16983_v28  ;;  %8129 = vst [vmem:[%s15346_s26 + $0x368] sm:$0xff] %v7873_v14  ;;  %v7876_v56 = vmul.f32 %v11229_v53, %v16245_v13  ;;  %11250 = vpow2.f32 %v9214_v61  ;;  %v9213_v60 = vmul.f32 -1.442695, %v16364_v43 }
 0x42c   : > { %v11233_v3 = vpop.eup %11232  ;;  %8259 = vst [vmem:[%s15361_s28 + $0x378] sm:$0xff] %v8003_v21  ;;  %v8006_v44 = vmul.f32 %v7878_v25, %v16984_v58  ;;  %8134 = vst [vmem:[%s15346_s26 + $0x390] sm:$0xff] %v7878_v25  ;;  %v7497_v24 = vadd.f32 1.0, %v11231_v11  ;;  %11252 = vpow2.f32 %v9212_v33 }
 0x42d   : > { %v11235_v12 = vpop.eup %11234  ;;  %8257 = vst [vmem:[%s15361_s28 + $0x368] sm:$0xff] %v8001_v34  ;;  %v8004_v37 = vmul.f32 %v7876_v56, %v16985_v52  ;;  %8132 = vst [vmem:[%s15346_s26 + $0x380] sm:$0xff] %v7876_v56  ;;  %v7502_v50 = vadd.f32 1.0, %v11233_v3  ;;  %11254 = vpow2.f32 %v9215_v0 }
 0x42e   : > { %v11237_v55 = vpop.eup %11236  ;;  %8262 = vst [vmem:[%s15361_s28 + $0x390] sm:$0xff] %v8006_v44  ;;  %11256 = vrcp.f32 %v7497_v24  ;;  %v7500_v13 = vadd.f32 1.0, %v11235_v12 }
 0x42f   : > { %v11239_v15 = vpop.eup %11238  ;;  %8260 = vst [vmem:[%s15361_s28 + $0x380] sm:$0xff] %v8004_v37  ;;  %11258 = vrcp.f32 %v7502_v50  ;;  %v7503_v18 = vadd.f32 1.0, %v11237_v55 }
 0x430   : > { %v11241_v47 = vpop.eup %11240  ;;  %v7879_v41 = vmul.f32 %v11239_v15, %v16258_v10  ;;  %11260 = vrcp.f32 %v7500_v13 }
 0x431   : > { %v11243_v38 = vpop.eup %11242  ;;  %v7877_v19 = vmul.f32 %v11241_v47, %v16264_v40  ;;  %11262 = vrcp.f32 %v7503_v18 }
 0x432   : > { %v11245_v23 = vpop.eup %11244  ;;  %v8007_v59 = vmul.f32 %v7879_v41, %v16986_v54  ;;  %8135 = vst [vmem:[%s15346_s26 + $0x398] sm:$0xff] %v7879_v41  ;;  %v7882_v32 = vmul.f32 %v11243_v38, %v16270_v6  ;;  %11264 = vpow2.f32 %v9213_v60 }
 0x433   : > { %v11247_v16 = vpop.eup %11246  ;;  %v8005_v63 = vmul.f32 %v7877_v19, %v16987_v35  ;;  %8133 = vst [vmem:[%s15346_s26 + $0x388] sm:$0xff] %v7877_v19  ;;  %v7880_v10 = vmul.f32 %v11245_v23, %v16276_v22 }
 0x434   : > { %v11249_v61 = vpop.eup %11248  ;;  %8263 = vst [vmem:[%s15361_s28 + $0x398] sm:$0xff] %v8007_v59  ;;  %v8010_v40 = vmul.f32 %v7882_v32, %v15015_v20  ;;  %8138 = vst [vmem:[%s15346_s26 + $0x3b0] sm:$0xff] %v7882_v32  ;;  %v7883_v4 = vmul.f32 %v11247_v16, %v16281_v2 }
 0x435   : > { %v11251_v9 = vpop.eup %11250  ;;  %8261 = vst [vmem:[%s15361_s28 + $0x388] sm:$0xff] %v8005_v63  ;;  %v8008_v6 = vmul.f32 %v7880_v10, %v14989_v46  ;;  %8136 = vst [vmem:[%s15346_s26 + $0x3a0] sm:$0xff] %v7880_v10  ;;  %v7501_v33 = vadd.f32 1.0, %v11249_v61 }
 0x436   : > { %v11253_v51 = vpop.eup %11252  ;;  %8266 = vst [vmem:[%s15361_s28 + $0x3b0] sm:$0xff] %v8010_v40  ;;  %v8011_v14 = vmul.f32 %v7883_v4, %v15023_v42  ;;  %8139 = vst [vmem:[%s15346_s26 + $0x3b8] sm:$0xff] %v7883_v4  ;;  %v7506_v22 = vadd.f32 1.0, %v11251_v9 }
 0x437   : > { %v11255_v0 = vpop.eup %11254  ;;  %8264 = vst [vmem:[%s15361_s28 + $0x3a0] sm:$0xff] %v8008_v6  ;;  %11266 = vrcp.f32 %v7501_v33  ;;  %v7504_v20 = vadd.f32 1.0, %v11253_v51 }
 0x438   : > { %v11257_v53 = vpop.eup %11256  ;;  %8267 = vst [vmem:[%s15361_s28 + $0x3b8] sm:$0xff] %v8011_v14  ;;  %11268 = vrcp.f32 %v7506_v22  ;;  %v7507_v2 = vadd.f32 1.0, %v11255_v0 }
 0x439   : > { %v11259_v46 = vpop.eup %11258  ;;  %v7881_v45 = vmul.f32 %v11257_v53, %v16297_v27  ;;  %11270 = vrcp.f32 %v7504_v20 }
 0x43a   : > { %v11261_v42 = vpop.eup %11260  ;;  %v7886_v21 = vmul.f32 %v11259_v46, %v16304_v49  ;;  %11272 = vrcp.f32 %v7507_v2 }
 0x43b   : > { %v11263_v25 = vpop.eup %11262  ;;  %v8009_v8 = vmul.f32 %v7881_v45, %v14997_v36  ;;  %8137 = vst [vmem:[%s15346_s26 + $0x3a8] sm:$0xff] %v7881_v45  ;;  %v7884_v11 = vmul.f32 %v11261_v42, %v16310_v29 }
 0x43c   : > { %v11265_v28 = vpop.eup %11264  ;;  %v8014_v34 = vmul.f32 %v7886_v21, %v15067_v39  ;;  %8142 = vst [vmem:[%s15346_s26 + $0x3d0] sm:$0xff] %v7886_v21  ;;  %v7887_v27 = vmul.f32 %v11263_v25, %v16318_v17 }
 0x43d   : > { %8265 = vst [vmem:[%s15361_s28 + $0x3a8] sm:$0xff] %v8009_v8  ;;  %v8012_v56 = vmul.f32 %v7884_v11, %v15041_v1  ;;  %8140 = vst [vmem:[%s15346_s26 + $0x3c0] sm:$0xff] %v7884_v11  ;;  %v7505_v49 = vadd.f32 1.0, %v11265_v28 }
 0x43e   : > { %8270 = vst [vmem:[%s15361_s28 + $0x3d0] sm:$0xff] %v8014_v34  ;;  %v8015_v36 = vmul.f32 %v7887_v27, %v15075_v31  ;;  %8143 = vst [vmem:[%s15346_s26 + $0x3d8] sm:$0xff] %v7887_v27 }
 0x43f   : > { %8268 = vst [vmem:[%s15361_s28 + $0x3c0] sm:$0xff] %v8012_v56  ;;  %11274 = vrcp.f32 %v7505_v49 }
 0x440   : > { %8271 = vst [vmem:[%s15361_s28 + $0x3d8] sm:$0xff] %v8015_v36 }
 0x441   : > { %v11267_v39 = vpop.eup %11266 }
 0x442   : > { %v11269_v29 = vpop.eup %11268  ;;  %v7885_v1 = vmul.f32 %v11267_v39, %v16333_v30 }
 0x443   : > { %v11271_v17 = vpop.eup %11270  ;;  %v7890_v3 = vmul.f32 %v11269_v29, %v16339_v7 }
 0x444   : > { %v11273_v58 = vpop.eup %11272  ;;  %v8013_v31 = vmul.f32 %v7885_v1, %v15049_v62  ;;  %8141 = vst [vmem:[%s15346_s26 + $0x3c8] sm:$0xff] %v7885_v1  ;;  %v7888_v44 = vmul.f32 %v11271_v17, %v16345_v57  ;;  %v16988_v62 = vld [vmem:[#allocation87_spill] sm:$0xff]  ;;  %v16989_v57 = vld [vmem:[#allocation82_spill] sm:$0xff] }
 0x445   : > { %v8018_v24 = vmul.f32 %v7890_v3, %v15114_v5  ;;  %8146 = vst [vmem:[%s15346_s26 + $0x3f0] sm:$0xff] %v7890_v3  ;;  %v7891_v12 = vmul.f32 %v11273_v58, %v16349_v26 }
 0x446   : > { %8269 = vst [vmem:[%s15361_s28 + $0x3c8] sm:$0xff] %v8013_v31  ;;  %v8016_v30 = vmul.f32 %v7888_v44, %v15093_v48  ;;  %8144 = vst [vmem:[%s15346_s26 + $0x3e0] sm:$0xff] %v7888_v44 }
 0x447   : > { %8274 = vst [vmem:[%s15361_s28 + $0x3f0] sm:$0xff] %v8018_v24  ;;  %v8019_v7 = vmul.f32 %v7891_v12, %v16988_v62  ;;  %8147 = vst [vmem:[%s15346_s26 + $0x3f8] sm:$0xff] %v7891_v12 }
 0x448   : > { %8272 = vst [vmem:[%s15361_s28 + $0x3e0] sm:$0xff] %v8016_v30 }
 0x449   : > { %v11275_v5 = vpop.eup %11274  ;;  %8275 = vst [vmem:[%s15361_s28 + $0x3f8] sm:$0xff] %v8019_v7 }
 0x44a   : > { %v7889_v48 = vmul.f32 %v11275_v5, %v16364_v43 }
 0x44c   : > { %v8017_v26 = vmul.f32 %v7889_v48, %v16989_v57  ;;  %8145 = vst [vmem:[%s15346_s26 + $0x3e8] sm:$0xff] %v7889_v48 }
 0x44d   : > { %11425 = shalt.err (!%p11422_p3)
}
 0x44e   : > { %s11426_s26 = scalar_lea.hbm %s16434_s14, 16384  ;;  %s11430_s21 = scalar_lea.hbm %s16530_s8, 65536 }
 0x44f   : > { %p11427_p4 = scmp.ne.s32.totalorder %s16434_s14, %s11426_s26  ;;  %p11431_p9 = scmp.lt.u32.totalorder %s16434_s14, %s16530_s8 }
 0x450   : > { %p11432_p10 = scmp.lt.u32.totalorder %s11430_s21, %s11426_s26  ;;  %p11434_p12 = scmp.lt.u32.totalorder %s11426_s26, %s16434_s14 }
 0x451   : > { %p11428_p7 = pnand %p11427_p4, %p11603_p5 }
 0x452   : > { %p11433_p11 = por %p11432_p10, %p11431_p9 }
 0x453   : > { %p11429_p8 = pneg %p11428_p7 }
 0x454   : > { %p11435_p13 = por %p11434_p12, %p11433_p11 }
 0x456   : > { %p11436_p0 = pnand %p11435_p13, %p11429_p8 }
 0x458   : > { %11439 = shalt.err (!%p11436_p0)
}
 0x459   : > { %s11512_s1 = smov 128   ;;  %s11513_s25 = smov 8   ;;  %8273 = vst [vmem:[%s15361_s28 + $0x3e8] sm:$0xff] %v8017_v26 }
 0x45a   : > { %10114 = dma.vmem_to_hbm [thread:$0]  (%p11603_p5), %s16437_s23, 16384, %s16434_s14, %s8277_s16, %s11512_s1, %s11512_s1, %s11513_s25  }
 0x45b   : > { %s8282_s26 = scalar_lea.sflag [#allocation5], %s15301_s24  ;;  %s11440_s22 = scalar_lea.vmem %s16448_s13, 16384 }
 0x45c   : > { %p11441_p1 = scmp.ne.s32.totalorder %s16448_s13, %s11440_s22  ;;  %s11514_s17 = smov [#allocation4]  }
 0x45d   : > { %s11444_s21 = sshll.u32 %s11514_s17, 4  ;;  %s11445_s21 = int_to_ptr.vmem [resolvable:$false] %s11444_s21 }
 0x45e   : > { %p11442_p2 = pnand %p11441_p1, %p11603_p5  ;;  %s11446_s29 = scalar_lea.vmem %s11445_s21, 32768 }
 0x45f   : > { %p11447_p4 = scmp.lt.s32.totalorder %s16448_s13, %s11445_s21  ;;  %p11448_p7 = scmp.lt.s32.totalorder %s11446_s29, %s11440_s22 }
 0x460   : > { %p11443_p3 = pneg %p11442_p2 }
 0x461   : > { %p11449_p8 = por %p11448_p7, %p11447_p4 }
 0x463   : > { %p11450_p9 = pnand %p11449_p8, %p11443_p3 }
 0x465   : > { %11453 = shalt.err (!%p11450_p9)
}
 0x466   : > { %s11454_s28 = scalar_lea.hbm %s16446_s27, 16384  ;;  %s11458_s16 = scalar_lea.hbm %s16531_s9, 65536 }
 0x467   : > { %p11455_p10 = scmp.ne.s32.totalorder %s16446_s27, %s11454_s28  ;;  %p11459_p13 = scmp.lt.u32.totalorder %s16446_s27, %s16531_s9 }
 0x468   : > { %p11460_p0 = scmp.lt.u32.totalorder %s11458_s16, %s11454_s28  ;;  %p11462_p2 = scmp.lt.u32.totalorder %s11454_s28, %s16446_s27 }
 0x469   : > { %p11456_p11 = pnand %p11455_p10, %p11603_p5 }
 0x46a   : > { %p11461_p1 = por %p11460_p0, %p11459_p13 }
 0x46b   : > { %p11457_p12 = pneg %p11456_p11 }
 0x46c   : > { %p11463_p3 = por %p11462_p2, %p11461_p1 }
 0x46e   : > { %p11464_p4 = pnand %p11463_p3, %p11457_p12 }
 0x470   : > { %11467 = shalt.err (!%p11464_p4)
}
 0x471   : > { %10115 = dma.vmem_to_hbm [thread:$0]  (%p11603_p5), %s16448_s13, 16384, %s16446_s27, %s8282_s26, %s11512_s1, %s11512_s1, %s11513_s25  }
 0x472 PF: > { %p10125_p7 = scmp.ge.s32.totalorder %s11506_s12, 2  ;;  %s8326_s22 = sand.u32 1, %s11494_s30  }
 0x473   : > { %s8327_s21 = scalar_lea.sflag [#allocation3], %s8326_s22 }
 0x474   : > { %p10119_p8 = pnand %p10125_p7, %p11607_p6 }
 0x476   : > { %11485 = dma.done.wait (!%p10119_p8), %s8327_s21, 16384  }
 0x477   : > { %11487 = vsyncadd (!%p10119_p8), %s8327_s21, 4294950912  ;;  %s8336_s19 = scalar_lea.sflag [#allocation5], %s8326_s22 }
 0x478   : > { %11489 = dma.done.wait (!%p10119_p8), %s8336_s19, 16384  }
 0x479   : > { %11491 = vsyncadd (!%p10119_p8), %s8336_s19, 4294950912  ;;  %p23_p5 = scmp.ge.s32.totalorder %s11590_s15, 6   ;;  %s16990_s30 = smov %s11498_s10 }
 0x47a   : > { %s16991_s10 = smov %s11502_s11  ;;  %s16992_s11 = smov %s11601_s18 }
 0x47b   : > { %s16993_s12 = smov %s11590_s15  ;;  %25 = sbr.rel (!%p23_p5) target bundleno = 8 (0x8), region = 107 }
 0x482   :  { %8341 = vsyncpa [#allocation3], 1 }
 0x483   :  { %8343 = vsyncpa [#allocation3 + $0x1], 1 }
 0x484   :  { %8344 = vsyncpa [#allocation5], 1 }
 0x485   :  { %8346 = vsyncpa [#allocation5 + $0x1], 1 }

</bundles_post_ra>
